<compile_context>
chip_gen: v7x
topology: tpu7x:2x2x1
jax: 0.10.0
libtpu: 0.0.40
codegen_flags: <defaults>
</compile_context>

<pallas_src>
import functools
import math

import jax
import jax.numpy as jnp
from jax.experimental import pallas as pl
from jax.experimental.pallas import tpu as pltpu

_VMEM_LIMIT = 32 * 1024 * 1024   # safe on v5e / v6e / v7x
_LN_EPS = 1e-5


# ---------------------------------------------------------------------------
# In-kernel helpers
# ---------------------------------------------------------------------------

def _ln(x, g, b):
    # LayerNorm in f32
    mean = jnp.mean(x, axis=-1, keepdims=True)
    var = jnp.mean(jnp.square(x - mean), axis=-1, keepdims=True)
    return (x - mean) * jax.lax.rsqrt(var + _LN_EPS) * g + b


def _mm(a_f32, w_bf16):
    # bf16 MXU matmul, f32 accumulation
    return jnp.dot(a_f32.astype(jnp.bfloat16), w_bf16,
                   preferred_element_type=jnp.float32)


# ---------------------------------------------------------------------------
# Pallas kernels
# ---------------------------------------------------------------------------

def _ln_matmul_kernel(x_ref, g_ref, beta_ref, w_ref, b_ref, o_ref):
    # o = LN(x) @ w + b        (used for LN->QKV, LN->Q, enc_norm->KV)
    y = _ln(x_ref[...], g_ref[...], beta_ref[...])
    o_ref[...] = _mm(y, w_ref[...]) + b_ref[...]


def _matmul_residual_kernel(x_ref, res_ref, w_ref, b_ref, o_ref):
    # o = x @ w + b + res      (attention output projection + residual add)
    o_ref[...] = _mm(x_ref[...], w_ref[...]) + b_ref[...] + res_ref[...]


def _ln_ffn_residual_kernel(x_ref, g_ref, beta_ref, w1_ref, b1_ref,
                            w2_ref, b2_ref, o_ref):
    # o = x + relu(LN(x) @ w1 + b1) @ w2 + b2
    x = x_ref[...]
    y = _ln(x, g_ref[...], beta_ref[...])
    hdn = jnp.maximum(_mm(y, w1_ref[...]) + b1_ref[...], 0.0)
    o_ref[...] = x + _mm(hdn, w2_ref[...]) + b2_ref[...]


def _ln_gen_logsoftmax_kernel(x_ref, g_ref, beta_ref, w_ref, b_ref, o_ref):
    # o = log_softmax(LN(x) @ w + b)   -- fused generator, logits never hit HBM
    # TODO(synk): for 32k+ vocab, N-tile the weight and use a two-pass/online LSE.
    y = _ln(x_ref[...], g_ref[...], beta_ref[...])
    logits = _mm(y, w_ref[...]) + b_ref[...]
    m = jnp.max(logits, axis=-1, keepdims=True)
    z = logits - m
    o_ref[...] = z - jnp.log(jnp.sum(jnp.exp(z), axis=-1, keepdims=True))


def _attention_kernel(q_ref, k_ref, v_ref, bias_ref, o_ref, *, scale):
    # One (batch, head) tile: q (1,Sq,dk), k/v (1,Sk,dk), bias (1,Sq,Sk) additive.
    # TODO(synk): for long sequences add a k-tile grid axis with online-softmax
    # (flash) scratch; at these sizes full K/V per head fits one VMEM block.
    q = q_ref[...].astype(jnp.bfloat16)
    k = k_ref[...].astype(jnp.bfloat16)
    v = v_ref[...].astype(jnp.bfloat16)
    s = jnp.einsum("bqd,bkd->bqk", q, k, preferred_element_type=jnp.float32)
    s = s * scale + bias_ref[...]
    m = jnp.max(s, axis=-1, keepdims=True)
    p = jnp.exp(s - m)
    denom = jnp.sum(p, axis=-1, keepdims=True)
    p = p * pl.reciprocal(denom, approx=True)
    o_ref[...] = jnp.einsum("bqk,bkd->bqd", p.astype(jnp.bfloat16), v,
                            preferred_element_type=jnp.float32)


# ---------------------------------------------------------------------------
# pallas_call wrappers
# ---------------------------------------------------------------------------

def _pick_block(n, candidates=(512, 256, 128, 64, 32, 16, 8)):
    for c in candidates:
        if n % c == 0:
            return c
    return n


def _call_rows(kernel, out_cols, row_inputs, params):
    """Row-tiled call: row_inputs are (rows, *) activations tiled over the grid;
    params are small 2-D arrays kept resident via a constant index_map."""
    rows = row_inputs[0].shape[0]
    tm = _pick_block(rows)
    in_specs = [pl.BlockSpec((tm, a.shape[1]), lambda i: (i, 0))
                for a in row_inputs]
    in_specs += [pl.BlockSpec(p.shape, lambda i: (0, 0)) for p in params]
    return pl.pallas_call(
        kernel,
        out_shape=jax.ShapeDtypeStruct((rows, out_cols), jnp.float32),
        grid=(rows // tm,),
        in_specs=in_specs,
        out_specs=pl.BlockSpec((tm, out_cols), lambda i: (i, 0)),
        compiler_params=pltpu.CompilerParams(
            dimension_semantics=("parallel",),
            vmem_limit_bytes=_VMEM_LIMIT),
    )(*row_inputs, *params)


def _attention(q_src, k_src, v_src, q_blk, k_blk, v_blk, bias, *, h, dk, scale):
    """Grid over (batch, head). Head split/merge is done by the index_maps:
    q/k/v are read as dk-wide column blocks of fused projection tensors, and the
    output head block is written straight into the head-merged (B, Sq, d) layout.
    The mask bias is (B, Sq, Sk) and shared across heads (never replicated)."""
    b, sq = q_src.shape[0], q_src.shape[1]
    sk = k_src.shape[1]
    return pl.pallas_call(
        functools.partial(_attention_kernel, scale=scale),
        out_shape=jax.ShapeDtypeStruct((b, sq, h * dk), jnp.float32),
        grid=(b, h),
        in_specs=[
            pl.BlockSpec((1, sq, dk), lambda bi, hi: (bi, 0, q_blk + hi)),
            pl.BlockSpec((1, sk, dk), lambda bi, hi: (bi, 0, k_blk + hi)),
            pl.BlockSpec((1, sk, dk), lambda bi, hi: (bi, 0, v_blk + hi)),
            pl.BlockSpec((1, sq, sk), lambda bi, hi: (bi, 0, 0)),
        ],
        out_specs=pl.BlockSpec((1, sq, dk), lambda bi, hi: (bi, 0, hi)),
        compiler_params=pltpu.CompilerParams(
            dimension_semantics=("parallel", "parallel"),
            vmem_limit_bytes=_VMEM_LIMIT),
    )(q_src, k_src, v_src, bias)


# ---------------------------------------------------------------------------
# Parameters (deterministic synthetic init: xavier-uniform matrices, zero bias)
# ---------------------------------------------------------------------------

def _xavier(key, shape):
    fan_in, fan_out = shape[0], shape[1]
    limit = math.sqrt(6.0 / (fan_in + fan_out))
    return jax.random.uniform(key, shape, jnp.float32, -limit, limit)


def init_params(key, src_vocab, tgt_vocab, n_layers, d_model, d_ff, h):
    keys = iter(jax.random.split(key, 4096))

    def lin(din, dout):
        return {"w": _xavier(next(keys), (din, dout)),
                "b": jnp.zeros((dout,), jnp.float32)}

    def ln():
        return {"g": jnp.ones((d_model,), jnp.float32),
                "b": jnp.zeros((d_model,), jnp.float32)}

    def attn():
        return {"q": lin(d_model, d_model), "k": lin(d_model, d_model),
                "v": lin(d_model, d_model), "o": lin(d_model, d_model)}

    def ffn():
        return {"w1": lin(d_model, d_ff), "w2": lin(d_ff, d_model)}

    enc = [{"ln1": ln(), "attn": attn(), "ln2": ln(), "ff": ffn()}
           for _ in range(n_layers)]
    dec = [{"ln1": ln(), "self_attn": attn(),
            "ln2": ln(), "cross_attn": attn(),
            "ln3": ln(), "ff": ffn()}
           for _ in range(n_layers)]

    return {
        "src_emb": _xavier(next(keys), (src_vocab, d_model)),
        "tgt_emb": _xavier(next(keys), (tgt_vocab, d_model)),
        "enc": enc, "enc_norm": ln(),
        "dec": dec, "dec_norm": ln(),
        "gen": lin(d_model, tgt_vocab),
    }


def prepare_params(params):
    """Fuse Q/K/V weights, cast matmul weights to bf16 (f32 accumulation inside
    the kernels), and reshape 1-D params to (1, n) row vectors for the kernels."""
    def lin(p):
        return {"w": p["w"].astype(jnp.bfloat16),
                "b": p["b"].reshape(1, -1).astype(jnp.float32)}

    def ln(p):
        return {"g": p["g"].reshape(1, -1), "b": p["b"].reshape(1, -1)}

    def attn(p):
        wqkv = jnp.concatenate([p["q"]["w"], p["k"]["w"], p["v"]["w"]], axis=1)
        bqkv = jnp.concatenate([p["q"]["b"], p["k"]["b"], p["v"]["b"]])
        wkv = jnp.concatenate([p["k"]["w"], p["v"]["w"]], axis=1)
        bkv = jnp.concatenate([p["k"]["b"], p["v"]["b"]])
        return {
            "wqkv": wqkv.astype(jnp.bfloat16), "bqkv": bqkv.reshape(1, -1),
            "wq": p["q"]["w"].astype(jnp.bfloat16), "bq": p["q"]["b"].reshape(1, -1),
            "wkv": wkv.astype(jnp.bfloat16), "bkv": bkv.reshape(1, -1),
            "wo": p["o"]["w"].astype(jnp.bfloat16), "bo": p["o"]["b"].reshape(1, -1),
        }

    def ffn(p):
        return {"w1": p["w1"]["w"].astype(jnp.bfloat16),
                "b1": p["w1"]["b"].reshape(1, -1),
                "w2": p["w2"]["w"].astype(jnp.bfloat16),
                "b2": p["w2"]["b"].reshape(1, -1)}

    enc = [{"ln1": ln(l["ln1"]), "attn": attn(l["attn"]),
            "ln2": ln(l["ln2"]), "ff": ffn(l["ff"])} for l in params["enc"]]
    dec = [{"ln1": ln(l["ln1"]), "self_attn": attn(l["self_attn"]),
            "ln2": ln(l["ln2"]), "cross_attn": attn(l["cross_attn"]),
            "ln3": ln(l["ln3"]), "ff": ffn(l["ff"])} for l in params["dec"]]
    return {
        "src_emb": params["src_emb"], "tgt_emb": params["tgt_emb"],
        "enc": enc, "enc_norm": ln(params["enc_norm"]),
        "dec": dec, "dec_norm": ln(params["dec_norm"]),
        "gen": lin(params["gen"]),
    }


def positional_encoding(max_len, d_model):
    pos = jnp.arange(max_len, dtype=jnp.float32)[:, None]
    i = jnp.arange(0, d_model, 2, dtype=jnp.float32)
    div = jnp.exp(-math.log(10000.0) * i / d_model)
    pe = jnp.zeros((max_len, d_model), jnp.float32)
    pe = pe.at[:, 0::2].set(jnp.sin(pos * div))
    pe = pe.at[:, 1::2].set(jnp.cos(pos * div))
    return pe


def embed(tokens, table, pe, d_model):
    # TODO(synk): embedding gather left to XLA jnp.take (a DMA-gather Pallas
    # kernel would only matter for very large vocab tables).
    x = jnp.take(table, tokens, axis=0) * math.sqrt(d_model)
    s = tokens.shape[1]
    return x + pe[:s][None, :, :]


def _mask_to_bias(mask, sq):
    # masked_fill(mask == 0, -1e9) as an additive f32 bias, (B, Sq, Sk),
    # shared across all heads and layers (computed once).
    b, _, sk = mask.shape
    m = jnp.broadcast_to(mask, (b, sq, sk))
    return jnp.where(m != 0, 0.0, -1e9).astype(jnp.float32)


# ---------------------------------------------------------------------------
# Full Transformer forward
# ---------------------------------------------------------------------------

def transformer_forward(prep, src, tgt, src_mask, tgt_mask, *, h, d_model):
    b, s_src = src.shape
    _, s_tgt = tgt.shape
    dk = d_model // h
    scale = 1.0 / math.sqrt(dk)
    pe = positional_encoding(512, d_model)

    enc_bias = _mask_to_bias(src_mask, s_src)     # (B, S_src, S_src)
    cross_bias = _mask_to_bias(src_mask, s_tgt)   # (B, S_tgt, S_src)
    dec_bias = _mask_to_bias(tgt_mask, s_tgt)     # (B, S_tgt, S_tgt)

    # ---- encode ----
    x = embed(src, prep["src_emb"], pe, d_model).reshape(b * s_src, d_model)
    for lp in prep["enc"]:
        qkv = _call_rows(_ln_matmul_kernel, 3 * d_model, [x],
                         [lp["ln1"]["g"], lp["ln1"]["b"],
                          lp["attn"]["wqkv"], lp["attn"]["bqkv"]])
        qkv3 = qkv.reshape(b, s_src, 3 * d_model)
        attn = _attention(qkv3, qkv3, qkv3, 0, h, 2 * h, enc_bias,
                          h=h, dk=dk, scale=scale)
        x = _call_rows(_matmul_residual_kernel, d_model,
                       [attn.reshape(b * s_src, d_model), x],
                       [lp["attn"]["wo"], lp["attn"]["bo"]])
        x = _call_rows(_ln_ffn_residual_kernel, d_model, [x],
                       [lp["ln2"]["g"], lp["ln2"]["b"],
                        lp["ff"]["w1"], lp["ff"]["b1"],
                        lp["ff"]["w2"], lp["ff"]["b2"]])
    # final encoder LayerNorm is fused into each decoder layer's K/V projection
    enc_x = x                                     # (B*S_src, d), pre-final-norm

    # ---- decode ----
    x = embed(tgt, prep["tgt_emb"], pe, d_model).reshape(b * s_tgt, d_model)
    for lp in prep["dec"]:
        # self-attention (LN1 fused into fused QKV projection)
        qkv = _call_rows(_ln_matmul_kernel, 3 * d_model, [x],
                         [lp["ln1"]["g"], lp["ln1"]["b"],
                          lp["self_attn"]["wqkv"], lp["self_attn"]["bqkv"]])
        qkv3 = qkv.reshape(b, s_tgt, 3 * d_model)
        attn = _attention(qkv3, qkv3, qkv3, 0, h, 2 * h, dec_bias,
                          h=h, dk=dk, scale=scale)
        x = _call_rows(_matmul_residual_kernel, d_model,
                       [attn.reshape(b * s_tgt, d_model), x],
                       [lp["self_attn"]["wo"], lp["self_attn"]["bo"]])

        # cross-attention: Q from LN2(x); K/V from encoder output
        # (= enc_norm(enc_x) @ [Wk|Wv], with the encoder norm fused in)
        q = _call_rows(_ln_matmul_kernel, d_model, [x],
                       [lp["ln2"]["g"], lp["ln2"]["b"],
                        lp["cross_attn"]["wq"], lp["cross_attn"]["bq"]])
        kv = _call_rows(_ln_matmul_kernel, 2 * d_model, [enc_x],
                        [prep["enc_norm"]["g"], prep["enc_norm"]["b"],
                         lp["cross_attn"]["wkv"], lp["cross_attn"]["bkv"]])
        q3 = q.reshape(b, s_tgt, d_model)
        kv3 = kv.reshape(b, s_src, 2 * d_model)
        attn = _attention(q3, kv3, kv3, 0, 0, h, cross_bias,
                          h=h, dk=dk, scale=scale)
        x = _call_rows(_matmul_residual_kernel, d_model,
                       [attn.reshape(b * s_tgt, d_model), x],
                       [lp["cross_attn"]["wo"], lp["cross_attn"]["bo"]])

        # feed-forward (LN3 + FFN + residual fused)
        x = _call_rows(_ln_ffn_residual_kernel, d_model, [x],
                       [lp["ln3"]["g"], lp["ln3"]["b"],
                        lp["ff"]["w1"], lp["ff"]["b1"],
                        lp["ff"]["w2"], lp["ff"]["b2"]])

    # ---- generator: final decoder norm + linear + log_softmax fused ----
    tgt_vocab = prep["gen"]["w"].shape[1]
    logp = _call_rows(_ln_gen_logsoftmax_kernel, tgt_vocab, [x],
                      [prep["dec_norm"]["g"], prep["dec_norm"]["b"],
                       prep["gen"]["w"], prep["gen"]["b"]])
    return logp.reshape(b, s_tgt, tgt_vocab)


# ---------------------------------------------------------------------------

if __name__ == "__main__":
    # Small but lane-aligned config: d_model=512, h=4 -> dk=128 so every
    # matmul / attention block is lane-dense (multiple of 128 on the last dim).
    B, S_SRC, S_TGT = 2, 8, 8
    SRC_VOCAB, TGT_VOCAB = 512, 512
    N_LAYERS, D_MODEL, D_FF, H = 2, 512, 1024, 4

    key = jax.random.PRNGKey(0)
    pkey, dkey = jax.random.split(key)
    params = init_params(pkey, SRC_VOCAB, TGT_VOCAB, N_LAYERS, D_MODEL, D_FF, H)
    prep = prepare_params(params)

    k1, k2 = jax.random.split(dkey)
    src = jax.random.randint(k1, (B, S_SRC), 0, SRC_VOCAB, dtype=jnp.int32)
    tgt = jax.random.randint(k2, (B, S_TGT), 0, TGT_VOCAB, dtype=jnp.int32)
    src_mask = jnp.ones((B, 1, S_SRC), jnp.float32)                        # pad mask
    tgt_mask = jnp.broadcast_to(                                           # causal mask
        jnp.tril(jnp.ones((S_TGT, S_TGT), jnp.float32)), (B, S_TGT, S_TGT))

    fwd = jax.jit(functools.partial(transformer_forward, h=H, d_model=D_MODEL))
    out = fwd(prep, src, tgt, src_mask, tgt_mask)
    out = jax.block_until_ready(out)

    assert out.shape == (B, S_TGT, TGT_VOCAB), out.shape
    # log-softmax rows must exponentiate-sum to ~1
    assert bool(jnp.all(jnp.abs(jnp.sum(jnp.exp(out), axis=-1) - 1.0) < 1e-3))
    print("KERNEL_OK")
</pallas_src>

<mosaic_0001>
module attributes {stable_mosaic.version = 11 : i64} {
  func.func @_ln_matmul_kernel(%arg0: i32, %arg1: memref<16x512xf32, #tpu.memory_space<vmem>>, %arg2: memref<1x512xf32, #tpu.memory_space<vmem>>, %arg3: memref<1x512xf32, #tpu.memory_space<vmem>>, %arg4: memref<512x1536xbf16, #tpu.memory_space<vmem>>, %arg5: memref<1x1536xf32, #tpu.memory_space<vmem>>, %arg6: memref<16x1536xf32, #tpu.memory_space<vmem>>) attributes {dimension_semantics = [#tpu.dimension_semantics<parallel>], iteration_bounds = array<i64: 1>, scalar_prefetch = 0 : i64, scratch_operands = 0 : i64, tpu.core_type = #tpu.core_type<tc>, window_params = [{transform_indices = @transform_0, window_bounds = array<i64: 16, 512>}, {pipeline_mode = #tpu.pipeline_mode<synchronous>, transform_indices = @transform_1, window_bounds = array<i64: 1, 512>}, {pipeline_mode = #tpu.pipeline_mode<synchronous>, transform_indices = @transform_2, window_bounds = array<i64: 1, 512>}, {pipeline_mode = #tpu.pipeline_mode<synchronous>, transform_indices = @transform_3, window_bounds = array<i64: 512, 1536>}, {pipeline_mode = #tpu.pipeline_mode<synchronous>, transform_indices = @transform_4, window_bounds = array<i64: 1, 1536>}, {transform_indices = @transform_5, window_bounds = array<i64: 16, 1536>}]} {
    %c0 = arith.constant 0 : index
    %c0_0 = arith.constant 0 : index
    %0 = vector.load %arg1[%c0, %c0_0] : memref<16x512xf32, #tpu.memory_space<vmem>>, vector<16x512xf32>
    %c0_1 = arith.constant 0 : index
    %c0_2 = arith.constant 0 : index
    %1 = vector.load %arg2[%c0_1, %c0_2] : memref<1x512xf32, #tpu.memory_space<vmem>>, vector<1x512xf32>
    %c0_3 = arith.constant 0 : index
    %c0_4 = arith.constant 0 : index
    %2 = vector.load %arg3[%c0_3, %c0_4] : memref<1x512xf32, #tpu.memory_space<vmem>>, vector<1x512xf32>
    %cst = arith.constant dense<0.000000e+00> : vector<16xf32>
    %3 = vector.multi_reduction <add>, %0, %cst [1] : vector<16x512xf32> to vector<16xf32>
    %4 = vector.shape_cast %3 : vector<16xf32> to vector<16x1xf32>
    %cst_5 = arith.constant 5.120000e+02 : f32
    %5 = vector.broadcast %cst_5 : f32 to vector<16x1xf32>
    %6 = arith.divf %4, %5 : vector<16x1xf32>
    %7 = vector.broadcast %6 : vector<16x1xf32> to vector<16x512xf32>
    %8 = arith.subf %0, %7 : vector<16x512xf32>
    %9 = arith.mulf %8, %8 : vector<16x512xf32>
    %cst_6 = arith.constant dense<0.000000e+00> : vector<16xf32>
    %10 = vector.multi_reduction <add>, %9, %cst_6 [1] : vector<16x512xf32> to vector<16xf32>
    %11 = vector.shape_cast %10 : vector<16xf32> to vector<16x1xf32>
    %cst_7 = arith.constant 5.120000e+02 : f32
    %12 = vector.broadcast %cst_7 : f32 to vector<16x1xf32>
    %13 = arith.divf %11, %12 : vector<16x1xf32>
    %14 = vector.broadcast %6 : vector<16x1xf32> to vector<16x512xf32>
    %15 = arith.subf %0, %14 : vector<16x512xf32>
    %cst_8 = arith.constant 9.99999974E-6 : f32
    %16 = vector.broadcast %cst_8 : f32 to vector<16x1xf32>
    %17 = arith.addf %13, %16 : vector<16x1xf32>
    %18 = math.rsqrt %17 : vector<16x1xf32>
    %19 = vector.broadcast %18 : vector<16x1xf32> to vector<16x512xf32>
    %20 = arith.mulf %15, %19 : vector<16x512xf32>
    %21 = vector.broadcast %1 : vector<1x512xf32> to vector<16x512xf32>
    %22 = arith.mulf %20, %21 : vector<16x512xf32>
    %23 = vector.broadcast %2 : vector<1x512xf32> to vector<16x512xf32>
    %24 = arith.addf %22, %23 : vector<16x512xf32>
    %c0_9 = arith.constant 0 : index
    %c0_10 = arith.constant 0 : index
    %25 = vector.load %arg4[%c0_9, %c0_10] : memref<512x1536xbf16, #tpu.memory_space<vmem>>, vector<512x1536xbf16>
    %26 = arith.truncf %24 : vector<16x512xf32> to vector<16x512xbf16>
    %cst_11 = arith.constant dense<0.000000e+00> : vector<16x1536xf32>
    %27 = tpu.matmul %26, %25, %cst_11 {dimension_numbers = #tpu.dot_dimension_numbers<[1], [0], [0], [1], [0, 0, 1, 1], [], []>} : vector<16x512xbf16>, vector<512x1536xbf16>, vector<16x1536xf32> -> vector<16x1536xf32>
    %c0_12 = arith.constant 0 : index
    %c0_13 = arith.constant 0 : index
    %28 = vector.load %arg5[%c0_12, %c0_13] : memref<1x1536xf32, #tpu.memory_space<vmem>>, vector<1x1536xf32>
    %29 = vector.broadcast %28 : vector<1x1536xf32> to vector<16x1536xf32>
    %30 = arith.addf %27, %29 : vector<16x1536xf32>
    %c0_14 = arith.constant 0 : index
    %c0_15 = arith.constant 0 : index
    %31 = vector.load %arg6[%c0_14, %c0_15] : memref<16x1536xf32, #tpu.memory_space<vmem>>, vector<16x1536xf32>
    tpu.vector_store %arg6[%c0_14, %c0_15], %30 {strides = array<i32>} : memref<16x1536xf32, #tpu.memory_space<vmem>>, vector<16x1536xf32>,
    return
  }
  func.func @transform_0(%arg0: i32) -> (i32, i32) {
    %c0_i32 = arith.constant 0 : i32
    %c0_i32_0 = arith.constant 0 : i32
    return %arg0, %c0_i32 : i32, i32
  }
  func.func @transform_1(%arg0: i32) -> (i32, i32) {
    %c0_i32 = arith.constant 0 : i32
    %c0_i32_0 = arith.constant 0 : i32
    %c0_i32_1 = arith.constant 0 : i32
    return %c0_i32, %c0_i32_0 : i32, i32
  }
  func.func @transform_2(%arg0: i32) -> (i32, i32) {
    %c0_i32 = arith.constant 0 : i32
    %c0_i32_0 = arith.constant 0 : i32
    %c0_i32_1 = arith.constant 0 : i32
    return %c0_i32, %c0_i32_0 : i32, i32
  }
  func.func @transform_3(%arg0: i32) -> (i32, i32) {
    %c0_i32 = arith.constant 0 : i32
    %c0_i32_0 = arith.constant 0 : i32
    %c0_i32_1 = arith.constant 0 : i32
    return %c0_i32, %c0_i32_0 : i32, i32
  }
  func.func @transform_4(%arg0: i32) -> (i32, i32) {
    %c0_i32 = arith.constant 0 : i32
    %c0_i32_0 = arith.constant 0 : i32
    %c0_i32_1 = arith.constant 0 : i32
    return %c0_i32, %c0_i32_0 : i32, i32
  }
  func.func @transform_5(%arg0: i32) -> (i32, i32) {
    %c0_i32 = arith.constant 0 : i32
    %c0_i32_0 = arith.constant 0 : i32
    return %arg0, %c0_i32 : i32, i32
  }
}

module attributes {stable_mosaic.version = 11 : i64} {
  func.func @_attention_kernel(%arg0: i32, %arg1: i32, %arg2: memref<1x8x128xf32, #tpu.memory_space<vmem>>, %arg3: memref<1x8x128xf32, #tpu.memory_space<vmem>>, %arg4: memref<1x8x128xf32, #tpu.memory_space<vmem>>, %arg5: memref<1x8x8xf32, #tpu.memory_space<vmem>>, %arg6: memref<1x8x128xf32, #tpu.memory_space<vmem>>) attributes {dimension_semantics = [#tpu.dimension_semantics<parallel>, #tpu.dimension_semantics<parallel>], iteration_bounds = array<i64: 2, 4>, scalar_prefetch = 0 : i64, scratch_operands = 0 : i64, tpu.core_type = #tpu.core_type<tc>, window_params = [{transform_indices = @transform_0, window_bounds = array<i64: 1, 8, 128>}, {transform_indices = @transform_1, window_bounds = array<i64: 1, 8, 128>}, {transform_indices = @transform_2, window_bounds = array<i64: 1, 8, 128>}, {transform_indices = @transform_3, window_bounds = array<i64: 1, 8, 8>}, {transform_indices = @transform_4, window_bounds = array<i64: 1, 8, 128>}]} {
    %c0 = arith.constant 0 : index
    %c0_0 = arith.constant 0 : index
    %c0_1 = arith.constant 0 : index
    %0 = vector.load %arg2[%c0, %c0_0, %c0_1] : memref<1x8x128xf32, #tpu.memory_space<vmem>>, vector<1x8x128xf32>
    %1 = arith.truncf %0 : vector<1x8x128xf32> to vector<1x8x128xbf16>
    %c0_2 = arith.constant 0 : index
    %c0_3 = arith.constant 0 : index
    %c0_4 = arith.constant 0 : index
    %2 = vector.load %arg3[%c0_2, %c0_3, %c0_4] : memref<1x8x128xf32, #tpu.memory_space<vmem>>, vector<1x8x128xf32>
    %3 = arith.truncf %2 : vector<1x8x128xf32> to vector<1x8x128xbf16>
    %c0_5 = arith.constant 0 : index
    %c0_6 = arith.constant 0 : index
    %c0_7 = arith.constant 0 : index
    %4 = vector.load %arg4[%c0_5, %c0_6, %c0_7] : memref<1x8x128xf32, #tpu.memory_space<vmem>>, vector<1x8x128xf32>
    %5 = arith.truncf %4 : vector<1x8x128xf32> to vector<1x8x128xbf16>
    "tpu.trace_start"() <{level = 10 : i32, message = "bqd,bkd->bqk"}> : () -> ()
    %cst = arith.constant dense<0.000000e+00> : vector<1x8x8xf32>
    %6 = tpu.matmul %1, %3, %cst {dimension_numbers = #tpu.dot_dimension_numbers<[2], [2], [1], [1], [0, 0, 0, 1, 1, 1], [0], [0]>} : vector<1x8x128xbf16>, vector<1x8x128xbf16>, vector<1x8x8xf32> -> vector<1x8x8xf32>
    "tpu.trace_stop"() : () -> ()
    %cst_8 = arith.constant 0.0883883461 : f32
    %7 = vector.broadcast %cst_8 : f32 to vector<1x8x8xf32>
    %8 = arith.mulf %6, %7 : vector<1x8x8xf32>
    %c0_9 = arith.constant 0 : index
    %c0_10 = arith.constant 0 : index
    %c0_11 = arith.constant 0 : index
    %9 = vector.load %arg5[%c0_9, %c0_10, %c0_11] : memref<1x8x8xf32, #tpu.memory_space<vmem>>, vector<1x8x8xf32>
    %10 = arith.addf %8, %9 : vector<1x8x8xf32>
    %cst_12 = arith.constant dense<0xFF800000> : vector<1x8xf32>
    %11 = vector.multi_reduction <maximumf>, %10, %cst_12 [2] : vector<1x8x8xf32> to vector<1x8xf32>
    %12 = vector.shape_cast %11 : vector<1x8xf32> to vector<1x8x1xf32>
    %13 = vector.broadcast %12 : vector<1x8x1xf32> to vector<1x8x8xf32>
    %14 = arith.subf %10, %13 : vector<1x8x8xf32>
    %15 = math.exp %14 : vector<1x8x8xf32>
    %cst_13 = arith.constant dense<0.000000e+00> : vector<1x8xf32>
    %16 = vector.multi_reduction <add>, %15, %cst_13 [2] : vector<1x8x8xf32> to vector<1x8xf32>
    %17 = vector.shape_cast %16 : vector<1x8xf32> to vector<1x8x1xf32>
    %18 = tpu.reciprocal %17 {approx = true} : vector<1x8x1xf32> -> vector<1x8x1xf32>
    %19 = vector.broadcast %18 : vector<1x8x1xf32> to vector<1x8x8xf32>
    %20 = arith.mulf %15, %19 : vector<1x8x8xf32>
    %21 = arith.truncf %20 : vector<1x8x8xf32> to vector<1x8x8xbf16>
    "tpu.trace_start"() <{level = 10 : i32, message = "bqk,bkd->bqd"}> : () -> ()
    %cst_14 = arith.constant dense<0.000000e+00> : vector<1x8x128xf32>
    %22 = tpu.matmul %21, %5, %cst_14 {dimension_numbers = #tpu.dot_dimension_numbers<[2], [1], [1], [2], [0, 0, 0, 1, 1, 2], [0], [0]>} : vector<1x8x8xbf16>, vector<1x8x128xbf16>, vector<1x8x128xf32> -> vector<1x8x128xf32>
    "tpu.trace_stop"() : () -> ()
    %c0_15 = arith.constant 0 : index
    %c0_16 = arith.constant 0 : index
    %c0_17 = arith.constant 0 : index
    %23 = vector.load %arg6[%c0_15, %c0_16, %c0_17] : memref<1x8x128xf32, #tpu.memory_space<vmem>>, vector<1x8x128xf32>
    tpu.vector_store %arg6[%c0_15, %c0_16, %c0_17], %22 {strides = array<i32>} : memref<1x8x128xf32, #tpu.memory_space<vmem>>, vector<1x8x128xf32>,
    return
  }
  func.func @transform_0(%arg0: i32, %arg1: i32) -> (i32, i32, i32) {
    %c0_i32 = arith.constant 0 : i32
    %0 = arith.addi %c0_i32, %arg1 : i32
    %c0_i32_0 = arith.constant 0 : i32
    %c0_i32_1 = arith.constant 0 : i32
    return %arg0, %c0_i32_0, %0 : i32, i32, i32
  }
  func.func @transform_1(%arg0: i32, %arg1: i32) -> (i32, i32, i32) {
    %c4_i32 = arith.constant 4 : i32
    %0 = arith.addi %c4_i32, %arg1 : i32
    %c0_i32 = arith.constant 0 : i32
    %c0_i32_0 = arith.constant 0 : i32
    return %arg0, %c0_i32, %0 : i32, i32, i32
  }
  func.func @transform_2(%arg0: i32, %arg1: i32) -> (i32, i32, i32) {
    %c8_i32 = arith.constant 8 : i32
    %0 = arith.addi %c8_i32, %arg1 : i32
    %c0_i32 = arith.constant 0 : i32
    %c0_i32_0 = arith.constant 0 : i32
    return %arg0, %c0_i32, %0 : i32, i32, i32
  }
  func.func @transform_3(%arg0: i32, %arg1: i32) -> (i32, i32, i32) {
    %c0_i32 = arith.constant 0 : i32
    %c0_i32_0 = arith.constant 0 : i32
    %c0_i32_1 = arith.constant 0 : i32
    return %arg0, %c0_i32, %c0_i32_0 : i32, i32, i32
  }
  func.func @transform_4(%arg0: i32, %arg1: i32) -> (i32, i32, i32) {
    %c0_i32 = arith.constant 0 : i32
    %c0_i32_0 = arith.constant 0 : i32
    return %arg0, %c0_i32, %arg1 : i32, i32, i32
  }
}

module attributes {stable_mosaic.version = 11 : i64} {
  func.func @_matmul_residual_kernel(%arg0: i32, %arg1: memref<16x512xf32, #tpu.memory_space<vmem>>, %arg2: memref<16x512xf32, #tpu.memory_space<vmem>>, %arg3: memref<512x512xbf16, #tpu.memory_space<vmem>>, %arg4: memref<1x512xf32, #tpu.memory_space<vmem>>, %arg5: memref<16x512xf32, #tpu.memory_space<vmem>>) attributes {dimension_semantics = [#tpu.dimension_semantics<parallel>], iteration_bounds = array<i64: 1>, scalar_prefetch = 0 : i64, scratch_operands = 0 : i64, tpu.core_type = #tpu.core_type<tc>, window_params = [{transform_indices = @transform_0, window_bounds = array<i64: 16, 512>}, {transform_indices = @transform_1, window_bounds = array<i64: 16, 512>}, {pipeline_mode = #tpu.pipeline_mode<synchronous>, transform_indices = @transform_2, window_bounds = array<i64: 512, 512>}, {pipeline_mode = #tpu.pipeline_mode<synchronous>, transform_indices = @transform_3, window_bounds = array<i64: 1, 512>}, {transform_indices = @transform_4, window_bounds = array<i64: 16, 512>}]} {
    %c0 = arith.constant 0 : index
    %c0_0 = arith.constant 0 : index
    %0 = vector.load %arg1[%c0, %c0_0] : memref<16x512xf32, #tpu.memory_space<vmem>>, vector<16x512xf32>
    %c0_1 = arith.constant 0 : index
    %c0_2 = arith.constant 0 : index
    %1 = vector.load %arg3[%c0_1, %c0_2] : memref<512x512xbf16, #tpu.memory_space<vmem>>, vector<512x512xbf16>
    %2 = arith.truncf %0 : vector<16x512xf32> to vector<16x512xbf16>
    %cst = arith.constant dense<0.000000e+00> : vector<16x512xf32>
    %3 = tpu.matmul %2, %1, %cst {dimension_numbers = #tpu.dot_dimension_numbers<[1], [0], [0], [1], [0, 0, 1, 1], [], []>} : vector<16x512xbf16>, vector<512x512xbf16>, vector<16x512xf32> -> vector<16x512xf32>
    %c0_3 = arith.constant 0 : index
    %c0_4 = arith.constant 0 : index
    %4 = vector.load %arg4[%c0_3, %c0_4] : memref<1x512xf32, #tpu.memory_space<vmem>>, vector<1x512xf32>
    %5 = vector.broadcast %4 : vector<1x512xf32> to vector<16x512xf32>
    %6 = arith.addf %3, %5 : vector<16x512xf32>
    %c0_5 = arith.constant 0 : index
    %c0_6 = arith.constant 0 : index
    %7 = vector.load %arg2[%c0_5, %c0_6] : memref<16x512xf32, #tpu.memory_space<vmem>>, vector<16x512xf32>
    %8 = arith.addf %6, %7 : vector<16x512xf32>
    %c0_7 = arith.constant 0 : index
    %c0_8 = arith.constant 0 : index
    %9 = vector.load %arg5[%c0_7, %c0_8] : memref<16x512xf32, #tpu.memory_space<vmem>>, vector<16x512xf32>
    tpu.vector_store %arg5[%c0_7, %c0_8], %8 {strides = array<i32>} : memref<16x512xf32, #tpu.memory_space<vmem>>, vector<16x512xf32>,
    return
  }
  func.func @transform_0(%arg0: i32) -> (i32, i32) {
    %c0_i32 = arith.constant 0 : i32
    %c0_i32_0 = arith.constant 0 : i32
    return %arg0, %c0_i32 : i32, i32
  }
  func.func @transform_1(%arg0: i32) -> (i32, i32) {
    %c0_i32 = arith.constant 0 : i32
    %c0_i32_0 = arith.constant 0 : i32
    return %arg0, %c0_i32 : i32, i32
  }
  func.func @transform_2(%arg0: i32) -> (i32, i32) {
    %c0_i32 = arith.constant 0 : i32
    %c0_i32_0 = arith.constant 0 : i32
    %c0_i32_1 = arith.constant 0 : i32
    return %c0_i32, %c0_i32_0 : i32, i32
  }
  func.func @transform_3(%arg0: i32) -> (i32, i32) {
    %c0_i32 = arith.constant 0 : i32
    %c0_i32_0 = arith.constant 0 : i32
    %c0_i32_1 = arith.constant 0 : i32
    return %c0_i32, %c0_i32_0 : i32, i32
  }
  func.func @transform_4(%arg0: i32) -> (i32, i32) {
    %c0_i32 = arith.constant 0 : i32
    %c0_i32_0 = arith.constant 0 : i32
    return %arg0, %c0_i32 : i32, i32
  }
}

module attributes {stable_mosaic.version = 11 : i64} {
  func.func @_ln_ffn_residual_kernel(%arg0: i32, %arg1: memref<16x512xf32, #tpu.memory_space<vmem>>, %arg2: memref<1x512xf32, #tpu.memory_space<vmem>>, %arg3: memref<1x512xf32, #tpu.memory_space<vmem>>, %arg4: memref<512x1024xbf16, #tpu.memory_space<vmem>>, %arg5: memref<1x1024xf32, #tpu.memory_space<vmem>>, %arg6: memref<1024x512xbf16, #tpu.memory_space<vmem>>, %arg7: memref<1x512xf32, #tpu.memory_space<vmem>>, %arg8: memref<16x512xf32, #tpu.memory_space<vmem>>) attributes {dimension_semantics = [#tpu.dimension_semantics<parallel>], iteration_bounds = array<i64: 1>, scalar_prefetch = 0 : i64, scratch_operands = 0 : i64, tpu.core_type = #tpu.core_type<tc>, window_params = [{transform_indices = @transform_0, window_bounds = array<i64: 16, 512>}, {pipeline_mode = #tpu.pipeline_mode<synchronous>, transform_indices = @transform_1, window_bounds = array<i64: 1, 512>}, {pipeline_mode = #tpu.pipeline_mode<synchronous>, transform_indices = @transform_2, window_bounds = array<i64: 1, 512>}, {pipeline_mode = #tpu.pipeline_mode<synchronous>, transform_indices = @transform_3, window_bounds = array<i64: 512, 1024>}, {pipeline_mode = #tpu.pipeline_mode<synchronous>, transform_indices = @transform_4, window_bounds = array<i64: 1, 1024>}, {pipeline_mode = #tpu.pipeline_mode<synchronous>, transform_indices = @transform_5, window_bounds = array<i64: 1024, 512>}, {pipeline_mode = #tpu.pipeline_mode<synchronous>, transform_indices = @transform_6, window_bounds = array<i64: 1, 512>}, {transform_indices = @transform_7, window_bounds = array<i64: 16, 512>}]} {
    %c0 = arith.constant 0 : index
    %c0_0 = arith.constant 0 : index
    %0 = vector.load %arg1[%c0, %c0_0] : memref<16x512xf32, #tpu.memory_space<vmem>>, vector<16x512xf32>
    %c0_1 = arith.constant 0 : index
    %c0_2 = arith.constant 0 : index
    %1 = vector.load %arg2[%c0_1, %c0_2] : memref<1x512xf32, #tpu.memory_space<vmem>>, vector<1x512xf32>
    %c0_3 = arith.constant 0 : index
    %c0_4 = arith.constant 0 : index
    %2 = vector.load %arg3[%c0_3, %c0_4] : memref<1x512xf32, #tpu.memory_space<vmem>>, vector<1x512xf32>
    %cst = arith.constant dense<0.000000e+00> : vector<16xf32>
    %3 = vector.multi_reduction <add>, %0, %cst [1] : vector<16x512xf32> to vector<16xf32>
    %4 = vector.shape_cast %3 : vector<16xf32> to vector<16x1xf32>
    %cst_5 = arith.constant 5.120000e+02 : f32
    %5 = vector.broadcast %cst_5 : f32 to vector<16x1xf32>
    %6 = arith.divf %4, %5 : vector<16x1xf32>
    %7 = vector.broadcast %6 : vector<16x1xf32> to vector<16x512xf32>
    %8 = arith.subf %0, %7 : vector<16x512xf32>
    %9 = arith.mulf %8, %8 : vector<16x512xf32>
    %cst_6 = arith.constant dense<0.000000e+00> : vector<16xf32>
    %10 = vector.multi_reduction <add>, %9, %cst_6 [1] : vector<16x512xf32> to vector<16xf32>
    %11 = vector.shape_cast %10 : vector<16xf32> to vector<16x1xf32>
    %cst_7 = arith.constant 5.120000e+02 : f32
    %12 = vector.broadcast %cst_7 : f32 to vector<16x1xf32>
    %13 = arith.divf %11, %12 : vector<16x1xf32>
    %14 = vector.broadcast %6 : vector<16x1xf32> to vector<16x512xf32>
    %15 = arith.subf %0, %14 : vector<16x512xf32>
    %cst_8 = arith.constant 9.99999974E-6 : f32
    %16 = vector.broadcast %cst_8 : f32 to vector<16x1xf32>
    %17 = arith.addf %13, %16 : vector<16x1xf32>
    %18 = math.rsqrt %17 : vector<16x1xf32>
    %19 = vector.broadcast %18 : vector<16x1xf32> to vector<16x512xf32>
    %20 = arith.mulf %15, %19 : vector<16x512xf32>
    %21 = vector.broadcast %1 : vector<1x512xf32> to vector<16x512xf32>
    %22 = arith.mulf %20, %21 : vector<16x512xf32>
    %23 = vector.broadcast %2 : vector<1x512xf32> to vector<16x512xf32>
    %24 = arith.addf %22, %23 : vector<16x512xf32>
    %c0_9 = arith.constant 0 : index
    %c0_10 = arith.constant 0 : index
    %25 = vector.load %arg4[%c0_9, %c0_10] : memref<512x1024xbf16, #tpu.memory_space<vmem>>, vector<512x1024xbf16>
    %26 = arith.truncf %24 : vector<16x512xf32> to vector<16x512xbf16>
    %cst_11 = arith.constant dense<0.000000e+00> : vector<16x1024xf32>
    %27 = tpu.matmul %26, %25, %cst_11 {dimension_numbers = #tpu.dot_dimension_numbers<[1], [0], [0], [1], [0, 0, 1, 1], [], []>} : vector<16x512xbf16>, vector<512x1024xbf16>, vector<16x1024xf32> -> vector<16x1024xf32>
    %c0_12 = arith.constant 0 : index
    %c0_13 = arith.constant 0 : index
    %28 = vector.load %arg5[%c0_12, %c0_13] : memref<1x1024xf32, #tpu.memory_space<vmem>>, vector<1x1024xf32>
    %29 = vector.broadcast %28 : vector<1x1024xf32> to vector<16x1024xf32>
    %30 = arith.addf %27, %29 : vector<16x1024xf32>
    %cst_14 = arith.constant 0.000000e+00 : f32
    %31 = vector.broadcast %cst_14 : f32 to vector<16x1024xf32>
    %32 = arith.maximumf %30, %31 : vector<16x1024xf32>
    %c0_15 = arith.constant 0 : index
    %c0_16 = arith.constant 0 : index
    %33 = vector.load %arg6[%c0_15, %c0_16] : memref<1024x512xbf16, #tpu.memory_space<vmem>>, vector<1024x512xbf16>
    %34 = arith.truncf %32 : vector<16x1024xf32> to vector<16x1024xbf16>
    %cst_17 = arith.constant dense<0.000000e+00> : vector<16x512xf32>
    %35 = tpu.matmul %34, %33, %cst_17 {dimension_numbers = #tpu.dot_dimension_numbers<[1], [0], [0], [1], [0, 0, 1, 1], [], []>} : vector<16x1024xbf16>, vector<1024x512xbf16>, vector<16x512xf32> -> vector<16x512xf32>
    %36 = arith.addf %0, %35 : vector<16x512xf32>
    %c0_18 = arith.constant 0 : index
    %c0_19 = arith.constant 0 : index
    %37 = vector.load %arg7[%c0_18, %c0_19] : memref<1x512xf32, #tpu.memory_space<vmem>>, vector<1x512xf32>
    %38 = vector.broadcast %37 : vector<1x512xf32> to vector<16x512xf32>
    %39 = arith.addf %36, %38 : vector<16x512xf32>
    %c0_20 = arith.constant 0 : index
    %c0_21 = arith.constant 0 : index
    %40 = vector.load %arg8[%c0_20, %c0_21] : memref<16x512xf32, #tpu.memory_space<vmem>>, vector<16x512xf32>
    tpu.vector_store %arg8[%c0_20, %c0_21], %39 {strides = array<i32>} : memref<16x512xf32, #tpu.memory_space<vmem>>, vector<16x512xf32>,
    return
  }
  func.func @transform_0(%arg0: i32) -> (i32, i32) {
    %c0_i32 = arith.constant 0 : i32
    %c0_i32_0 = arith.constant 0 : i32
    return %arg0, %c0_i32 : i32, i32
  }
  func.func @transform_1(%arg0: i32) -> (i32, i32) {
    %c0_i32 = arith.constant 0 : i32
    %c0_i32_0 = arith.constant 0 : i32
    %c0_i32_1 = arith.constant 0 : i32
    return %c0_i32, %c0_i32_0 : i32, i32
  }
  func.func @transform_2(%arg0: i32) -> (i32, i32) {
    %c0_i32 = arith.constant 0 : i32
    %c0_i32_0 = arith.constant 0 : i32
    %c0_i32_1 = arith.constant 0 : i32
    return %c0_i32, %c0_i32_0 : i32, i32
  }
  func.func @transform_3(%arg0: i32) -> (i32, i32) {
    %c0_i32 = arith.constant 0 : i32
    %c0_i32_0 = arith.constant 0 : i32
    %c0_i32_1 = arith.constant 0 : i32
    return %c0_i32, %c0_i32_0 : i32, i32
  }
  func.func @transform_4(%arg0: i32) -> (i32, i32) {
    %c0_i32 = arith.constant 0 : i32
    %c0_i32_0 = arith.constant 0 : i32
    %c0_i32_1 = arith.constant 0 : i32
    return %c0_i32, %c0_i32_0 : i32, i32
  }
  func.func @transform_5(%arg0: i32) -> (i32, i32) {
    %c0_i32 = arith.constant 0 : i32
    %c0_i32_0 = arith.constant 0 : i32
    %c0_i32_1 = arith.constant 0 : i32
    return %c0_i32, %c0_i32_0 : i32, i32
  }
  func.func @transform_6(%arg0: i32) -> (i32, i32) {
    %c0_i32 = arith.constant 0 : i32
    %c0_i32_0 = arith.constant 0 : i32
    %c0_i32_1 = arith.constant 0 : i32
    return %c0_i32, %c0_i32_0 : i32, i32
  }
  func.func @transform_7(%arg0: i32) -> (i32, i32) {
    %c0_i32 = arith.constant 0 : i32
    %c0_i32_0 = arith.constant 0 : i32
    return %arg0, %c0_i32 : i32, i32
  }
}

module attributes {stable_mosaic.version = 11 : i64} {
  func.func @_ln_matmul_kernel(%arg0: i32, %arg1: memref<16x512xf32, #tpu.memory_space<vmem>>, %arg2: memref<1x512xf32, #tpu.memory_space<vmem>>, %arg3: memref<1x512xf32, #tpu.memory_space<vmem>>, %arg4: memref<512x1024xbf16, #tpu.memory_space<vmem>>, %arg5: memref<1x1024xf32, #tpu.memory_space<vmem>>, %arg6: memref<16x1024xf32, #tpu.memory_space<vmem>>) attributes {dimension_semantics = [#tpu.dimension_semantics<parallel>], iteration_bounds = array<i64: 1>, scalar_prefetch = 0 : i64, scratch_operands = 0 : i64, tpu.core_type = #tpu.core_type<tc>, window_params = [{transform_indices = @transform_0, window_bounds = array<i64: 16, 512>}, {pipeline_mode = #tpu.pipeline_mode<synchronous>, transform_indices = @transform_1, window_bounds = array<i64: 1, 512>}, {pipeline_mode = #tpu.pipeline_mode<synchronous>, transform_indices = @transform_2, window_bounds = array<i64: 1, 512>}, {pipeline_mode = #tpu.pipeline_mode<synchronous>, transform_indices = @transform_3, window_bounds = array<i64: 512, 1024>}, {pipeline_mode = #tpu.pipeline_mode<synchronous>, transform_indices = @transform_4, window_bounds = array<i64: 1, 1024>}, {transform_indices = @transform_5, window_bounds = array<i64: 16, 1024>}]} {
    %c0 = arith.constant 0 : index
    %c0_0 = arith.constant 0 : index
    %0 = vector.load %arg1[%c0, %c0_0] : memref<16x512xf32, #tpu.memory_space<vmem>>, vector<16x512xf32>
    %c0_1 = arith.constant 0 : index
    %c0_2 = arith.constant 0 : index
    %1 = vector.load %arg2[%c0_1, %c0_2] : memref<1x512xf32, #tpu.memory_space<vmem>>, vector<1x512xf32>
    %c0_3 = arith.constant 0 : index
    %c0_4 = arith.constant 0 : index
    %2 = vector.load %arg3[%c0_3, %c0_4] : memref<1x512xf32, #tpu.memory_space<vmem>>, vector<1x512xf32>
    %cst = arith.constant dense<0.000000e+00> : vector<16xf32>
    %3 = vector.multi_reduction <add>, %0, %cst [1] : vector<16x512xf32> to vector<16xf32>
    %4 = vector.shape_cast %3 : vector<16xf32> to vector<16x1xf32>
    %cst_5 = arith.constant 5.120000e+02 : f32
    %5 = vector.broadcast %cst_5 : f32 to vector<16x1xf32>
    %6 = arith.divf %4, %5 : vector<16x1xf32>
    %7 = vector.broadcast %6 : vector<16x1xf32> to vector<16x512xf32>
    %8 = arith.subf %0, %7 : vector<16x512xf32>
    %9 = arith.mulf %8, %8 : vector<16x512xf32>
    %cst_6 = arith.constant dense<0.000000e+00> : vector<16xf32>
    %10 = vector.multi_reduction <add>, %9, %cst_6 [1] : vector<16x512xf32> to vector<16xf32>
    %11 = vector.shape_cast %10 : vector<16xf32> to vector<16x1xf32>
    %cst_7 = arith.constant 5.120000e+02 : f32
    %12 = vector.broadcast %cst_7 : f32 to vector<16x1xf32>
    %13 = arith.divf %11, %12 : vector<16x1xf32>
    %14 = vector.broadcast %6 : vector<16x1xf32> to vector<16x512xf32>
    %15 = arith.subf %0, %14 : vector<16x512xf32>
    %cst_8 = arith.constant 9.99999974E-6 : f32
    %16 = vector.broadcast %cst_8 : f32 to vector<16x1xf32>
    %17 = arith.addf %13, %16 : vector<16x1xf32>
    %18 = math.rsqrt %17 : vector<16x1xf32>
    %19 = vector.broadcast %18 : vector<16x1xf32> to vector<16x512xf32>
    %20 = arith.mulf %15, %19 : vector<16x512xf32>
    %21 = vector.broadcast %1 : vector<1x512xf32> to vector<16x512xf32>
    %22 = arith.mulf %20, %21 : vector<16x512xf32>
    %23 = vector.broadcast %2 : vector<1x512xf32> to vector<16x512xf32>
    %24 = arith.addf %22, %23 : vector<16x512xf32>
    %c0_9 = arith.constant 0 : index
    %c0_10 = arith.constant 0 : index
    %25 = vector.load %arg4[%c0_9, %c0_10] : memref<512x1024xbf16, #tpu.memory_space<vmem>>, vector<512x1024xbf16>
    %26 = arith.truncf %24 : vector<16x512xf32> to vector<16x512xbf16>
    %cst_11 = arith.constant dense<0.000000e+00> : vector<16x1024xf32>
    %27 = tpu.matmul %26, %25, %cst_11 {dimension_numbers = #tpu.dot_dimension_numbers<[1], [0], [0], [1], [0, 0, 1, 1], [], []>} : vector<16x512xbf16>, vector<512x1024xbf16>, vector<16x1024xf32> -> vector<16x1024xf32>
    %c0_12 = arith.constant 0 : index
    %c0_13 = arith.constant 0 : index
    %28 = vector.load %arg5[%c0_12, %c0_13] : memref<1x1024xf32, #tpu.memory_space<vmem>>, vector<1x1024xf32>
    %29 = vector.broadcast %28 : vector<1x1024xf32> to vector<16x1024xf32>
    %30 = arith.addf %27, %29 : vector<16x1024xf32>
    %c0_14 = arith.constant 0 : index
    %c0_15 = arith.constant 0 : index
    %31 = vector.load %arg6[%c0_14, %c0_15] : memref<16x1024xf32, #tpu.memory_space<vmem>>, vector<16x1024xf32>
    tpu.vector_store %arg6[%c0_14, %c0_15], %30 {strides = array<i32>} : memref<16x1024xf32, #tpu.memory_space<vmem>>, vector<16x1024xf32>,
    return
  }
  func.func @transform_0(%arg0: i32) -> (i32, i32) {
    %c0_i32 = arith.constant 0 : i32
    %c0_i32_0 = arith.constant 0 : i32
    return %arg0, %c0_i32 : i32, i32
  }
  func.func @transform_1(%arg0: i32) -> (i32, i32) {
    %c0_i32 = arith.constant 0 : i32
    %c0_i32_0 = arith.constant 0 : i32
    %c0_i32_1 = arith.constant 0 : i32
    return %c0_i32, %c0_i32_0 : i32, i32
  }
  func.func @transform_2(%arg0: i32) -> (i32, i32) {
    %c0_i32 = arith.constant 0 : i32
    %c0_i32_0 = arith.constant 0 : i32
    %c0_i32_1 = arith.constant 0 : i32
    return %c0_i32, %c0_i32_0 : i32, i32
  }
  func.func @transform_3(%arg0: i32) -> (i32, i32) {
    %c0_i32 = arith.constant 0 : i32
    %c0_i32_0 = arith.constant 0 : i32
    %c0_i32_1 = arith.constant 0 : i32
    return %c0_i32, %c0_i32_0 : i32, i32
  }
  func.func @transform_4(%arg0: i32) -> (i32, i32) {
    %c0_i32 = arith.constant 0 : i32
    %c0_i32_0 = arith.constant 0 : i32
    %c0_i32_1 = arith.constant 0 : i32
    return %c0_i32, %c0_i32_0 : i32, i32
  }
  func.func @transform_5(%arg0: i32) -> (i32, i32) {
    %c0_i32 = arith.constant 0 : i32
    %c0_i32_0 = arith.constant 0 : i32
    return %arg0, %c0_i32 : i32, i32
  }
}

module attributes {stable_mosaic.version = 11 : i64} {
  func.func @_ln_matmul_kernel(%arg0: i32, %arg1: memref<16x512xf32, #tpu.memory_space<vmem>>, %arg2: memref<1x512xf32, #tpu.memory_space<vmem>>, %arg3: memref<1x512xf32, #tpu.memory_space<vmem>>, %arg4: memref<512x512xbf16, #tpu.memory_space<vmem>>, %arg5: memref<1x512xf32, #tpu.memory_space<vmem>>, %arg6: memref<16x512xf32, #tpu.memory_space<vmem>>) attributes {dimension_semantics = [#tpu.dimension_semantics<parallel>], iteration_bounds = array<i64: 1>, scalar_prefetch = 0 : i64, scratch_operands = 0 : i64, tpu.core_type = #tpu.core_type<tc>, window_params = [{transform_indices = @transform_0, window_bounds = array<i64: 16, 512>}, {pipeline_mode = #tpu.pipeline_mode<synchronous>, transform_indices = @transform_1, window_bounds = array<i64: 1, 512>}, {pipeline_mode = #tpu.pipeline_mode<synchronous>, transform_indices = @transform_2, window_bounds = array<i64: 1, 512>}, {pipeline_mode = #tpu.pipeline_mode<synchronous>, transform_indices = @transform_3, window_bounds = array<i64: 512, 512>}, {pipeline_mode = #tpu.pipeline_mode<synchronous>, transform_indices = @transform_4, window_bounds = array<i64: 1, 512>}, {transform_indices = @transform_5, window_bounds = array<i64: 16, 512>}]} {
    %c0 = arith.constant 0 : index
    %c0_0 = arith.constant 0 : index
    %0 = vector.load %arg1[%c0, %c0_0] : memref<16x512xf32, #tpu.memory_space<vmem>>, vector<16x512xf32>
    %c0_1 = arith.constant 0 : index
    %c0_2 = arith.constant 0 : index
    %1 = vector.load %arg2[%c0_1, %c0_2] : memref<1x512xf32, #tpu.memory_space<vmem>>, vector<1x512xf32>
    %c0_3 = arith.constant 0 : index
    %c0_4 = arith.constant 0 : index
    %2 = vector.load %arg3[%c0_3, %c0_4] : memref<1x512xf32, #tpu.memory_space<vmem>>, vector<1x512xf32>
    %cst = arith.constant dense<0.000000e+00> : vector<16xf32>
    %3 = vector.multi_reduction <add>, %0, %cst [1] : vector<16x512xf32> to vector<16xf32>
    %4 = vector.shape_cast %3 : vector<16xf32> to vector<16x1xf32>
    %cst_5 = arith.constant 5.120000e+02 : f32
    %5 = vector.broadcast %cst_5 : f32 to vector<16x1xf32>
    %6 = arith.divf %4, %5 : vector<16x1xf32>
    %7 = vector.broadcast %6 : vector<16x1xf32> to vector<16x512xf32>
    %8 = arith.subf %0, %7 : vector<16x512xf32>
    %9 = arith.mulf %8, %8 : vector<16x512xf32>
    %cst_6 = arith.constant dense<0.000000e+00> : vector<16xf32>
    %10 = vector.multi_reduction <add>, %9, %cst_6 [1] : vector<16x512xf32> to vector<16xf32>
    %11 = vector.shape_cast %10 : vector<16xf32> to vector<16x1xf32>
    %cst_7 = arith.constant 5.120000e+02 : f32
    %12 = vector.broadcast %cst_7 : f32 to vector<16x1xf32>
    %13 = arith.divf %11, %12 : vector<16x1xf32>
    %14 = vector.broadcast %6 : vector<16x1xf32> to vector<16x512xf32>
    %15 = arith.subf %0, %14 : vector<16x512xf32>
    %cst_8 = arith.constant 9.99999974E-6 : f32
    %16 = vector.broadcast %cst_8 : f32 to vector<16x1xf32>
    %17 = arith.addf %13, %16 : vector<16x1xf32>
    %18 = math.rsqrt %17 : vector<16x1xf32>
    %19 = vector.broadcast %18 : vector<16x1xf32> to vector<16x512xf32>
    %20 = arith.mulf %15, %19 : vector<16x512xf32>
    %21 = vector.broadcast %1 : vector<1x512xf32> to vector<16x512xf32>
    %22 = arith.mulf %20, %21 : vector<16x512xf32>
    %23 = vector.broadcast %2 : vector<1x512xf32> to vector<16x512xf32>
    %24 = arith.addf %22, %23 : vector<16x512xf32>
    %c0_9 = arith.constant 0 : index
    %c0_10 = arith.constant 0 : index
    %25 = vector.load %arg4[%c0_9, %c0_10] : memref<512x512xbf16, #tpu.memory_space<vmem>>, vector<512x512xbf16>
    %26 = arith.truncf %24 : vector<16x512xf32> to vector<16x512xbf16>
    %cst_11 = arith.constant dense<0.000000e+00> : vector<16x512xf32>
    %27 = tpu.matmul %26, %25, %cst_11 {dimension_numbers = #tpu.dot_dimension_numbers<[1], [0], [0], [1], [0, 0, 1, 1], [], []>} : vector<16x512xbf16>, vector<512x512xbf16>, vector<16x512xf32> -> vector<16x512xf32>
    %c0_12 = arith.constant 0 : index
    %c0_13 = arith.constant 0 : index
    %28 = vector.load %arg5[%c0_12, %c0_13] : memref<1x512xf32, #tpu.memory_space<vmem>>, vector<1x512xf32>
    %29 = vector.broadcast %28 : vector<1x512xf32> to vector<16x512xf32>
    %30 = arith.addf %27, %29 : vector<16x512xf32>
    %c0_14 = arith.constant 0 : index
    %c0_15 = arith.constant 0 : index
    %31 = vector.load %arg6[%c0_14, %c0_15] : memref<16x512xf32, #tpu.memory_space<vmem>>, vector<16x512xf32>
    tpu.vector_store %arg6[%c0_14, %c0_15], %30 {strides = array<i32>} : memref<16x512xf32, #tpu.memory_space<vmem>>, vector<16x512xf32>,
    return
  }
  func.func @transform_0(%arg0: i32) -> (i32, i32) {
    %c0_i32 = arith.constant 0 : i32
    %c0_i32_0 = arith.constant 0 : i32
    return %arg0, %c0_i32 : i32, i32
  }
  func.func @transform_1(%arg0: i32) -> (i32, i32) {
    %c0_i32 = arith.constant 0 : i32
    %c0_i32_0 = arith.constant 0 : i32
    %c0_i32_1 = arith.constant 0 : i32
    return %c0_i32, %c0_i32_0 : i32, i32
  }
  func.func @transform_2(%arg0: i32) -> (i32, i32) {
    %c0_i32 = arith.constant 0 : i32
    %c0_i32_0 = arith.constant 0 : i32
    %c0_i32_1 = arith.constant 0 : i32
    return %c0_i32, %c0_i32_0 : i32, i32
  }
  func.func @transform_3(%arg0: i32) -> (i32, i32) {
    %c0_i32 = arith.constant 0 : i32
    %c0_i32_0 = arith.constant 0 : i32
    %c0_i32_1 = arith.constant 0 : i32
    return %c0_i32, %c0_i32_0 : i32, i32
  }
  func.func @transform_4(%arg0: i32) -> (i32, i32) {
    %c0_i32 = arith.constant 0 : i32
    %c0_i32_0 = arith.constant 0 : i32
    %c0_i32_1 = arith.constant 0 : i32
    return %c0_i32, %c0_i32_0 : i32, i32
  }
  func.func @transform_5(%arg0: i32) -> (i32, i32) {
    %c0_i32 = arith.constant 0 : i32
    %c0_i32_0 = arith.constant 0 : i32
    return %arg0, %c0_i32 : i32, i32
  }
}

module attributes {stable_mosaic.version = 11 : i64} {
  func.func @_attention_kernel(%arg0: i32, %arg1: i32, %arg2: memref<1x8x128xf32, #tpu.memory_space<vmem>>, %arg3: memref<1x8x128xf32, #tpu.memory_space<vmem>>, %arg4: memref<1x8x128xf32, #tpu.memory_space<vmem>>, %arg5: memref<1x8x8xf32, #tpu.memory_space<vmem>>, %arg6: memref<1x8x128xf32, #tpu.memory_space<vmem>>) attributes {dimension_semantics = [#tpu.dimension_semantics<parallel>, #tpu.dimension_semantics<parallel>], iteration_bounds = array<i64: 2, 4>, scalar_prefetch = 0 : i64, scratch_operands = 0 : i64, tpu.core_type = #tpu.core_type<tc>, window_params = [{transform_indices = @transform_0, window_bounds = array<i64: 1, 8, 128>}, {transform_indices = @transform_1, window_bounds = array<i64: 1, 8, 128>}, {transform_indices = @transform_2, window_bounds = array<i64: 1, 8, 128>}, {transform_indices = @transform_3, window_bounds = array<i64: 1, 8, 8>}, {transform_indices = @transform_4, window_bounds = array<i64: 1, 8, 128>}]} {
    %c0 = arith.constant 0 : index
    %c0_0 = arith.constant 0 : index
    %c0_1 = arith.constant 0 : index
    %0 = vector.load %arg2[%c0, %c0_0, %c0_1] : memref<1x8x128xf32, #tpu.memory_space<vmem>>, vector<1x8x128xf32>
    %1 = arith.truncf %0 : vector<1x8x128xf32> to vector<1x8x128xbf16>
    %c0_2 = arith.constant 0 : index
    %c0_3 = arith.constant 0 : index
    %c0_4 = arith.constant 0 : index
    %2 = vector.load %arg3[%c0_2, %c0_3, %c0_4] : memref<1x8x128xf32, #tpu.memory_space<vmem>>, vector<1x8x128xf32>
    %3 = arith.truncf %2 : vector<1x8x128xf32> to vector<1x8x128xbf16>
    %c0_5 = arith.constant 0 : index
    %c0_6 = arith.constant 0 : index
    %c0_7 = arith.constant 0 : index
    %4 = vector.load %arg4[%c0_5, %c0_6, %c0_7] : memref<1x8x128xf32, #tpu.memory_space<vmem>>, vector<1x8x128xf32>
    %5 = arith.truncf %4 : vector<1x8x128xf32> to vector<1x8x128xbf16>
    "tpu.trace_start"() <{level = 10 : i32, message = "bqd,bkd->bqk"}> : () -> ()
    %cst = arith.constant dense<0.000000e+00> : vector<1x8x8xf32>
    %6 = tpu.matmul %1, %3, %cst {dimension_numbers = #tpu.dot_dimension_numbers<[2], [2], [1], [1], [0, 0, 0, 1, 1, 1], [0], [0]>} : vector<1x8x128xbf16>, vector<1x8x128xbf16>, vector<1x8x8xf32> -> vector<1x8x8xf32>
    "tpu.trace_stop"() : () -> ()
    %cst_8 = arith.constant 0.0883883461 : f32
    %7 = vector.broadcast %cst_8 : f32 to vector<1x8x8xf32>
    %8 = arith.mulf %6, %7 : vector<1x8x8xf32>
    %c0_9 = arith.constant 0 : index
    %c0_10 = arith.constant 0 : index
    %c0_11 = arith.constant 0 : index
    %9 = vector.load %arg5[%c0_9, %c0_10, %c0_11] : memref<1x8x8xf32, #tpu.memory_space<vmem>>, vector<1x8x8xf32>
    %10 = arith.addf %8, %9 : vector<1x8x8xf32>
    %cst_12 = arith.constant dense<0xFF800000> : vector<1x8xf32>
    %11 = vector.multi_reduction <maximumf>, %10, %cst_12 [2] : vector<1x8x8xf32> to vector<1x8xf32>
    %12 = vector.shape_cast %11 : vector<1x8xf32> to vector<1x8x1xf32>
    %13 = vector.broadcast %12 : vector<1x8x1xf32> to vector<1x8x8xf32>
    %14 = arith.subf %10, %13 : vector<1x8x8xf32>
    %15 = math.exp %14 : vector<1x8x8xf32>
    %cst_13 = arith.constant dense<0.000000e+00> : vector<1x8xf32>
    %16 = vector.multi_reduction <add>, %15, %cst_13 [2] : vector<1x8x8xf32> to vector<1x8xf32>
    %17 = vector.shape_cast %16 : vector<1x8xf32> to vector<1x8x1xf32>
    %18 = tpu.reciprocal %17 {approx = true} : vector<1x8x1xf32> -> vector<1x8x1xf32>
    %19 = vector.broadcast %18 : vector<1x8x1xf32> to vector<1x8x8xf32>
    %20 = arith.mulf %15, %19 : vector<1x8x8xf32>
    %21 = arith.truncf %20 : vector<1x8x8xf32> to vector<1x8x8xbf16>
    "tpu.trace_start"() <{level = 10 : i32, message = "bqk,bkd->bqd"}> : () -> ()
    %cst_14 = arith.constant dense<0.000000e+00> : vector<1x8x128xf32>
    %22 = tpu.matmul %21, %5, %cst_14 {dimension_numbers = #tpu.dot_dimension_numbers<[2], [1], [1], [2], [0, 0, 0, 1, 1, 2], [0], [0]>} : vector<1x8x8xbf16>, vector<1x8x128xbf16>, vector<1x8x128xf32> -> vector<1x8x128xf32>
    "tpu.trace_stop"() : () -> ()
    %c0_15 = arith.constant 0 : index
    %c0_16 = arith.constant 0 : index
    %c0_17 = arith.constant 0 : index
    %23 = vector.load %arg6[%c0_15, %c0_16, %c0_17] : memref<1x8x128xf32, #tpu.memory_space<vmem>>, vector<1x8x128xf32>
    tpu.vector_store %arg6[%c0_15, %c0_16, %c0_17], %22 {strides = array<i32>} : memref<1x8x128xf32, #tpu.memory_space<vmem>>, vector<1x8x128xf32>,
    return
  }
  func.func @transform_0(%arg0: i32, %arg1: i32) -> (i32, i32, i32) {
    %c0_i32 = arith.constant 0 : i32
    %0 = arith.addi %c0_i32, %arg1 : i32
    %c0_i32_0 = arith.constant 0 : i32
    %c0_i32_1 = arith.constant 0 : i32
    return %arg0, %c0_i32_0, %0 : i32, i32, i32
  }
  func.func @transform_1(%arg0: i32, %arg1: i32) -> (i32, i32, i32) {
    %c0_i32 = arith.constant 0 : i32
    %0 = arith.addi %c0_i32, %arg1 : i32
    %c0_i32_0 = arith.constant 0 : i32
    %c0_i32_1 = arith.constant 0 : i32
    return %arg0, %c0_i32_0, %0 : i32, i32, i32
  }
  func.func @transform_2(%arg0: i32, %arg1: i32) -> (i32, i32, i32) {
    %c4_i32 = arith.constant 4 : i32
    %0 = arith.addi %c4_i32, %arg1 : i32
    %c0_i32 = arith.constant 0 : i32
    %c0_i32_0 = arith.constant 0 : i32
    return %arg0, %c0_i32, %0 : i32, i32, i32
  }
  func.func @transform_3(%arg0: i32, %arg1: i32) -> (i32, i32, i32) {
    %c0_i32 = arith.constant 0 : i32
    %c0_i32_0 = arith.constant 0 : i32
    %c0_i32_1 = arith.constant 0 : i32
    return %arg0, %c0_i32, %c0_i32_0 : i32, i32, i32
  }
  func.func @transform_4(%arg0: i32, %arg1: i32) -> (i32, i32, i32) {
    %c0_i32 = arith.constant 0 : i32
    %c0_i32_0 = arith.constant 0 : i32
    return %arg0, %c0_i32, %arg1 : i32, i32, i32
  }
}

module attributes {stable_mosaic.version = 11 : i64} {
  func.func @_ln_gen_logsoftmax_kernel(%arg0: i32, %arg1: memref<16x512xf32, #tpu.memory_space<vmem>>, %arg2: memref<1x512xf32, #tpu.memory_space<vmem>>, %arg3: memref<1x512xf32, #tpu.memory_space<vmem>>, %arg4: memref<512x512xbf16, #tpu.memory_space<vmem>>, %arg5: memref<1x512xf32, #tpu.memory_space<vmem>>, %arg6: memref<16x512xf32, #tpu.memory_space<vmem>>) attributes {dimension_semantics = [#tpu.dimension_semantics<parallel>], iteration_bounds = array<i64: 1>, scalar_prefetch = 0 : i64, scratch_operands = 0 : i64, tpu.core_type = #tpu.core_type<tc>, window_params = [{transform_indices = @transform_0, window_bounds = array<i64: 16, 512>}, {pipeline_mode = #tpu.pipeline_mode<synchronous>, transform_indices = @transform_1, window_bounds = array<i64: 1, 512>}, {pipeline_mode = #tpu.pipeline_mode<synchronous>, transform_indices = @transform_2, window_bounds = array<i64: 1, 512>}, {pipeline_mode = #tpu.pipeline_mode<synchronous>, transform_indices = @transform_3, window_bounds = array<i64: 512, 512>}, {pipeline_mode = #tpu.pipeline_mode<synchronous>, transform_indices = @transform_4, window_bounds = array<i64: 1, 512>}, {transform_indices = @transform_5, window_bounds = array<i64: 16, 512>}]} {
    %c0 = arith.constant 0 : index
    %c0_0 = arith.constant 0 : index
    %0 = vector.load %arg1[%c0, %c0_0] : memref<16x512xf32, #tpu.memory_space<vmem>>, vector<16x512xf32>
    %c0_1 = arith.constant 0 : index
    %c0_2 = arith.constant 0 : index
    %1 = vector.load %arg2[%c0_1, %c0_2] : memref<1x512xf32, #tpu.memory_space<vmem>>, vector<1x512xf32>
    %c0_3 = arith.constant 0 : index
    %c0_4 = arith.constant 0 : index
    %2 = vector.load %arg3[%c0_3, %c0_4] : memref<1x512xf32, #tpu.memory_space<vmem>>, vector<1x512xf32>
    %cst = arith.constant dense<0.000000e+00> : vector<16xf32>
    %3 = vector.multi_reduction <add>, %0, %cst [1] : vector<16x512xf32> to vector<16xf32>
    %4 = vector.shape_cast %3 : vector<16xf32> to vector<16x1xf32>
    %cst_5 = arith.constant 5.120000e+02 : f32
    %5 = vector.broadcast %cst_5 : f32 to vector<16x1xf32>
    %6 = arith.divf %4, %5 : vector<16x1xf32>
    %7 = vector.broadcast %6 : vector<16x1xf32> to vector<16x512xf32>
    %8 = arith.subf %0, %7 : vector<16x512xf32>
    %9 = arith.mulf %8, %8 : vector<16x512xf32>
    %cst_6 = arith.constant dense<0.000000e+00> : vector<16xf32>
    %10 = vector.multi_reduction <add>, %9, %cst_6 [1] : vector<16x512xf32> to vector<16xf32>
    %11 = vector.shape_cast %10 : vector<16xf32> to vector<16x1xf32>
    %cst_7 = arith.constant 5.120000e+02 : f32
    %12 = vector.broadcast %cst_7 : f32 to vector<16x1xf32>
    %13 = arith.divf %11, %12 : vector<16x1xf32>
    %14 = vector.broadcast %6 : vector<16x1xf32> to vector<16x512xf32>
    %15 = arith.subf %0, %14 : vector<16x512xf32>
    %cst_8 = arith.constant 9.99999974E-6 : f32
    %16 = vector.broadcast %cst_8 : f32 to vector<16x1xf32>
    %17 = arith.addf %13, %16 : vector<16x1xf32>
    %18 = math.rsqrt %17 : vector<16x1xf32>
    %19 = vector.broadcast %18 : vector<16x1xf32> to vector<16x512xf32>
    %20 = arith.mulf %15, %19 : vector<16x512xf32>
    %21 = vector.broadcast %1 : vector<1x512xf32> to vector<16x512xf32>
    %22 = arith.mulf %20, %21 : vector<16x512xf32>
    %23 = vector.broadcast %2 : vector<1x512xf32> to vector<16x512xf32>
    %24 = arith.addf %22, %23 : vector<16x512xf32>
    %c0_9 = arith.constant 0 : index
    %c0_10 = arith.constant 0 : index
    %25 = vector.load %arg4[%c0_9, %c0_10] : memref<512x512xbf16, #tpu.memory_space<vmem>>, vector<512x512xbf16>
    %26 = arith.truncf %24 : vector<16x512xf32> to vector<16x512xbf16>
    %cst_11 = arith.constant dense<0.000000e+00> : vector<16x512xf32>
    %27 = tpu.matmul %26, %25, %cst_11 {dimension_numbers = #tpu.dot_dimension_numbers<[1], [0], [0], [1], [0, 0, 1, 1], [], []>} : vector<16x512xbf16>, vector<512x512xbf16>, vector<16x512xf32> -> vector<16x512xf32>
    %c0_12 = arith.constant 0 : index
    %c0_13 = arith.constant 0 : index
    %28 = vector.load %arg5[%c0_12, %c0_13] : memref<1x512xf32, #tpu.memory_space<vmem>>, vector<1x512xf32>
    %29 = vector.broadcast %28 : vector<1x512xf32> to vector<16x512xf32>
    %30 = arith.addf %27, %29 : vector<16x512xf32>
    %cst_14 = arith.constant dense<0xFF800000> : vector<16xf32>
    %31 = vector.multi_reduction <maximumf>, %30, %cst_14 [1] : vector<16x512xf32> to vector<16xf32>
    %32 = vector.shape_cast %31 : vector<16xf32> to vector<16x1xf32>
    %33 = vector.broadcast %32 : vector<16x1xf32> to vector<16x512xf32>
    %34 = arith.subf %30, %33 : vector<16x512xf32>
    %35 = math.exp %34 : vector<16x512xf32>
    %cst_15 = arith.constant dense<0.000000e+00> : vector<16xf32>
    %36 = vector.multi_reduction <add>, %35, %cst_15 [1] : vector<16x512xf32> to vector<16xf32>
    %37 = vector.shape_cast %36 : vector<16xf32> to vector<16x1xf32>
    %38 = math.log %37 : vector<16x1xf32>
    %39 = vector.broadcast %38 : vector<16x1xf32> to vector<16x512xf32>
    %40 = arith.subf %34, %39 : vector<16x512xf32>
    %c0_16 = arith.constant 0 : index
    %c0_17 = arith.constant 0 : index
    %41 = vector.load %arg6[%c0_16, %c0_17] : memref<16x512xf32, #tpu.memory_space<vmem>>, vector<16x512xf32>
    tpu.vector_store %arg6[%c0_16, %c0_17], %40 {strides = array<i32>} : memref<16x512xf32, #tpu.memory_space<vmem>>, vector<16x512xf32>,
    return
  }
  func.func @transform_0(%arg0: i32) -> (i32, i32) {
    %c0_i32 = arith.constant 0 : i32
    %c0_i32_0 = arith.constant 0 : i32
    return %arg0, %c0_i32 : i32, i32
  }
  func.func @transform_1(%arg0: i32) -> (i32, i32) {
    %c0_i32 = arith.constant 0 : i32
    %c0_i32_0 = arith.constant 0 : i32
    %c0_i32_1 = arith.constant 0 : i32
    return %c0_i32, %c0_i32_0 : i32, i32
  }
  func.func @transform_2(%arg0: i32) -> (i32, i32) {
    %c0_i32 = arith.constant 0 : i32
    %c0_i32_0 = arith.constant 0 : i32
    %c0_i32_1 = arith.constant 0 : i32
    return %c0_i32, %c0_i32_0 : i32, i32
  }
  func.func @transform_3(%arg0: i32) -> (i32, i32) {
    %c0_i32 = arith.constant 0 : i32
    %c0_i32_0 = arith.constant 0 : i32
    %c0_i32_1 = arith.constant 0 : i32
    return %c0_i32, %c0_i32_0 : i32, i32
  }
  func.func @transform_4(%arg0: i32) -> (i32, i32) {
    %c0_i32 = arith.constant 0 : i32
    %c0_i32_0 = arith.constant 0 : i32
    %c0_i32_1 = arith.constant 0 : i32
    return %c0_i32, %c0_i32_0 : i32, i32
  }
  func.func @transform_5(%arg0: i32) -> (i32, i32) {
    %c0_i32 = arith.constant 0 : i32
    %c0_i32_0 = arith.constant 0 : i32
    return %arg0, %c0_i32 : i32, i32
  }
}

</mosaic_0001>

<bundles_post_ra>
// kernel: transformer_forward.26
= control target key start
LH: loop header
LB: loop body
LE: loop exit
PB: predicated region body
PF: predicated region fallthrough
CT: control target
= control target key end

     0   :  { %s711_s15 = smov 0   ;;  %s713_s16 = smov 0   ;;  %s792_s0 = inlined_call_operand.vmem [shape: f32[2,8,1536], index: 0, kind: input, shape index: {}, may-alias: {0,1,2}]   ;;  %s793_s1 = inlined_call_operand.vmem [shape: f32[2,8,1536], index: 1, kind: input, shape index: {}, may-alias: {0,1,2}]   ;;  %s794_s2 = inlined_call_operand.vmem [shape: f32[2,8,1536], index: 2, kind: input, shape index: {}, may-alias: {0,1,2}]   ;;  %s795_s3 = inlined_call_operand.vmem [shape: f32[2,8,8], index: 3, kind: input, shape index: {}]   ;;  %s796_s4 = inlined_call_operand.vmem [shape: f32[2,8,512], index: 4, kind: output, shape index: {}]  }
   0x1   :  { %s715_s17 = smov 0   ;;  %s717_s18 = smov 0  }
   0x2   :  { %s719_s19 = smov 0  }
   0x3 LB: > { %s23_s20 = sadd.s32 1, %s674_s17  ;;  %s26_s21 = sadd.s32 1, %s678_s18  ;;  %s682_s19 = sphi %s719_s19, %s14_s19   ;;  %s678_s18 = sphi %s717_s18, %s800_s18   ;;  %s674_s17 = sphi %s715_s17, %s799_s17   ;;  %s670_s16 = sphi %s713_s16, %s798_s16   ;;  %s666_s15 = sphi %s711_s15, %s797_s15  }
   0x4   : > { %p24_p0 = scmp.ge.s32.totalorder %s23_s20, 4  ;;  %p571_p1 = scmp.ge.s32.totalorder %s682_s19, 1 }
   0x5   : > { %p228_p2 = scmp.lt.s32.totalorder %s682_s19, 9 }
   0x6   : > { %s802_s20 = smov (%p24_p0, %s23_s20), 0  ;;  %s804_s21 = smov (!%p24_p0, %s26_s21), %s678_s18 }
   0x7   : > { %p229_p3 = pnand %p571_p1, %p228_p2  ;;  %p28_p4 = scmp.ge.s32.totalorder %s804_s21, 2 }
   0x8   : > { %p282_p5 = scmp.lt.s32.totalorder (!%p229_p3), %s670_s16, 1  ;;  %s290_s22 = sadd.s32 (!%p229_p3), 4, %s666_s15  ;;  %v684_v0 = vmov (!%p229_p3), 0.0   ;;  %vm685_vm0 = vmmov (!%p229_p3), 0   ;;  %vm372_vm1 = vcmask (!%p229_p3), 64512   ;;  %vm388_vm2 = vcmask (!%p229_p3), 1043456  }
   0x9   : > { %s806_s21 = smov (%p28_p4, %s804_s21), 0  ;;  %232 = sbr.rel (%p229_p3) target bundleno = 779 (0x30b), region = 36 }
   0xa   : > { %585 = vmatprep.subr.bf16.mxu0 (!%p229_p3), %v684_v0  ;;  %p293_p6 = scmp.lt.s32.totalorder (!%p229_p3), %s290_s22, 11  ;;  %587 = vmatprep.mubr.msk.bf16.mxu0 (!%p229_p3), %vm685_vm0, %v684_v0  ;;  %p284_p7 = scmp.lt.s32.totalorder (!%p229_p3), %s666_s15, 11 }
   0xb   : > { %591 = vmatprep.subr.bf16.mxu1 (!%p229_p3), %v684_v0  ;;  %593 = vmatprep.mubr.msk.bf16.mxu1 (!%p229_p3), %vm685_vm0, %v684_v0  ;;  %s300_s13 = sadd.s32 (!%p229_p3), 8, %s666_s15  ;;  %p316_p9 = scmp.lt.s32.totalorder (!%p229_p3), %s666_s15, 3 }
   0xc   : > { %p303_p8 = scmp.lt.s32.totalorder (!%p229_p3), %s300_s13, 11 }
  0x10   : > { %s808_s16 = smov (!%p282_p5, %s670_s16), 1  ;;  %s810_s22 = smov (!%p293_p6, %s290_s22), 11 }
  0x11   : > { %s748_s23 = smul.u32 12, %s808_s16  ;;  %s575_s9 = sshll.u32 %s808_s16, 3 }
  0x12   : > { %s285_s24 = scalar_select %p284_p7, %s666_s15, 11 }
  0x13   : > { %s296_s25 = sadd.s32 %s748_s23, %s810_s22  ;;  %s313_s12 = scalar_lea.vmem %s795_s3, %s575_s9 }
  0x14   : > { %s573_s26 = sshll.u32 %s296_s25, 3  ;;  %s287_s27 = sadd.s32 %s748_s23, %s285_s24  ;;  %v370_v6 = vld [vmem:[%s313_s12] sm:$0xff] }
  0x15   : > { %s298_s30 = scalar_lea.vmem %s793_s1, %s573_s26  ;;  %s572_s5 = sshll.u32 %s287_s27, 3 }
  0x16   : > { %v325_v1 = vld [vmem:[%s298_s30] sm:$0xff]  ;;  %s289_s8 = scalar_lea.vmem %s792_s0, %s572_s5  ;;  %s812_s13 = smov (!%p303_p8, %s300_s13), 11 }
  0x17   : > { %v326_v2 = vpack.c.bf16 %v325_v1, %v325_v1  ;;  %v323_v3 = vld [vmem:[%s289_s8] sm:$0xff]  ;;  %s306_s14 = sadd.s32 %s748_s23, %s812_s13  ;;  %s814_s15 = smov (!%p316_p9, %s666_s15), 3 }
  0x18   : > { %v324_v4 = vpack.c.bf16 %v323_v3, %v323_v3  ;;  %s574_s22 = sshll.u32 %s306_s14, 3  ;;  %s576_s23 = sshll.u32 %s808_s16, 2 }
  0x19   : > { %586 = vmatpush3.bf16.xpose.msra.mxu0 %v326_v2  ;;  %s308_s26 = scalar_lea.vmem %s794_s2, %s574_s22  ;;  %s319_s27 = sadd.s32 %s576_s23, %s814_s15 }
  0x1a   : > { %v327_v18 = vld [vmem:[%s308_s26] sm:$0xff]  ;;  %s577_s28 = sshll.u32 %s319_s27, 3 }
  0x1b   : > { %v328_v19 = vpack.c.bf16 %v327_v18, %v327_v18  ;;  %s321_s5 = scalar_lea.vmem %s796_s4, %s577_s28 }
  0x1d   : > { %v390_v20 = vsel %vm388_vm2, %v328_v19, 0 }
  0x1e   : > { %592 = vmatpush3.bf16.msra.mxu1 %v390_v20 }
  0x20   : > { %588 = vmatmul.mubr.bf16.vlgmr.msra.gmra.mrb[0].mxu0 %v324_v4 }
  0xf3   : > { %v363_v5 = vpop.f32.mrb[0].mxu0 }
  0xf4   : > { %v369_v7 = vmul.f32 0.088388346, %v363_v5  ;;  %v589_v8 = vpop.f32.mrb[1].mxu0 }
  0xf5   : > { %v366_v9 = vpop.f32.mrb[2].mxu0 }
  0xf6   : > { %v590_v10 = vpop.f32.mrb[3].mxu0  ;;  %v371_v11 = vadd.f32 %v370_v6, %v369_v7 }
  0xf8   : > { %v373_v12 = vsel %vm372_vm1, %v371_v11, -inf }
  0xf9   : > { %374 = vmax.xlane.f32.xlu0 %v373_v12 }
 0x186   : > { %v375_v13 = vpop.xlane.xlu0 %374 }
 0x187   : > { %v376_v14 = vsub.f32 %v371_v11, %v375_v13 }
 0x189   : > { %v377_v15 = vmul.f32 1.442695, %v376_v14 }
 0x18b   : > { %640 = vpow2.f32 %v377_v15 }
 0x195   : > { %v641_v16 = vpop.eup %640 }
 0x196   : > { %v379_v17 = vsel %vm372_vm1, %v641_v16, 0.0 }
 0x197   : > { %380 = vadd.xlane.f32.xlu0 %v379_v17 }
 0x224   : > { %v381_v21 = vpop.xlane.xlu0 %380 }
 0x225   : > { %642 = vrcp.f32 %v381_v21 }
 0x22f   : > { %v643_v22 = vpop.eup %642 }
 0x230   : > { %v383_v23 = vmul.f32 %v643_v22, %v641_v16 }
 0x232   : > { %v384_v24 = vpack.c.bf16 %v383_v23, %v383_v23 }
 0x234   : > { %594 = vmatmul.mubr.msk.bf16.vlgmr.msra.gmra.mrb[0].mxu1 %vm372_vm1, %v384_v24 }
 0x307   : > { %v426_v25 = vpop.f32.mrb[0].mxu1 }
 0x308   : > { %432 = vst [vmem:[%s321_s5] sm:$0xff] %v426_v25  ;;  %v595_v26 = vpop.f32.mrb[1].mxu1 }
 0x309   : > { %v429_v27 = vpop.f32.mrb[2].mxu1 }
 0x30a   : > { %v596_v28 = vpop.f32.mrb[3].mxu1 }
 0x30b PF: > { %s14_s19 = sadd.s32 1, %s682_s19   ;;  %s797_s15 = smov %s674_s17 }
 0x30c   : > { %p11_p10 = scmp.ge.s32.totalorder %s14_s19, 10   ;;  %s798_s16 = smov %s678_s18 }
 0x30d   : > { %s799_s17 = smov %s802_s20  ;;  %s800_s18 = smov %s806_s21 }
 0x30e   :  { %13 = sbr.rel (!%p11_p10) target bundleno = 3 (0x3), region = 75 }

// kernel: transformer_forward.27
= control target key start
LH: loop header
LB: loop body
LE: loop exit
PB: predicated region body
PF: predicated region fallthrough
CT: control target
= control target key end

     0   :  { %s1839_s2 = inlined_call_operand.vmem [shape: bf16[512,512], index: 2, kind: input, shape index: {}]   ;;  %s1840_s0 = inlined_call_operand.vmem [shape: f32[16,512], index: 0, kind: input, shape index: {}]   ;;  %s1841_s3 = inlined_call_operand.vmem [shape: f32[1,512], index: 3, kind: input, shape index: {}]   ;;  %s1842_s1 = inlined_call_operand.vmem [shape: f32[16,512], index: 1, kind: input, shape index: {}]   ;;  %s1843_s4 = inlined_call_operand.vmem [shape: f32[16,512], index: 4, kind: output, shape index: {}]  }
   0x1   :  { %v1163_v0 = vld [vmem:[%s1839_s2 + $0x4] ss:$16 sps:$4 sm:$0xff]   ;;  %v1165_v1 = vld [vmem:[%s1839_s2 + $0xc] ss:$16 sps:$4 sm:$0xff]   ;;  %v1167_v2 = vld [vmem:[%s1839_s2] ss:$16 sps:$4 sm:$0xff]  }
   0x2   :  { %819 = vmatprep.subr.bf16.mxu0 %v1163_v0  ;;  %v1168_v3 = vld [vmem:[%s1839_s2 + $0x8] ss:$16 sps:$4 sm:$0xff]   ;;  %905 = vmatprep.subr.bf16.mxu1 %v1165_v1  ;;  %v1169_v4 = vld [vmem:[%s1839_s2 + $0x24] ss:$16 sps:$4 sm:$0xff]   ;;  %v1171_v5 = vld [vmem:[%s1839_s2 + $0x2c] ss:$16 sps:$4 sm:$0xff]  }
   0x3   :  { %820 = vmatpush1.bf16.msra.mxu0 %v1167_v2  ;;  %906 = vmatpush1.bf16.msra.mxu1 %v1168_v3  ;;  %v1173_v6 = vld [vmem:[%s1839_s2 + $0x20] ss:$16 sps:$4 sm:$0xff]   ;;  %v1174_v7 = vld [vmem:[%s1839_s2 + $0x28] ss:$16 sps:$4 sm:$0xff]   ;;  %v1175_v8 = vld [vmem:[%s1839_s2 + $0x44] ss:$16 sps:$4 sm:$0xff]  }
   0x4   :  { %821 = vmatprep.subr.bf16.mxu0 %v1169_v4  ;;  %907 = vmatprep.subr.bf16.mxu1 %v1171_v5  ;;  %v1177_v9 = vld [vmem:[%s1839_s2 + $0x4c] ss:$16 sps:$4 sm:$0xff]   ;;  %v1179_v10 = vld [vmem:[%s1839_s2 + $0x40] ss:$16 sps:$4 sm:$0xff]   ;;  %v1180_v11 = vld [vmem:[%s1839_s2 + $0x48] ss:$16 sps:$4 sm:$0xff]  }
   0x5   :  { %v1181_v12 = vld [vmem:[%s1839_s2 + $0x64] ss:$16 sps:$4 sm:$0xff]   ;;  %v1183_v13 = vld [vmem:[%s1839_s2 + $0x6c] ss:$16 sps:$4 sm:$0xff]   ;;  %v1185_v14 = vld [vmem:[%s1839_s2 + $0x60] ss:$16 sps:$4 sm:$0xff]  }
   0x6   :  { %v1186_v15 = vld [vmem:[%s1839_s2 + $0x68] ss:$16 sps:$4 sm:$0xff]   ;;  %v1187_v16 = vld [vmem:[%s1839_s2 + $0x84] ss:$16 sps:$4 sm:$0xff]   ;;  %v1189_v17 = vld [vmem:[%s1839_s2 + $0x8c] ss:$16 sps:$4 sm:$0xff]  }
   0x7   :  { %822 = vmatpush1.bf16.msra.mxu0 %v1173_v6  ;;  %908 = vmatpush1.bf16.msra.mxu1 %v1174_v7  ;;  %v1191_v18 = vld [vmem:[%s1839_s2 + $0x80] ss:$16 sps:$4 sm:$0xff]   ;;  %v1192_v19 = vld [vmem:[%s1839_s2 + $0x88] ss:$16 sps:$4 sm:$0xff]   ;;  %v1193_v20 = vld [vmem:[%s1839_s2 + $0xa4] ss:$16 sps:$4 sm:$0xff]  }
   0x8   :  { %823 = vmatprep.subr.bf16.mxu0 %v1175_v8  ;;  %909 = vmatprep.subr.bf16.mxu1 %v1177_v9  ;;  %v1195_v21 = vld [vmem:[%s1839_s2 + $0xac] ss:$16 sps:$4 sm:$0xff]   ;;  %v1197_v22 = vld [vmem:[%s1839_s2 + $0xa0] ss:$16 sps:$4 sm:$0xff]   ;;  %v1198_v23 = vld [vmem:[%s1839_s2 + $0xa8] ss:$16 sps:$4 sm:$0xff]  }
   0x9   :  { %v1199_v24 = vld [vmem:[%s1839_s2 + $0xc4] ss:$16 sps:$4 sm:$0xff]   ;;  %v1201_v25 = vld [vmem:[%s1839_s2 + $0xcc] ss:$16 sps:$4 sm:$0xff]   ;;  %v1203_v26 = vld [vmem:[%s1839_s2 + $0xc0] ss:$16 sps:$4 sm:$0xff]  }
   0xa   :  { %v1204_v27 = vld [vmem:[%s1839_s2 + $0xc8] ss:$16 sps:$4 sm:$0xff]   ;;  %v1205_v28 = vld [vmem:[%s1839_s2 + $0xe4] ss:$16 sps:$4 sm:$0xff]   ;;  %v1207_v29 = vld [vmem:[%s1839_s2 + $0xec] ss:$16 sps:$4 sm:$0xff]  }
   0xb   :  { %824 = vmatpush1.bf16.msra.mxu0 %v1179_v10  ;;  %910 = vmatpush1.bf16.msra.mxu1 %v1180_v11  ;;  %v1209_v30 = vld [vmem:[%s1839_s2 + $0xe0] ss:$16 sps:$4 sm:$0xff]   ;;  %v1210_v31 = vld [vmem:[%s1839_s2 + $0xe8] ss:$16 sps:$4 sm:$0xff]   ;;  %v1211_v32 = vld [vmem:[%s1839_s2 + $0x104] ss:$16 sps:$4 sm:$0xff]  }
   0xc   :  { %825 = vmatprep.subr.bf16.mxu0 %v1181_v12  ;;  %911 = vmatprep.subr.bf16.mxu1 %v1183_v13  ;;  %v1213_v33 = vld [vmem:[%s1839_s2 + $0x10c] ss:$16 sps:$4 sm:$0xff]   ;;  %v1215_v34 = vld [vmem:[%s1839_s2 + $0x100] ss:$16 sps:$4 sm:$0xff]   ;;  %v1216_v35 = vld [vmem:[%s1839_s2 + $0x108] ss:$16 sps:$4 sm:$0xff]  }
   0xd   :  { %v1217_v36 = vld [vmem:[%s1839_s2 + $0x124] ss:$16 sps:$4 sm:$0xff]   ;;  %v1219_v37 = vld [vmem:[%s1839_s2 + $0x12c] ss:$16 sps:$4 sm:$0xff]   ;;  %v1221_v38 = vld [vmem:[%s1839_s2 + $0x120] ss:$16 sps:$4 sm:$0xff]  }
   0xe   :  { %v1222_v39 = vld [vmem:[%s1839_s2 + $0x128] ss:$16 sps:$4 sm:$0xff]   ;;  %v1223_v40 = vld [vmem:[%s1839_s2 + $0x144] ss:$16 sps:$4 sm:$0xff]   ;;  %v1225_v41 = vld [vmem:[%s1839_s2 + $0x14c] ss:$16 sps:$4 sm:$0xff]  }
   0xf   :  { %826 = vmatpush1.bf16.msra.mxu0 %v1185_v14  ;;  %912 = vmatpush1.bf16.msra.mxu1 %v1186_v15  ;;  %v1227_v42 = vld [vmem:[%s1839_s2 + $0x140] ss:$16 sps:$4 sm:$0xff]   ;;  %v1228_v43 = vld [vmem:[%s1839_s2 + $0x148] ss:$16 sps:$4 sm:$0xff]   ;;  %v1229_v44 = vld [vmem:[%s1839_s2 + $0x164] ss:$16 sps:$4 sm:$0xff]  }
  0x10   :  { %827 = vmatprep.subr.bf16.mxu0 %v1187_v16  ;;  %913 = vmatprep.subr.bf16.mxu1 %v1189_v17  ;;  %v1231_v45 = vld [vmem:[%s1839_s2 + $0x16c] ss:$16 sps:$4 sm:$0xff]   ;;  %v1233_v48 = vld [vmem:[%s1839_s2 + $0x160] ss:$16 sps:$4 sm:$0xff]   ;;  %v1234_v49 = vld [vmem:[%s1839_s2 + $0x168] ss:$16 sps:$4 sm:$0xff]  }
  0x11   :  { %v18_v46 = vld [vmem:[%s1840_s0 + $0x8] sm:$0xff]  ;;  %v1235_v51 = vld [vmem:[%s1839_s2 + $0x184] ss:$16 sps:$4 sm:$0xff]   ;;  %v1239_v53 = vld [vmem:[%s1839_s2 + $0x180] ss:$16 sps:$4 sm:$0xff]  }
  0x12   :  { %v22_v47 = vld [vmem:[%s1840_s0 + $0x28] sm:$0xff]  ;;  %v1241_v55 = vld [vmem:[%s1839_s2 + $0x1a4] ss:$16 sps:$4 sm:$0xff]   ;;  %v1245_v57 = vld [vmem:[%s1839_s2 + $0x1a0] ss:$16 sps:$4 sm:$0xff]  }
  0x13   :  { %828 = vmatpush1.bf16.msra.mxu0 %v1191_v18  ;;  %914 = vmatpush1.bf16.msra.mxu1 %v1192_v19  ;;  %v154_v50 = vpack.c.bf16 %v22_v47, %v18_v46  ;;  %v1237_v52 = vld [vmem:[%s1839_s2 + $0x18c] ss:$16 sps:$4 sm:$0xff]   ;;  %v1240_v54 = vld [vmem:[%s1839_s2 + $0x188] ss:$16 sps:$4 sm:$0xff]   ;;  %v1247_v59 = vld [vmem:[%s1839_s2 + $0x1c4] ss:$16 sps:$4 sm:$0xff]  }
  0x14   :  { %829 = vmatprep.subr.bf16.mxu0 %v1193_v20  ;;  %915 = vmatprep.subr.bf16.mxu1 %v1195_v21  ;;  %v1243_v56 = vld [vmem:[%s1839_s2 + $0x1ac] ss:$16 sps:$4 sm:$0xff]   ;;  %v1246_v58 = vld [vmem:[%s1839_s2 + $0x1a8] ss:$16 sps:$4 sm:$0xff]   ;;  %v1251_v61 = vld [vmem:[%s1839_s2 + $0x1c0] ss:$16 sps:$4 sm:$0xff]  }
  0x15   :  { %851 = vmatprep.mubr.bf16.mxu0 %v154_v50  ;;  %937 = vmatprep.mubr.bf16.mxu1 %v154_v50  ;;  %v1249_v60 = vld [vmem:[%s1839_s2 + $0x1cc] ss:$16 sps:$4 sm:$0xff]   ;;  %v1252_v62 = vld [vmem:[%s1839_s2 + $0x1c8] ss:$16 sps:$4 sm:$0xff]   ;;  %v1253_v63 = vld [vmem:[%s1839_s2 + $0x1e4] ss:$16 sps:$4 sm:$0xff]  }
  0x16   :  { %v1255_v0 = vld [vmem:[%s1839_s2 + $0x1ec] ss:$16 sps:$4 sm:$0xff]   ;;  %v1257_v1 = vld [vmem:[%s1839_s2 + $0x1e0] ss:$16 sps:$4 sm:$0xff]   ;;  %v1258_v2 = vld [vmem:[%s1839_s2 + $0x1e8] ss:$16 sps:$4 sm:$0xff]  }
  0x17   :  { %830 = vmatpush1.bf16.msra.mxu0 %v1197_v22  ;;  %916 = vmatpush1.bf16.msra.mxu1 %v1198_v23  ;;  %v1261_v3 = vld [vmem:[%s1839_s2 + $0x204] ss:$16 sps:$4 sm:$0xff]   ;;  %v1264_v6 = vld [vmem:[%s1839_s2 + $0x20c] ss:$16 sps:$4 sm:$0xff]   ;;  %v1259_v7 = vld [vmem:[%s1839_s2 + $0x200] ss:$16 sps:$4 sm:$0xff]  }
  0x18   :  { %831 = vmatprep.subr.bf16.mxu0 %v1199_v24  ;;  %917 = vmatprep.subr.bf16.mxu1 %v1201_v25  ;;  %v17_v4 = vld [vmem:[%s1840_s0] sm:$0xff]  ;;  %v1262_v8 = vld [vmem:[%s1839_s2 + $0x208] ss:$16 sps:$4 sm:$0xff]   ;;  %v1270_v11 = vld [vmem:[%s1839_s2 + $0x22c] ss:$16 sps:$4 sm:$0xff]  }
  0x19   :  { %v21_v5 = vld [vmem:[%s1840_s0 + $0x20] sm:$0xff]  ;;  %v1268_v13 = vld [vmem:[%s1839_s2 + $0x228] ss:$16 sps:$4 sm:$0xff]   ;;  %v1276_v15 = vld [vmem:[%s1839_s2 + $0x24c] ss:$16 sps:$4 sm:$0xff]  }
  0x1a   :  { %v153_v9 = vpack.c.bf16 %v21_v5, %v17_v4  ;;  %v1267_v10 = vld [vmem:[%s1839_s2 + $0x224] ss:$16 sps:$4 sm:$0xff]   ;;  %v1265_v12 = vld [vmem:[%s1839_s2 + $0x220] ss:$16 sps:$4 sm:$0xff]   ;;  %v1274_v17 = vld [vmem:[%s1839_s2 + $0x248] ss:$16 sps:$4 sm:$0xff]  }
  0x1b   :  { %832 = vmatpush1.bf16.msra.mxu0 %v1203_v26  ;;  %918 = vmatpush1.bf16.msra.mxu1 %v1204_v27  ;;  %v1273_v14 = vld [vmem:[%s1839_s2 + $0x244] ss:$16 sps:$4 sm:$0xff]   ;;  %v1271_v16 = vld [vmem:[%s1839_s2 + $0x240] ss:$16 sps:$4 sm:$0xff]   ;;  %v1282_v19 = vld [vmem:[%s1839_s2 + $0x26c] ss:$16 sps:$4 sm:$0xff]  }
  0x1c   :  { %833 = vmatprep.subr.bf16.mxu0 %v1205_v28  ;;  %919 = vmatprep.subr.bf16.mxu1 %v1207_v29  ;;  %v1279_v18 = vld [vmem:[%s1839_s2 + $0x264] ss:$16 sps:$4 sm:$0xff]   ;;  %v1277_v20 = vld [vmem:[%s1839_s2 + $0x260] ss:$16 sps:$4 sm:$0xff]   ;;  %v1280_v21 = vld [vmem:[%s1839_s2 + $0x268] ss:$16 sps:$4 sm:$0xff]  }
  0x1d   :  { %v1285_v22 = vld [vmem:[%s1839_s2 + $0x284] ss:$16 sps:$4 sm:$0xff]   ;;  %v1288_v23 = vld [vmem:[%s1839_s2 + $0x28c] ss:$16 sps:$4 sm:$0xff]   ;;  %v1283_v24 = vld [vmem:[%s1839_s2 + $0x280] ss:$16 sps:$4 sm:$0xff]  }
  0x1e   :  { %v1286_v25 = vld [vmem:[%s1839_s2 + $0x288] ss:$16 sps:$4 sm:$0xff]   ;;  %v1291_v26 = vld [vmem:[%s1839_s2 + $0x2a4] ss:$16 sps:$4 sm:$0xff]   ;;  %v1294_v27 = vld [vmem:[%s1839_s2 + $0x2ac] ss:$16 sps:$4 sm:$0xff]  }
  0x1f   :  { %834 = vmatpush1.bf16.msra.mxu0 %v1209_v30  ;;  %920 = vmatpush1.bf16.msra.mxu1 %v1210_v31  ;;  %v1289_v28 = vld [vmem:[%s1839_s2 + $0x2a0] ss:$16 sps:$4 sm:$0xff]   ;;  %v1292_v29 = vld [vmem:[%s1839_s2 + $0x2a8] ss:$16 sps:$4 sm:$0xff]   ;;  %v1297_v30 = vld [vmem:[%s1839_s2 + $0x2c4] ss:$16 sps:$4 sm:$0xff]  }
  0x20   :  { %835 = vmatprep.subr.bf16.mxu0 %v1211_v32  ;;  %921 = vmatprep.subr.bf16.mxu1 %v1213_v33  ;;  %v1300_v31 = vld [vmem:[%s1839_s2 + $0x2cc] ss:$16 sps:$4 sm:$0xff]   ;;  %v1313_v47 = vld [vmem:[%s1839_s2 + $0x320] ss:$16 sps:$4 sm:$0xff]   ;;  %v1346_v4 = vld [vmem:[%s1839_s2 + $0x3c8] ss:$16 sps:$4 sm:$0xff]  }
  0x21   :  { %v20_v32 = vld [vmem:[%s1840_s0 + $0x18] sm:$0xff]  ;;  %v1351_v5 = vld [vmem:[%s1839_s2 + $0x3e4] ss:$16 sps:$4 sm:$0xff]  }
  0x22   :  { %v24_v33 = vld [vmem:[%s1840_s0 + $0x38] sm:$0xff] }
  0x23   :  { %836 = vmatpush1.bf16.msra.mxu0 %v1215_v34  ;;  %922 = vmatpush1.bf16.msra.mxu1 %v1216_v35  ;;  %v1295_v34 = vld [vmem:[%s1839_s2 + $0x2c0] ss:$16 sps:$4 sm:$0xff]   ;;  %v1298_v35 = vld [vmem:[%s1839_s2 + $0x2c8] ss:$16 sps:$4 sm:$0xff]   ;;  %v1318_v46 = vld [vmem:[%s1839_s2 + $0x32c] ss:$16 sps:$4 sm:$0xff]  }
  0x24   :  { %837 = vmatprep.subr.bf16.mxu0 %v1217_v36  ;;  %923 = vmatprep.subr.bf16.mxu1 %v1219_v37  ;;  %v156_v36 = vpack.c.bf16 %v24_v33, %v20_v32  ;;  %v1303_v37 = vld [vmem:[%s1839_s2 + $0x2e4] ss:$16 sps:$4 sm:$0xff]   ;;  %v1324_v50 = vld [vmem:[%s1839_s2 + $0x34c] ss:$16 sps:$4 sm:$0xff]  }
  0x25   :  { %v994_v32 = vld [vmem:[%s1842_s1 + $0x18] sm:$0xff] }
  0x27   :  { %838 = vmatpush1.bf16.msra.mxu0 %v1221_v38  ;;  %924 = vmatpush1.bf16.msra.mxu1 %v1222_v39  ;;  %v1306_v38 = vld [vmem:[%s1839_s2 + $0x2ec] ss:$16 sps:$4 sm:$0xff]   ;;  %v1301_v39 = vld [vmem:[%s1839_s2 + $0x2e0] ss:$16 sps:$4 sm:$0xff]  }
  0x28   :  { %839 = vmatprep.subr.bf16.mxu0 %v1223_v40  ;;  %925 = vmatprep.subr.bf16.mxu1 %v1225_v41  ;;  %v1304_v40 = vld [vmem:[%s1839_s2 + $0x2e8] ss:$16 sps:$4 sm:$0xff]   ;;  %v1309_v41 = vld [vmem:[%s1839_s2 + $0x304] ss:$16 sps:$4 sm:$0xff]  }
  0x2b   :  { %840 = vmatpush1.bf16.msra.mxu0 %v1227_v42  ;;  %926 = vmatpush1.bf16.msra.mxu1 %v1228_v43  ;;  %v1312_v42 = vld [vmem:[%s1839_s2 + $0x30c] ss:$16 sps:$4 sm:$0xff]   ;;  %v1307_v43 = vld [vmem:[%s1839_s2 + $0x300] ss:$16 sps:$4 sm:$0xff]  }
  0x2c   :  { %841 = vmatprep.subr.bf16.mxu0 %v1229_v44  ;;  %927 = vmatprep.subr.bf16.mxu1 %v1231_v45  ;;  %v1310_v44 = vld [vmem:[%s1839_s2 + $0x308] ss:$16 sps:$4 sm:$0xff]   ;;  %v1315_v45 = vld [vmem:[%s1839_s2 + $0x324] ss:$16 sps:$4 sm:$0xff]  }
  0x2f   :  { %842 = vmatpush1.bf16.msra.mxu0 %v1233_v48  ;;  %928 = vmatpush1.bf16.msra.mxu1 %v1234_v49  ;;  %v1316_v48 = vld [vmem:[%s1839_s2 + $0x328] ss:$16 sps:$4 sm:$0xff]   ;;  %v1321_v49 = vld [vmem:[%s1839_s2 + $0x344] ss:$16 sps:$4 sm:$0xff]  }
  0x30   :  { %843 = vmatprep.subr.bf16.mxu0 %v1235_v51  ;;  %929 = vmatprep.subr.bf16.mxu1 %v1237_v52  ;;  %v1319_v51 = vld [vmem:[%s1839_s2 + $0x340] ss:$16 sps:$4 sm:$0xff]   ;;  %v1322_v52 = vld [vmem:[%s1839_s2 + $0x348] ss:$16 sps:$4 sm:$0xff]  }
  0x33   :  { %844 = vmatpush1.bf16.msra.mxu0 %v1239_v53  ;;  %930 = vmatpush1.bf16.msra.mxu1 %v1240_v54  ;;  %v1327_v53 = vld [vmem:[%s1839_s2 + $0x364] ss:$16 sps:$4 sm:$0xff]   ;;  %v1330_v54 = vld [vmem:[%s1839_s2 + $0x36c] ss:$16 sps:$4 sm:$0xff]  }
  0x34   :  { %845 = vmatprep.subr.bf16.mxu0 %v1241_v55  ;;  %931 = vmatprep.subr.bf16.mxu1 %v1243_v56  ;;  %v1325_v55 = vld [vmem:[%s1839_s2 + $0x360] ss:$16 sps:$4 sm:$0xff]   ;;  %v1328_v56 = vld [vmem:[%s1839_s2 + $0x368] ss:$16 sps:$4 sm:$0xff]  }
  0x37   :  { %846 = vmatpush1.bf16.msra.mxu0 %v1245_v57  ;;  %932 = vmatpush1.bf16.msra.mxu1 %v1246_v58  ;;  %v1333_v57 = vld [vmem:[%s1839_s2 + $0x384] ss:$16 sps:$4 sm:$0xff]   ;;  %v1336_v58 = vld [vmem:[%s1839_s2 + $0x38c] ss:$16 sps:$4 sm:$0xff]  }
  0x38   :  { %847 = vmatprep.subr.bf16.mxu0 %v1247_v59  ;;  %933 = vmatprep.subr.bf16.mxu1 %v1249_v60  ;;  %v1331_v59 = vld [vmem:[%s1839_s2 + $0x380] ss:$16 sps:$4 sm:$0xff]   ;;  %v1334_v60 = vld [vmem:[%s1839_s2 + $0x388] ss:$16 sps:$4 sm:$0xff]  }
  0x3b   :  { %848 = vmatpush1.bf16.msra.mxu0 %v1251_v61  ;;  %934 = vmatpush1.bf16.msra.mxu1 %v1252_v62  ;;  %v1339_v61 = vld [vmem:[%s1839_s2 + $0x3a4] ss:$16 sps:$4 sm:$0xff]   ;;  %v1342_v62 = vld [vmem:[%s1839_s2 + $0x3ac] ss:$16 sps:$4 sm:$0xff]  }
  0x3c   :  { %849 = vmatprep.subr.bf16.mxu0 %v1253_v63  ;;  %935 = vmatprep.subr.bf16.mxu1 %v1255_v0  ;;  %v1337_v63 = vld [vmem:[%s1839_s2 + $0x3a0] ss:$16 sps:$4 sm:$0xff]   ;;  %v1340_v0 = vld [vmem:[%s1839_s2 + $0x3a8] ss:$16 sps:$4 sm:$0xff]  }
  0x3f   :  { %850 = vmatpush1.bf16.msra.mxu0 %v1257_v1  ;;  %936 = vmatpush1.bf16.msra.mxu1 %v1258_v2  ;;  %v1345_v1 = vld [vmem:[%s1839_s2 + $0x3c4] ss:$16 sps:$4 sm:$0xff]   ;;  %v1348_v2 = vld [vmem:[%s1839_s2 + $0x3cc] ss:$16 sps:$4 sm:$0xff]  }
  0x40   :  { %862 = vmatprep.subr.bf16.mxu0 %v1261_v3  ;;  %948 = vmatprep.subr.bf16.mxu1 %v1264_v6  ;;  %v1343_v3 = vld [vmem:[%s1839_s2 + $0x3c0] ss:$16 sps:$4 sm:$0xff]   ;;  %v1354_v6 = vld [vmem:[%s1839_s2 + $0x3ec] ss:$16 sps:$4 sm:$0xff]  }
  0x42   :  { %852 = vmatmul.mubr.bf16.vlgmr.msra.gmra.mrb[0].mxu0 %v153_v9  ;;  %938 = vmatmul.mubr.bf16.vlgmr.msra.gmra.mrb[0].mxu1 %v153_v9  ;;  %v19_v9 = vld [vmem:[%s1840_s0 + $0x10] sm:$0xff] }
  0x43   :  { %863 = vmatpush1.bf16.msra.mxu0 %v1259_v7  ;;  %949 = vmatpush1.bf16.msra.mxu1 %v1262_v8  ;;  %v1349_v7 = vld [vmem:[%s1839_s2 + $0x3e0] ss:$16 sps:$4 sm:$0xff]   ;;  %v1352_v8 = vld [vmem:[%s1839_s2 + $0x3e8] ss:$16 sps:$4 sm:$0xff]  }
  0x44   :  { %864 = vmatprep.subr.bf16.mxu0 %v1267_v10  ;;  %950 = vmatprep.subr.bf16.mxu1 %v1270_v11  ;;  %v23_v10 = vld [vmem:[%s1840_s0 + $0x30] sm:$0xff] }
  0x45   :  { %894 = vmatprep.mubr.bf16.mxu0 %v156_v36  ;;  %980 = vmatprep.mubr.bf16.mxu1 %v156_v36  ;;  %v155_v11 = vpack.c.bf16 %v23_v10, %v19_v9  ;;  %v995_v36 = vld [vmem:[%s1842_s1 + $0x20] sm:$0xff] }
  0x47   :  { %865 = vmatpush1.bf16.msra.mxu0 %v1265_v12  ;;  %951 = vmatpush1.bf16.msra.mxu1 %v1268_v13  ;;  %v159_v12 = vlaneseq }
  0x48   :  { %866 = vmatprep.subr.bf16.mxu0 %v1273_v14  ;;  %952 = vmatprep.subr.bf16.mxu1 %v1276_v15 }
  0x49   :  { %v160_v13 = vshrl.u32 %v159_v12, 7 }
  0x4b   :  { %867 = vmatpush1.bf16.msra.mxu0 %v1271_v16  ;;  %953 = vmatpush1.bf16.msra.mxu1 %v1274_v17  ;;  %v161_v14 = vsub.s32 0, %v160_v13  ;;  %v169_v15 = vsub.s32 2, %v160_v13  ;;  %v157_v16 = vld [vmem:[%s1841_s3] sm:$0xf]  ;;  %v165_v17 = vsub.s32 1, %v160_v13 }
  0x4c   :  { %868 = vmatprep.subr.bf16.mxu0 %v1279_v18  ;;  %954 = vmatprep.subr.bf16.mxu1 %v1282_v19  ;;  %v173_v18 = vsub.s32 3, %v160_v13 }
  0x4d   :  { %v162_v19 = vrot.slane %v157_v16, %v161_v14 }
  0x4f   :  { %869 = vmatpush1.bf16.msra.mxu0 %v1277_v20  ;;  %955 = vmatpush1.bf16.msra.mxu1 %v1280_v21  ;;  %v170_v20 = vrot.slane %v157_v16, %v169_v15  ;;  %v166_v21 = vrot.slane %v157_v16, %v165_v17 }
  0x50   :  { %870 = vmatprep.subr.bf16.mxu0 %v1285_v22  ;;  %956 = vmatprep.subr.bf16.mxu1 %v1288_v23  ;;  %v174_v22 = vrot.slane %v157_v16, %v173_v18 }
  0x53   :  { %871 = vmatpush1.bf16.msra.mxu0 %v1283_v24  ;;  %957 = vmatpush1.bf16.msra.mxu1 %v1286_v25  ;;  %v991_v24 = vld [vmem:[%s1842_s1] sm:$0xff] }
  0x54   :  { %872 = vmatprep.subr.bf16.mxu0 %v1291_v26  ;;  %958 = vmatprep.subr.bf16.mxu1 %v1294_v27  ;;  %v993_v26 = vld [vmem:[%s1842_s1 + $0x10] sm:$0xff] }
  0x57   :  { %873 = vmatpush1.bf16.msra.mxu0 %v1289_v28  ;;  %959 = vmatpush1.bf16.msra.mxu1 %v1292_v29 }
  0x58   :  { %874 = vmatprep.subr.bf16.mxu0 %v1297_v30  ;;  %960 = vmatprep.subr.bf16.mxu1 %v1300_v31  ;;  %v992_v30 = vld [vmem:[%s1842_s1 + $0x8] sm:$0xff] }
  0x5b   :  { %875 = vmatpush1.bf16.msra.mxu0 %v1295_v34  ;;  %961 = vmatpush1.bf16.msra.mxu1 %v1298_v35 }
  0x5c   :  { %876 = vmatprep.subr.bf16.mxu0 %v1303_v37  ;;  %962 = vmatprep.subr.bf16.mxu1 %v1306_v38  ;;  %v997_v38 = vld [vmem:[%s1842_s1 + $0x30] sm:$0xff] }
  0x5f   :  { %877 = vmatpush1.bf16.msra.mxu0 %v1301_v39  ;;  %963 = vmatpush1.bf16.msra.mxu1 %v1304_v40 }
  0x60   :  { %878 = vmatprep.subr.bf16.mxu0 %v1309_v41  ;;  %964 = vmatprep.subr.bf16.mxu1 %v1312_v42 }
  0x63   :  { %879 = vmatpush1.bf16.msra.mxu0 %v1307_v43  ;;  %965 = vmatpush1.bf16.msra.mxu1 %v1310_v44  ;;  %v996_v44 = vld [vmem:[%s1842_s1 + $0x28] sm:$0xff] }
  0x64   :  { %880 = vmatprep.subr.bf16.mxu0 %v1315_v45  ;;  %966 = vmatprep.subr.bf16.mxu1 %v1318_v46  ;;  %v998_v46 = vld [vmem:[%s1842_s1 + $0x38] sm:$0xff] }
  0x67   :  { %881 = vmatpush1.bf16.msra.mxu0 %v1313_v47  ;;  %967 = vmatpush1.bf16.msra.mxu1 %v1316_v48 }
  0x68   :  { %882 = vmatprep.subr.bf16.mxu0 %v1321_v49  ;;  %968 = vmatprep.subr.bf16.mxu1 %v1324_v50 }
  0x6b   :  { %883 = vmatpush1.bf16.msra.mxu0 %v1319_v51  ;;  %969 = vmatpush1.bf16.msra.mxu1 %v1322_v52 }
  0x6c   :  { %884 = vmatprep.subr.bf16.mxu0 %v1327_v53  ;;  %970 = vmatprep.subr.bf16.mxu1 %v1330_v54 }
  0x6f   :  { %885 = vmatpush1.bf16.msra.mxu0 %v1325_v55  ;;  %971 = vmatpush1.bf16.msra.mxu1 %v1328_v56 }
  0x70   :  { %886 = vmatprep.subr.bf16.mxu0 %v1333_v57  ;;  %972 = vmatprep.subr.bf16.mxu1 %v1336_v58 }
  0x73   :  { %887 = vmatpush1.bf16.msra.mxu0 %v1331_v59  ;;  %973 = vmatpush1.bf16.msra.mxu1 %v1334_v60 }
  0x74   :  { %888 = vmatprep.subr.bf16.mxu0 %v1339_v61  ;;  %974 = vmatprep.subr.bf16.mxu1 %v1342_v62 }
  0x77   :  { %889 = vmatpush1.bf16.msra.mxu0 %v1337_v63  ;;  %975 = vmatpush1.bf16.msra.mxu1 %v1340_v0 }
  0x78   :  { %890 = vmatprep.subr.bf16.mxu0 %v1345_v1  ;;  %976 = vmatprep.subr.bf16.mxu1 %v1348_v2 }
  0x7b   :  { %891 = vmatpush1.bf16.msra.mxu0 %v1343_v3  ;;  %977 = vmatpush1.bf16.msra.mxu1 %v1346_v4 }
  0x7c   :  { %892 = vmatprep.subr.bf16.mxu0 %v1351_v5  ;;  %978 = vmatprep.subr.bf16.mxu1 %v1354_v6 }
  0x7f   :  { %893 = vmatpush1.bf16.msra.mxu0 %v1349_v7  ;;  %979 = vmatpush1.bf16.msra.mxu1 %v1352_v8 }
  0x82   :  { %895 = vmatmul.mubr.bf16.vlgmr.msra.gmra.mrb[0].mxu0 %v155_v11  ;;  %981 = vmatmul.mubr.bf16.vlgmr.msra.gmra.mrb[0].mxu1 %v155_v11 }
 0x155   :  { %v896_v23 = vpop.f32.mrb[0].mxu0  ;;  %v982_v25 = vpop.f32.mrb[0].mxu1 }
 0x156   :  { %v1147_v27 = vadd.f32 %v896_v23, %v162_v19  ;;  %v1151_v28 = vadd.f32 %v982_v25, %v170_v20  ;;  %v898_v29 = vpop.f32.mrb[1].mxu0  ;;  %v984_v31 = vpop.f32.mrb[1].mxu1 }
 0x157   :  { %v1148_v33 = vadd.f32 %v898_v29, %v166_v21  ;;  %v1152_v34 = vadd.f32 %v984_v31, %v174_v22  ;;  %v900_v35 = vpop.f32.mrb[2].mxu0  ;;  %v986_v37 = vpop.f32.mrb[2].mxu1 }
 0x158   :  { %v999_v39 = vadd.f32 %v1147_v27, %v991_v24  ;;  %v1001_v40 = vadd.f32 %v1151_v28, %v993_v26  ;;  %v1149_v41 = vadd.f32 %v900_v35, %v162_v19  ;;  %v1153_v42 = vadd.f32 %v986_v37, %v170_v20  ;;  %v902_v43 = vpop.f32.mrb[3].mxu0  ;;  %v988_v45 = vpop.f32.mrb[3].mxu1 }
 0x159   :  { %v1000_v47 = vadd.f32 %v1148_v33, %v992_v30  ;;  %v1002_v48 = vadd.f32 %v1152_v34, %v994_v32  ;;  %v1150_v49 = vadd.f32 %v902_v43, %v166_v21  ;;  %v1154_v50 = vadd.f32 %v988_v45, %v174_v22 }
 0x15a   :  { %1007 = vst [vmem:[%s1843_s4] sm:$0xff] %v999_v39  ;;  %1009 = vst [vmem:[%s1843_s4 + $0x10] sm:$0xff] %v1001_v40  ;;  %v1003_v51 = vadd.f32 %v1149_v41, %v995_v36  ;;  %v1005_v52 = vadd.f32 %v1153_v42, %v997_v38 }
 0x15b   :  { %1008 = vst [vmem:[%s1843_s4 + $0x8] sm:$0xff] %v1000_v47  ;;  %1010 = vst [vmem:[%s1843_s4 + $0x18] sm:$0xff] %v1002_v48  ;;  %v1004_v53 = vadd.f32 %v1150_v49, %v996_v44  ;;  %v1006_v54 = vadd.f32 %v1154_v50, %v998_v46 }
 0x15c   :  { %1011 = vst [vmem:[%s1843_s4 + $0x20] sm:$0xff] %v1003_v51  ;;  %1013 = vst [vmem:[%s1843_s4 + $0x30] sm:$0xff] %v1005_v52 }
 0x15d   :  { %1012 = vst [vmem:[%s1843_s4 + $0x28] sm:$0xff] %v1004_v53  ;;  %1014 = vst [vmem:[%s1843_s4 + $0x38] sm:$0xff] %v1006_v54 }

// kernel: transformer_forward.25
= control target key start
LH: loop header
LB: loop body
LE: loop exit
PB: predicated region body
PF: predicated region fallthrough
CT: control target
= control target key end

     0   :  { %s5507_s0 = inlined_call_operand.vmem [shape: f32[16,512], index: 0, kind: input, shape index: {}]   ;;  %s5508_s3 = inlined_call_operand.vmem [shape: bf16[512,1536], index: 3, kind: input, shape index: {}]   ;;  %s5509_s1 = inlined_call_operand.vmem [shape: f32[1,512], index: 1, kind: input, shape index: {}]   ;;  %s5510_s2 = inlined_call_operand.vmem [shape: f32[1,512], index: 2, kind: input, shape index: {}]   ;;  %s5511_s4 = inlined_call_operand.vmem [shape: f32[1,1536], index: 4, kind: input, shape index: {}]   ;;  %s5512_s5 = inlined_call_operand.vmem [shape: f32[16,1536], index: 5, kind: output, shape index: {}]  }
   0x1   :  { %v4102_v0 = vld [vmem:[%s5507_s0] sm:$0xff]  ;;  %v4107_v1 = vld [vmem:[%s5507_s0 + $0x8] sm:$0xff]  ;;  %v4112_v2 = vld [vmem:[%s5507_s0 + $0x10] sm:$0xff] }
   0x2   :  { %v30_v3 = vadd.f32 %v4107_v1, %v4102_v0  ;;  %v4119_v4 = vld [vmem:[%s5507_s0 + $0x20] sm:$0xff]  ;;  %v4124_v5 = vld [vmem:[%s5507_s0 + $0x28] sm:$0xff]  ;;  %v4129_v6 = vld [vmem:[%s5507_s0 + $0x18] sm:$0xff] }
   0x3   :  { %v4134_v7 = vld [vmem:[%s5507_s0 + $0x30] sm:$0xff]  ;;  %v35_v8 = vadd.f32 %v4124_v5, %v4119_v4  ;;  %v4142_v10 = vld [vmem:[%s5507_s0 + $0x38] sm:$0xff] }
   0x4   :  { %v31_v9 = vadd.f32 %v30_v3, %v4112_v2  ;;  %v3489_v14 = vld [vmem:[%s5508_s3 + $0x4] ss:$48 sps:$4 sm:$0xff]   ;;  %v3491_v15 = vld [vmem:[%s5508_s3 + $0xc] ss:$48 sps:$4 sm:$0xff]   ;;  %v3493_v16 = vld [vmem:[%s5508_s3] ss:$48 sps:$4 sm:$0xff]  }
   0x5   :  { %v36_v11 = vadd.f32 %v35_v8, %v4134_v7  ;;  %2513 = vmatprep.subr.bf16.mxu0 %v3489_v14  ;;  %v3494_v17 = vld [vmem:[%s5508_s3 + $0x8] ss:$48 sps:$4 sm:$0xff]   ;;  %2599 = vmatprep.subr.bf16.mxu1 %v3491_v15  ;;  %v3495_v18 = vld [vmem:[%s5508_s3 + $0x64] ss:$48 sps:$4 sm:$0xff]   ;;  %v3497_v19 = vld [vmem:[%s5508_s3 + $0x6c] ss:$48 sps:$4 sm:$0xff]  }
   0x6   :  { %v32_v12 = vadd.f32 %v31_v9, %v4129_v6  ;;  %2514 = vmatpush1.bf16.msra.mxu0 %v3493_v16  ;;  %2600 = vmatpush1.bf16.msra.mxu1 %v3494_v17  ;;  %v3499_v20 = vld [vmem:[%s5508_s3 + $0x60] ss:$48 sps:$4 sm:$0xff]   ;;  %v3500_v21 = vld [vmem:[%s5508_s3 + $0x68] ss:$48 sps:$4 sm:$0xff]   ;;  %v3501_v22 = vld [vmem:[%s5508_s3 + $0xc4] ss:$48 sps:$4 sm:$0xff]  }
   0x7   :  { %v37_v13 = vadd.f32 %v36_v11, %v4142_v10  ;;  %2515 = vmatprep.subr.bf16.mxu0 %v3495_v18  ;;  %2601 = vmatprep.subr.bf16.mxu1 %v3497_v19  ;;  %v3503_v23 = vld [vmem:[%s5508_s3 + $0xcc] ss:$48 sps:$4 sm:$0xff]   ;;  %v3505_v24 = vld [vmem:[%s5508_s3 + $0xc0] ss:$48 sps:$4 sm:$0xff]   ;;  %v3506_v25 = vld [vmem:[%s5508_s3 + $0xc8] ss:$48 sps:$4 sm:$0xff]  }
   0x8   :  { %33 = vadd.xlane.f32.xlu0 %v32_v12  ;;  %v3507_v26 = vld [vmem:[%s5508_s3 + $0x124] ss:$48 sps:$4 sm:$0xff]   ;;  %v3509_v27 = vld [vmem:[%s5508_s3 + $0x12c] ss:$48 sps:$4 sm:$0xff]   ;;  %v3511_v28 = vld [vmem:[%s5508_s3 + $0x120] ss:$48 sps:$4 sm:$0xff]  }
   0x9   :  { %v3512_v29 = vld [vmem:[%s5508_s3 + $0x128] ss:$48 sps:$4 sm:$0xff]   ;;  %v3513_v30 = vld [vmem:[%s5508_s3 + $0x184] ss:$48 sps:$4 sm:$0xff]   ;;  %v3515_v31 = vld [vmem:[%s5508_s3 + $0x18c] ss:$48 sps:$4 sm:$0xff]  }
   0xa   :  { %2516 = vmatpush1.bf16.msra.mxu0 %v3499_v20  ;;  %2602 = vmatpush1.bf16.msra.mxu1 %v3500_v21  ;;  %v3517_v32 = vld [vmem:[%s5508_s3 + $0x180] ss:$48 sps:$4 sm:$0xff]   ;;  %v3518_v33 = vld [vmem:[%s5508_s3 + $0x188] ss:$48 sps:$4 sm:$0xff]   ;;  %v3519_v34 = vld [vmem:[%s5508_s3 + $0x1e4] ss:$48 sps:$4 sm:$0xff]  }
   0xb   :  { %2517 = vmatprep.subr.bf16.mxu0 %v3501_v22  ;;  %2603 = vmatprep.subr.bf16.mxu1 %v3503_v23  ;;  %v3521_v35 = vld [vmem:[%s5508_s3 + $0x1ec] ss:$48 sps:$4 sm:$0xff]   ;;  %v3523_v36 = vld [vmem:[%s5508_s3 + $0x1e0] ss:$48 sps:$4 sm:$0xff]   ;;  %v3524_v37 = vld [vmem:[%s5508_s3 + $0x1e8] ss:$48 sps:$4 sm:$0xff]  }
   0xc   :  { %38 = vadd.xlane.f32.xlu0 %v37_v13  ;;  %v3525_v38 = vld [vmem:[%s5508_s3 + $0x244] ss:$48 sps:$4 sm:$0xff]   ;;  %v3527_v39 = vld [vmem:[%s5508_s3 + $0x24c] ss:$48 sps:$4 sm:$0xff]   ;;  %v3529_v40 = vld [vmem:[%s5508_s3 + $0x240] ss:$48 sps:$4 sm:$0xff]  }
   0xd   :  { %v3530_v41 = vld [vmem:[%s5508_s3 + $0x248] ss:$48 sps:$4 sm:$0xff]   ;;  %v3531_v42 = vld [vmem:[%s5508_s3 + $0x2a4] ss:$48 sps:$4 sm:$0xff]   ;;  %v3533_v43 = vld [vmem:[%s5508_s3 + $0x2ac] ss:$48 sps:$4 sm:$0xff]  }
   0xe   :  { %2518 = vmatpush1.bf16.msra.mxu0 %v3505_v24  ;;  %2604 = vmatpush1.bf16.msra.mxu1 %v3506_v25  ;;  %v3535_v44 = vld [vmem:[%s5508_s3 + $0x2a0] ss:$48 sps:$4 sm:$0xff]   ;;  %v3536_v45 = vld [vmem:[%s5508_s3 + $0x2a8] ss:$48 sps:$4 sm:$0xff]   ;;  %v3537_v46 = vld [vmem:[%s5508_s3 + $0x304] ss:$48 sps:$4 sm:$0xff]  }
   0xf   :  { %2519 = vmatprep.subr.bf16.mxu0 %v3507_v26  ;;  %2605 = vmatprep.subr.bf16.mxu1 %v3509_v27  ;;  %v3539_v47 = vld [vmem:[%s5508_s3 + $0x30c] ss:$48 sps:$4 sm:$0xff]   ;;  %v3541_v48 = vld [vmem:[%s5508_s3 + $0x300] ss:$48 sps:$4 sm:$0xff]   ;;  %v3542_v49 = vld [vmem:[%s5508_s3 + $0x308] ss:$48 sps:$4 sm:$0xff]  }
  0x10   :  { %v3543_v50 = vld [vmem:[%s5508_s3 + $0x364] ss:$48 sps:$4 sm:$0xff]   ;;  %v3545_v51 = vld [vmem:[%s5508_s3 + $0x36c] ss:$48 sps:$4 sm:$0xff]   ;;  %v3548_v15 = vld [vmem:[%s5508_s3 + $0x368] ss:$48 sps:$4 sm:$0xff]  }
  0x11   :  { %v3549_v16 = vld [vmem:[%s5508_s3 + $0x3c4] ss:$48 sps:$4 sm:$0xff]   ;;  %v3551_v17 = vld [vmem:[%s5508_s3 + $0x3cc] ss:$48 sps:$4 sm:$0xff]   ;;  %v3553_v18 = vld [vmem:[%s5508_s3 + $0x3c0] ss:$48 sps:$4 sm:$0xff]  }
  0x12   :  { %2520 = vmatpush1.bf16.msra.mxu0 %v3511_v28  ;;  %2606 = vmatpush1.bf16.msra.mxu1 %v3512_v29  ;;  %v3554_v19 = vld [vmem:[%s5508_s3 + $0x3c8] ss:$48 sps:$4 sm:$0xff]   ;;  %v3555_v20 = vld [vmem:[%s5508_s3 + $0x424] ss:$48 sps:$4 sm:$0xff]   ;;  %v3557_v21 = vld [vmem:[%s5508_s3 + $0x42c] ss:$48 sps:$4 sm:$0xff]  }
  0x13   :  { %2521 = vmatprep.subr.bf16.mxu0 %v3513_v30  ;;  %2607 = vmatprep.subr.bf16.mxu1 %v3515_v31  ;;  %v3559_v22 = vld [vmem:[%s5508_s3 + $0x420] ss:$48 sps:$4 sm:$0xff]   ;;  %v3560_v23 = vld [vmem:[%s5508_s3 + $0x428] ss:$48 sps:$4 sm:$0xff]   ;;  %v3561_v24 = vld [vmem:[%s5508_s3 + $0x484] ss:$48 sps:$4 sm:$0xff]  }
  0x14   :  { %v3563_v25 = vld [vmem:[%s5508_s3 + $0x48c] ss:$48 sps:$4 sm:$0xff]   ;;  %v3565_v26 = vld [vmem:[%s5508_s3 + $0x480] ss:$48 sps:$4 sm:$0xff]   ;;  %v3566_v27 = vld [vmem:[%s5508_s3 + $0x488] ss:$48 sps:$4 sm:$0xff]  }
  0x15   :  { %v3567_v28 = vld [vmem:[%s5508_s3 + $0x4e4] ss:$48 sps:$4 sm:$0xff]   ;;  %v3569_v29 = vld [vmem:[%s5508_s3 + $0x4ec] ss:$48 sps:$4 sm:$0xff]   ;;  %v3571_v30 = vld [vmem:[%s5508_s3 + $0x4e0] ss:$48 sps:$4 sm:$0xff]  }
  0x16   :  { %2522 = vmatpush1.bf16.msra.mxu0 %v3517_v32  ;;  %2608 = vmatpush1.bf16.msra.mxu1 %v3518_v33  ;;  %v3572_v31 = vld [vmem:[%s5508_s3 + $0x4e8] ss:$48 sps:$4 sm:$0xff]   ;;  %v3573_v32 = vld [vmem:[%s5508_s3 + $0x544] ss:$48 sps:$4 sm:$0xff]   ;;  %v3575_v33 = vld [vmem:[%s5508_s3 + $0x54c] ss:$48 sps:$4 sm:$0xff]  }
  0x17   :  { %2523 = vmatprep.subr.bf16.mxu0 %v3519_v34  ;;  %2609 = vmatprep.subr.bf16.mxu1 %v3521_v35  ;;  %v3577_v34 = vld [vmem:[%s5508_s3 + $0x540] ss:$48 sps:$4 sm:$0xff]   ;;  %v3578_v35 = vld [vmem:[%s5508_s3 + $0x548] ss:$48 sps:$4 sm:$0xff]  }
  0x1a   :  { %2524 = vmatpush1.bf16.msra.mxu0 %v3523_v36  ;;  %2610 = vmatpush1.bf16.msra.mxu1 %v3524_v37  ;;  %v3579_v36 = vld [vmem:[%s5508_s3 + $0x5a4] ss:$48 sps:$4 sm:$0xff]   ;;  %v3581_v37 = vld [vmem:[%s5508_s3 + $0x5ac] ss:$48 sps:$4 sm:$0xff]  }
  0x1b   :  { %2525 = vmatprep.subr.bf16.mxu0 %v3525_v38  ;;  %2611 = vmatprep.subr.bf16.mxu1 %v3527_v39  ;;  %v3583_v38 = vld [vmem:[%s5508_s3 + $0x5a0] ss:$48 sps:$4 sm:$0xff]   ;;  %v3584_v39 = vld [vmem:[%s5508_s3 + $0x5a8] ss:$48 sps:$4 sm:$0xff]  }
  0x1e   :  { %2526 = vmatpush1.bf16.msra.mxu0 %v3529_v40  ;;  %2612 = vmatpush1.bf16.msra.mxu1 %v3530_v41  ;;  %v3587_v40 = vld [vmem:[%s5508_s3 + $0x604] ss:$48 sps:$4 sm:$0xff]   ;;  %v3590_v41 = vld [vmem:[%s5508_s3 + $0x60c] ss:$48 sps:$4 sm:$0xff]  }
  0x1f   :  { %2527 = vmatprep.subr.bf16.mxu0 %v3531_v42  ;;  %2613 = vmatprep.subr.bf16.mxu1 %v3533_v43 }
  0x22   :  { %2528 = vmatpush1.bf16.msra.mxu0 %v3535_v44  ;;  %2614 = vmatpush1.bf16.msra.mxu1 %v3536_v45  ;;  %v84_v44 = vlaneseq }
  0x23   :  { %2529 = vmatprep.subr.bf16.mxu0 %v3537_v46  ;;  %2615 = vmatprep.subr.bf16.mxu1 %v3539_v47 }
  0x26   :  { %2530 = vmatpush1.bf16.msra.mxu0 %v3541_v48  ;;  %2616 = vmatpush1.bf16.msra.mxu1 %v3542_v49  ;;  %v4385_v48 = vshrl.u32 %v84_v44, 7  ;;  %v3611_v44 = vld [vmem:[%s5508_s3 + $0x784] ss:$48 sps:$4 sm:$0xff]  }
  0x27   :  { %2531 = vmatprep.subr.bf16.mxu0 %v3543_v50  ;;  %2617 = vmatprep.subr.bf16.mxu1 %v3545_v51  ;;  %v28_v51 = vld [vmem:[%s5509_s1] sm:$0xf] }
  0x28   :  { %v4388_v50 = vsub.s32 2, %v4385_v48 }
  0x2a   :  { %2618 = vmatpush1.bf16.msra.mxu1 %v3548_v15 }
  0x2b   :  { %2619 = vmatprep.subr.bf16.mxu1 %v3551_v17 }
  0x2e   :  { %2620 = vmatpush1.bf16.msra.mxu1 %v3554_v19 }
  0x2f   :  { %2621 = vmatprep.subr.bf16.mxu1 %v3557_v21 }
  0x32   :  { %2622 = vmatpush1.bf16.msra.mxu1 %v3560_v23 }
  0x33   :  { %2623 = vmatprep.subr.bf16.mxu1 %v3563_v25 }
  0x36   :  { %2624 = vmatpush1.bf16.msra.mxu1 %v3566_v27 }
  0x37   :  { %2625 = vmatprep.subr.bf16.mxu1 %v3569_v29 }
  0x3a   :  { %2626 = vmatpush1.bf16.msra.mxu1 %v3572_v31  ;;  %v3593_v31 = vld [vmem:[%s5508_s3 + $0x664] ss:$48 sps:$4 sm:$0xff]  }
  0x3b   :  { %2627 = vmatprep.subr.bf16.mxu1 %v3575_v33 }
  0x3e   :  { %2628 = vmatpush1.bf16.msra.mxu1 %v3578_v35  ;;  %v3594_v35 = vld [vmem:[%s5508_s3 + $0x668] ss:$48 sps:$4 sm:$0xff]  }
  0x3f   :  { %2629 = vmatprep.subr.bf16.mxu1 %v3581_v37  ;;  %v3602_v37 = vld [vmem:[%s5508_s3 + $0x6cc] ss:$48 sps:$4 sm:$0xff]  }
  0x42   :  { %2630 = vmatpush1.bf16.msra.mxu1 %v3584_v39  ;;  %v3600_v39 = vld [vmem:[%s5508_s3 + $0x6c8] ss:$48 sps:$4 sm:$0xff]  }
  0x43   :  { %2642 = vmatprep.subr.bf16.mxu1 %v3590_v41  ;;  %v3608_v41 = vld [vmem:[%s5508_s3 + $0x72c] ss:$48 sps:$4 sm:$0xff]  }
  0x95   :  { %v34_v52 = vpop.xlane.xlu0 %33 }
  0x96   :  { %v41_v53 = vmul.f32 0.001953125, %v34_v52  ;;  %v4394_v52 = vsub.s32 1, %v4385_v48 }
  0x98   :  { %v4262_v54 = vsub.f32 %v4102_v0, %v41_v53  ;;  %v4265_v55 = vsub.f32 %v4107_v1, %v41_v53  ;;  %v4268_v56 = vsub.f32 %v4112_v2, %v41_v53  ;;  %v4271_v58 = vsub.f32 %v4129_v6, %v41_v53 }
  0x99   :  { %v39_v57 = vpop.xlane.xlu0 %38  ;;  %v4397_v53 = vsub.s32 0, %v4385_v48 }
  0x9a   :  { %v42_v59 = vmul.f32 0.001953125, %v39_v57  ;;  %v51_v60 = vmul.f32 %v4262_v54, %v4262_v54  ;;  %v52_v61 = vmul.f32 %v4265_v55, %v4265_v55  ;;  %v53_v62 = vmul.f32 %v4268_v56, %v4268_v56  ;;  %v29_v57 = vld [vmem:[%s5510_s2] sm:$0xf] }
  0x9b   :  { %v54_v3 = vmul.f32 %v4271_v58, %v4271_v58 }
  0x9c   :  { %v4280_v63 = vsub.f32 %v4119_v4, %v42_v59  ;;  %v4283_v0 = vsub.f32 %v4124_v5, %v42_v59  ;;  %v59_v1 = vadd.f32 %v52_v61, %v51_v60  ;;  %v4286_v2 = vsub.f32 %v4134_v7, %v42_v59 }
  0x9d   :  { %v4291_v8 = vsub.f32 %v4142_v10, %v42_v59  ;;  %v3547_v10 = vld [vmem:[%s5508_s3 + $0x360] ss:$48 sps:$4 sm:$0xff]   ;;  %v95_v59 = vrot.slane %v28_v51, %v4388_v50  ;;  %v91_v61 = vrot.slane %v28_v51, %v4394_v52 }
  0x9e   :  { %v60_v6 = vadd.f32 %v59_v1, %v53_v62  ;;  %v55_v9 = vmul.f32 %v4280_v63, %v4280_v63  ;;  %v56_v4 = vmul.f32 %v4283_v0, %v4283_v0  ;;  %v57_v5 = vmul.f32 %v4286_v2, %v4286_v2  ;;  %2532 = vmatpush1.bf16.msra.mxu0 %v3547_v10 }
  0x9f   :  { %v58_v7 = vmul.f32 %v4291_v8, %v4291_v8  ;;  %2533 = vmatprep.subr.bf16.mxu0 %v3549_v16  ;;  %v4405_v62 = vsub.s32 3, %v4385_v48 }
  0xa0   :  { %v61_v11 = vadd.f32 %v60_v6, %v54_v3  ;;  %v64_v12 = vadd.f32 %v56_v4, %v55_v9  ;;  %v87_v6 = vrot.slane %v28_v51, %v4397_v53  ;;  %v124_v4 = vrot.slane %v29_v57, %v4388_v50 }
  0xa2   :  { %62 = vadd.xlane.f32.xlu1 %v61_v11  ;;  %v65_v13 = vadd.f32 %v64_v12, %v57_v5  ;;  %2534 = vmatpush1.bf16.msra.mxu0 %v3553_v18  ;;  %v120_v12 = vrot.slane %v29_v57, %v4394_v52 }
  0xa3   :  { %2535 = vmatprep.subr.bf16.mxu0 %v3555_v20 }
  0xa4   :  { %v66_v14 = vadd.f32 %v65_v13, %v58_v7  ;;  %v116_v7 = vrot.slane %v29_v57, %v4397_v53 }
  0xa6   :  { %67 = vadd.xlane.f32.xlu1 %v66_v14  ;;  %2536 = vmatpush1.bf16.msra.mxu0 %v3559_v22  ;;  %v99_v14 = vrot.slane %v28_v51, %v4405_v62  ;;  %v128_v22 = vrot.slane %v29_v57, %v4405_v62  ;;  %v3620_v51 = vld [vmem:[%s5508_s3 + $0x7ec] ss:$48 sps:$4 sm:$0xff]   ;;  %v3615_v57 = vld [vmem:[%s5508_s3 + $0x7e0] ss:$48 sps:$4 sm:$0xff]  }
  0xa7   :  { %2537 = vmatprep.subr.bf16.mxu0 %v3561_v24 }
  0xaa   :  { %2538 = vmatpush1.bf16.msra.mxu0 %v3565_v26 }
  0xab   :  { %2539 = vmatprep.subr.bf16.mxu0 %v3567_v28 }
  0xae   :  { %2540 = vmatpush1.bf16.msra.mxu0 %v3571_v30 }
  0xaf   :  { %2541 = vmatprep.subr.bf16.mxu0 %v3573_v32  ;;  %v3596_v32 = vld [vmem:[%s5508_s3 + $0x66c] ss:$48 sps:$4 sm:$0xff]  }
  0xb2   :  { %2542 = vmatpush1.bf16.msra.mxu0 %v3577_v34  ;;  %v3591_v34 = vld [vmem:[%s5508_s3 + $0x660] ss:$48 sps:$4 sm:$0xff]  }
  0xb3   :  { %2543 = vmatprep.subr.bf16.mxu0 %v3579_v36  ;;  %v3599_v36 = vld [vmem:[%s5508_s3 + $0x6c4] ss:$48 sps:$4 sm:$0xff]  }
  0xb6   :  { %2544 = vmatpush1.bf16.msra.mxu0 %v3583_v38  ;;  %v3597_v38 = vld [vmem:[%s5508_s3 + $0x6c0] ss:$48 sps:$4 sm:$0xff]  }
  0xb7   :  { %2556 = vmatprep.subr.bf16.mxu0 %v3587_v40  ;;  %v3605_v40 = vld [vmem:[%s5508_s3 + $0x724] ss:$48 sps:$4 sm:$0xff]  }
 0x12f   :  { %v63_v42 = vpop.xlane.xlu1 %62 }
 0x130   :  { %v69_v43 = vmul.f32 0.001953125, %v63_v42  ;;  %v3603_v42 = vld [vmem:[%s5508_s3 + $0x720] ss:$48 sps:$4 sm:$0xff]  }
 0x132   :  { %v71_v45 = vadd.f32 1e-05, %v69_v43  ;;  %v3606_v43 = vld [vmem:[%s5508_s3 + $0x728] ss:$48 sps:$4 sm:$0xff]  }
 0x133   :  { %v68_v46 = vpop.xlane.xlu1 %67 }
 0x134   :  { %4065 = vrsqrt.f32 %v71_v45  ;;  %v70_v47 = vmul.f32 0.001953125, %v68_v46  ;;  %v3614_v45 = vld [vmem:[%s5508_s3 + $0x78c] ss:$48 sps:$4 sm:$0xff]   ;;  %v3609_v46 = vld [vmem:[%s5508_s3 + $0x780] ss:$48 sps:$4 sm:$0xff]  }
 0x136   :  { %v72_v49 = vadd.f32 1e-05, %v70_v47  ;;  %v3612_v47 = vld [vmem:[%s5508_s3 + $0x788] ss:$48 sps:$4 sm:$0xff]  }
 0x138   :  { %4067 = vrsqrt.f32 %v72_v49  ;;  %v3617_v49 = vld [vmem:[%s5508_s3 + $0x7e4] ss:$48 sps:$4 sm:$0xff]  }
 0x13e   :  { %v4066_v60 = vpop.eup %4065 }
 0x13f   :  { %v76_v1 = vmul.f32 %v4066_v60, %v4265_v55  ;;  %v75_v3 = vmul.f32 %v4066_v60, %v4262_v54  ;;  %v77_v9 = vmul.f32 %v4066_v60, %v4268_v56  ;;  %v78_v13 = vmul.f32 %v4066_v60, %v4271_v58  ;;  %v3623_v60 = vld [vmem:[%s5508_s3 + $0x844] ss:$48 sps:$4 sm:$0xff]  }
 0x141   :  { %v106_v11 = vmul.f32 %v95_v59, %v77_v9  ;;  %v105_v10 = vmul.f32 %v91_v61, %v76_v1  ;;  %v104_v15 = vmul.f32 %v87_v6, %v75_v3  ;;  %v107_v20 = vmul.f32 %v99_v14, %v78_v13  ;;  %v3621_v1 = vld [vmem:[%s5508_s3 + $0x840] ss:$48 sps:$4 sm:$0xff]   ;;  %v3624_v3 = vld [vmem:[%s5508_s3 + $0x848] ss:$48 sps:$4 sm:$0xff]   ;;  %v3632_v9 = vld [vmem:[%s5508_s3 + $0x8ac] ss:$48 sps:$4 sm:$0xff]  }
 0x142   :  { %v4068_v5 = vpop.eup %4067  ;;  %v3636_v13 = vld [vmem:[%s5508_s3 + $0x908] ss:$48 sps:$4 sm:$0xff]  }
 0x143   :  { %v80_v55 = vmul.f32 %v4068_v5, %v4283_v0  ;;  %v79_v54 = vmul.f32 %v4068_v5, %v4280_v63  ;;  %v82_v56 = vmul.f32 %v4068_v5, %v4291_v8  ;;  %v81_v16 = vmul.f32 %v4068_v5, %v4286_v2  ;;  %v3585_v2 = vld [vmem:[%s5508_s3 + $0x600] ss:$48 sps:$4 sm:$0xff]   ;;  %v3588_v8 = vld [vmem:[%s5508_s3 + $0x608] ss:$48 sps:$4 sm:$0xff]   ;;  %v3635_v5 = vld [vmem:[%s5508_s3 + $0x904] ss:$48 sps:$4 sm:$0xff]  }
 0x144   :  { %v135_v17 = vadd.f32 %v124_v4, %v106_v11  ;;  %v134_v23 = vadd.f32 %v120_v12, %v105_v10  ;;  %v133_v25 = vadd.f32 %v116_v7, %v104_v15  ;;  %v136_v29 = vadd.f32 %v128_v22, %v107_v20  ;;  %v3630_v11 = vld [vmem:[%s5508_s3 + $0x8a8] ss:$48 sps:$4 sm:$0xff]   ;;  %v3639_v10 = vld [vmem:[%s5508_s3 + $0x960] ss:$48 sps:$4 sm:$0xff]   ;;  %v3647_v15 = vld [vmem:[%s5508_s3 + $0x9c4] ss:$48 sps:$4 sm:$0xff]  }
 0x145   :  { %v109_v18 = vmul.f32 %v91_v61, %v80_v55  ;;  %v108_v19 = vmul.f32 %v87_v6, %v79_v54  ;;  %v111_v21 = vmul.f32 %v99_v14, %v82_v56  ;;  %v110_v58 = vmul.f32 %v95_v59, %v81_v16  ;;  %v3618_v59 = vld [vmem:[%s5508_s3 + $0x7e8] ss:$48 sps:$4 sm:$0xff]   ;;  %v3626_v61 = vld [vmem:[%s5508_s3 + $0x84c] ss:$48 sps:$4 sm:$0xff]   ;;  %v3629_v6 = vld [vmem:[%s5508_s3 + $0x8a4] ss:$48 sps:$4 sm:$0xff]  }
 0x146   :  { %v3641_v14 = vld [vmem:[%s5508_s3 + $0x964] ss:$48 sps:$4 sm:$0xff]   ;;  %v3644_v55 = vld [vmem:[%s5508_s3 + $0x96c] ss:$48 sps:$4 sm:$0xff]   ;;  %v3642_v54 = vld [vmem:[%s5508_s3 + $0x968] ss:$48 sps:$4 sm:$0xff]  }
 0x147   :  { %v138_v24 = vadd.f32 %v120_v12, %v109_v18  ;;  %v137_v0 = vadd.f32 %v116_v7, %v108_v19  ;;  %v140_v26 = vadd.f32 %v128_v22, %v111_v21  ;;  %v139_v27 = vadd.f32 %v124_v4, %v110_v58  ;;  %v3627_v4 = vld [vmem:[%s5508_s3 + $0x8a0] ss:$48 sps:$4 sm:$0xff]   ;;  %v3638_v12 = vld [vmem:[%s5508_s3 + $0x90c] ss:$48 sps:$4 sm:$0xff]   ;;  %v3653_v18 = vld [vmem:[%s5508_s3 + $0xa24] ss:$48 sps:$4 sm:$0xff]  }
 0x148   :  { %v3633_v7 = vld [vmem:[%s5508_s3 + $0x900] ss:$48 sps:$4 sm:$0xff]   ;;  %v3650_v56 = vld [vmem:[%s5508_s3 + $0x9cc] ss:$48 sps:$4 sm:$0xff]   ;;  %v3654_v21 = vld [vmem:[%s5508_s3 + $0xa28] ss:$48 sps:$4 sm:$0xff]  }
 0x149   :  { %v4421_v63 = vpack.c.bf16 %v138_v24, %v134_v23  ;;  %v4429_v28 = vpack.c.bf16 %v137_v0, %v133_v25  ;;  %v4431_v30 = vpack.c.bf16 %v139_v27, %v135_v17  ;;  %v4443_v33 = vpack.c.bf16 %v140_v26, %v136_v29  ;;  %v3645_v16 = vld [vmem:[%s5508_s3 + $0x9c0] ss:$48 sps:$4 sm:$0xff]   ;;  %v3648_v17 = vld [vmem:[%s5508_s3 + $0x9c8] ss:$48 sps:$4 sm:$0xff]   ;;  %v3656_v19 = vld [vmem:[%s5508_s3 + $0xa2c] ss:$48 sps:$4 sm:$0xff]  }
 0x14a   :  { %v3651_v20 = vld [vmem:[%s5508_s3 + $0xa20] ss:$48 sps:$4 sm:$0xff]   ;;  %v3659_v22 = vld [vmem:[%s5508_s3 + $0xa84] ss:$48 sps:$4 sm:$0xff]   ;;  %v3662_v58 = vld [vmem:[%s5508_s3 + $0xa8c] ss:$48 sps:$4 sm:$0xff]  }
 0x14b   :  { %2545 = vmatprep.mubr.bf16.mxu0 %v4421_v63  ;;  %2631 = vmatprep.mubr.bf16.mxu1 %v4421_v63  ;;  %v3657_v23 = vld [vmem:[%s5508_s3 + $0xa80] ss:$48 sps:$4 sm:$0xff]   ;;  %v3660_v24 = vld [vmem:[%s5508_s3 + $0xa88] ss:$48 sps:$4 sm:$0xff]   ;;  %v3665_v25 = vld [vmem:[%s5508_s3 + $0xae4] ss:$48 sps:$4 sm:$0xff]  }
 0x14c   :  { %2546 = vmatmul.mubr.bf16.vlgmr.msra.gmra.mrb[0].mxu0 %v4429_v28  ;;  %2632 = vmatmul.mubr.bf16.vlgmr.msra.gmra.mrb[0].mxu1 %v4429_v28  ;;  %v3668_v0 = vld [vmem:[%s5508_s3 + $0xaec] ss:$48 sps:$4 sm:$0xff]   ;;  %v3663_v26 = vld [vmem:[%s5508_s3 + $0xae0] ss:$48 sps:$4 sm:$0xff]   ;;  %v3666_v27 = vld [vmem:[%s5508_s3 + $0xae8] ss:$48 sps:$4 sm:$0xff]  }
 0x14d   :  { %2557 = vmatpush1.bf16.msra.mxu0 %v3585_v2  ;;  %2643 = vmatpush1.bf16.msra.mxu1 %v3588_v8  ;;  %v3671_v2 = vld [vmem:[%s5508_s3 + $0xb44] ss:$48 sps:$4 sm:$0xff]   ;;  %v3674_v8 = vld [vmem:[%s5508_s3 + $0xb4c] ss:$48 sps:$4 sm:$0xff]   ;;  %v3669_v29 = vld [vmem:[%s5508_s3 + $0xb40] ss:$48 sps:$4 sm:$0xff]  }
 0x14e   :  { %2588 = vmatprep.mubr.bf16.mxu0 %v4443_v33  ;;  %2674 = vmatprep.mubr.bf16.mxu1 %v4443_v33 }
 0x14f   :  { %2558 = vmatprep.subr.bf16.mxu0 %v3593_v31  ;;  %2644 = vmatprep.subr.bf16.mxu1 %v3596_v32  ;;  %v3672_v31 = vld [vmem:[%s5508_s3 + $0xb48] ss:$48 sps:$4 sm:$0xff]   ;;  %v3677_v32 = vld [vmem:[%s5508_s3 + $0xba4] ss:$48 sps:$4 sm:$0xff]  }
 0x151   :  { %2559 = vmatpush1.bf16.msra.mxu0 %v3591_v34  ;;  %2645 = vmatpush1.bf16.msra.mxu1 %v3594_v35  ;;  %v3680_v34 = vld [vmem:[%s5508_s3 + $0xbac] ss:$48 sps:$4 sm:$0xff]   ;;  %v3675_v35 = vld [vmem:[%s5508_s3 + $0xba0] ss:$48 sps:$4 sm:$0xff]  }
 0x152   :  { %2560 = vmatprep.subr.bf16.mxu0 %v3599_v36  ;;  %2646 = vmatprep.subr.bf16.mxu1 %v3602_v37  ;;  %v3678_v36 = vld [vmem:[%s5508_s3 + $0xba8] ss:$48 sps:$4 sm:$0xff]   ;;  %v3683_v37 = vld [vmem:[%s5508_s3 + $0x14] ss:$48 sps:$4 sm:$0xff]  }
 0x155   :  { %2561 = vmatpush1.bf16.msra.mxu0 %v3597_v38  ;;  %2647 = vmatpush1.bf16.msra.mxu1 %v3600_v39  ;;  %v3686_v38 = vld [vmem:[%s5508_s3 + $0x1c] ss:$48 sps:$4 sm:$0xff]   ;;  %v3681_v39 = vld [vmem:[%s5508_s3 + $0x10] ss:$48 sps:$4 sm:$0xff]  }
 0x156   :  { %2562 = vmatprep.subr.bf16.mxu0 %v3605_v40  ;;  %2648 = vmatprep.subr.bf16.mxu1 %v3608_v41  ;;  %v3684_v40 = vld [vmem:[%s5508_s3 + $0x18] ss:$48 sps:$4 sm:$0xff]   ;;  %v3689_v41 = vld [vmem:[%s5508_s3 + $0x74] ss:$48 sps:$4 sm:$0xff]  }
 0x159   :  { %2563 = vmatpush1.bf16.msra.mxu0 %v3603_v42  ;;  %2649 = vmatpush1.bf16.msra.mxu1 %v3606_v43  ;;  %v3692_v42 = vld [vmem:[%s5508_s3 + $0x7c] ss:$48 sps:$4 sm:$0xff]   ;;  %v3687_v43 = vld [vmem:[%s5508_s3 + $0x70] ss:$48 sps:$4 sm:$0xff]  }
 0x15a   :  { %2564 = vmatprep.subr.bf16.mxu0 %v3611_v44  ;;  %2650 = vmatprep.subr.bf16.mxu1 %v3614_v45  ;;  %v3690_v44 = vld [vmem:[%s5508_s3 + $0x78] ss:$48 sps:$4 sm:$0xff]   ;;  %v3695_v45 = vld [vmem:[%s5508_s3 + $0xd4] ss:$48 sps:$4 sm:$0xff]  }
 0x15d   :  { %2565 = vmatpush1.bf16.msra.mxu0 %v3609_v46  ;;  %2651 = vmatpush1.bf16.msra.mxu1 %v3612_v47  ;;  %v3698_v46 = vld [vmem:[%s5508_s3 + $0xdc] ss:$48 sps:$4 sm:$0xff]   ;;  %v3693_v47 = vld [vmem:[%s5508_s3 + $0xd0] ss:$48 sps:$4 sm:$0xff]  }
 0x15e   :  { %2566 = vmatprep.subr.bf16.mxu0 %v3617_v49  ;;  %2652 = vmatprep.subr.bf16.mxu1 %v3620_v51  ;;  %v3696_v49 = vld [vmem:[%s5508_s3 + $0xd8] ss:$48 sps:$4 sm:$0xff]   ;;  %v3701_v51 = vld [vmem:[%s5508_s3 + $0x134] ss:$48 sps:$4 sm:$0xff]  }
 0x161   :  { %2567 = vmatpush1.bf16.msra.mxu0 %v3615_v57  ;;  %2653 = vmatpush1.bf16.msra.mxu1 %v3618_v59  ;;  %v3704_v57 = vld [vmem:[%s5508_s3 + $0x13c] ss:$48 sps:$4 sm:$0xff]   ;;  %v3699_v59 = vld [vmem:[%s5508_s3 + $0x130] ss:$48 sps:$4 sm:$0xff]  }
 0x162   :  { %2568 = vmatprep.subr.bf16.mxu0 %v3623_v60  ;;  %2654 = vmatprep.subr.bf16.mxu1 %v3626_v61  ;;  %v3702_v60 = vld [vmem:[%s5508_s3 + $0x138] ss:$48 sps:$4 sm:$0xff]   ;;  %v3707_v61 = vld [vmem:[%s5508_s3 + $0x194] ss:$48 sps:$4 sm:$0xff]  }
 0x165   :  { %2569 = vmatpush1.bf16.msra.mxu0 %v3621_v1  ;;  %2655 = vmatpush1.bf16.msra.mxu1 %v3624_v3  ;;  %v3710_v1 = vld [vmem:[%s5508_s3 + $0x19c] ss:$48 sps:$4 sm:$0xff]   ;;  %v3705_v3 = vld [vmem:[%s5508_s3 + $0x190] ss:$48 sps:$4 sm:$0xff]  }
 0x166   :  { %2570 = vmatprep.subr.bf16.mxu0 %v3629_v6  ;;  %2656 = vmatprep.subr.bf16.mxu1 %v3632_v9  ;;  %v3708_v6 = vld [vmem:[%s5508_s3 + $0x198] ss:$48 sps:$4 sm:$0xff]   ;;  %v3713_v9 = vld [vmem:[%s5508_s3 + $0x1f4] ss:$48 sps:$4 sm:$0xff]  }
 0x169   :  { %2571 = vmatpush1.bf16.msra.mxu0 %v3627_v4  ;;  %2657 = vmatpush1.bf16.msra.mxu1 %v3630_v11  ;;  %v3716_v4 = vld [vmem:[%s5508_s3 + $0x1fc] ss:$48 sps:$4 sm:$0xff]   ;;  %v3711_v11 = vld [vmem:[%s5508_s3 + $0x1f0] ss:$48 sps:$4 sm:$0xff]  }
 0x16a   :  { %2572 = vmatprep.subr.bf16.mxu0 %v3635_v5  ;;  %2658 = vmatprep.subr.bf16.mxu1 %v3638_v12  ;;  %v3714_v5 = vld [vmem:[%s5508_s3 + $0x1f8] ss:$48 sps:$4 sm:$0xff]   ;;  %v3719_v12 = vld [vmem:[%s5508_s3 + $0x254] ss:$48 sps:$4 sm:$0xff]  }
 0x16d   :  { %2573 = vmatpush1.bf16.msra.mxu0 %v3633_v7  ;;  %2659 = vmatpush1.bf16.msra.mxu1 %v3636_v13  ;;  %v3722_v7 = vld [vmem:[%s5508_s3 + $0x25c] ss:$48 sps:$4 sm:$0xff]   ;;  %v3717_v13 = vld [vmem:[%s5508_s3 + $0x250] ss:$48 sps:$4 sm:$0xff]  }
 0x16e   :  { %2574 = vmatprep.subr.bf16.mxu0 %v3641_v14  ;;  %2660 = vmatprep.subr.bf16.mxu1 %v3644_v55  ;;  %v3720_v14 = vld [vmem:[%s5508_s3 + $0x258] ss:$48 sps:$4 sm:$0xff]   ;;  %v3725_v55 = vld [vmem:[%s5508_s3 + $0x2b4] ss:$48 sps:$4 sm:$0xff]  }
 0x171   :  { %2575 = vmatpush1.bf16.msra.mxu0 %v3639_v10  ;;  %2661 = vmatpush1.bf16.msra.mxu1 %v3642_v54  ;;  %v3728_v10 = vld [vmem:[%s5508_s3 + $0x2bc] ss:$48 sps:$4 sm:$0xff]   ;;  %v3723_v54 = vld [vmem:[%s5508_s3 + $0x2b0] ss:$48 sps:$4 sm:$0xff]  }
 0x172   :  { %2576 = vmatprep.subr.bf16.mxu0 %v3647_v15  ;;  %2662 = vmatprep.subr.bf16.mxu1 %v3650_v56  ;;  %v3726_v15 = vld [vmem:[%s5508_s3 + $0x2b8] ss:$48 sps:$4 sm:$0xff]   ;;  %v3731_v56 = vld [vmem:[%s5508_s3 + $0x314] ss:$48 sps:$4 sm:$0xff]  }
 0x175   :  { %2577 = vmatpush1.bf16.msra.mxu0 %v3645_v16  ;;  %2663 = vmatpush1.bf16.msra.mxu1 %v3648_v17  ;;  %v3734_v16 = vld [vmem:[%s5508_s3 + $0x31c] ss:$48 sps:$4 sm:$0xff]   ;;  %v3729_v17 = vld [vmem:[%s5508_s3 + $0x310] ss:$48 sps:$4 sm:$0xff]  }
 0x176   :  { %2578 = vmatprep.subr.bf16.mxu0 %v3653_v18  ;;  %2664 = vmatprep.subr.bf16.mxu1 %v3656_v19  ;;  %v3732_v18 = vld [vmem:[%s5508_s3 + $0x318] ss:$48 sps:$4 sm:$0xff]   ;;  %v3737_v19 = vld [vmem:[%s5508_s3 + $0x374] ss:$48 sps:$4 sm:$0xff]  }
 0x179   :  { %2579 = vmatpush1.bf16.msra.mxu0 %v3651_v20  ;;  %2665 = vmatpush1.bf16.msra.mxu1 %v3654_v21  ;;  %v3740_v20 = vld [vmem:[%s5508_s3 + $0x37c] ss:$48 sps:$4 sm:$0xff]   ;;  %v3735_v21 = vld [vmem:[%s5508_s3 + $0x370] ss:$48 sps:$4 sm:$0xff]  }
 0x17a   :  { %2580 = vmatprep.subr.bf16.mxu0 %v3659_v22  ;;  %2666 = vmatprep.subr.bf16.mxu1 %v3662_v58  ;;  %v3738_v22 = vld [vmem:[%s5508_s3 + $0x378] ss:$48 sps:$4 sm:$0xff]   ;;  %v3743_v58 = vld [vmem:[%s5508_s3 + $0x3d4] ss:$48 sps:$4 sm:$0xff]  }
 0x17d   :  { %2581 = vmatpush1.bf16.msra.mxu0 %v3657_v23  ;;  %2667 = vmatpush1.bf16.msra.mxu1 %v3660_v24  ;;  %v3746_v23 = vld [vmem:[%s5508_s3 + $0x3dc] ss:$48 sps:$4 sm:$0xff]   ;;  %v3741_v24 = vld [vmem:[%s5508_s3 + $0x3d0] ss:$48 sps:$4 sm:$0xff]  }
 0x17e   :  { %2582 = vmatprep.subr.bf16.mxu0 %v3665_v25  ;;  %2668 = vmatprep.subr.bf16.mxu1 %v3668_v0  ;;  %v3744_v25 = vld [vmem:[%s5508_s3 + $0x3d8] ss:$48 sps:$4 sm:$0xff]   ;;  %v3749_v0 = vld [vmem:[%s5508_s3 + $0x434] ss:$48 sps:$4 sm:$0xff]  }
 0x181   :  { %2583 = vmatpush1.bf16.msra.mxu0 %v3663_v26  ;;  %2669 = vmatpush1.bf16.msra.mxu1 %v3666_v27  ;;  %v3752_v26 = vld [vmem:[%s5508_s3 + $0x43c] ss:$48 sps:$4 sm:$0xff]   ;;  %v3747_v27 = vld [vmem:[%s5508_s3 + $0x430] ss:$48 sps:$4 sm:$0xff]  }
 0x182   :  { %2584 = vmatprep.subr.bf16.mxu0 %v3671_v2  ;;  %2670 = vmatprep.subr.bf16.mxu1 %v3674_v8  ;;  %v3750_v2 = vld [vmem:[%s5508_s3 + $0x438] ss:$48 sps:$4 sm:$0xff]   ;;  %v3755_v8 = vld [vmem:[%s5508_s3 + $0x494] ss:$48 sps:$4 sm:$0xff]  }
 0x185   :  { %2585 = vmatpush1.bf16.msra.mxu0 %v3669_v29  ;;  %2671 = vmatpush1.bf16.msra.mxu1 %v3672_v31  ;;  %v3758_v29 = vld [vmem:[%s5508_s3 + $0x49c] ss:$48 sps:$4 sm:$0xff]   ;;  %v3753_v31 = vld [vmem:[%s5508_s3 + $0x490] ss:$48 sps:$4 sm:$0xff]  }
 0x186   :  { %2586 = vmatprep.subr.bf16.mxu0 %v3677_v32  ;;  %2672 = vmatprep.subr.bf16.mxu1 %v3680_v34  ;;  %v3756_v32 = vld [vmem:[%s5508_s3 + $0x498] ss:$48 sps:$4 sm:$0xff]   ;;  %v3761_v34 = vld [vmem:[%s5508_s3 + $0x4f4] ss:$48 sps:$4 sm:$0xff]  }
 0x189   :  { %2587 = vmatpush1.bf16.msra.mxu0 %v3675_v35  ;;  %2673 = vmatpush1.bf16.msra.mxu1 %v3678_v36  ;;  %v3764_v35 = vld [vmem:[%s5508_s3 + $0x4fc] ss:$48 sps:$4 sm:$0xff]   ;;  %v3759_v36 = vld [vmem:[%s5508_s3 + $0x4f0] ss:$48 sps:$4 sm:$0xff]  }
 0x18a   :  { %2685 = vmatprep.subr.bf16.mxu0 %v3683_v37  ;;  %2771 = vmatprep.subr.bf16.mxu1 %v3686_v38  ;;  %v3762_v37 = vld [vmem:[%s5508_s3 + $0x4f8] ss:$48 sps:$4 sm:$0xff]   ;;  %v3767_v38 = vld [vmem:[%s5508_s3 + $0x554] ss:$48 sps:$4 sm:$0xff]  }
 0x18c   :  { %2589 = vmatmul.mubr.bf16.vlgmr.msra.gmra.mrb[0].mxu0 %v4431_v30  ;;  %2675 = vmatmul.mubr.bf16.vlgmr.msra.gmra.mrb[0].mxu1 %v4431_v30 }
 0x18d   :  { %2686 = vmatpush1.bf16.msra.mxu0 %v3681_v39  ;;  %2717 = vmatprep.mubr.bf16.mxu0 %v4421_v63  ;;  %v3770_v39 = vld [vmem:[%s5508_s3 + $0x55c] ss:$48 sps:$4 sm:$0xff]  }
 0x18e   :  { %2772 = vmatpush1.bf16.msra.mxu1 %v3684_v40  ;;  %2803 = vmatprep.mubr.bf16.mxu1 %v4421_v63  ;;  %v3765_v40 = vld [vmem:[%s5508_s3 + $0x550] ss:$48 sps:$4 sm:$0xff]  }
 0x18f   :  { %2687 = vmatprep.subr.bf16.mxu0 %v3689_v41  ;;  %2773 = vmatprep.subr.bf16.mxu1 %v3692_v42  ;;  %v3768_v41 = vld [vmem:[%s5508_s3 + $0x558] ss:$48 sps:$4 sm:$0xff]   ;;  %v3773_v42 = vld [vmem:[%s5508_s3 + $0x5b4] ss:$48 sps:$4 sm:$0xff]  }
 0x191   :  { %2688 = vmatpush1.bf16.msra.mxu0 %v3687_v43  ;;  %v3776_v43 = vld [vmem:[%s5508_s3 + $0x5bc] ss:$48 sps:$4 sm:$0xff]  }
 0x192   :  { %2774 = vmatpush1.bf16.msra.mxu1 %v3690_v44  ;;  %2689 = vmatprep.subr.bf16.mxu0 %v3695_v45  ;;  %v3771_v44 = vld [vmem:[%s5508_s3 + $0x5b0] ss:$48 sps:$4 sm:$0xff]   ;;  %v3774_v45 = vld [vmem:[%s5508_s3 + $0x5b8] ss:$48 sps:$4 sm:$0xff]  }
 0x193   :  { %2775 = vmatprep.subr.bf16.mxu1 %v3698_v46  ;;  %v3779_v46 = vld [vmem:[%s5508_s3 + $0x614] ss:$48 sps:$4 sm:$0xff]  }
 0x195   :  { %2690 = vmatpush1.bf16.msra.mxu0 %v3693_v47  ;;  %v3782_v47 = vld [vmem:[%s5508_s3 + $0x61c] ss:$48 sps:$4 sm:$0xff]  }
 0x196   :  { %2776 = vmatpush1.bf16.msra.mxu1 %v3696_v49  ;;  %2691 = vmatprep.subr.bf16.mxu0 %v3701_v51  ;;  %v3777_v49 = vld [vmem:[%s5508_s3 + $0x610] ss:$48 sps:$4 sm:$0xff]   ;;  %v3780_v51 = vld [vmem:[%s5508_s3 + $0x618] ss:$48 sps:$4 sm:$0xff]  }
 0x197   :  { %2777 = vmatprep.subr.bf16.mxu1 %v3704_v57  ;;  %v3785_v57 = vld [vmem:[%s5508_s3 + $0x674] ss:$48 sps:$4 sm:$0xff]  }
 0x199   :  { %2692 = vmatpush1.bf16.msra.mxu0 %v3699_v59  ;;  %v3788_v59 = vld [vmem:[%s5508_s3 + $0x67c] ss:$48 sps:$4 sm:$0xff]  }
 0x19a   :  { %2778 = vmatpush1.bf16.msra.mxu1 %v3702_v60  ;;  %2693 = vmatprep.subr.bf16.mxu0 %v3707_v61  ;;  %v3783_v60 = vld [vmem:[%s5508_s3 + $0x670] ss:$48 sps:$4 sm:$0xff]   ;;  %v3786_v61 = vld [vmem:[%s5508_s3 + $0x678] ss:$48 sps:$4 sm:$0xff]  }
 0x19b   :  { %2779 = vmatprep.subr.bf16.mxu1 %v3710_v1  ;;  %v3791_v1 = vld [vmem:[%s5508_s3 + $0x6d4] ss:$48 sps:$4 sm:$0xff]  }
 0x19d   :  { %2694 = vmatpush1.bf16.msra.mxu0 %v3705_v3  ;;  %v3794_v3 = vld [vmem:[%s5508_s3 + $0x6dc] ss:$48 sps:$4 sm:$0xff]  }
 0x19e   :  { %2780 = vmatpush1.bf16.msra.mxu1 %v3708_v6  ;;  %2695 = vmatprep.subr.bf16.mxu0 %v3713_v9  ;;  %v3789_v6 = vld [vmem:[%s5508_s3 + $0x6d0] ss:$48 sps:$4 sm:$0xff]   ;;  %v3792_v9 = vld [vmem:[%s5508_s3 + $0x6d8] ss:$48 sps:$4 sm:$0xff]  }
 0x19f   :  { %2781 = vmatprep.subr.bf16.mxu1 %v3716_v4  ;;  %v3797_v4 = vld [vmem:[%s5508_s3 + $0x734] ss:$48 sps:$4 sm:$0xff]  }
 0x1a1   :  { %2696 = vmatpush1.bf16.msra.mxu0 %v3711_v11  ;;  %v3800_v11 = vld [vmem:[%s5508_s3 + $0x73c] ss:$48 sps:$4 sm:$0xff]  }
 0x1a2   :  { %2782 = vmatpush1.bf16.msra.mxu1 %v3714_v5  ;;  %2697 = vmatprep.subr.bf16.mxu0 %v3719_v12  ;;  %v3795_v5 = vld [vmem:[%s5508_s3 + $0x730] ss:$48 sps:$4 sm:$0xff]   ;;  %v3798_v12 = vld [vmem:[%s5508_s3 + $0x738] ss:$48 sps:$4 sm:$0xff]  }
 0x1a3   :  { %2783 = vmatprep.subr.bf16.mxu1 %v3722_v7  ;;  %v3803_v7 = vld [vmem:[%s5508_s3 + $0x794] ss:$48 sps:$4 sm:$0xff]  }
 0x1a5   :  { %2698 = vmatpush1.bf16.msra.mxu0 %v3717_v13  ;;  %v3806_v13 = vld [vmem:[%s5508_s3 + $0x79c] ss:$48 sps:$4 sm:$0xff]  }
 0x1a6   :  { %2784 = vmatpush1.bf16.msra.mxu1 %v3720_v14  ;;  %2699 = vmatprep.subr.bf16.mxu0 %v3725_v55  ;;  %v3801_v14 = vld [vmem:[%s5508_s3 + $0x790] ss:$48 sps:$4 sm:$0xff]   ;;  %v3804_v55 = vld [vmem:[%s5508_s3 + $0x798] ss:$48 sps:$4 sm:$0xff]  }
 0x1a7   :  { %2785 = vmatprep.subr.bf16.mxu1 %v3728_v10  ;;  %v3809_v10 = vld [vmem:[%s5508_s3 + $0x7f4] ss:$48 sps:$4 sm:$0xff]  }
 0x1a9   :  { %2700 = vmatpush1.bf16.msra.mxu0 %v3723_v54  ;;  %v3812_v54 = vld [vmem:[%s5508_s3 + $0x7fc] ss:$48 sps:$4 sm:$0xff]  }
 0x1aa   :  { %2786 = vmatpush1.bf16.msra.mxu1 %v3726_v15  ;;  %2701 = vmatprep.subr.bf16.mxu0 %v3731_v56  ;;  %v3807_v15 = vld [vmem:[%s5508_s3 + $0x7f0] ss:$48 sps:$4 sm:$0xff]   ;;  %v3810_v56 = vld [vmem:[%s5508_s3 + $0x7f8] ss:$48 sps:$4 sm:$0xff]  }
 0x1ab   :  { %2787 = vmatprep.subr.bf16.mxu1 %v3734_v16  ;;  %v3815_v16 = vld [vmem:[%s5508_s3 + $0x854] ss:$48 sps:$4 sm:$0xff]  }
 0x1ad   :  { %2702 = vmatpush1.bf16.msra.mxu0 %v3729_v17  ;;  %v3818_v17 = vld [vmem:[%s5508_s3 + $0x85c] ss:$48 sps:$4 sm:$0xff]  }
 0x1ae   :  { %2788 = vmatpush1.bf16.msra.mxu1 %v3732_v18  ;;  %2703 = vmatprep.subr.bf16.mxu0 %v3737_v19  ;;  %v3813_v18 = vld [vmem:[%s5508_s3 + $0x850] ss:$48 sps:$4 sm:$0xff]   ;;  %v3816_v19 = vld [vmem:[%s5508_s3 + $0x858] ss:$48 sps:$4 sm:$0xff]  }
 0x1af   :  { %2789 = vmatprep.subr.bf16.mxu1 %v3740_v20  ;;  %v3821_v20 = vld [vmem:[%s5508_s3 + $0x8b4] ss:$48 sps:$4 sm:$0xff]  }
 0x1b1   :  { %2704 = vmatpush1.bf16.msra.mxu0 %v3735_v21  ;;  %v3824_v21 = vld [vmem:[%s5508_s3 + $0x8bc] ss:$48 sps:$4 sm:$0xff]  }
 0x1b2   :  { %2790 = vmatpush1.bf16.msra.mxu1 %v3738_v22  ;;  %2705 = vmatprep.subr.bf16.mxu0 %v3743_v58  ;;  %v3819_v22 = vld [vmem:[%s5508_s3 + $0x8b0] ss:$48 sps:$4 sm:$0xff]   ;;  %v3822_v58 = vld [vmem:[%s5508_s3 + $0x8b8] ss:$48 sps:$4 sm:$0xff]  }
 0x1b3   :  { %2791 = vmatprep.subr.bf16.mxu1 %v3746_v23  ;;  %v3827_v23 = vld [vmem:[%s5508_s3 + $0x914] ss:$48 sps:$4 sm:$0xff]  }
 0x1b5   :  { %2706 = vmatpush1.bf16.msra.mxu0 %v3741_v24  ;;  %v3830_v24 = vld [vmem:[%s5508_s3 + $0x91c] ss:$48 sps:$4 sm:$0xff]  }
 0x1b6   :  { %2792 = vmatpush1.bf16.msra.mxu1 %v3744_v25  ;;  %2707 = vmatprep.subr.bf16.mxu0 %v3749_v0  ;;  %v3825_v25 = vld [vmem:[%s5508_s3 + $0x910] ss:$48 sps:$4 sm:$0xff]   ;;  %v3828_v0 = vld [vmem:[%s5508_s3 + $0x918] ss:$48 sps:$4 sm:$0xff]  }
 0x1b7   :  { %2793 = vmatprep.subr.bf16.mxu1 %v3752_v26  ;;  %v3833_v26 = vld [vmem:[%s5508_s3 + $0x974] ss:$48 sps:$4 sm:$0xff]  }
 0x1b9   :  { %2708 = vmatpush1.bf16.msra.mxu0 %v3747_v27  ;;  %v3836_v27 = vld [vmem:[%s5508_s3 + $0x97c] ss:$48 sps:$4 sm:$0xff]  }
 0x1ba   :  { %2794 = vmatpush1.bf16.msra.mxu1 %v3750_v2  ;;  %2709 = vmatprep.subr.bf16.mxu0 %v3755_v8  ;;  %v3831_v2 = vld [vmem:[%s5508_s3 + $0x970] ss:$48 sps:$4 sm:$0xff]   ;;  %v3834_v8 = vld [vmem:[%s5508_s3 + $0x978] ss:$48 sps:$4 sm:$0xff]  }
 0x1bb   :  { %2795 = vmatprep.subr.bf16.mxu1 %v3758_v29  ;;  %v3839_v29 = vld [vmem:[%s5508_s3 + $0x9d4] ss:$48 sps:$4 sm:$0xff]  }
 0x1bd   :  { %2710 = vmatpush1.bf16.msra.mxu0 %v3753_v31  ;;  %v3842_v31 = vld [vmem:[%s5508_s3 + $0x9dc] ss:$48 sps:$4 sm:$0xff]  }
 0x1be   :  { %2796 = vmatpush1.bf16.msra.mxu1 %v3756_v32  ;;  %2711 = vmatprep.subr.bf16.mxu0 %v3761_v34  ;;  %v3837_v32 = vld [vmem:[%s5508_s3 + $0x9d0] ss:$48 sps:$4 sm:$0xff]   ;;  %v3840_v34 = vld [vmem:[%s5508_s3 + $0x9d8] ss:$48 sps:$4 sm:$0xff]  }
 0x1bf   :  { %2797 = vmatprep.subr.bf16.mxu1 %v3764_v35  ;;  %v3845_v35 = vld [vmem:[%s5508_s3 + $0xa34] ss:$48 sps:$4 sm:$0xff]  }
 0x1c1   :  { %2712 = vmatpush1.bf16.msra.mxu0 %v3759_v36  ;;  %v3848_v36 = vld [vmem:[%s5508_s3 + $0xa3c] ss:$48 sps:$4 sm:$0xff]  }
 0x1c2   :  { %2798 = vmatpush1.bf16.msra.mxu1 %v3762_v37  ;;  %2713 = vmatprep.subr.bf16.mxu0 %v3767_v38  ;;  %v3843_v37 = vld [vmem:[%s5508_s3 + $0xa30] ss:$48 sps:$4 sm:$0xff]   ;;  %v3846_v38 = vld [vmem:[%s5508_s3 + $0xa38] ss:$48 sps:$4 sm:$0xff]  }
 0x1c3   :  { %2799 = vmatprep.subr.bf16.mxu1 %v3770_v39  ;;  %v3851_v39 = vld [vmem:[%s5508_s3 + $0xa94] ss:$48 sps:$4 sm:$0xff]  }
 0x1c5   :  { %2714 = vmatpush1.bf16.msra.mxu0 %v3765_v40  ;;  %v3854_v40 = vld [vmem:[%s5508_s3 + $0xa9c] ss:$48 sps:$4 sm:$0xff]  }
 0x1c6   :  { %2800 = vmatpush1.bf16.msra.mxu1 %v3768_v41  ;;  %2715 = vmatprep.subr.bf16.mxu0 %v3773_v42  ;;  %v3849_v41 = vld [vmem:[%s5508_s3 + $0xa90] ss:$48 sps:$4 sm:$0xff]   ;;  %v3852_v42 = vld [vmem:[%s5508_s3 + $0xa98] ss:$48 sps:$4 sm:$0xff]  }
 0x1c7   :  { %2801 = vmatprep.subr.bf16.mxu1 %v3776_v43  ;;  %v3857_v43 = vld [vmem:[%s5508_s3 + $0xaf4] ss:$48 sps:$4 sm:$0xff]  }
 0x1c9   :  { %2716 = vmatpush1.bf16.msra.mxu0 %v3771_v44  ;;  %v3860_v44 = vld [vmem:[%s5508_s3 + $0xafc] ss:$48 sps:$4 sm:$0xff]  }
 0x1ca   :  { %2802 = vmatpush1.bf16.msra.mxu1 %v3774_v45  ;;  %2728 = vmatprep.subr.bf16.mxu0 %v3779_v46  ;;  %v3855_v45 = vld [vmem:[%s5508_s3 + $0xaf0] ss:$48 sps:$4 sm:$0xff]   ;;  %v3858_v46 = vld [vmem:[%s5508_s3 + $0xaf8] ss:$48 sps:$4 sm:$0xff]  }
 0x1cb   :  { %2814 = vmatprep.subr.bf16.mxu1 %v3782_v47  ;;  %v3863_v47 = vld [vmem:[%s5508_s3 + $0xb54] ss:$48 sps:$4 sm:$0xff]  }
 0x1cc   :  { %2718 = vmatmul.mubr.bf16.vlgmr.msra.gmra.mrb[4].mxu0 %v4429_v28 }
 0x1cd   :  { %2804 = vmatmul.mubr.bf16.vlgmr.msra.gmra.mrb[4].mxu1 %v4429_v28  ;;  %2729 = vmatpush1.bf16.msra.mxu0 %v3777_v49  ;;  %v3866_v49 = vld [vmem:[%s5508_s3 + $0xb5c] ss:$48 sps:$4 sm:$0xff]  }
 0x1ce   :  { %2760 = vmatprep.mubr.bf16.mxu0 %v4443_v33  ;;  %2815 = vmatpush1.bf16.msra.mxu1 %v3780_v51  ;;  %v3861_v51 = vld [vmem:[%s5508_s3 + $0xb50] ss:$48 sps:$4 sm:$0xff]  }
 0x1cf   :  { %2846 = vmatprep.mubr.bf16.mxu1 %v4443_v33  ;;  %2730 = vmatprep.subr.bf16.mxu0 %v3785_v57  ;;  %v3864_v57 = vld [vmem:[%s5508_s3 + $0xb58] ss:$48 sps:$4 sm:$0xff]  }
 0x1d0   :  { %2816 = vmatprep.subr.bf16.mxu1 %v3788_v59  ;;  %v3869_v59 = vld [vmem:[%s5508_s3 + $0xbb4] ss:$48 sps:$4 sm:$0xff]  }
 0x1d1   :  { %2731 = vmatpush1.bf16.msra.mxu0 %v3783_v60  ;;  %v3872_v60 = vld [vmem:[%s5508_s3 + $0xbbc] ss:$48 sps:$4 sm:$0xff]  }
 0x1d2   :  { %2817 = vmatpush1.bf16.msra.mxu1 %v3786_v61  ;;  %2732 = vmatprep.subr.bf16.mxu0 %v3791_v1  ;;  %v3867_v61 = vld [vmem:[%s5508_s3 + $0xbb0] ss:$48 sps:$4 sm:$0xff]   ;;  %v3870_v1 = vld [vmem:[%s5508_s3 + $0xbb8] ss:$48 sps:$4 sm:$0xff]  }
 0x1d3   :  { %2818 = vmatprep.subr.bf16.mxu1 %v3794_v3  ;;  %v3875_v3 = vld [vmem:[%s5508_s3 + $0x24] ss:$48 sps:$4 sm:$0xff]  }
 0x1d5   :  { %2733 = vmatpush1.bf16.msra.mxu0 %v3789_v6  ;;  %v3878_v6 = vld [vmem:[%s5508_s3 + $0x2c] ss:$48 sps:$4 sm:$0xff]  }
 0x1d6   :  { %2819 = vmatpush1.bf16.msra.mxu1 %v3792_v9  ;;  %2734 = vmatprep.subr.bf16.mxu0 %v3797_v4  ;;  %v3873_v9 = vld [vmem:[%s5508_s3 + $0x20] ss:$48 sps:$4 sm:$0xff]   ;;  %v3876_v4 = vld [vmem:[%s5508_s3 + $0x28] ss:$48 sps:$4 sm:$0xff]  }
 0x1d7   :  { %2820 = vmatprep.subr.bf16.mxu1 %v3800_v11  ;;  %v3881_v11 = vld [vmem:[%s5508_s3 + $0x84] ss:$48 sps:$4 sm:$0xff]  }
 0x1d9   :  { %2735 = vmatpush1.bf16.msra.mxu0 %v3795_v5  ;;  %v3884_v5 = vld [vmem:[%s5508_s3 + $0x8c] ss:$48 sps:$4 sm:$0xff]  }
 0x1da   :  { %2821 = vmatpush1.bf16.msra.mxu1 %v3798_v12  ;;  %2736 = vmatprep.subr.bf16.mxu0 %v3803_v7  ;;  %v3879_v12 = vld [vmem:[%s5508_s3 + $0x80] ss:$48 sps:$4 sm:$0xff]   ;;  %v3882_v7 = vld [vmem:[%s5508_s3 + $0x88] ss:$48 sps:$4 sm:$0xff]  }
 0x1db   :  { %2822 = vmatprep.subr.bf16.mxu1 %v3806_v13  ;;  %v3887_v13 = vld [vmem:[%s5508_s3 + $0xe4] ss:$48 sps:$4 sm:$0xff]  }
 0x1dd   :  { %2737 = vmatpush1.bf16.msra.mxu0 %v3801_v14  ;;  %v3890_v14 = vld [vmem:[%s5508_s3 + $0xec] ss:$48 sps:$4 sm:$0xff]  }
 0x1de   :  { %2823 = vmatpush1.bf16.msra.mxu1 %v3804_v55  ;;  %2738 = vmatprep.subr.bf16.mxu0 %v3809_v10  ;;  %v3885_v55 = vld [vmem:[%s5508_s3 + $0xe0] ss:$48 sps:$4 sm:$0xff]   ;;  %v3888_v10 = vld [vmem:[%s5508_s3 + $0xe8] ss:$48 sps:$4 sm:$0xff]  }
 0x1df   :  { %2824 = vmatprep.subr.bf16.mxu1 %v3812_v54  ;;  %v3896_v54 = vld [vmem:[%s5508_s3 + $0x14c] ss:$48 sps:$4 sm:$0xff]  }
 0x1e1   :  { %2739 = vmatpush1.bf16.msra.mxu0 %v3807_v15  ;;  %v3891_v15 = vld [vmem:[%s5508_s3 + $0x140] ss:$48 sps:$4 sm:$0xff]  }
 0x1e2   :  { %2825 = vmatpush1.bf16.msra.mxu1 %v3810_v56  ;;  %2740 = vmatprep.subr.bf16.mxu0 %v3815_v16  ;;  %v3894_v56 = vld [vmem:[%s5508_s3 + $0x148] ss:$48 sps:$4 sm:$0xff]   ;;  %v3899_v16 = vld [vmem:[%s5508_s3 + $0x1a4] ss:$48 sps:$4 sm:$0xff]  }
 0x1e3   :  { %2826 = vmatprep.subr.bf16.mxu1 %v3818_v17  ;;  %v3902_v17 = vld [vmem:[%s5508_s3 + $0x1ac] ss:$48 sps:$4 sm:$0xff]  }
 0x1e5   :  { %2741 = vmatpush1.bf16.msra.mxu0 %v3813_v18  ;;  %v3897_v18 = vld [vmem:[%s5508_s3 + $0x1a0] ss:$48 sps:$4 sm:$0xff]  }
 0x1e6   :  { %2827 = vmatpush1.bf16.msra.mxu1 %v3816_v19  ;;  %2742 = vmatprep.subr.bf16.mxu0 %v3821_v20  ;;  %v3900_v19 = vld [vmem:[%s5508_s3 + $0x1a8] ss:$48 sps:$4 sm:$0xff]   ;;  %v3905_v20 = vld [vmem:[%s5508_s3 + $0x204] ss:$48 sps:$4 sm:$0xff]  }
 0x1e7   :  { %2828 = vmatprep.subr.bf16.mxu1 %v3824_v21  ;;  %v3908_v21 = vld [vmem:[%s5508_s3 + $0x20c] ss:$48 sps:$4 sm:$0xff]  }
 0x1e9   :  { %2743 = vmatpush1.bf16.msra.mxu0 %v3819_v22  ;;  %v3903_v22 = vld [vmem:[%s5508_s3 + $0x200] ss:$48 sps:$4 sm:$0xff]  }
 0x1ea   :  { %2829 = vmatpush1.bf16.msra.mxu1 %v3822_v58  ;;  %2744 = vmatprep.subr.bf16.mxu0 %v3827_v23  ;;  %v3906_v58 = vld [vmem:[%s5508_s3 + $0x208] ss:$48 sps:$4 sm:$0xff]   ;;  %v3911_v23 = vld [vmem:[%s5508_s3 + $0x264] ss:$48 sps:$4 sm:$0xff]  }
 0x1eb   :  { %2830 = vmatprep.subr.bf16.mxu1 %v3830_v24  ;;  %v3914_v24 = vld [vmem:[%s5508_s3 + $0x26c] ss:$48 sps:$4 sm:$0xff]  }
 0x1ed   :  { %2745 = vmatpush1.bf16.msra.mxu0 %v3825_v25  ;;  %v3909_v25 = vld [vmem:[%s5508_s3 + $0x260] ss:$48 sps:$4 sm:$0xff]  }
 0x1ee   :  { %2831 = vmatpush1.bf16.msra.mxu1 %v3828_v0  ;;  %2746 = vmatprep.subr.bf16.mxu0 %v3833_v26  ;;  %v3912_v0 = vld [vmem:[%s5508_s3 + $0x268] ss:$48 sps:$4 sm:$0xff]   ;;  %v3917_v26 = vld [vmem:[%s5508_s3 + $0x2c4] ss:$48 sps:$4 sm:$0xff]  }
 0x1ef   :  { %2832 = vmatprep.subr.bf16.mxu1 %v3836_v27  ;;  %v3920_v27 = vld [vmem:[%s5508_s3 + $0x2cc] ss:$48 sps:$4 sm:$0xff]  }
 0x1f1   :  { %2747 = vmatpush1.bf16.msra.mxu0 %v3831_v2  ;;  %v3915_v2 = vld [vmem:[%s5508_s3 + $0x2c0] ss:$48 sps:$4 sm:$0xff]  }
 0x1f2   :  { %2833 = vmatpush1.bf16.msra.mxu1 %v3834_v8  ;;  %2748 = vmatprep.subr.bf16.mxu0 %v3839_v29  ;;  %v3918_v8 = vld [vmem:[%s5508_s3 + $0x2c8] ss:$48 sps:$4 sm:$0xff]   ;;  %v3923_v29 = vld [vmem:[%s5508_s3 + $0x324] ss:$48 sps:$4 sm:$0xff]  }
 0x1f3   :  { %2834 = vmatprep.subr.bf16.mxu1 %v3842_v31  ;;  %v3926_v31 = vld [vmem:[%s5508_s3 + $0x32c] ss:$48 sps:$4 sm:$0xff]  }
 0x1f5   :  { %2749 = vmatpush1.bf16.msra.mxu0 %v3837_v32  ;;  %v3921_v32 = vld [vmem:[%s5508_s3 + $0x320] ss:$48 sps:$4 sm:$0xff]  }
 0x1f6   :  { %2835 = vmatpush1.bf16.msra.mxu1 %v3840_v34  ;;  %2750 = vmatprep.subr.bf16.mxu0 %v3845_v35  ;;  %v3924_v34 = vld [vmem:[%s5508_s3 + $0x328] ss:$48 sps:$4 sm:$0xff]   ;;  %v3929_v35 = vld [vmem:[%s5508_s3 + $0x384] ss:$48 sps:$4 sm:$0xff]  }
 0x1f7   :  { %2836 = vmatprep.subr.bf16.mxu1 %v3848_v36  ;;  %v3932_v36 = vld [vmem:[%s5508_s3 + $0x38c] ss:$48 sps:$4 sm:$0xff]  }
 0x1f9   :  { %2751 = vmatpush1.bf16.msra.mxu0 %v3843_v37  ;;  %v3927_v37 = vld [vmem:[%s5508_s3 + $0x380] ss:$48 sps:$4 sm:$0xff]  }
 0x1fa   :  { %2837 = vmatpush1.bf16.msra.mxu1 %v3846_v38  ;;  %2752 = vmatprep.subr.bf16.mxu0 %v3851_v39  ;;  %v3930_v38 = vld [vmem:[%s5508_s3 + $0x388] ss:$48 sps:$4 sm:$0xff]   ;;  %v3935_v39 = vld [vmem:[%s5508_s3 + $0x3e4] ss:$48 sps:$4 sm:$0xff]  }
 0x1fb   :  { %2838 = vmatprep.subr.bf16.mxu1 %v3854_v40  ;;  %v3938_v40 = vld [vmem:[%s5508_s3 + $0x3ec] ss:$48 sps:$4 sm:$0xff]  }
 0x1fd   :  { %2753 = vmatpush1.bf16.msra.mxu0 %v3849_v41  ;;  %v3933_v41 = vld [vmem:[%s5508_s3 + $0x3e0] ss:$48 sps:$4 sm:$0xff]  }
 0x1fe   :  { %2839 = vmatpush1.bf16.msra.mxu1 %v3852_v42  ;;  %2754 = vmatprep.subr.bf16.mxu0 %v3857_v43  ;;  %v3936_v42 = vld [vmem:[%s5508_s3 + $0x3e8] ss:$48 sps:$4 sm:$0xff]   ;;  %v3941_v43 = vld [vmem:[%s5508_s3 + $0x444] ss:$48 sps:$4 sm:$0xff]  }
 0x1ff   :  { %2840 = vmatprep.subr.bf16.mxu1 %v3860_v44  ;;  %v3944_v44 = vld [vmem:[%s5508_s3 + $0x44c] ss:$48 sps:$4 sm:$0xff]  }
 0x201   :  { %2755 = vmatpush1.bf16.msra.mxu0 %v3855_v45  ;;  %v3939_v45 = vld [vmem:[%s5508_s3 + $0x440] ss:$48 sps:$4 sm:$0xff]  }
 0x202   :  { %2841 = vmatpush1.bf16.msra.mxu1 %v3858_v46  ;;  %2756 = vmatprep.subr.bf16.mxu0 %v3863_v47  ;;  %v3942_v46 = vld [vmem:[%s5508_s3 + $0x448] ss:$48 sps:$4 sm:$0xff]   ;;  %v3947_v47 = vld [vmem:[%s5508_s3 + $0x4a4] ss:$48 sps:$4 sm:$0xff]  }
 0x203   :  { %2842 = vmatprep.subr.bf16.mxu1 %v3866_v49  ;;  %v3950_v49 = vld [vmem:[%s5508_s3 + $0x4ac] ss:$48 sps:$4 sm:$0xff]  }
 0x205   :  { %2757 = vmatpush1.bf16.msra.mxu0 %v3861_v51  ;;  %v3945_v51 = vld [vmem:[%s5508_s3 + $0x4a0] ss:$48 sps:$4 sm:$0xff]  }
 0x206   :  { %2843 = vmatpush1.bf16.msra.mxu1 %v3864_v57  ;;  %2758 = vmatprep.subr.bf16.mxu0 %v3869_v59  ;;  %v3948_v57 = vld [vmem:[%s5508_s3 + $0x4a8] ss:$48 sps:$4 sm:$0xff]   ;;  %v3953_v59 = vld [vmem:[%s5508_s3 + $0x504] ss:$48 sps:$4 sm:$0xff]  }
 0x207   :  { %2844 = vmatprep.subr.bf16.mxu1 %v3872_v60  ;;  %v3956_v60 = vld [vmem:[%s5508_s3 + $0x50c] ss:$48 sps:$4 sm:$0xff]  }
 0x209   :  { %2759 = vmatpush1.bf16.msra.mxu0 %v3867_v61  ;;  %v3951_v61 = vld [vmem:[%s5508_s3 + $0x500] ss:$48 sps:$4 sm:$0xff]  }
 0x20a   :  { %2845 = vmatpush1.bf16.msra.mxu1 %v3870_v1  ;;  %2857 = vmatprep.subr.bf16.mxu0 %v3875_v3  ;;  %v3954_v1 = vld [vmem:[%s5508_s3 + $0x508] ss:$48 sps:$4 sm:$0xff]   ;;  %v3959_v3 = vld [vmem:[%s5508_s3 + $0x564] ss:$48 sps:$4 sm:$0xff]  }
 0x20b   :  { %2943 = vmatprep.subr.bf16.mxu1 %v3878_v6  ;;  %v3962_v6 = vld [vmem:[%s5508_s3 + $0x56c] ss:$48 sps:$4 sm:$0xff]  }
 0x20c   :  { %2761 = vmatmul.mubr.bf16.vlgmr.msra.gmra.mrb[4].mxu0 %v4431_v30 }
 0x20d   :  { %2847 = vmatmul.mubr.bf16.vlgmr.msra.gmra.mrb[4].mxu1 %v4431_v30  ;;  %2858 = vmatpush1.bf16.msra.mxu0 %v3873_v9  ;;  %v3957_v9 = vld [vmem:[%s5508_s3 + $0x560] ss:$48 sps:$4 sm:$0xff]  }
 0x20e   :  { %2889 = vmatprep.mubr.bf16.mxu0 %v4421_v63  ;;  %2944 = vmatpush1.bf16.msra.mxu1 %v3876_v4  ;;  %v3960_v4 = vld [vmem:[%s5508_s3 + $0x568] ss:$48 sps:$4 sm:$0xff]  }
 0x20f   :  { %2975 = vmatprep.mubr.bf16.mxu1 %v4421_v63  ;;  %2859 = vmatprep.subr.bf16.mxu0 %v3881_v11  ;;  %v3893_v63 = vld [vmem:[%s5508_s3 + $0x144] ss:$48 sps:$4 sm:$0xff]  }
 0x210   :  { %2945 = vmatprep.subr.bf16.mxu1 %v3884_v5  ;;  %v3965_v11 = vld [vmem:[%s5508_s3 + $0x5c4] ss:$48 sps:$4 sm:$0xff]   ;;  %v3968_v5 = vld [vmem:[%s5508_s3 + $0x5cc] ss:$48 sps:$4 sm:$0xff]  }
 0x211   :  { %2860 = vmatpush1.bf16.msra.mxu0 %v3879_v12  ;;  %v3963_v12 = vld [vmem:[%s5508_s3 + $0x5c0] ss:$48 sps:$4 sm:$0xff]  }
 0x212   :  { %2946 = vmatpush1.bf16.msra.mxu1 %v3882_v7  ;;  %2861 = vmatprep.subr.bf16.mxu0 %v3887_v13  ;;  %v3966_v7 = vld [vmem:[%s5508_s3 + $0x5c8] ss:$48 sps:$4 sm:$0xff]   ;;  %v3971_v13 = vld [vmem:[%s5508_s3 + $0x624] ss:$48 sps:$4 sm:$0xff]  }
 0x213   :  { %2947 = vmatprep.subr.bf16.mxu1 %v3890_v14  ;;  %v3974_v14 = vld [vmem:[%s5508_s3 + $0x62c] ss:$48 sps:$4 sm:$0xff]  }
 0x215   :  { %2862 = vmatpush1.bf16.msra.mxu0 %v3885_v55  ;;  %v3969_v55 = vld [vmem:[%s5508_s3 + $0x620] ss:$48 sps:$4 sm:$0xff]  }
 0x216   :  { %2948 = vmatpush1.bf16.msra.mxu1 %v3888_v10  ;;  %2863 = vmatprep.subr.bf16.mxu0 %v3893_v63  ;;  %v3972_v10 = vld [vmem:[%s5508_s3 + $0x628] ss:$48 sps:$4 sm:$0xff]   ;;  %v3977_v63 = vld [vmem:[%s5508_s3 + $0x684] ss:$48 sps:$4 sm:$0xff]  }
 0x217   :  { %2949 = vmatprep.subr.bf16.mxu1 %v3896_v54  ;;  %v3980_v54 = vld [vmem:[%s5508_s3 + $0x68c] ss:$48 sps:$4 sm:$0xff]  }
 0x219   :  { %2864 = vmatpush1.bf16.msra.mxu0 %v3891_v15  ;;  %v3975_v15 = vld [vmem:[%s5508_s3 + $0x680] ss:$48 sps:$4 sm:$0xff]  }
 0x21a   :  { %2950 = vmatpush1.bf16.msra.mxu1 %v3894_v56  ;;  %2865 = vmatprep.subr.bf16.mxu0 %v3899_v16  ;;  %v3978_v56 = vld [vmem:[%s5508_s3 + $0x688] ss:$48 sps:$4 sm:$0xff]   ;;  %v3983_v16 = vld [vmem:[%s5508_s3 + $0x6e4] ss:$48 sps:$4 sm:$0xff]  }
 0x21b   :  { %2951 = vmatprep.subr.bf16.mxu1 %v3902_v17  ;;  %v3981_v17 = vld [vmem:[%s5508_s3 + $0x6e0] ss:$48 sps:$4 sm:$0xff]  }
 0x21d   :  { %2866 = vmatpush1.bf16.msra.mxu0 %v3897_v18  ;;  %v3984_v18 = vld [vmem:[%s5508_s3 + $0x6e8] ss:$48 sps:$4 sm:$0xff]  }
 0x21e   :  { %2952 = vmatpush1.bf16.msra.mxu1 %v3900_v19  ;;  %2867 = vmatprep.subr.bf16.mxu0 %v3905_v20  ;;  %v3992_v19 = vld [vmem:[%s5508_s3 + $0x74c] ss:$48 sps:$4 sm:$0xff]   ;;  %v3987_v20 = vld [vmem:[%s5508_s3 + $0x740] ss:$48 sps:$4 sm:$0xff]  }
 0x21f   :  { %2953 = vmatprep.subr.bf16.mxu1 %v3908_v21  ;;  %v3990_v21 = vld [vmem:[%s5508_s3 + $0x748] ss:$48 sps:$4 sm:$0xff]  }
 0x221   :  { %2868 = vmatpush1.bf16.msra.mxu0 %v3903_v22  ;;  %v3995_v22 = vld [vmem:[%s5508_s3 + $0x7a4] ss:$48 sps:$4 sm:$0xff]  }
 0x222   :  { %2954 = vmatpush1.bf16.msra.mxu1 %v3906_v58  ;;  %2869 = vmatprep.subr.bf16.mxu0 %v3911_v23  ;;  %v3998_v58 = vld [vmem:[%s5508_s3 + $0x7ac] ss:$48 sps:$4 sm:$0xff]   ;;  %v3993_v23 = vld [vmem:[%s5508_s3 + $0x7a0] ss:$48 sps:$4 sm:$0xff]  }
 0x223   :  { %2955 = vmatprep.subr.bf16.mxu1 %v3914_v24  ;;  %v5273_v24 = vld [vmem:[%s5511_s4] sm:$0xff] }
 0x225   :  { %2870 = vmatpush1.bf16.msra.mxu0 %v3909_v25  ;;  %v3996_v25 = vld [vmem:[%s5508_s3 + $0x7a8] ss:$48 sps:$4 sm:$0xff]  }
 0x226   :  { %2956 = vmatpush1.bf16.msra.mxu1 %v3912_v0  ;;  %2871 = vmatprep.subr.bf16.mxu0 %v3917_v26  ;;  %v4001_v0 = vld [vmem:[%s5508_s3 + $0x804] ss:$48 sps:$4 sm:$0xff]   ;;  %v4004_v26 = vld [vmem:[%s5508_s3 + $0x80c] ss:$48 sps:$4 sm:$0xff]  }
 0x227   :  { %2957 = vmatprep.subr.bf16.mxu1 %v3920_v27  ;;  %v536_v27 = vrot.slane %v5273_v24, %v4397_v53 }
 0x229   :  { %2872 = vmatpush1.bf16.msra.mxu0 %v3915_v2  ;;  %v544_v2 = vrot.slane %v5273_v24, %v4388_v50 }
 0x22a   :  { %2958 = vmatpush1.bf16.msra.mxu1 %v3918_v8  ;;  %2873 = vmatprep.subr.bf16.mxu0 %v3923_v29  ;;  %v540_v8 = vrot.slane %v5273_v24, %v4394_v52  ;;  %v548_v29 = vrot.slane %v5273_v24, %v4405_v62 }
 0x22b   :  { %2959 = vmatprep.subr.bf16.mxu1 %v3926_v31  ;;  %v3999_v31 = vld [vmem:[%s5508_s3 + $0x800] ss:$48 sps:$4 sm:$0xff]  }
 0x22d   :  { %2874 = vmatpush1.bf16.msra.mxu0 %v3921_v32  ;;  %v4002_v32 = vld [vmem:[%s5508_s3 + $0x808] ss:$48 sps:$4 sm:$0xff]  }
 0x22e   :  { %2960 = vmatpush1.bf16.msra.mxu1 %v3924_v34  ;;  %2875 = vmatprep.subr.bf16.mxu0 %v3929_v35  ;;  %v4007_v34 = vld [vmem:[%s5508_s3 + $0x864] ss:$48 sps:$4 sm:$0xff]  }
 0x22f   :  { %2961 = vmatprep.subr.bf16.mxu1 %v3932_v36 }
 0x231   :  { %2876 = vmatpush1.bf16.msra.mxu0 %v3927_v37  ;;  %v4010_v37 = vld [vmem:[%s5508_s3 + $0x86c] ss:$48 sps:$4 sm:$0xff]  }
 0x232   :  { %2962 = vmatpush1.bf16.msra.mxu1 %v3930_v38  ;;  %2877 = vmatprep.subr.bf16.mxu0 %v3935_v39 }
 0x233   :  { %2963 = vmatprep.subr.bf16.mxu1 %v3938_v40 }
 0x235   :  { %2878 = vmatpush1.bf16.msra.mxu0 %v3933_v41 }
 0x236   :  { %2964 = vmatpush1.bf16.msra.mxu1 %v3936_v42  ;;  %2879 = vmatprep.subr.bf16.mxu0 %v3941_v43 }
 0x237   :  { %2965 = vmatprep.subr.bf16.mxu1 %v3944_v44 }
 0x239   :  { %2880 = vmatpush1.bf16.msra.mxu0 %v3939_v45 }
 0x23a   :  { %2966 = vmatpush1.bf16.msra.mxu1 %v3942_v46  ;;  %2881 = vmatprep.subr.bf16.mxu0 %v3947_v47  ;;  %v4005_v46 = vld [vmem:[%s5508_s3 + $0x860] ss:$48 sps:$4 sm:$0xff]  }
 0x23b   :  { %2967 = vmatprep.subr.bf16.mxu1 %v3950_v49 }
 0x23d   :  { %2882 = vmatpush1.bf16.msra.mxu0 %v3945_v51 }
 0x23e   :  { %2968 = vmatpush1.bf16.msra.mxu1 %v3948_v57  ;;  %2883 = vmatprep.subr.bf16.mxu0 %v3953_v59  ;;  %v4008_v59 = vld [vmem:[%s5508_s3 + $0x868] ss:$48 sps:$4 sm:$0xff]  }
 0x23f   :  { %2969 = vmatprep.subr.bf16.mxu1 %v3956_v60  ;;  %v4013_v60 = vld [vmem:[%s5508_s3 + $0x8c4] ss:$48 sps:$4 sm:$0xff]  }
 0x241   :  { %2884 = vmatpush1.bf16.msra.mxu0 %v3951_v61 }
 0x242   :  { %2970 = vmatpush1.bf16.msra.mxu1 %v3954_v1  ;;  %2885 = vmatprep.subr.bf16.mxu0 %v3959_v3  ;;  %v4016_v3 = vld [vmem:[%s5508_s3 + $0x8cc] ss:$48 sps:$4 sm:$0xff]  }
 0x243   :  { %2971 = vmatprep.subr.bf16.mxu1 %v3962_v6  ;;  %v4011_v6 = vld [vmem:[%s5508_s3 + $0x8c0] ss:$48 sps:$4 sm:$0xff]  }
 0x245   :  { %2886 = vmatpush1.bf16.msra.mxu0 %v3957_v9  ;;  %v4014_v9 = vld [vmem:[%s5508_s3 + $0x8c8] ss:$48 sps:$4 sm:$0xff]  }
 0x246   :  { %2972 = vmatpush1.bf16.msra.mxu1 %v3960_v4  ;;  %2887 = vmatprep.subr.bf16.mxu0 %v3965_v11  ;;  %v4019_v4 = vld [vmem:[%s5508_s3 + $0x924] ss:$48 sps:$4 sm:$0xff]   ;;  %v4022_v11 = vld [vmem:[%s5508_s3 + $0x92c] ss:$48 sps:$4 sm:$0xff]  }
 0x247   :  { %2973 = vmatprep.subr.bf16.mxu1 %v3968_v5  ;;  %v4017_v5 = vld [vmem:[%s5508_s3 + $0x920] ss:$48 sps:$4 sm:$0xff]  }
 0x249   :  { %2888 = vmatpush1.bf16.msra.mxu0 %v3963_v12  ;;  %v4020_v12 = vld [vmem:[%s5508_s3 + $0x928] ss:$48 sps:$4 sm:$0xff]  }
 0x24a   :  { %2974 = vmatpush1.bf16.msra.mxu1 %v3966_v7  ;;  %2900 = vmatprep.subr.bf16.mxu0 %v3971_v13  ;;  %v4025_v7 = vld [vmem:[%s5508_s3 + $0x984] ss:$48 sps:$4 sm:$0xff]   ;;  %v4028_v13 = vld [vmem:[%s5508_s3 + $0x98c] ss:$48 sps:$4 sm:$0xff]  }
 0x24b   :  { %2986 = vmatprep.subr.bf16.mxu1 %v3974_v14  ;;  %v4023_v14 = vld [vmem:[%s5508_s3 + $0x980] ss:$48 sps:$4 sm:$0xff]  }
 0x24c   :  { %2890 = vmatmul.mubr.bf16.vlgmr.msra.gmra.mrb[8].mxu0 %v4429_v28 }
 0x24d   :  { %2976 = vmatmul.mubr.bf16.vlgmr.msra.gmra.mrb[8].mxu1 %v4429_v28  ;;  %2901 = vmatpush1.bf16.msra.mxu0 %v3969_v55  ;;  %v3986_v28 = vld [vmem:[%s5508_s3 + $0x6ec] ss:$48 sps:$4 sm:$0xff]   ;;  %v4026_v55 = vld [vmem:[%s5508_s3 + $0x988] ss:$48 sps:$4 sm:$0xff]  }
 0x24e   :  { %2932 = vmatprep.mubr.bf16.mxu0 %v4443_v33  ;;  %2987 = vmatpush1.bf16.msra.mxu1 %v3972_v10  ;;  %v4031_v10 = vld [vmem:[%s5508_s3 + $0x9e4] ss:$48 sps:$4 sm:$0xff]  }
 0x24f   :  { %3018 = vmatprep.mubr.bf16.mxu1 %v4443_v33  ;;  %2902 = vmatprep.subr.bf16.mxu0 %v3977_v63  ;;  %v3989_v33 = vld [vmem:[%s5508_s3 + $0x744] ss:$48 sps:$4 sm:$0xff]   ;;  %v4034_v63 = vld [vmem:[%s5508_s3 + $0x9ec] ss:$48 sps:$4 sm:$0xff]  }
 0x250   :  { %2988 = vmatprep.subr.bf16.mxu1 %v3980_v54  ;;  %v4029_v54 = vld [vmem:[%s5508_s3 + $0x9e0] ss:$48 sps:$4 sm:$0xff]  }
 0x251   :  { %2903 = vmatpush1.bf16.msra.mxu0 %v3975_v15  ;;  %v4032_v15 = vld [vmem:[%s5508_s3 + $0x9e8] ss:$48 sps:$4 sm:$0xff]  }
 0x252   :  { %2989 = vmatpush1.bf16.msra.mxu1 %v3978_v56  ;;  %2904 = vmatprep.subr.bf16.mxu0 %v3983_v16  ;;  %v4037_v56 = vld [vmem:[%s5508_s3 + $0xa44] ss:$48 sps:$4 sm:$0xff]   ;;  %v4040_v16 = vld [vmem:[%s5508_s3 + $0xa4c] ss:$48 sps:$4 sm:$0xff]  }
 0x253   :  { %2990 = vmatprep.subr.bf16.mxu1 %v3986_v28  ;;  %v4035_v28 = vld [vmem:[%s5508_s3 + $0xa40] ss:$48 sps:$4 sm:$0xff]  }
 0x255   :  { %2905 = vmatpush1.bf16.msra.mxu0 %v3981_v17  ;;  %v4038_v17 = vld [vmem:[%s5508_s3 + $0xa48] ss:$48 sps:$4 sm:$0xff]  }
 0x256   :  { %2991 = vmatpush1.bf16.msra.mxu1 %v3984_v18  ;;  %2906 = vmatprep.subr.bf16.mxu0 %v3989_v33  ;;  %v4043_v18 = vld [vmem:[%s5508_s3 + $0xaa4] ss:$48 sps:$4 sm:$0xff]   ;;  %v4046_v33 = vld [vmem:[%s5508_s3 + $0xaac] ss:$48 sps:$4 sm:$0xff]  }
 0x257   :  { %2992 = vmatprep.subr.bf16.mxu1 %v3992_v19  ;;  %v4041_v19 = vld [vmem:[%s5508_s3 + $0xaa0] ss:$48 sps:$4 sm:$0xff]  }
 0x259   :  { %2907 = vmatpush1.bf16.msra.mxu0 %v3987_v20  ;;  %v4044_v20 = vld [vmem:[%s5508_s3 + $0xaa8] ss:$48 sps:$4 sm:$0xff]  }
 0x25a   :  { %2993 = vmatpush1.bf16.msra.mxu1 %v3990_v21  ;;  %2908 = vmatprep.subr.bf16.mxu0 %v3995_v22  ;;  %v4049_v21 = vld [vmem:[%s5508_s3 + $0xb04] ss:$48 sps:$4 sm:$0xff]   ;;  %v4052_v22 = vld [vmem:[%s5508_s3 + $0xb0c] ss:$48 sps:$4 sm:$0xff]  }
 0x25b   :  { %2994 = vmatprep.subr.bf16.mxu1 %v3998_v58  ;;  %v4047_v58 = vld [vmem:[%s5508_s3 + $0xb00] ss:$48 sps:$4 sm:$0xff]  }
 0x25d   :  { %2909 = vmatpush1.bf16.msra.mxu0 %v3993_v23  ;;  %v4050_v23 = vld [vmem:[%s5508_s3 + $0xb08] ss:$48 sps:$4 sm:$0xff]  }
 0x25e   :  { %2995 = vmatpush1.bf16.msra.mxu1 %v3996_v25  ;;  %2910 = vmatprep.subr.bf16.mxu0 %v4001_v0  ;;  %v4055_v25 = vld [vmem:[%s5508_s3 + $0xb64] ss:$48 sps:$4 sm:$0xff]   ;;  %v4058_v0 = vld [vmem:[%s5508_s3 + $0xb6c] ss:$48 sps:$4 sm:$0xff]  }
 0x25f   :  { %v2590_v35 = vpop.f32.mrb[0].mxu0  ;;  %v2676_v36 = vpop.f32.mrb[0].mxu1  ;;  %2996 = vmatprep.subr.bf16.mxu1 %v4004_v26  ;;  %v4053_v26 = vld [vmem:[%s5508_s3 + $0xb60] ss:$48 sps:$4 sm:$0xff]  }
 0x260   :  { %v3441_v38 = vadd.f32 %v2590_v35, %v536_v27  ;;  %v3445_v39 = vadd.f32 %v2676_v36, %v544_v2  ;;  %v2592_v40 = vpop.f32.mrb[1].mxu0  ;;  %v2678_v41 = vpop.f32.mrb[1].mxu1  ;;  %v555_v35 = vsub.s32 5, %v4385_v48  ;;  %v563_v36 = vsub.s32 7, %v4385_v48 }
 0x261   :  { %v3442_v42 = vadd.f32 %v2592_v40, %v540_v8  ;;  %v3446_v43 = vadd.f32 %v2678_v41, %v548_v29  ;;  %v2594_v44 = vpop.f32.mrb[2].mxu0  ;;  %v2680_v45 = vpop.f32.mrb[2].mxu1  ;;  %2911 = vmatpush1.bf16.msra.mxu0 %v3999_v31  ;;  %v4062_v31 = vld [vmem:[%s5508_s3 + $0xbc8] ss:$48 sps:$4 sm:$0xff]  }
 0x262   :  { %3029 = vst [vmem:[%s5512_s5] sm:$0xff] %v3441_v38  ;;  %3031 = vst [vmem:[%s5512_s5 + $0x10] sm:$0xff] %v3445_v39  ;;  %v3443_v47 = vadd.f32 %v2594_v44, %v536_v27  ;;  %v3447_v49 = vadd.f32 %v2680_v45, %v544_v2  ;;  %2997 = vmatpush1.bf16.msra.mxu1 %v4002_v32  ;;  %v2596_v51 = vpop.f32.mrb[3].mxu0  ;;  %v2682_v57 = vpop.f32.mrb[3].mxu1  ;;  %2912 = vmatprep.subr.bf16.mxu0 %v4007_v34  ;;  %v4056_v27 = vld [vmem:[%s5508_s3 + $0xb68] ss:$48 sps:$4 sm:$0xff]   ;;  %v551_v32 = vsub.s32 4, %v4385_v48 }
 0x263   :  { %3030 = vst [vmem:[%s5512_s5 + $0x8] sm:$0xff] %v3442_v42  ;;  %3032 = vst [vmem:[%s5512_s5 + $0x18] sm:$0xff] %v3446_v43  ;;  %v3444_v61 = vadd.f32 %v2596_v51, %v540_v8  ;;  %v3448_v1 = vadd.f32 %v2682_v57, %v548_v29  ;;  %2998 = vmatprep.subr.bf16.mxu1 %v4010_v37  ;;  %v4061_v2 = vld [vmem:[%s5508_s3 + $0xbc4] ss:$48 sps:$4 sm:$0xff]   ;;  %v4064_v8 = vld [vmem:[%s5508_s3 + $0xbcc] ss:$48 sps:$4 sm:$0xff]   ;;  %v556_v39 = vrot.slane %v5273_v24, %v555_v35 }
 0x264   :  { %3041 = vst [vmem:[%s5512_s5 + $0x60] sm:$0xff] %v3443_v47  ;;  %3043 = vst [vmem:[%s5512_s5 + $0x70] sm:$0xff] %v3447_v49  ;;  %v4059_v29 = vld [vmem:[%s5508_s3 + $0xbc0] ss:$48 sps:$4 sm:$0xff]   ;;  %v559_v34 = vsub.s32 6, %v4385_v48  ;;  %v552_v37 = vrot.slane %v5273_v24, %v551_v32  ;;  %v564_v40 = vrot.slane %v5273_v24, %v563_v36 }
 0x265   :  { %3042 = vst [vmem:[%s5512_s5 + $0x68] sm:$0xff] %v3444_v61  ;;  %3044 = vst [vmem:[%s5512_s5 + $0x78] sm:$0xff] %v3448_v1  ;;  %2913 = vmatpush1.bf16.msra.mxu0 %v4005_v46  ;;  %v530_v1 = vld [vmem:[%s5511_s4 + $0x8] sm:$0xf] }
 0x266   :  { %2999 = vmatpush1.bf16.msra.mxu1 %v4008_v59  ;;  %2914 = vmatprep.subr.bf16.mxu0 %v4013_v60  ;;  %v560_v38 = vrot.slane %v5273_v24, %v559_v34 }
 0x267   :  { %3000 = vmatprep.subr.bf16.mxu1 %v4016_v3  ;;  %v568_v3 = vrot.slane %v530_v1, %v4397_v53 }
 0x269   :  { %2915 = vmatpush1.bf16.msra.mxu0 %v4011_v6  ;;  %v576_v6 = vrot.slane %v530_v1, %v4388_v50 }
 0x26a   :  { %3001 = vmatpush1.bf16.msra.mxu1 %v4014_v9  ;;  %2916 = vmatprep.subr.bf16.mxu0 %v4019_v4  ;;  %v572_v9 = vrot.slane %v530_v1, %v4394_v52  ;;  %v580_v4 = vrot.slane %v530_v1, %v4405_v62 }
 0x26b   :  { %3002 = vmatprep.subr.bf16.mxu1 %v4022_v11 }
 0x26d   :  { %2917 = vmatpush1.bf16.msra.mxu0 %v4017_v5 }
 0x26e   :  { %3003 = vmatpush1.bf16.msra.mxu1 %v4020_v12  ;;  %2918 = vmatprep.subr.bf16.mxu0 %v4025_v7 }
 0x26f   :  { %3004 = vmatprep.subr.bf16.mxu1 %v4028_v13 }
 0x271   :  { %2919 = vmatpush1.bf16.msra.mxu0 %v4023_v14 }
 0x272   :  { %3005 = vmatpush1.bf16.msra.mxu1 %v4026_v55  ;;  %2920 = vmatprep.subr.bf16.mxu0 %v4031_v10 }
 0x273   :  { %3006 = vmatprep.subr.bf16.mxu1 %v4034_v63 }
 0x275   :  { %2921 = vmatpush1.bf16.msra.mxu0 %v4029_v54 }
 0x276   :  { %3007 = vmatpush1.bf16.msra.mxu1 %v4032_v15  ;;  %2922 = vmatprep.subr.bf16.mxu0 %v4037_v56 }
 0x277   :  { %3008 = vmatprep.subr.bf16.mxu1 %v4040_v16 }
 0x279   :  { %2923 = vmatpush1.bf16.msra.mxu0 %v4035_v28 }
 0x27a   :  { %3009 = vmatpush1.bf16.msra.mxu1 %v4038_v17  ;;  %2924 = vmatprep.subr.bf16.mxu0 %v4043_v18 }
 0x27b   :  { %3010 = vmatprep.subr.bf16.mxu1 %v4046_v33 }
 0x27d   :  { %2925 = vmatpush1.bf16.msra.mxu0 %v4041_v19 }
 0x27e   :  { %3011 = vmatpush1.bf16.msra.mxu1 %v4044_v20  ;;  %2926 = vmatprep.subr.bf16.mxu0 %v4049_v21 }
 0x27f   :  { %3012 = vmatprep.subr.bf16.mxu1 %v4052_v22 }
 0x281   :  { %2927 = vmatpush1.bf16.msra.mxu0 %v4047_v58 }
 0x282   :  { %3013 = vmatpush1.bf16.msra.mxu1 %v4050_v23  ;;  %2928 = vmatprep.subr.bf16.mxu0 %v4055_v25 }
 0x283   :  { %3014 = vmatprep.subr.bf16.mxu1 %v4058_v0 }
 0x285   :  { %2929 = vmatpush1.bf16.msra.mxu0 %v4053_v26 }
 0x286   :  { %3015 = vmatpush1.bf16.msra.mxu1 %v4056_v27  ;;  %2930 = vmatprep.subr.bf16.mxu0 %v4061_v2 }
 0x287   :  { %3016 = vmatprep.subr.bf16.mxu1 %v4064_v8 }
 0x289   :  { %2931 = vmatpush1.bf16.msra.mxu0 %v4059_v29 }
 0x28a   :  { %3017 = vmatpush1.bf16.msra.mxu1 %v4062_v31 }
 0x28c   :  { %2933 = vmatmul.mubr.bf16.vlgmr.msra.gmra.mrb[8].mxu0 %v4431_v30 }
 0x28d   :  { %3019 = vmatmul.mubr.bf16.vlgmr.msra.gmra.mrb[8].mxu1 %v4431_v30 }
 0x2df   :  { %v2762_v41 = vpop.f32.mrb[4].mxu0 }
 0x2e0   :  { %v3449_v42 = vadd.f32 %v2762_v41, %v552_v37  ;;  %v2848_v43 = vpop.f32.mrb[4].mxu1  ;;  %v2764_v30 = vpop.f32.mrb[5].mxu0 }
 0x2e1   :  { %v3453_v44 = vadd.f32 %v2848_v43, %v560_v38  ;;  %v3450_v45 = vadd.f32 %v2764_v30, %v556_v39  ;;  %v2850_v46 = vpop.f32.mrb[5].mxu1  ;;  %v2766_v47 = vpop.f32.mrb[6].mxu0 }
 0x2e2   :  { %3033 = vst [vmem:[%s5512_s5 + $0x20] sm:$0xff] %v3449_v42  ;;  %v3454_v48 = vadd.f32 %v2850_v46, %v564_v40  ;;  %v3451_v49 = vadd.f32 %v2766_v47, %v552_v37  ;;  %v2852_v51 = vpop.f32.mrb[6].mxu1  ;;  %v2768_v57 = vpop.f32.mrb[7].mxu0 }
 0x2e3   :  { %3035 = vst [vmem:[%s5512_s5 + $0x30] sm:$0xff] %v3453_v44  ;;  %3034 = vst [vmem:[%s5512_s5 + $0x28] sm:$0xff] %v3450_v45  ;;  %v3455_v24 = vadd.f32 %v2852_v51, %v560_v38  ;;  %v3452_v59 = vadd.f32 %v2768_v57, %v556_v39  ;;  %v2854_v60 = vpop.f32.mrb[7].mxu1 }
 0x2e4   :  { %3036 = vst [vmem:[%s5512_s5 + $0x38] sm:$0xff] %v3454_v48  ;;  %3045 = vst [vmem:[%s5512_s5 + $0x80] sm:$0xff] %v3451_v49  ;;  %v3456_v61 = vadd.f32 %v2854_v60, %v564_v40 }
 0x2e5   :  { %3047 = vst [vmem:[%s5512_s5 + $0x90] sm:$0xff] %v3455_v24  ;;  %3046 = vst [vmem:[%s5512_s5 + $0x88] sm:$0xff] %v3452_v59 }
 0x2e6   :  { %3048 = vst [vmem:[%s5512_s5 + $0x98] sm:$0xff] %v3456_v61 }
 0x35f   :  { %v2934_v11 = vpop.f32.mrb[8].mxu0 }
 0x360   :  { %v3457_v5 = vadd.f32 %v2934_v11, %v568_v3  ;;  %v3020_v12 = vpop.f32.mrb[8].mxu1  ;;  %v2936_v7 = vpop.f32.mrb[9].mxu0 }
 0x361   :  { %v3461_v13 = vadd.f32 %v3020_v12, %v576_v6  ;;  %v3458_v14 = vadd.f32 %v2936_v7, %v572_v9  ;;  %v3022_v55 = vpop.f32.mrb[9].mxu1  ;;  %v2938_v10 = vpop.f32.mrb[10].mxu0 }
 0x362   :  { %3037 = vst [vmem:[%s5512_s5 + $0x40] sm:$0xff] %v3457_v5  ;;  %v3462_v63 = vadd.f32 %v3022_v55, %v580_v4  ;;  %v3459_v53 = vadd.f32 %v2938_v10, %v568_v3  ;;  %v3024_v54 = vpop.f32.mrb[10].mxu1  ;;  %v2940_v50 = vpop.f32.mrb[11].mxu0 }
 0x363   :  { %3039 = vst [vmem:[%s5512_s5 + $0x50] sm:$0xff] %v3461_v13  ;;  %3038 = vst [vmem:[%s5512_s5 + $0x48] sm:$0xff] %v3458_v14  ;;  %v3463_v52 = vadd.f32 %v3024_v54, %v576_v6  ;;  %v3460_v62 = vadd.f32 %v2940_v50, %v572_v9  ;;  %v3026_v15 = vpop.f32.mrb[11].mxu1 }
 0x364   :  { %3040 = vst [vmem:[%s5512_s5 + $0x58] sm:$0xff] %v3462_v63  ;;  %3049 = vst [vmem:[%s5512_s5 + $0xa0] sm:$0xff] %v3459_v53  ;;  %v3464_v56 = vadd.f32 %v3026_v15, %v580_v4 }
 0x365   :  { %3051 = vst [vmem:[%s5512_s5 + $0xb0] sm:$0xff] %v3463_v52  ;;  %3050 = vst [vmem:[%s5512_s5 + $0xa8] sm:$0xff] %v3460_v62 }
 0x366   :  { %3052 = vst [vmem:[%s5512_s5 + $0xb8] sm:$0xff] %v3464_v56 }

// kernel: transformer_forward.37
= control target key start
LH: loop header
LB: loop body
LE: loop exit
PB: predicated region body
PF: predicated region fallthrough
CT: control target
= control target key end

     0   :  { %s3406_s0 = inlined_call_operand.vmem [shape: f32[16,512], index: 0, kind: input, shape index: {}]   ;;  %s3407_s3 = inlined_call_operand.vmem [shape: bf16[512,1024], index: 3, kind: input, shape index: {}]   ;;  %s3408_s1 = inlined_call_operand.vmem [shape: f32[1,512], index: 1, kind: input, shape index: {}]   ;;  %s3409_s2 = inlined_call_operand.vmem [shape: f32[1,512], index: 2, kind: input, shape index: {}]   ;;  %s3410_s4 = inlined_call_operand.vmem [shape: f32[1,1024], index: 4, kind: input, shape index: {}]   ;;  %s3411_s5 = inlined_call_operand.vmem [shape: f32[16,1024], index: 5, kind: output, shape index: {}]  }
   0x1   :  { %v2412_v0 = vld [vmem:[%s3406_s0] sm:$0xff]  ;;  %v2417_v1 = vld [vmem:[%s3406_s0 + $0x8] sm:$0xff]  ;;  %v2422_v2 = vld [vmem:[%s3406_s0 + $0x10] sm:$0xff] }
   0x2   :  { %v30_v3 = vadd.f32 %v2417_v1, %v2412_v0  ;;  %v2429_v4 = vld [vmem:[%s3406_s0 + $0x20] sm:$0xff]  ;;  %v2434_v5 = vld [vmem:[%s3406_s0 + $0x28] sm:$0xff]  ;;  %v2439_v6 = vld [vmem:[%s3406_s0 + $0x18] sm:$0xff] }
   0x3   :  { %v2444_v7 = vld [vmem:[%s3406_s0 + $0x30] sm:$0xff]  ;;  %v35_v8 = vadd.f32 %v2434_v5, %v2429_v4  ;;  %v2452_v10 = vld [vmem:[%s3406_s0 + $0x38] sm:$0xff]  ;;  %v141_v14 = vld [vmem:[%s3407_s3] sm:$0xff] }
   0x4   :  { %v31_v9 = vadd.f32 %v30_v3, %v2422_v2  ;;  %v145_v15 = vld [vmem:[%s3407_s3 + $0x20] sm:$0xff]  ;;  %v142_v16 = vld [vmem:[%s3407_s3 + $0x8] sm:$0xff] }
   0x5   :  { %v36_v11 = vadd.f32 %v35_v8, %v2444_v7  ;;  %v2088_v17 = vcombine.high %v141_v14, %v145_v15  ;;  %v146_v18 = vld [vmem:[%s3407_s3 + $0x28] sm:$0xff]  ;;  %v2087_v19 = vcombine.low %v141_v14, %v145_v15  ;;  %v149_v20 = vld [vmem:[%s3407_s3 + $0x40] sm:$0xff] }
   0x6   :  { %v32_v12 = vadd.f32 %v31_v9, %v2439_v6  ;;  %v153_v21 = vld [vmem:[%s3407_s3 + $0x60] sm:$0xff]  ;;  %v2090_v22 = vcombine.high %v142_v16, %v146_v18  ;;  %v2089_v23 = vcombine.low %v142_v16, %v146_v18  ;;  %v150_v25 = vld [vmem:[%s3407_s3 + $0x48] sm:$0xff] }
   0x7   :  { %v37_v13 = vadd.f32 %v36_v11, %v2452_v10  ;;  %v2096_v24 = vcombine.high %v149_v20, %v153_v21  ;;  %v154_v26 = vld [vmem:[%s3407_s3 + $0x68] sm:$0xff]  ;;  %v157_v27 = vld [vmem:[%s3407_s3 + $0x80] sm:$0xff]  ;;  %1723 = vmatprep.subr.bf16.mxu0 %v2088_v17  ;;  %v2095_v32 = vcombine.low %v149_v20, %v153_v21 }
   0x8   :  { %33 = vadd.xlane.f32.xlu0 %v32_v12  ;;  %v2098_v28 = vcombine.high %v150_v25, %v154_v26  ;;  %v161_v29 = vld [vmem:[%s3407_s3 + $0xa0] sm:$0xff]  ;;  %v158_v30 = vld [vmem:[%s3407_s3 + $0x88] sm:$0xff]  ;;  %1809 = vmatprep.subr.bf16.mxu1 %v2090_v22  ;;  %v2097_v33 = vcombine.low %v150_v25, %v154_v26 }
   0x9   :  { %v162_v31 = vld [vmem:[%s3407_s3 + $0xa8] sm:$0xff]  ;;  %1724 = vmatpush1.bf16.msra.mxu0 %v2087_v19  ;;  %1810 = vmatpush1.bf16.msra.mxu1 %v2089_v23  ;;  %v2104_v34 = vcombine.high %v157_v27, %v161_v29  ;;  %v165_v36 = vld [vmem:[%s3407_s3 + $0xc0] sm:$0xff]  ;;  %v2103_v40 = vcombine.low %v157_v27, %v161_v29 }
   0xa   :  { %1725 = vmatprep.subr.bf16.mxu0 %v2096_v24  ;;  %1811 = vmatprep.subr.bf16.mxu1 %v2098_v28  ;;  %v2106_v35 = vcombine.high %v158_v30, %v162_v31  ;;  %v169_v37 = vld [vmem:[%s3407_s3 + $0xe0] sm:$0xff]  ;;  %v166_v38 = vld [vmem:[%s3407_s3 + $0xc8] sm:$0xff]  ;;  %v2105_v41 = vcombine.low %v158_v30, %v162_v31 }
   0xb   :  { %v170_v39 = vld [vmem:[%s3407_s3 + $0xe8] sm:$0xff]  ;;  %v2112_v42 = vcombine.high %v165_v36, %v169_v37  ;;  %v173_v44 = vld [vmem:[%s3407_s3 + $0x100] sm:$0xff]  ;;  %v2111_v48 = vcombine.low %v165_v36, %v169_v37 }
   0xc   :  { %38 = vadd.xlane.f32.xlu0 %v37_v13  ;;  %v2114_v43 = vcombine.high %v166_v38, %v170_v39  ;;  %v177_v45 = vld [vmem:[%s3407_s3 + $0x120] sm:$0xff]  ;;  %v174_v46 = vld [vmem:[%s3407_s3 + $0x108] sm:$0xff]  ;;  %v2113_v49 = vcombine.low %v166_v38, %v170_v39 }
   0xd   :  { %1726 = vmatpush1.bf16.msra.mxu0 %v2095_v32  ;;  %1812 = vmatpush1.bf16.msra.mxu1 %v2097_v33  ;;  %v178_v47 = vld [vmem:[%s3407_s3 + $0x128] sm:$0xff]  ;;  %v2120_v50 = vcombine.high %v173_v44, %v177_v45  ;;  %v181_v52 = vld [vmem:[%s3407_s3 + $0x140] sm:$0xff]  ;;  %v2119_v56 = vcombine.low %v173_v44, %v177_v45 }
   0xe   :  { %1727 = vmatprep.subr.bf16.mxu0 %v2104_v34  ;;  %1813 = vmatprep.subr.bf16.mxu1 %v2106_v35  ;;  %v2122_v51 = vcombine.high %v174_v46, %v178_v47  ;;  %v185_v53 = vld [vmem:[%s3407_s3 + $0x160] sm:$0xff]  ;;  %v182_v54 = vld [vmem:[%s3407_s3 + $0x148] sm:$0xff]  ;;  %v2121_v57 = vcombine.low %v174_v46, %v178_v47 }
   0xf   :  { %v186_v55 = vld [vmem:[%s3407_s3 + $0x168] sm:$0xff]  ;;  %v2128_v58 = vcombine.high %v181_v52, %v185_v53  ;;  %v189_v60 = vld [vmem:[%s3407_s3 + $0x180] sm:$0xff]  ;;  %v2127_v3 = vcombine.low %v181_v52, %v185_v53 }
  0x10   :  { %v2130_v59 = vcombine.high %v182_v54, %v186_v55  ;;  %v193_v61 = vld [vmem:[%s3407_s3 + $0x1a0] sm:$0xff]  ;;  %v190_v62 = vld [vmem:[%s3407_s3 + $0x188] sm:$0xff]  ;;  %v2129_v8 = vcombine.low %v182_v54, %v186_v55 }
  0x11   :  { %1728 = vmatpush1.bf16.msra.mxu0 %v2103_v40  ;;  %1814 = vmatpush1.bf16.msra.mxu1 %v2105_v41  ;;  %v194_v63 = vld [vmem:[%s3407_s3 + $0x1a8] sm:$0xff]  ;;  %v2136_v9 = vcombine.high %v189_v60, %v193_v61  ;;  %v197_v12 = vld [vmem:[%s3407_s3 + $0x1c0] sm:$0xff]  ;;  %v2135_v16 = vcombine.low %v189_v60, %v193_v61 }
  0x12   :  { %1729 = vmatprep.subr.bf16.mxu0 %v2112_v42  ;;  %1815 = vmatprep.subr.bf16.mxu1 %v2114_v43  ;;  %v2138_v11 = vcombine.high %v190_v62, %v194_v63  ;;  %v201_v13 = vld [vmem:[%s3407_s3 + $0x1e0] sm:$0xff]  ;;  %v198_v14 = vld [vmem:[%s3407_s3 + $0x1c8] sm:$0xff]  ;;  %v2137_v17 = vcombine.low %v190_v62, %v194_v63 }
  0x13   :  { %v202_v15 = vld [vmem:[%s3407_s3 + $0x1e8] sm:$0xff]  ;;  %v2144_v18 = vcombine.high %v197_v12, %v201_v13  ;;  %v205_v20 = vld [vmem:[%s3407_s3 + $0x200] sm:$0xff]  ;;  %v2143_v24 = vcombine.low %v197_v12, %v201_v13 }
  0x14   :  { %v2146_v19 = vcombine.high %v198_v14, %v202_v15  ;;  %v209_v21 = vld [vmem:[%s3407_s3 + $0x220] sm:$0xff]  ;;  %v206_v22 = vld [vmem:[%s3407_s3 + $0x208] sm:$0xff]  ;;  %v2145_v25 = vcombine.low %v198_v14, %v202_v15 }
  0x15   :  { %1730 = vmatpush1.bf16.msra.mxu0 %v2111_v48  ;;  %1816 = vmatpush1.bf16.msra.mxu1 %v2113_v49  ;;  %v210_v23 = vld [vmem:[%s3407_s3 + $0x228] sm:$0xff]  ;;  %v2152_v26 = vcombine.high %v205_v20, %v209_v21  ;;  %v213_v28 = vld [vmem:[%s3407_s3 + $0x240] sm:$0xff]  ;;  %v2151_v32 = vcombine.low %v205_v20, %v209_v21 }
  0x16   :  { %1731 = vmatprep.subr.bf16.mxu0 %v2120_v50  ;;  %1817 = vmatprep.subr.bf16.mxu1 %v2122_v51  ;;  %v2154_v27 = vcombine.high %v206_v22, %v210_v23  ;;  %v217_v29 = vld [vmem:[%s3407_s3 + $0x260] sm:$0xff]  ;;  %v214_v30 = vld [vmem:[%s3407_s3 + $0x248] sm:$0xff]  ;;  %v2153_v33 = vcombine.low %v206_v22, %v210_v23 }
  0x17   :  { %v218_v31 = vld [vmem:[%s3407_s3 + $0x268] sm:$0xff]  ;;  %v2160_v34 = vcombine.high %v213_v28, %v217_v29  ;;  %v245_v22 = vld [vmem:[%s3407_s3 + $0x340] sm:$0xff] }
  0x18   :  { %v2162_v35 = vcombine.high %v214_v30, %v218_v31  ;;  %v2161_v55 = vcombine.low %v214_v30, %v218_v31  ;;  %v226_v60 = vld [vmem:[%s3407_s3 + $0x2a8] sm:$0xff]  ;;  %v249_v23 = vld [vmem:[%s3407_s3 + $0x360] sm:$0xff] }
  0x19   :  { %1732 = vmatpush1.bf16.msra.mxu0 %v2119_v56  ;;  %1818 = vmatpush1.bf16.msra.mxu1 %v2121_v57  ;;  %v221_v56 = vld [vmem:[%s3407_s3 + $0x280] sm:$0xff]  ;;  %v234_v12 = vld [vmem:[%s3407_s3 + $0x2e8] sm:$0xff] }
  0x1a   :  { %1733 = vmatprep.subr.bf16.mxu0 %v2128_v58  ;;  %1819 = vmatprep.subr.bf16.mxu1 %v2130_v59  ;;  %v225_v57 = vld [vmem:[%s3407_s3 + $0x2a0] sm:$0xff]  ;;  %v222_v58 = vld [vmem:[%s3407_s3 + $0x288] sm:$0xff] }
  0x1b   :  { %v2168_v59 = vcombine.high %v221_v56, %v225_v57  ;;  %v2170_v61 = vcombine.high %v222_v58, %v226_v60  ;;  %v2167_v62 = vcombine.low %v221_v56, %v225_v57  ;;  %v2169_v63 = vcombine.low %v222_v58, %v226_v60  ;;  %v242_v20 = vld [vmem:[%s3407_s3 + $0x328] sm:$0xff]  ;;  %v253_v30 = vld [vmem:[%s3407_s3 + $0x380] sm:$0xff] }
  0x1c   :  { %v257_v31 = vld [vmem:[%s3407_s3 + $0x3a0] sm:$0xff]  ;;  %v84_v58 = vlaneseq }
  0x1d   :  { %1734 = vmatpush1.bf16.msra.mxu0 %v2127_v3  ;;  %1820 = vmatpush1.bf16.msra.mxu1 %v2129_v8  ;;  %v229_v3 = vld [vmem:[%s3407_s3 + $0x2c0] sm:$0xff] }
  0x1e   :  { %1735 = vmatprep.subr.bf16.mxu0 %v2136_v9  ;;  %1821 = vmatprep.subr.bf16.mxu1 %v2138_v11  ;;  %v233_v8 = vld [vmem:[%s3407_s3 + $0x2e0] sm:$0xff]  ;;  %v230_v9 = vld [vmem:[%s3407_s3 + $0x2c8] sm:$0xff] }
  0x1f   :  { %v2176_v11 = vcombine.high %v229_v3, %v233_v8  ;;  %v2178_v13 = vcombine.high %v230_v9, %v234_v12  ;;  %v2175_v14 = vcombine.low %v229_v3, %v233_v8  ;;  %v2177_v15 = vcombine.low %v230_v9, %v234_v12  ;;  %v28_v8 = vld [vmem:[%s3408_s1] sm:$0xf] }
  0x20   :  { %v29_v12 = vld [vmem:[%s3409_s2] sm:$0xf] }
  0x21   :  { %1736 = vmatpush1.bf16.msra.mxu0 %v2135_v16  ;;  %1822 = vmatpush1.bf16.msra.mxu1 %v2137_v17  ;;  %v237_v16 = vld [vmem:[%s3407_s3 + $0x300] sm:$0xff] }
  0x22   :  { %1737 = vmatprep.subr.bf16.mxu0 %v2144_v18  ;;  %1823 = vmatprep.subr.bf16.mxu1 %v2146_v19  ;;  %v241_v17 = vld [vmem:[%s3407_s3 + $0x320] sm:$0xff]  ;;  %v238_v18 = vld [vmem:[%s3407_s3 + $0x308] sm:$0xff] }
  0x23   :  { %v2184_v19 = vcombine.high %v237_v16, %v241_v17  ;;  %v2183_v21 = vcombine.low %v237_v16, %v241_v17 }
  0x25   :  { %1738 = vmatpush1.bf16.msra.mxu0 %v2143_v24  ;;  %1824 = vmatpush1.bf16.msra.mxu1 %v2145_v25  ;;  %v2186_v24 = vcombine.high %v238_v18, %v242_v20  ;;  %v2185_v25 = vcombine.low %v238_v18, %v242_v20 }
  0x26   :  { %1739 = vmatprep.subr.bf16.mxu0 %v2152_v26  ;;  %1825 = vmatprep.subr.bf16.mxu1 %v2154_v27  ;;  %v2192_v26 = vcombine.high %v245_v22, %v249_v23  ;;  %v246_v27 = vld [vmem:[%s3407_s3 + $0x348] sm:$0xff] }
  0x29   :  { %1740 = vmatpush1.bf16.msra.mxu0 %v2151_v32  ;;  %1826 = vmatpush1.bf16.msra.mxu1 %v2153_v33  ;;  %v254_v32 = vld [vmem:[%s3407_s3 + $0x388] sm:$0xff] }
  0x2a   :  { %1741 = vmatprep.subr.bf16.mxu0 %v2160_v34  ;;  %1827 = vmatprep.subr.bf16.mxu1 %v2162_v35  ;;  %v258_v33 = vld [vmem:[%s3407_s3 + $0x3a8] sm:$0xff]  ;;  %v2191_v34 = vcombine.low %v245_v22, %v249_v23 }
  0x2d   :  { %1828 = vmatpush1.bf16.msra.mxu1 %v2161_v55 }
  0x2e   :  { %1829 = vmatprep.subr.bf16.mxu1 %v2170_v61 }
  0x31   :  { %1830 = vmatpush1.bf16.msra.mxu1 %v2169_v63 }
  0x32   :  { %1831 = vmatprep.subr.bf16.mxu1 %v2178_v13 }
  0x35   :  { %1832 = vmatpush1.bf16.msra.mxu1 %v2177_v15 }
  0x36   :  { %1833 = vmatprep.subr.bf16.mxu1 %v2186_v24 }
  0x39   :  { %1834 = vmatpush1.bf16.msra.mxu1 %v2185_v25 }
  0x95   :  { %v34_v36 = vpop.xlane.xlu0 %33 }
  0x96   :  { %v41_v37 = vmul.f32 0.001953125, %v34_v36  ;;  %v2200_v36 = vcombine.high %v253_v30, %v257_v31 }
  0x98   :  { %v2578_v38 = vsub.f32 %v2412_v0, %v41_v37  ;;  %v2581_v39 = vsub.f32 %v2417_v1, %v41_v37  ;;  %v2584_v40 = vsub.f32 %v2422_v2, %v41_v37  ;;  %v2587_v42 = vsub.f32 %v2439_v6, %v41_v37 }
  0x99   :  { %v39_v41 = vpop.xlane.xlu0 %38  ;;  %v2202_v37 = vcombine.high %v254_v32, %v258_v33 }
  0x9a   :  { %v42_v43 = vmul.f32 0.001953125, %v39_v41  ;;  %v51_v44 = vmul.f32 %v2578_v38, %v2578_v38  ;;  %v52_v45 = vmul.f32 %v2581_v39, %v2581_v39  ;;  %v53_v0 = vmul.f32 %v2584_v40, %v2584_v40  ;;  %v261_v41 = vld [vmem:[%s3407_s3 + $0x3c0] sm:$0xff] }
  0x9b   :  { %v54_v47 = vmul.f32 %v2587_v42, %v2587_v42 }
  0x9c   :  { %v2596_v1 = vsub.f32 %v2429_v4, %v42_v43  ;;  %v2599_v2 = vsub.f32 %v2434_v5, %v42_v43  ;;  %v59_v46 = vadd.f32 %v52_v45, %v51_v44  ;;  %v2602_v6 = vsub.f32 %v2444_v7, %v42_v43  ;;  %v262_v44 = vld [vmem:[%s3407_s3 + $0x3c8] sm:$0xff] }
  0x9d   :  { %v2607_v49 = vsub.f32 %v2452_v10, %v42_v43  ;;  %v2159_v10 = vcombine.low %v213_v28, %v217_v29  ;;  %v250_v28 = vld [vmem:[%s3407_s3 + $0x368] sm:$0xff]  ;;  %v265_v43 = vld [vmem:[%s3407_s3 + $0x3e0] sm:$0xff] }
  0x9e   :  { %v60_v48 = vadd.f32 %v59_v46, %v53_v0  ;;  %v55_v50 = vmul.f32 %v2596_v1, %v2596_v1  ;;  %v56_v4 = vmul.f32 %v2599_v2, %v2599_v2  ;;  %v57_v5 = vmul.f32 %v2602_v6, %v2602_v6  ;;  %v266_v45 = vld [vmem:[%s3407_s3 + $0x3e8] sm:$0xff] }
  0x9f   :  { %v58_v7 = vmul.f32 %v2607_v49, %v2607_v49  ;;  %1742 = vmatpush1.bf16.msra.mxu0 %v2159_v10  ;;  %v2194_v29 = vcombine.high %v246_v27, %v250_v28  ;;  %v2193_v35 = vcombine.low %v246_v27, %v250_v28  ;;  %v2199_v0 = vcombine.low %v253_v30, %v257_v31 }
  0xa0   :  { %v61_v51 = vadd.f32 %v60_v48, %v54_v47  ;;  %v64_v52 = vadd.f32 %v56_v4, %v55_v50  ;;  %1743 = vmatprep.subr.bf16.mxu0 %v2168_v59  ;;  %v2201_v46 = vcombine.low %v254_v32, %v258_v33  ;;  %v2208_v47 = vcombine.high %v261_v41, %v265_v43 }
  0xa1   :  { %1835 = vmatprep.subr.bf16.mxu1 %v2194_v29  ;;  %v2210_v48 = vcombine.high %v262_v44, %v266_v45  ;;  %v2207_v50 = vcombine.low %v261_v41, %v265_v43  ;;  %v2209_v4 = vcombine.low %v262_v44, %v266_v45  ;;  %v282_v45 = vld [vmem:[%s3407_s3 + $0x468] sm:$0xff] }
  0xa2   :  { %62 = vadd.xlane.f32.xlu1 %v61_v51  ;;  %v65_v53 = vadd.f32 %v64_v52, %v57_v5  ;;  %1836 = vmatpush1.bf16.msra.mxu1 %v2193_v35  ;;  %v2692_v51 = vld [vmem:[%s3407_s3 + $0x400] sm:$0xff]  ;;  %v2702_v52 = vld [vmem:[%s3407_s3 + $0x408] sm:$0xff] }
  0xa3   :  { %1744 = vmatpush1.bf16.msra.mxu0 %v2167_v62  ;;  %1837 = vmatprep.subr.bf16.mxu1 %v2202_v37  ;;  %v2697_v5 = vld [vmem:[%s3407_s3 + $0x420] sm:$0xff]  ;;  %v2717_v62 = vshrl.u32 %v84_v58, 7  ;;  %v290_v58 = vld [vmem:[%s3407_s3 + $0x4a8] sm:$0xff] }
  0xa4   :  { %v66_v54 = vadd.f32 %v65_v53, %v58_v7  ;;  %1745 = vmatprep.subr.bf16.mxu0 %v2176_v11  ;;  %v2216_v7 = vcombine.high %v2692_v51, %v2697_v5  ;;  %v2709_v53 = vld [vmem:[%s3407_s3 + $0x428] sm:$0xff] }
  0xa5   :  { %v2217_v10 = vcombine.low %v2702_v52, %v2709_v53  ;;  %v2218_v55 = vcombine.high %v2702_v52, %v2709_v53  ;;  %v2720_v3 = vsub.s32 2, %v2717_v62  ;;  %v2726_v9 = vsub.s32 1, %v2717_v62  ;;  %v298_v52 = vld [vmem:[%s3407_s3 + $0x4e8] sm:$0xff] }
  0xa6   :  { %67 = vadd.xlane.f32.xlu1 %v66_v54  ;;  %1838 = vmatpush1.bf16.msra.mxu1 %v2201_v46  ;;  %v2215_v54 = vcombine.low %v2692_v51, %v2697_v5  ;;  %v2729_v11 = vsub.s32 0, %v2717_v62  ;;  %v2737_v16 = vsub.s32 3, %v2717_v62  ;;  %v297_v51 = vld [vmem:[%s3407_s3 + $0x4e0] sm:$0xff]  ;;  %v294_v5 = vld [vmem:[%s3407_s3 + $0x4c8] sm:$0xff] }
  0xa7   :  { %1746 = vmatpush1.bf16.msra.mxu0 %v2175_v14  ;;  %1839 = vmatprep.subr.bf16.mxu1 %v2210_v48  ;;  %v95_v13 = vrot.slane %v28_v8, %v2720_v3  ;;  %v91_v15 = vrot.slane %v28_v8, %v2726_v9  ;;  %v120_v24 = vrot.slane %v29_v12, %v2726_v9 }
  0xa8   :  { %1747 = vmatprep.subr.bf16.mxu0 %v2184_v19  ;;  %v87_v19 = vrot.slane %v28_v8, %v2729_v11  ;;  %v116_v25 = vrot.slane %v29_v12, %v2729_v11  ;;  %v99_v27 = vrot.slane %v28_v8, %v2737_v16 }
  0xaa   :  { %1840 = vmatpush1.bf16.msra.mxu1 %v2209_v4 }
  0xab   :  { %1748 = vmatpush1.bf16.msra.mxu0 %v2183_v21  ;;  %1852 = vmatprep.subr.bf16.mxu1 %v2218_v55  ;;  %v124_v21 = vrot.slane %v29_v12, %v2720_v3 }
  0xac   :  { %1749 = vmatprep.subr.bf16.mxu0 %v2192_v26 }
  0xaf   :  { %1750 = vmatpush1.bf16.msra.mxu0 %v2191_v34 }
  0xb0   :  { %1751 = vmatprep.subr.bf16.mxu0 %v2200_v36  ;;  %v128_v36 = vrot.slane %v29_v12, %v2737_v16  ;;  %v293_v12 = vld [vmem:[%s3407_s3 + $0x4c0] sm:$0xff] }
  0xb3   :  { %1752 = vmatpush1.bf16.msra.mxu0 %v2199_v0 }
  0xb4   :  { %1753 = vmatprep.subr.bf16.mxu0 %v2208_v47 }
  0xb7   :  { %1754 = vmatpush1.bf16.msra.mxu0 %v2207_v50  ;;  %v285_v50 = vld [vmem:[%s3407_s3 + $0x480] sm:$0xff] }
  0xb8   :  { %1766 = vmatprep.subr.bf16.mxu0 %v2216_v7 }
 0x12f   :  { %v63_v56 = vpop.xlane.xlu1 %62 }
 0x130   :  { %v69_v57 = vmul.f32 0.001953125, %v63_v56  ;;  %v289_v56 = vld [vmem:[%s3407_s3 + $0x4a0] sm:$0xff] }
 0x131   :  { %v2231_v53 = vcombine.low %v285_v50, %v289_v56 }
 0x132   :  { %v71_v59 = vadd.f32 1e-05, %v69_v57  ;;  %v286_v57 = vld [vmem:[%s3407_s3 + $0x488] sm:$0xff] }
 0x133   :  { %v68_v60 = vpop.xlane.xlu1 %67  ;;  %v2234_v8 = vcombine.high %v286_v57, %v290_v58 }
 0x134   :  { %2375 = vrsqrt.f32 %v71_v59  ;;  %v70_v61 = vmul.f32 0.001953125, %v68_v60 }
 0x136   :  { %v72_v63 = vadd.f32 1e-05, %v70_v61 }
 0x138   :  { %2377 = vrsqrt.f32 %v72_v63  ;;  %v2232_v63 = vcombine.high %v285_v50, %v289_v56  ;;  %v341_v56 = vld [vmem:[%s3407_s3 + $0x640] sm:$0xff] }
 0x13e   :  { %v2376_v14 = vpop.eup %2375 }
 0x13f   :  { %v76_v17 = vmul.f32 %v2376_v14, %v2581_v39  ;;  %v75_v18 = vmul.f32 %v2376_v14, %v2578_v38  ;;  %v77_v20 = vmul.f32 %v2376_v14, %v2584_v40  ;;  %v78_v26 = vmul.f32 %v2376_v14, %v2587_v42  ;;  %v301_v14 = vld [vmem:[%s3407_s3 + $0x500] sm:$0xff] }
 0x141   :  { %v106_v22 = vmul.f32 %v95_v13, %v77_v20  ;;  %v105_v28 = vmul.f32 %v91_v15, %v76_v17  ;;  %v104_v29 = vmul.f32 %v87_v19, %v75_v18  ;;  %v107_v34 = vmul.f32 %v99_v27, %v78_v26  ;;  %v302_v17 = vld [vmem:[%s3407_s3 + $0x508] sm:$0xff] }
 0x142   :  { %v2378_v23 = vpop.eup %2377  ;;  %v306_v18 = vld [vmem:[%s3407_s3 + $0x528] sm:$0xff]  ;;  %v2241_v20 = vcombine.low %v294_v5, %v298_v52 }
 0x143   :  { %v80_v39 = vmul.f32 %v2378_v23, %v2599_v2  ;;  %v79_v38 = vmul.f32 %v2378_v23, %v2596_v1  ;;  %v82_v40 = vmul.f32 %v2378_v23, %v2607_v49  ;;  %v81_v30 = vmul.f32 %v2378_v23, %v2602_v6  ;;  %v277_v1 = vld [vmem:[%s3407_s3 + $0x440] sm:$0xff]  ;;  %v278_v49 = vld [vmem:[%s3407_s3 + $0x448] sm:$0xff] }
 0x144   :  { %v135_v31 = vadd.f32 %v124_v21, %v106_v22  ;;  %v134_v37 = vadd.f32 %v120_v24, %v105_v28  ;;  %v133_v43 = vadd.f32 %v116_v25, %v104_v29  ;;  %v281_v6 = vld [vmem:[%s3407_s3 + $0x460] sm:$0xff]  ;;  %v136_v48 = vadd.f32 %v128_v36, %v107_v34  ;;  %v314_v26 = vld [vmem:[%s3407_s3 + $0x568] sm:$0xff] }
 0x145   :  { %v109_v32 = vmul.f32 %v91_v15, %v80_v39  ;;  %v108_v33 = vmul.f32 %v87_v19, %v79_v38  ;;  %v111_v35 = vmul.f32 %v99_v27, %v82_v40  ;;  %v110_v42 = vmul.f32 %v95_v13, %v81_v30  ;;  %v305_v15 = vld [vmem:[%s3407_s3 + $0x520] sm:$0xff]  ;;  %v318_v30 = vld [vmem:[%s3407_s3 + $0x588] sm:$0xff] }
 0x146   :  { %v2224_v7 = vcombine.high %v277_v1, %v281_v6  ;;  %v2226_v55 = vcombine.high %v278_v49, %v282_v45  ;;  %v2223_v60 = vcombine.low %v277_v1, %v281_v6  ;;  %v2225_v61 = vcombine.low %v278_v49, %v282_v45  ;;  %v309_v23 = vld [vmem:[%s3407_s3 + $0x540] sm:$0xff]  ;;  %v334_v45 = vld [vmem:[%s3407_s3 + $0x608] sm:$0xff] }
 0x147   :  { %v138_v41 = vadd.f32 %v120_v24, %v109_v32  ;;  %v137_v2 = vadd.f32 %v116_v25, %v108_v33  ;;  %v140_v44 = vadd.f32 %v128_v36, %v111_v35  ;;  %v139_v0 = vadd.f32 %v124_v21, %v110_v42  ;;  %v313_v24 = vld [vmem:[%s3407_s3 + $0x560] sm:$0xff]  ;;  %v310_v25 = vld [vmem:[%s3407_s3 + $0x548] sm:$0xff] }
 0x148   :  { %v2242_v13 = vcombine.high %v294_v5, %v298_v52  ;;  %v2239_v19 = vcombine.low %v293_v12, %v297_v51  ;;  %v2248_v21 = vcombine.high %v301_v14, %v305_v15  ;;  %v2250_v22 = vcombine.high %v302_v17, %v306_v18  ;;  %v317_v29 = vld [vmem:[%s3407_s3 + $0x580] sm:$0xff]  ;;  %v350_v52 = vld [vmem:[%s3407_s3 + $0x688] sm:$0xff] }
 0x149   :  { %v2765_v46 = vpack.c.bf16 %v138_v41, %v134_v37  ;;  %v2767_v47 = vpack.c.bf16 %v137_v2, %v133_v43  ;;  %v2772_v4 = vpack.c.bf16 %v139_v0, %v135_v31  ;;  %v2787_v59 = vpack.c.bf16 %v140_v44, %v136_v48  ;;  %v321_v40 = vld [vmem:[%s3407_s3 + $0x5a0] sm:$0xff]  ;;  %v322_v31 = vld [vmem:[%s3407_s3 + $0x5a8] sm:$0xff] }
 0x14a   :  { %v2247_v27 = vcombine.low %v301_v14, %v305_v15  ;;  %v2249_v39 = vcombine.low %v302_v17, %v306_v18  ;;  %v2256_v28 = vcombine.high %v309_v23, %v313_v24  ;;  %v2258_v38 = vcombine.high %v310_v25, %v314_v26  ;;  %v325_v36 = vld [vmem:[%s3407_s3 + $0x5c0] sm:$0xff]  ;;  %v326_v37 = vld [vmem:[%s3407_s3 + $0x5c8] sm:$0xff] }
 0x14b   :  { %1755 = vmatprep.mubr.bf16.mxu0 %v2765_v46  ;;  %1841 = vmatprep.mubr.bf16.mxu1 %v2765_v46  ;;  %v2255_v32 = vcombine.low %v309_v23, %v313_v24  ;;  %v2257_v33 = vcombine.low %v310_v25, %v314_v26  ;;  %v2264_v34 = vcombine.high %v317_v29, %v321_v40  ;;  %v329_v42 = vld [vmem:[%s3407_s3 + $0x5e0] sm:$0xff]  ;;  %v330_v41 = vld [vmem:[%s3407_s3 + $0x5e8] sm:$0xff] }
 0x14c   :  { %1756 = vmatmul.mubr.bf16.vlgmr.msra.gmra.mrb[0].mxu0 %v2767_v47  ;;  %1842 = vmatmul.mubr.bf16.vlgmr.msra.gmra.mrb[0].mxu1 %v2767_v47  ;;  %v2266_v35 = vcombine.high %v318_v30, %v322_v31  ;;  %v2263_v43 = vcombine.low %v317_v29, %v321_v40  ;;  %v2265_v2 = vcombine.low %v318_v30, %v322_v31  ;;  %v333_v6 = vld [vmem:[%s3407_s3 + $0x600] sm:$0xff]  ;;  %v338_v0 = vld [vmem:[%s3407_s3 + $0x628] sm:$0xff] }
 0x14d   :  { %1767 = vmatpush1.bf16.msra.mxu0 %v2215_v54  ;;  %1853 = vmatpush1.bf16.msra.mxu1 %v2217_v10  ;;  %v2233_v54 = vcombine.low %v286_v57, %v290_v58  ;;  %v2240_v10 = vcombine.high %v293_v12, %v297_v51  ;;  %v2272_v1 = vcombine.high %v325_v36, %v329_v42  ;;  %v337_v49 = vld [vmem:[%s3407_s3 + $0x620] sm:$0xff]  ;;  %v342_v58 = vld [vmem:[%s3407_s3 + $0x648] sm:$0xff] }
 0x14e   :  { %1798 = vmatprep.mubr.bf16.mxu0 %v2787_v59  ;;  %1884 = vmatprep.mubr.bf16.mxu1 %v2787_v59  ;;  %v2274_v44 = vcombine.high %v326_v37, %v330_v41  ;;  %v2271_v48 = vcombine.low %v325_v36, %v329_v42  ;;  %v2273_v50 = vcombine.low %v326_v37, %v330_v41  ;;  %v345_v57 = vld [vmem:[%s3407_s3 + $0x660] sm:$0xff]  ;;  %v358_v18 = vld [vmem:[%s3407_s3 + $0x6c8] sm:$0xff] }
 0x14f   :  { %1768 = vmatprep.subr.bf16.mxu0 %v2224_v7  ;;  %1854 = vmatprep.subr.bf16.mxu1 %v2226_v55  ;;  %v2280_v7 = vcombine.high %v333_v6, %v337_v49  ;;  %v2282_v55 = vcombine.high %v334_v45, %v338_v0  ;;  %v349_v51 = vld [vmem:[%s3407_s3 + $0x680] sm:$0xff]  ;;  %v366_v26 = vld [vmem:[%s3407_s3 + $0x708] sm:$0xff] }
 0x150   :  { %v353_v5 = vld [vmem:[%s3407_s3 + $0x6a0] sm:$0xff]  ;;  %v374_v31 = vld [vmem:[%s3407_s3 + $0x748] sm:$0xff] }
 0x151   :  { %1769 = vmatpush1.bf16.msra.mxu0 %v2223_v60  ;;  %1855 = vmatpush1.bf16.msra.mxu1 %v2225_v61  ;;  %v346_v60 = vld [vmem:[%s3407_s3 + $0x668] sm:$0xff]  ;;  %v2279_v61 = vcombine.low %v333_v6, %v337_v49  ;;  %v357_v15 = vld [vmem:[%s3407_s3 + $0x6c0] sm:$0xff] }
 0x152   :  { %1770 = vmatprep.subr.bf16.mxu0 %v2232_v63  ;;  %1856 = vmatprep.subr.bf16.mxu1 %v2234_v8  ;;  %v2281_v63 = vcombine.low %v334_v45, %v338_v0  ;;  %v2288_v8 = vcombine.high %v341_v56, %v345_v57  ;;  %v2290_v12 = vcombine.high %v342_v58, %v346_v60  ;;  %v361_v17 = vld [vmem:[%s3407_s3 + $0x6e0] sm:$0xff]  ;;  %v382_v41 = vld [vmem:[%s3407_s3 + $0x788] sm:$0xff] }
 0x153   :  { %v365_v24 = vld [vmem:[%s3407_s3 + $0x700] sm:$0xff]  ;;  %v390_v0 = vld [vmem:[%s3407_s3 + $0x7c8] sm:$0xff] }
 0x154   :  { %v369_v25 = vld [vmem:[%s3407_s3 + $0x720] sm:$0xff] }
 0x155   :  { %1771 = vmatpush1.bf16.msra.mxu0 %v2231_v53  ;;  %1857 = vmatpush1.bf16.msra.mxu1 %v2233_v54  ;;  %v354_v53 = vld [vmem:[%s3407_s3 + $0x6a8] sm:$0xff]  ;;  %v2287_v54 = vcombine.low %v341_v56, %v345_v57  ;;  %v373_v40 = vld [vmem:[%s3407_s3 + $0x740] sm:$0xff]  ;;  %v143_v57 = vld [vmem:[%s3407_s3 + $0x10] sm:$0xff] }
 0x156   :  { %1772 = vmatprep.subr.bf16.mxu0 %v2240_v10  ;;  %1858 = vmatprep.subr.bf16.mxu1 %v2242_v13  ;;  %v2289_v10 = vcombine.low %v342_v58, %v346_v60  ;;  %v2296_v13 = vcombine.high %v349_v51, %v353_v5  ;;  %v2298_v14 = vcombine.high %v350_v52, %v354_v53  ;;  %v377_v30 = vld [vmem:[%s3407_s3 + $0x760] sm:$0xff]  ;;  %v147_v58 = vld [vmem:[%s3407_s3 + $0x30] sm:$0xff]  ;;  %v144_v60 = vld [vmem:[%s3407_s3 + $0x18] sm:$0xff] }
 0x157   :  { %v381_v42 = vld [vmem:[%s3407_s3 + $0x780] sm:$0xff] }
 0x158   :  { %v385_v37 = vld [vmem:[%s3407_s3 + $0x7a0] sm:$0xff] }
 0x159   :  { %1773 = vmatpush1.bf16.msra.mxu0 %v2239_v19  ;;  %1859 = vmatpush1.bf16.msra.mxu1 %v2241_v20  ;;  %v362_v19 = vld [vmem:[%s3407_s3 + $0x6e8] sm:$0xff]  ;;  %v2295_v20 = vcombine.low %v349_v51, %v353_v5  ;;  %v389_v49 = vld [vmem:[%s3407_s3 + $0x7c0] sm:$0xff]  ;;  %v151_v5 = vld [vmem:[%s3407_s3 + $0x50] sm:$0xff] }
 0x15a   :  { %1774 = vmatprep.subr.bf16.mxu0 %v2248_v21  ;;  %1860 = vmatprep.subr.bf16.mxu1 %v2250_v22  ;;  %v2297_v21 = vcombine.low %v350_v52, %v354_v53  ;;  %v2304_v22 = vcombine.high %v357_v15, %v361_v17  ;;  %v2306_v23 = vcombine.high %v358_v18, %v362_v19  ;;  %v393_v45 = vld [vmem:[%s3407_s3 + $0x7e0] sm:$0xff]  ;;  %v155_v52 = vld [vmem:[%s3407_s3 + $0x70] sm:$0xff]  ;;  %v152_v53 = vld [vmem:[%s3407_s3 + $0x58] sm:$0xff] }
 0x15d   :  { %1775 = vmatpush1.bf16.msra.mxu0 %v2247_v27  ;;  %1861 = vmatpush1.bf16.msra.mxu1 %v2249_v39  ;;  %v370_v27 = vld [vmem:[%s3407_s3 + $0x728] sm:$0xff]  ;;  %v2303_v39 = vcombine.low %v357_v15, %v361_v17  ;;  %v159_v17 = vld [vmem:[%s3407_s3 + $0x90] sm:$0xff] }
 0x15e   :  { %1776 = vmatprep.subr.bf16.mxu0 %v2256_v28  ;;  %1862 = vmatprep.subr.bf16.mxu1 %v2258_v38  ;;  %v2305_v28 = vcombine.low %v358_v18, %v362_v19  ;;  %v2312_v38 = vcombine.high %v365_v24, %v369_v25  ;;  %v2314_v29 = vcombine.high %v366_v26, %v370_v27  ;;  %v163_v18 = vld [vmem:[%s3407_s3 + $0xb0] sm:$0xff]  ;;  %v160_v19 = vld [vmem:[%s3407_s3 + $0x98] sm:$0xff] }
 0x161   :  { %1777 = vmatpush1.bf16.msra.mxu0 %v2255_v32  ;;  %1863 = vmatpush1.bf16.msra.mxu1 %v2257_v33  ;;  %v378_v32 = vld [vmem:[%s3407_s3 + $0x768] sm:$0xff]  ;;  %v2311_v33 = vcombine.low %v365_v24, %v369_v25  ;;  %v167_v25 = vld [vmem:[%s3407_s3 + $0xd0] sm:$0xff] }
 0x162   :  { %1778 = vmatprep.subr.bf16.mxu0 %v2264_v34  ;;  %1864 = vmatprep.subr.bf16.mxu1 %v2266_v35  ;;  %v2313_v34 = vcombine.low %v366_v26, %v370_v27  ;;  %v2320_v35 = vcombine.high %v373_v40, %v377_v30  ;;  %v2322_v36 = vcombine.high %v374_v31, %v378_v32  ;;  %v171_v26 = vld [vmem:[%s3407_s3 + $0xf0] sm:$0xff]  ;;  %v168_v27 = vld [vmem:[%s3407_s3 + $0xd8] sm:$0xff] }
 0x165   :  { %1779 = vmatpush1.bf16.msra.mxu0 %v2263_v43  ;;  %1865 = vmatpush1.bf16.msra.mxu1 %v2265_v2  ;;  %v386_v43 = vld [vmem:[%s3407_s3 + $0x7a8] sm:$0xff]  ;;  %v2319_v2 = vcombine.low %v373_v40, %v377_v30  ;;  %v175_v40 = vld [vmem:[%s3407_s3 + $0x110] sm:$0xff] }
 0x166   :  { %1780 = vmatprep.subr.bf16.mxu0 %v2272_v1  ;;  %1866 = vmatprep.subr.bf16.mxu1 %v2274_v44  ;;  %v2321_v1 = vcombine.low %v374_v31, %v378_v32  ;;  %v2328_v44 = vcombine.high %v381_v42, %v385_v37  ;;  %v2330_v6 = vcombine.high %v382_v41, %v386_v43  ;;  %v179_v30 = vld [vmem:[%s3407_s3 + $0x130] sm:$0xff]  ;;  %v176_v31 = vld [vmem:[%s3407_s3 + $0x118] sm:$0xff] }
 0x167   :  { %v180_v32 = vld [vmem:[%s3407_s3 + $0x138] sm:$0xff] }
 0x169   :  { %1781 = vmatpush1.bf16.msra.mxu0 %v2271_v48  ;;  %1867 = vmatpush1.bf16.msra.mxu1 %v2273_v50  ;;  %v394_v48 = vld [vmem:[%s3407_s3 + $0x7e8] sm:$0xff]  ;;  %v2327_v50 = vcombine.low %v381_v42, %v385_v37  ;;  %v183_v42 = vld [vmem:[%s3407_s3 + $0x150] sm:$0xff] }
 0x16a   :  { %1782 = vmatprep.subr.bf16.mxu0 %v2280_v7  ;;  %1868 = vmatprep.subr.bf16.mxu1 %v2282_v55  ;;  %v2329_v7 = vcombine.low %v382_v41, %v386_v43  ;;  %v2336_v55 = vcombine.high %v389_v49, %v393_v45  ;;  %v2338_v56 = vcombine.high %v390_v0, %v394_v48  ;;  %v187_v37 = vld [vmem:[%s3407_s3 + $0x170] sm:$0xff]  ;;  %v184_v41 = vld [vmem:[%s3407_s3 + $0x158] sm:$0xff] }
 0x16b   :  { %v188_v43 = vld [vmem:[%s3407_s3 + $0x178] sm:$0xff] }
 0x16d   :  { %1783 = vmatpush1.bf16.msra.mxu0 %v2279_v61  ;;  %1869 = vmatpush1.bf16.msra.mxu1 %v2281_v63  ;;  %v148_v61 = vld [vmem:[%s3407_s3 + $0x38] sm:$0xff]  ;;  %v2335_v63 = vcombine.low %v389_v49, %v393_v45  ;;  %v191_v49 = vld [vmem:[%s3407_s3 + $0x190] sm:$0xff] }
 0x16e   :  { %1784 = vmatprep.subr.bf16.mxu0 %v2288_v8  ;;  %1870 = vmatprep.subr.bf16.mxu1 %v2290_v12  ;;  %v2337_v8 = vcombine.low %v390_v0, %v394_v48  ;;  %v2092_v12 = vcombine.high %v143_v57, %v147_v58  ;;  %v2094_v51 = vcombine.high %v144_v60, %v148_v61  ;;  %v195_v45 = vld [vmem:[%s3407_s3 + $0x1b0] sm:$0xff]  ;;  %v192_v0 = vld [vmem:[%s3407_s3 + $0x198] sm:$0xff] }
 0x16f   :  { %v196_v48 = vld [vmem:[%s3407_s3 + $0x1b8] sm:$0xff] }
 0x171   :  { %1785 = vmatpush1.bf16.msra.mxu0 %v2287_v54  ;;  %1871 = vmatpush1.bf16.msra.mxu1 %v2289_v10  ;;  %v156_v54 = vld [vmem:[%s3407_s3 + $0x78] sm:$0xff]  ;;  %v2091_v10 = vcombine.low %v143_v57, %v147_v58  ;;  %v199_v57 = vld [vmem:[%s3407_s3 + $0x1d0] sm:$0xff] }
 0x172   :  { %1786 = vmatprep.subr.bf16.mxu0 %v2296_v13  ;;  %1872 = vmatprep.subr.bf16.mxu1 %v2298_v14  ;;  %v2093_v13 = vcombine.low %v144_v60, %v148_v61  ;;  %v2100_v14 = vcombine.high %v151_v5, %v155_v52  ;;  %v2102_v15 = vcombine.high %v152_v53, %v156_v54  ;;  %v203_v58 = vld [vmem:[%s3407_s3 + $0x1f0] sm:$0xff]  ;;  %v200_v60 = vld [vmem:[%s3407_s3 + $0x1d8] sm:$0xff] }
 0x173   :  { %v204_v61 = vld [vmem:[%s3407_s3 + $0x1f8] sm:$0xff] }
 0x175   :  { %1787 = vmatpush1.bf16.msra.mxu0 %v2295_v20  ;;  %1873 = vmatpush1.bf16.msra.mxu1 %v2297_v21  ;;  %v164_v20 = vld [vmem:[%s3407_s3 + $0xb8] sm:$0xff]  ;;  %v2099_v21 = vcombine.low %v151_v5, %v155_v52  ;;  %v207_v5 = vld [vmem:[%s3407_s3 + $0x210] sm:$0xff] }
 0x176   :  { %1788 = vmatprep.subr.bf16.mxu0 %v2304_v22  ;;  %1874 = vmatprep.subr.bf16.mxu1 %v2306_v23  ;;  %v2101_v22 = vcombine.low %v152_v53, %v156_v54  ;;  %v2108_v23 = vcombine.high %v159_v17, %v163_v18  ;;  %v2110_v24 = vcombine.high %v160_v19, %v164_v20  ;;  %v211_v52 = vld [vmem:[%s3407_s3 + $0x230] sm:$0xff]  ;;  %v208_v53 = vld [vmem:[%s3407_s3 + $0x218] sm:$0xff] }
 0x177   :  { %v212_v54 = vld [vmem:[%s3407_s3 + $0x238] sm:$0xff] }
 0x179   :  { %1789 = vmatpush1.bf16.msra.mxu0 %v2303_v39  ;;  %1875 = vmatpush1.bf16.msra.mxu1 %v2305_v28  ;;  %v2107_v39 = vcombine.low %v159_v17, %v163_v18  ;;  %v2109_v28 = vcombine.low %v160_v19, %v164_v20  ;;  %v215_v17 = vld [vmem:[%s3407_s3 + $0x250] sm:$0xff]  ;;  %v216_v19 = vld [vmem:[%s3407_s3 + $0x258] sm:$0xff] }
 0x17a   :  { %1790 = vmatprep.subr.bf16.mxu0 %v2312_v38  ;;  %1876 = vmatprep.subr.bf16.mxu1 %v2314_v29  ;;  %v2116_v38 = vcombine.high %v167_v25, %v171_v26  ;;  %v219_v18 = vld [vmem:[%s3407_s3 + $0x270] sm:$0xff]  ;;  %v220_v20 = vld [vmem:[%s3407_s3 + $0x278] sm:$0xff] }
 0x17d   :  { %1791 = vmatpush1.bf16.msra.mxu0 %v2311_v33  ;;  %1877 = vmatpush1.bf16.msra.mxu1 %v2313_v34  ;;  %v2115_v33 = vcombine.low %v167_v25, %v171_v26  ;;  %v223_v25 = vld [vmem:[%s3407_s3 + $0x290] sm:$0xff] }
 0x17e   :  { %1792 = vmatprep.subr.bf16.mxu0 %v2320_v35  ;;  %1878 = vmatprep.subr.bf16.mxu1 %v2322_v36  ;;  %v2124_v35 = vcombine.high %v175_v40, %v179_v30  ;;  %v2126_v36 = vcombine.high %v176_v31, %v180_v32  ;;  %v227_v26 = vld [vmem:[%s3407_s3 + $0x2b0] sm:$0xff] }
 0x181   :  { %1793 = vmatpush1.bf16.msra.mxu0 %v2319_v2  ;;  %1879 = vmatpush1.bf16.msra.mxu1 %v2321_v1  ;;  %v2123_v2 = vcombine.low %v175_v40, %v179_v30  ;;  %v2125_v1 = vcombine.low %v176_v31, %v180_v32  ;;  %v231_v40 = vld [vmem:[%s3407_s3 + $0x2d0] sm:$0xff]  ;;  %v232_v31 = vld [vmem:[%s3407_s3 + $0x2d8] sm:$0xff] }
 0x182   :  { %1794 = vmatprep.subr.bf16.mxu0 %v2328_v44  ;;  %1880 = vmatprep.subr.bf16.mxu1 %v2330_v6  ;;  %v2132_v44 = vcombine.high %v183_v42, %v187_v37  ;;  %v2134_v6 = vcombine.high %v184_v41, %v188_v43  ;;  %v235_v30 = vld [vmem:[%s3407_s3 + $0x2f0] sm:$0xff]  ;;  %v236_v32 = vld [vmem:[%s3407_s3 + $0x2f8] sm:$0xff] }
 0x185   :  { %1795 = vmatpush1.bf16.msra.mxu0 %v2327_v50  ;;  %1881 = vmatpush1.bf16.msra.mxu1 %v2329_v7  ;;  %v2131_v50 = vcombine.low %v183_v42, %v187_v37  ;;  %v2133_v7 = vcombine.low %v184_v41, %v188_v43  ;;  %v239_v42 = vld [vmem:[%s3407_s3 + $0x310] sm:$0xff]  ;;  %v240_v41 = vld [vmem:[%s3407_s3 + $0x318] sm:$0xff] }
 0x186   :  { %1796 = vmatprep.subr.bf16.mxu0 %v2336_v55  ;;  %1882 = vmatprep.subr.bf16.mxu1 %v2338_v56  ;;  %v2140_v55 = vcombine.high %v191_v49, %v195_v45  ;;  %v2142_v56 = vcombine.high %v192_v0, %v196_v48  ;;  %v243_v37 = vld [vmem:[%s3407_s3 + $0x330] sm:$0xff]  ;;  %v244_v43 = vld [vmem:[%s3407_s3 + $0x338] sm:$0xff] }
 0x189   :  { %1797 = vmatpush1.bf16.msra.mxu0 %v2335_v63  ;;  %1883 = vmatpush1.bf16.msra.mxu1 %v2337_v8  ;;  %v2139_v63 = vcombine.low %v191_v49, %v195_v45  ;;  %v2141_v8 = vcombine.low %v192_v0, %v196_v48  ;;  %v247_v49 = vld [vmem:[%s3407_s3 + $0x350] sm:$0xff]  ;;  %v248_v0 = vld [vmem:[%s3407_s3 + $0x358] sm:$0xff] }
 0x18a   :  { %1895 = vmatprep.subr.bf16.mxu0 %v2092_v12  ;;  %1981 = vmatprep.subr.bf16.mxu1 %v2094_v51  ;;  %v2148_v12 = vcombine.high %v199_v57, %v203_v58  ;;  %v2150_v51 = vcombine.high %v200_v60, %v204_v61  ;;  %v251_v45 = vld [vmem:[%s3407_s3 + $0x370] sm:$0xff]  ;;  %v252_v48 = vld [vmem:[%s3407_s3 + $0x378] sm:$0xff] }
 0x18c   :  { %1799 = vmatmul.mubr.bf16.vlgmr.msra.gmra.mrb[0].mxu0 %v2772_v4  ;;  %1885 = vmatmul.mubr.bf16.vlgmr.msra.gmra.mrb[0].mxu1 %v2772_v4 }
 0x18d   :  { %1896 = vmatpush1.bf16.msra.mxu0 %v2091_v10  ;;  %1927 = vmatprep.mubr.bf16.mxu0 %v2765_v46  ;;  %v2147_v10 = vcombine.low %v199_v57, %v203_v58  ;;  %v255_v57 = vld [vmem:[%s3407_s3 + $0x390] sm:$0xff] }
 0x18e   :  { %1982 = vmatpush1.bf16.msra.mxu1 %v2093_v13  ;;  %2013 = vmatprep.mubr.bf16.mxu1 %v2765_v46  ;;  %v172_v46 = vld [vmem:[%s3407_s3 + $0xf8] sm:$0xff]  ;;  %v2149_v13 = vcombine.low %v200_v60, %v204_v61  ;;  %v259_v58 = vld [vmem:[%s3407_s3 + $0x3b0] sm:$0xff] }
 0x18f   :  { %1897 = vmatprep.subr.bf16.mxu0 %v2100_v14  ;;  %1983 = vmatprep.subr.bf16.mxu1 %v2102_v15  ;;  %v2118_v29 = vcombine.high %v168_v27, %v172_v46  ;;  %v2117_v34 = vcombine.low %v168_v27, %v172_v46  ;;  %v2156_v14 = vcombine.high %v207_v5, %v211_v52  ;;  %v224_v27 = vld [vmem:[%s3407_s3 + $0x298] sm:$0xff] }
 0x190   :  { %v2158_v15 = vcombine.high %v208_v53, %v212_v54  ;;  %v228_v46 = vld [vmem:[%s3407_s3 + $0x2b8] sm:$0xff] }
 0x191   :  { %1898 = vmatpush1.bf16.msra.mxu0 %v2099_v21  ;;  %v2155_v21 = vcombine.low %v207_v5, %v211_v52  ;;  %v256_v60 = vld [vmem:[%s3407_s3 + $0x398] sm:$0xff]  ;;  %v263_v5 = vld [vmem:[%s3407_s3 + $0x3d0] sm:$0xff] }
 0x192   :  { %1984 = vmatpush1.bf16.msra.mxu1 %v2101_v22  ;;  %1899 = vmatprep.subr.bf16.mxu0 %v2108_v23  ;;  %v2157_v22 = vcombine.low %v208_v53, %v212_v54  ;;  %v2164_v23 = vcombine.high %v215_v17, %v219_v18  ;;  %v260_v61 = vld [vmem:[%s3407_s3 + $0x3b8] sm:$0xff]  ;;  %v267_v52 = vld [vmem:[%s3407_s3 + $0x3f0] sm:$0xff] }
 0x193   :  { %1985 = vmatprep.subr.bf16.mxu1 %v2110_v24  ;;  %v2166_v24 = vcombine.high %v216_v19, %v220_v20  ;;  %v264_v53 = vld [vmem:[%s3407_s3 + $0x3d8] sm:$0xff] }
 0x194   :  { %v268_v54 = vld [vmem:[%s3407_s3 + $0x3f8] sm:$0xff] }
 0x195   :  { %1900 = vmatpush1.bf16.msra.mxu0 %v2107_v39  ;;  %v2163_v39 = vcombine.low %v215_v17, %v219_v18  ;;  %v271_v17 = vld [vmem:[%s3407_s3 + $0x410] sm:$0xff] }
 0x196   :  { %1986 = vmatpush1.bf16.msra.mxu1 %v2109_v28  ;;  %1901 = vmatprep.subr.bf16.mxu0 %v2116_v38  ;;  %v2165_v28 = vcombine.low %v216_v19, %v220_v20  ;;  %v2172_v38 = vcombine.high %v223_v25, %v227_v26  ;;  %v275_v18 = vld [vmem:[%s3407_s3 + $0x430] sm:$0xff]  ;;  %v272_v19 = vld [vmem:[%s3407_s3 + $0x418] sm:$0xff] }
 0x197   :  { %1987 = vmatprep.subr.bf16.mxu1 %v2118_v29  ;;  %v2174_v29 = vcombine.high %v224_v27, %v228_v46  ;;  %v276_v20 = vld [vmem:[%s3407_s3 + $0x438] sm:$0xff] }
 0x199   :  { %1902 = vmatpush1.bf16.msra.mxu0 %v2115_v33  ;;  %v2171_v33 = vcombine.low %v223_v25, %v227_v26  ;;  %v279_v25 = vld [vmem:[%s3407_s3 + $0x450] sm:$0xff] }
 0x19a   :  { %1988 = vmatpush1.bf16.msra.mxu1 %v2117_v34  ;;  %1903 = vmatprep.subr.bf16.mxu0 %v2124_v35  ;;  %v2173_v34 = vcombine.low %v224_v27, %v228_v46  ;;  %v2180_v35 = vcombine.high %v231_v40, %v235_v30  ;;  %v283_v26 = vld [vmem:[%s3407_s3 + $0x470] sm:$0xff]  ;;  %v2219_v27 = vcombine.low %v271_v17, %v275_v18  ;;  %v280_v46 = vld [vmem:[%s3407_s3 + $0x458] sm:$0xff] }
 0x19b   :  { %1989 = vmatprep.subr.bf16.mxu1 %v2126_v36  ;;  %v2182_v36 = vcombine.high %v232_v31, %v236_v32 }
 0x19d   :  { %1904 = vmatpush1.bf16.msra.mxu0 %v2123_v2  ;;  %v2179_v2 = vcombine.low %v231_v40, %v235_v30  ;;  %v291_v40 = vld [vmem:[%s3407_s3 + $0x4b0] sm:$0xff] }
 0x19e   :  { %1990 = vmatpush1.bf16.msra.mxu1 %v2125_v1  ;;  %1905 = vmatprep.subr.bf16.mxu0 %v2132_v44  ;;  %v2181_v1 = vcombine.low %v232_v31, %v236_v32  ;;  %v2188_v44 = vcombine.high %v239_v42, %v243_v37  ;;  %v288_v31 = vld [vmem:[%s3407_s3 + $0x498] sm:$0xff] }
 0x19f   :  { %1991 = vmatprep.subr.bf16.mxu1 %v2134_v6  ;;  %v2190_v6 = vcombine.high %v240_v41, %v244_v43  ;;  %v292_v32 = vld [vmem:[%s3407_s3 + $0x4b8] sm:$0xff] }
 0x1a1   :  { %1906 = vmatpush1.bf16.msra.mxu0 %v2131_v50  ;;  %v2187_v50 = vcombine.low %v239_v42, %v243_v37  ;;  %v295_v42 = vld [vmem:[%s3407_s3 + $0x4d0] sm:$0xff] }
 0x1a2   :  { %1992 = vmatpush1.bf16.msra.mxu1 %v2133_v7  ;;  %1907 = vmatprep.subr.bf16.mxu0 %v2140_v55  ;;  %v2189_v7 = vcombine.low %v240_v41, %v244_v43  ;;  %v2196_v55 = vcombine.high %v247_v49, %v251_v45  ;;  %v299_v37 = vld [vmem:[%s3407_s3 + $0x4f0] sm:$0xff]  ;;  %v300_v41 = vld [vmem:[%s3407_s3 + $0x4f8] sm:$0xff]  ;;  %v2237_v43 = vcombine.low %v288_v31, %v292_v32 }
 0x1a3   :  { %1993 = vmatprep.subr.bf16.mxu1 %v2142_v56  ;;  %v2198_v56 = vcombine.high %v248_v0, %v252_v48 }
 0x1a5   :  { %1908 = vmatpush1.bf16.msra.mxu0 %v2139_v63  ;;  %v2195_v63 = vcombine.low %v247_v49, %v251_v45  ;;  %v304_v49 = vld [vmem:[%s3407_s3 + $0x518] sm:$0xff] }
 0x1a6   :  { %1994 = vmatpush1.bf16.msra.mxu1 %v2141_v8  ;;  %1909 = vmatprep.subr.bf16.mxu0 %v2148_v12  ;;  %v2197_v8 = vcombine.low %v248_v0, %v252_v48  ;;  %v2204_v12 = vcombine.high %v255_v57, %v259_v58  ;;  %v308_v45 = vld [vmem:[%s3407_s3 + $0x538] sm:$0xff]  ;;  %v2243_v0 = vcombine.low %v295_v42, %v299_v37 }
 0x1a7   :  { %1995 = vmatprep.subr.bf16.mxu1 %v2150_v51  ;;  %v2206_v51 = vcombine.high %v256_v60, %v260_v61 }
 0x1a9   :  { %1910 = vmatpush1.bf16.msra.mxu0 %v2147_v10  ;;  %v2203_v10 = vcombine.low %v255_v57, %v259_v58  ;;  %v312_v57 = vld [vmem:[%s3407_s3 + $0x558] sm:$0xff] }
 0x1aa   :  { %1996 = vmatpush1.bf16.msra.mxu1 %v2149_v13  ;;  %1911 = vmatprep.subr.bf16.mxu0 %v2156_v14  ;;  %v2205_v13 = vcombine.low %v256_v60, %v260_v61  ;;  %v2212_v14 = vcombine.high %v263_v5, %v267_v52  ;;  %v316_v58 = vld [vmem:[%s3407_s3 + $0x578] sm:$0xff]  ;;  %v2253_v61 = vcombine.low %v304_v49, %v308_v45 }
 0x1ab   :  { %1997 = vmatprep.subr.bf16.mxu1 %v2158_v15  ;;  %v2214_v15 = vcombine.high %v264_v53, %v268_v54 }
 0x1ad   :  { %1912 = vmatpush1.bf16.msra.mxu0 %v2155_v21  ;;  %v2211_v21 = vcombine.low %v263_v5, %v267_v52  ;;  %v320_v5 = vld [vmem:[%s3407_s3 + $0x598] sm:$0xff] }
 0x1ae   :  { %1998 = vmatpush1.bf16.msra.mxu1 %v2157_v22  ;;  %1913 = vmatprep.subr.bf16.mxu0 %v2164_v23  ;;  %v2213_v22 = vcombine.low %v264_v53, %v268_v54  ;;  %v2220_v23 = vcombine.high %v271_v17, %v275_v18  ;;  %v324_v52 = vld [vmem:[%s3407_s3 + $0x5b8] sm:$0xff]  ;;  %v2261_v54 = vcombine.low %v312_v57, %v316_v58 }
 0x1af   :  { %1999 = vmatprep.subr.bf16.mxu1 %v2166_v24  ;;  %v2222_v24 = vcombine.high %v272_v19, %v276_v20  ;;  %v328_v17 = vld [vmem:[%s3407_s3 + $0x5d8] sm:$0xff] }
 0x1b0   :  { %v332_v18 = vld [vmem:[%s3407_s3 + $0x5f8] sm:$0xff] }
 0x1b1   :  { %1914 = vmatpush1.bf16.msra.mxu0 %v2163_v39  ;;  %v284_v39 = vld [vmem:[%s3407_s3 + $0x478] sm:$0xff] }
 0x1b2   :  { %2000 = vmatpush1.bf16.msra.mxu1 %v2165_v28  ;;  %1915 = vmatprep.subr.bf16.mxu0 %v2172_v38  ;;  %v2221_v28 = vcombine.low %v272_v19, %v276_v20  ;;  %v2228_v38 = vcombine.high %v279_v25, %v283_v26  ;;  %v2230_v30 = vcombine.high %v280_v46, %v284_v39 }
 0x1b3   :  { %2001 = vmatprep.subr.bf16.mxu1 %v2174_v29  ;;  %v287_v29 = vld [vmem:[%s3407_s3 + $0x490] sm:$0xff]  ;;  %v2269_v20 = vcombine.low %v320_v5, %v324_v52 }
 0x1b5   :  { %1916 = vmatpush1.bf16.msra.mxu0 %v2171_v33  ;;  %v2227_v33 = vcombine.low %v279_v25, %v283_v26  ;;  %v336_v25 = vld [vmem:[%s3407_s3 + $0x618] sm:$0xff] }
 0x1b6   :  { %2002 = vmatpush1.bf16.msra.mxu1 %v2173_v34  ;;  %1917 = vmatprep.subr.bf16.mxu0 %v2180_v35  ;;  %v2229_v34 = vcombine.low %v280_v46, %v284_v39  ;;  %v2236_v35 = vcombine.high %v287_v29, %v291_v40  ;;  %v340_v26 = vld [vmem:[%s3407_s3 + $0x638] sm:$0xff]  ;;  %v2277_v46 = vcombine.low %v328_v17, %v332_v18 }
 0x1b7   :  { %2003 = vmatprep.subr.bf16.mxu1 %v2182_v36  ;;  %v2238_v36 = vcombine.high %v288_v31, %v292_v32  ;;  %v2285_v32 = vcombine.low %v336_v25, %v340_v26 }
 0x1b9   :  { %1918 = vmatpush1.bf16.msra.mxu0 %v2179_v2  ;;  %v2244_v2 = vcombine.high %v295_v42, %v299_v37  ;;  %v352_v42 = vld [vmem:[%s3407_s3 + $0x698] sm:$0xff] }
 0x1ba   :  { %2004 = vmatpush1.bf16.msra.mxu1 %v2181_v1  ;;  %1919 = vmatprep.subr.bf16.mxu0 %v2188_v44  ;;  %v303_v44 = vld [vmem:[%s3407_s3 + $0x510] sm:$0xff]  ;;  %v356_v37 = vld [vmem:[%s3407_s3 + $0x6b8] sm:$0xff] }
 0x1bb   :  { %2005 = vmatprep.subr.bf16.mxu1 %v2190_v6  ;;  %v307_v6 = vld [vmem:[%s3407_s3 + $0x530] sm:$0xff] }
 0x1bc   :  { %v2251_v60 = vcombine.low %v303_v44, %v307_v6 }
 0x1bd   :  { %1920 = vmatpush1.bf16.msra.mxu0 %v2187_v50  ;;  %v2252_v50 = vcombine.high %v303_v44, %v307_v6  ;;  %v360_v44 = vld [vmem:[%s3407_s3 + $0x6d8] sm:$0xff] }
 0x1be   :  { %2006 = vmatpush1.bf16.msra.mxu1 %v2189_v7  ;;  %1921 = vmatprep.subr.bf16.mxu0 %v2196_v55  ;;  %v2254_v7 = vcombine.high %v304_v49, %v308_v45  ;;  %v311_v55 = vld [vmem:[%s3407_s3 + $0x550] sm:$0xff]  ;;  %v364_v6 = vld [vmem:[%s3407_s3 + $0x6f8] sm:$0xff]  ;;  %v2301_v45 = vcombine.low %v352_v42, %v356_v37 }
 0x1bf   :  { %2007 = vmatprep.subr.bf16.mxu1 %v2198_v56  ;;  %v315_v56 = vld [vmem:[%s3407_s3 + $0x570] sm:$0xff] }
 0x1c0   :  { %v2259_v53 = vcombine.low %v311_v55, %v315_v56 }
 0x1c1   :  { %1922 = vmatpush1.bf16.msra.mxu0 %v2195_v63  ;;  %v2260_v63 = vcombine.high %v311_v55, %v315_v56  ;;  %v368_v55 = vld [vmem:[%s3407_s3 + $0x718] sm:$0xff] }
 0x1c2   :  { %2008 = vmatpush1.bf16.msra.mxu1 %v2197_v8  ;;  %1923 = vmatprep.subr.bf16.mxu0 %v2204_v12  ;;  %v2262_v8 = vcombine.high %v312_v57, %v316_v58  ;;  %v319_v12 = vld [vmem:[%s3407_s3 + $0x590] sm:$0xff]  ;;  %v372_v56 = vld [vmem:[%s3407_s3 + $0x738] sm:$0xff]  ;;  %v2309_v58 = vcombine.low %v360_v44, %v364_v6 }
 0x1c3   :  { %2009 = vmatprep.subr.bf16.mxu1 %v2206_v51  ;;  %v323_v51 = vld [vmem:[%s3407_s3 + $0x5b0] sm:$0xff] }
 0x1c4   :  { %v2267_v19 = vcombine.low %v319_v12, %v323_v51 }
 0x1c5   :  { %1924 = vmatpush1.bf16.msra.mxu0 %v2203_v10  ;;  %v2268_v10 = vcombine.high %v319_v12, %v323_v51  ;;  %v376_v12 = vld [vmem:[%s3407_s3 + $0x758] sm:$0xff] }
 0x1c6   :  { %2010 = vmatpush1.bf16.msra.mxu1 %v2205_v13  ;;  %1925 = vmatprep.subr.bf16.mxu0 %v2212_v14  ;;  %v2270_v13 = vcombine.high %v320_v5, %v324_v52  ;;  %v327_v14 = vld [vmem:[%s3407_s3 + $0x5d0] sm:$0xff]  ;;  %v380_v51 = vld [vmem:[%s3407_s3 + $0x778] sm:$0xff]  ;;  %v2317_v52 = vcombine.low %v368_v55, %v372_v56 }
 0x1c7   :  { %2011 = vmatprep.subr.bf16.mxu1 %v2214_v15  ;;  %v331_v15 = vld [vmem:[%s3407_s3 + $0x5f0] sm:$0xff] }
 0x1c9   :  { %1926 = vmatpush1.bf16.msra.mxu0 %v2211_v21  ;;  %v2276_v21 = vcombine.high %v327_v14, %v331_v15 }
 0x1ca   :  { %2012 = vmatpush1.bf16.msra.mxu1 %v2213_v22  ;;  %1938 = vmatprep.subr.bf16.mxu0 %v2220_v23  ;;  %v2278_v22 = vcombine.high %v328_v17, %v332_v18  ;;  %v335_v23 = vld [vmem:[%s3407_s3 + $0x610] sm:$0xff]  ;;  %v2325_v18 = vcombine.low %v376_v12, %v380_v51 }
 0x1cb   :  { %2024 = vmatprep.subr.bf16.mxu1 %v2222_v24  ;;  %v339_v24 = vld [vmem:[%s3407_s3 + $0x630] sm:$0xff] }
 0x1cc   :  { %1928 = vmatmul.mubr.bf16.vlgmr.msra.gmra.mrb[4].mxu0 %v2767_v47  ;;  %v2284_v39 = vcombine.high %v335_v23, %v339_v24  ;;  %v2283_v31 = vcombine.low %v335_v23, %v339_v24  ;;  %v392_v23 = vld [vmem:[%s3407_s3 + $0x7d8] sm:$0xff] }
 0x1cd   :  { %2014 = vmatmul.mubr.bf16.vlgmr.msra.gmra.mrb[4].mxu1 %v2767_v47  ;;  %1939 = vmatpush1.bf16.msra.mxu0 %v2219_v27  ;;  %v296_v47 = vld [vmem:[%s3407_s3 + $0x4d8] sm:$0xff]  ;;  %v2275_v27 = vcombine.low %v327_v14, %v331_v15 }
 0x1ce   :  { %1970 = vmatprep.mubr.bf16.mxu0 %v2787_v59  ;;  %2025 = vmatpush1.bf16.msra.mxu1 %v2221_v28  ;;  %v2246_v1 = vcombine.high %v296_v47, %v300_v41  ;;  %v2245_v48 = vcombine.low %v296_v47, %v300_v41  ;;  %v2286_v28 = vcombine.high %v336_v25, %v340_v26  ;;  %v384_v14 = vld [vmem:[%s3407_s3 + $0x798] sm:$0xff] }
 0x1cf   :  { %2056 = vmatprep.mubr.bf16.mxu1 %v2787_v59  ;;  %1940 = vmatprep.subr.bf16.mxu0 %v2228_v38  ;;  %v2235_v59 = vcombine.low %v287_v29, %v291_v40  ;;  %v343_v38 = vld [vmem:[%s3407_s3 + $0x650] sm:$0xff]  ;;  %v344_v40 = vld [vmem:[%s3407_s3 + $0x658] sm:$0xff] }
 0x1d0   :  { %2026 = vmatprep.subr.bf16.mxu1 %v2230_v30  ;;  %v347_v29 = vld [vmem:[%s3407_s3 + $0x670] sm:$0xff]  ;;  %v348_v30 = vld [vmem:[%s3407_s3 + $0x678] sm:$0xff] }
 0x1d1   :  { %1941 = vmatpush1.bf16.msra.mxu0 %v2227_v33  ;;  %v2292_v33 = vcombine.high %v343_v38, %v347_v29  ;;  %v2291_v47 = vcombine.low %v343_v38, %v347_v29  ;;  %v2293_v41 = vcombine.low %v344_v40, %v348_v30  ;;  %v388_v15 = vld [vmem:[%s3407_s3 + $0x7b8] sm:$0xff]  ;;  %v401_v38 = vld [vmem:[%s3410_s4] sm:$0xff] }
 0x1d2   :  { %2027 = vmatpush1.bf16.msra.mxu1 %v2229_v34  ;;  %1942 = vmatprep.subr.bf16.mxu0 %v2236_v35  ;;  %v2294_v34 = vcombine.high %v344_v40, %v348_v30  ;;  %v351_v35 = vld [vmem:[%s3407_s3 + $0x690] sm:$0xff]  ;;  %v396_v24 = vld [vmem:[%s3407_s3 + $0x7f8] sm:$0xff]  ;;  %v2333_v26 = vcombine.low %v384_v14, %v388_v15  ;;  %v406_v29 = vrot.slane %v401_v38, %v2729_v11 }
 0x1d3   :  { %2028 = vmatprep.subr.bf16.mxu1 %v2238_v36  ;;  %v355_v36 = vld [vmem:[%s3407_s3 + $0x6b0] sm:$0xff]  ;;  %v414_v40 = vrot.slane %v401_v38, %v2720_v3  ;;  %v410_v30 = vrot.slane %v401_v38, %v2726_v9 }
 0x1d4   :  { %v2299_v49 = vcombine.low %v351_v35, %v355_v36 }
 0x1d5   :  { %1943 = vmatpush1.bf16.msra.mxu0 %v2235_v59  ;;  %v2300_v59 = vcombine.high %v351_v35, %v355_v36 }
 0x1d6   :  { %2029 = vmatpush1.bf16.msra.mxu1 %v2237_v43  ;;  %1944 = vmatprep.subr.bf16.mxu0 %v2244_v2  ;;  %v2302_v43 = vcombine.high %v352_v42, %v356_v37  ;;  %v359_v2 = vld [vmem:[%s3407_s3 + $0x6d0] sm:$0xff] }
 0x1d7   :  { %2030 = vmatprep.subr.bf16.mxu1 %v2246_v1  ;;  %v363_v1 = vld [vmem:[%s3407_s3 + $0x6f0] sm:$0xff] }
 0x1d8   :  { %v2307_v57 = vcombine.low %v359_v2, %v363_v1 }
 0x1d9   :  { %1945 = vmatpush1.bf16.msra.mxu0 %v2243_v0  ;;  %v2308_v0 = vcombine.high %v359_v2, %v363_v1  ;;  %v421_v2 = vsub.s32 4, %v2717_v62  ;;  %v429_v1 = vsub.s32 6, %v2717_v62 }
 0x1da   :  { %2031 = vmatpush1.bf16.msra.mxu1 %v2245_v48  ;;  %1946 = vmatprep.subr.bf16.mxu0 %v2252_v50  ;;  %v2310_v48 = vcombine.high %v360_v44, %v364_v6  ;;  %v367_v50 = vld [vmem:[%s3407_s3 + $0x710] sm:$0xff]  ;;  %v425_v44 = vsub.s32 5, %v2717_v62  ;;  %v433_v6 = vsub.s32 7, %v2717_v62 }
 0x1db   :  { %2032 = vmatprep.subr.bf16.mxu1 %v2254_v7  ;;  %v371_v7 = vld [vmem:[%s3407_s3 + $0x730] sm:$0xff] }
 0x1dc   :  { %v2315_v5 = vcombine.low %v367_v50, %v371_v7 }
 0x1dd   :  { %1947 = vmatpush1.bf16.msra.mxu0 %v2251_v60  ;;  %v2316_v60 = vcombine.high %v367_v50, %v371_v7 }
 0x1de   :  { %2033 = vmatpush1.bf16.msra.mxu1 %v2253_v61  ;;  %1948 = vmatprep.subr.bf16.mxu0 %v2260_v63  ;;  %v2318_v61 = vcombine.high %v368_v55, %v372_v56  ;;  %v375_v63 = vld [vmem:[%s3407_s3 + $0x750] sm:$0xff] }
 0x1df   :  { %2034 = vmatprep.subr.bf16.mxu1 %v2262_v8  ;;  %v379_v8 = vld [vmem:[%s3407_s3 + $0x770] sm:$0xff] }
 0x1e0   :  { %v2323_v17 = vcombine.low %v375_v63, %v379_v8 }
 0x1e1   :  { %1949 = vmatpush1.bf16.msra.mxu0 %v2259_v53  ;;  %v2324_v53 = vcombine.high %v375_v63, %v379_v8 }
 0x1e2   :  { %2035 = vmatpush1.bf16.msra.mxu1 %v2261_v54  ;;  %1950 = vmatprep.subr.bf16.mxu0 %v2268_v10  ;;  %v2326_v54 = vcombine.high %v376_v12, %v380_v51  ;;  %v383_v10 = vld [vmem:[%s3407_s3 + $0x790] sm:$0xff] }
 0x1e3   :  { %2036 = vmatprep.subr.bf16.mxu1 %v2270_v13  ;;  %v387_v13 = vld [vmem:[%s3407_s3 + $0x7b0] sm:$0xff] }
 0x1e4   :  { %v2331_v25 = vcombine.low %v383_v10, %v387_v13 }
 0x1e5   :  { %1951 = vmatpush1.bf16.msra.mxu0 %v2267_v19  ;;  %v2332_v19 = vcombine.high %v383_v10, %v387_v13 }
 0x1e6   :  { %2037 = vmatpush1.bf16.msra.mxu1 %v2269_v20  ;;  %1952 = vmatprep.subr.bf16.mxu0 %v2276_v21  ;;  %v2334_v20 = vcombine.high %v384_v14, %v388_v15  ;;  %v391_v21 = vld [vmem:[%s3407_s3 + $0x7d0] sm:$0xff] }
 0x1e7   :  { %2038 = vmatprep.subr.bf16.mxu1 %v2278_v22  ;;  %v395_v22 = vld [vmem:[%s3407_s3 + $0x7f0] sm:$0xff] }
 0x1e9   :  { %1953 = vmatpush1.bf16.msra.mxu0 %v2275_v27  ;;  %v2340_v27 = vcombine.high %v391_v21, %v395_v22 }
 0x1ea   :  { %2039 = vmatpush1.bf16.msra.mxu1 %v2277_v46  ;;  %1954 = vmatprep.subr.bf16.mxu0 %v2284_v39  ;;  %v2342_v46 = vcombine.high %v392_v23, %v396_v24  ;;  %v2339_v39 = vcombine.low %v391_v21, %v395_v22 }
 0x1eb   :  { %2040 = vmatprep.subr.bf16.mxu1 %v2286_v28  ;;  %v2341_v28 = vcombine.low %v392_v23, %v396_v24 }
 0x1ed   :  { %1955 = vmatpush1.bf16.msra.mxu0 %v2283_v31  ;;  %v418_v31 = vrot.slane %v401_v38, %v2737_v16 }
 0x1ee   :  { %2041 = vmatpush1.bf16.msra.mxu1 %v2285_v32  ;;  %1956 = vmatprep.subr.bf16.mxu0 %v2292_v33 }
 0x1ef   :  { %2042 = vmatprep.subr.bf16.mxu1 %v2294_v34 }
 0x1f1   :  { %1957 = vmatpush1.bf16.msra.mxu0 %v2291_v47 }
 0x1f2   :  { %2043 = vmatpush1.bf16.msra.mxu1 %v2293_v41  ;;  %1958 = vmatprep.subr.bf16.mxu0 %v2300_v59 }
 0x1f3   :  { %2044 = vmatprep.subr.bf16.mxu1 %v2302_v43 }
 0x1f5   :  { %1959 = vmatpush1.bf16.msra.mxu0 %v2299_v49  ;;  %v422_v49 = vrot.slane %v401_v38, %v421_v2 }
 0x1f6   :  { %2045 = vmatpush1.bf16.msra.mxu1 %v2301_v45  ;;  %1960 = vmatprep.subr.bf16.mxu0 %v2308_v0  ;;  %v430_v45 = vrot.slane %v401_v38, %v429_v1  ;;  %v426_v0 = vrot.slane %v401_v38, %v425_v44 }
 0x1f7   :  { %2046 = vmatprep.subr.bf16.mxu1 %v2310_v48  ;;  %v434_v48 = vrot.slane %v401_v38, %v433_v6 }
 0x1f9   :  { %1961 = vmatpush1.bf16.msra.mxu0 %v2307_v57 }
 0x1fa   :  { %2047 = vmatpush1.bf16.msra.mxu1 %v2309_v58  ;;  %1962 = vmatprep.subr.bf16.mxu0 %v2316_v60 }
 0x1fb   :  { %2048 = vmatprep.subr.bf16.mxu1 %v2318_v61 }
 0x1fd   :  { %1963 = vmatpush1.bf16.msra.mxu0 %v2315_v5 }
 0x1fe   :  { %2049 = vmatpush1.bf16.msra.mxu1 %v2317_v52  ;;  %1964 = vmatprep.subr.bf16.mxu0 %v2324_v53 }
 0x1ff   :  { %2050 = vmatprep.subr.bf16.mxu1 %v2326_v54 }
 0x201   :  { %1965 = vmatpush1.bf16.msra.mxu0 %v2323_v17 }
 0x202   :  { %2051 = vmatpush1.bf16.msra.mxu1 %v2325_v18  ;;  %1966 = vmatprep.subr.bf16.mxu0 %v2332_v19 }
 0x203   :  { %2052 = vmatprep.subr.bf16.mxu1 %v2334_v20 }
 0x205   :  { %1967 = vmatpush1.bf16.msra.mxu0 %v2331_v25 }
 0x206   :  { %2053 = vmatpush1.bf16.msra.mxu1 %v2333_v26  ;;  %1968 = vmatprep.subr.bf16.mxu0 %v2340_v27 }
 0x207   :  { %2054 = vmatprep.subr.bf16.mxu1 %v2342_v46 }
 0x209   :  { %1969 = vmatpush1.bf16.msra.mxu0 %v2339_v39 }
 0x20a   :  { %2055 = vmatpush1.bf16.msra.mxu1 %v2341_v28 }
 0x20c   :  { %1971 = vmatmul.mubr.bf16.vlgmr.msra.gmra.mrb[4].mxu0 %v2772_v4 }
 0x20d   :  { %2057 = vmatmul.mubr.bf16.vlgmr.msra.gmra.mrb[4].mxu1 %v2772_v4 }
 0x25f   :  { %v1800_v32 = vpop.f32.mrb[0].mxu0  ;;  %v1886_v33 = vpop.f32.mrb[0].mxu1 }
 0x260   :  { %v2343_v34 = vadd.f32 %v1800_v32, %v406_v29  ;;  %v2347_v35 = vadd.f32 %v1886_v33, %v414_v40  ;;  %v1802_v36 = vpop.f32.mrb[1].mxu0  ;;  %v1888_v42 = vpop.f32.mrb[1].mxu1 }
 0x261   :  { %v2344_v37 = vadd.f32 %v1802_v36, %v410_v30  ;;  %v2348_v4 = vadd.f32 %v1888_v42, %v418_v31  ;;  %v1804_v47 = vpop.f32.mrb[2].mxu0  ;;  %v1890_v41 = vpop.f32.mrb[2].mxu1 }
 0x262   :  { %2067 = vst [vmem:[%s3411_s5] sm:$0xff] %v2343_v34  ;;  %2069 = vst [vmem:[%s3411_s5 + $0x10] sm:$0xff] %v2347_v35  ;;  %v2345_v3 = vadd.f32 %v1804_v47, %v406_v29  ;;  %v2349_v9 = vadd.f32 %v1890_v41, %v414_v40  ;;  %v1806_v11 = vpop.f32.mrb[3].mxu0  ;;  %v1892_v16 = vpop.f32.mrb[3].mxu1 }
 0x263   :  { %2068 = vst [vmem:[%s3411_s5 + $0x8] sm:$0xff] %v2344_v37  ;;  %2070 = vst [vmem:[%s3411_s5 + $0x18] sm:$0xff] %v2348_v4  ;;  %v2346_v59 = vadd.f32 %v1806_v11, %v410_v30  ;;  %v2350_v43 = vadd.f32 %v1892_v16, %v418_v31 }
 0x264   :  { %2075 = vst [vmem:[%s3411_s5 + $0x40] sm:$0xff] %v2345_v3  ;;  %2077 = vst [vmem:[%s3411_s5 + $0x50] sm:$0xff] %v2349_v9 }
 0x265   :  { %2076 = vst [vmem:[%s3411_s5 + $0x48] sm:$0xff] %v2346_v59  ;;  %2078 = vst [vmem:[%s3411_s5 + $0x58] sm:$0xff] %v2350_v43 }
 0x2df   :  { %v1972_v50 = vpop.f32.mrb[4].mxu0 }
 0x2e0   :  { %v2351_v7 = vadd.f32 %v1972_v50, %v422_v49  ;;  %v2058_v55 = vpop.f32.mrb[4].mxu1  ;;  %v1974_v56 = vpop.f32.mrb[5].mxu0 }
 0x2e1   :  { %v2355_v57 = vadd.f32 %v2058_v55, %v430_v45  ;;  %v2352_v58 = vadd.f32 %v1974_v56, %v426_v0  ;;  %v2060_v60 = vpop.f32.mrb[5].mxu1  ;;  %v1976_v61 = vpop.f32.mrb[6].mxu0 }
 0x2e2   :  { %2071 = vst [vmem:[%s3411_s5 + $0x20] sm:$0xff] %v2351_v7  ;;  %v2356_v63 = vadd.f32 %v2060_v60, %v434_v48  ;;  %v2353_v8 = vadd.f32 %v1976_v61, %v422_v49  ;;  %v2062_v12 = vpop.f32.mrb[6].mxu1  ;;  %v1978_v62 = vpop.f32.mrb[7].mxu0 }
 0x2e3   :  { %2073 = vst [vmem:[%s3411_s5 + $0x30] sm:$0xff] %v2355_v57  ;;  %2072 = vst [vmem:[%s3411_s5 + $0x28] sm:$0xff] %v2352_v58  ;;  %v2357_v51 = vadd.f32 %v2062_v12, %v430_v45  ;;  %v2354_v5 = vadd.f32 %v1978_v62, %v426_v0  ;;  %v2064_v52 = vpop.f32.mrb[7].mxu1 }
 0x2e4   :  { %2074 = vst [vmem:[%s3411_s5 + $0x38] sm:$0xff] %v2356_v63  ;;  %2079 = vst [vmem:[%s3411_s5 + $0x60] sm:$0xff] %v2353_v8  ;;  %v2358_v53 = vadd.f32 %v2064_v52, %v434_v48 }
 0x2e5   :  { %2081 = vst [vmem:[%s3411_s5 + $0x70] sm:$0xff] %v2357_v51  ;;  %2080 = vst [vmem:[%s3411_s5 + $0x68] sm:$0xff] %v2354_v5 }
 0x2e6   :  { %2082 = vst [vmem:[%s3411_s5 + $0x78] sm:$0xff] %v2358_v53 }

// kernel: transformer_forward.28
= control target key start
LH: loop header
LB: loop body
LE: loop exit
PB: predicated region body
PF: predicated region fallthrough
CT: control target
= control target key end

     0   :  { %s6821_s0 = inlined_call_operand.vmem [shape: f32[16,512], index: 0, kind: input, shape index: {}]   ;;  %s6822_s3 = inlined_call_operand.vmem [shape: bf16[512,1024], index: 3, kind: input, shape index: {}]   ;;  %s6823_s1 = inlined_call_operand.vmem [shape: f32[1,512], index: 1, kind: input, shape index: {}]   ;;  %s6824_s2 = inlined_call_operand.vmem [shape: f32[1,512], index: 2, kind: input, shape index: {}]   ;;  %s6825_s5 = inlined_call_operand.vmem [shape: bf16[1024,512], index: 5, kind: input, shape index: {}]   ;;  %s6826_s4 = inlined_call_operand.vmem [shape: f32[1,1024], index: 4, kind: input, shape index: {}]   ;;  %s6827_s6 = inlined_call_operand.vmem [shape: f32[1,512], index: 6, kind: input, shape index: {}]   ;;  %s6828_s7 = inlined_call_operand.vmem [shape: f32[16,512], index: 7, kind: output, shape index: {}]  }
   0x1   :  { %v5034_v0 = vld [vmem:[%s6821_s0] sm:$0xff]  ;;  %v5039_v1 = vld [vmem:[%s6821_s0 + $0x8] sm:$0xff]  ;;  %v5044_v2 = vld [vmem:[%s6821_s0 + $0x10] sm:$0xff] }
   0x2   :  { %v36_v3 = vadd.f32 %v5039_v1, %v5034_v0  ;;  %v5051_v4 = vld [vmem:[%s6821_s0 + $0x20] sm:$0xff]  ;;  %v5056_v5 = vld [vmem:[%s6821_s0 + $0x28] sm:$0xff]  ;;  %v5061_v6 = vld [vmem:[%s6821_s0 + $0x18] sm:$0xff] }
   0x3   :  { %v5066_v7 = vld [vmem:[%s6821_s0 + $0x30] sm:$0xff]  ;;  %v41_v8 = vadd.f32 %v5056_v5, %v5051_v4  ;;  %v5074_v10 = vld [vmem:[%s6821_s0 + $0x38] sm:$0xff]  ;;  %v147_v14 = vld [vmem:[%s6822_s3] sm:$0xff] }
   0x4   :  { %v37_v9 = vadd.f32 %v36_v3, %v5044_v2  ;;  %v151_v15 = vld [vmem:[%s6822_s3 + $0x20] sm:$0xff]  ;;  %v148_v16 = vld [vmem:[%s6822_s3 + $0x8] sm:$0xff] }
   0x5   :  { %v42_v11 = vadd.f32 %v41_v8, %v5066_v7  ;;  %v4028_v17 = vcombine.high %v147_v14, %v151_v15  ;;  %v152_v18 = vld [vmem:[%s6822_s3 + $0x28] sm:$0xff]  ;;  %v4027_v19 = vcombine.low %v147_v14, %v151_v15  ;;  %v155_v20 = vld [vmem:[%s6822_s3 + $0x40] sm:$0xff] }
   0x6   :  { %v38_v12 = vadd.f32 %v37_v9, %v5061_v6  ;;  %v159_v21 = vld [vmem:[%s6822_s3 + $0x60] sm:$0xff]  ;;  %v4030_v22 = vcombine.high %v148_v16, %v152_v18  ;;  %v4029_v23 = vcombine.low %v148_v16, %v152_v18  ;;  %v156_v25 = vld [vmem:[%s6822_s3 + $0x48] sm:$0xff] }
   0x7   :  { %v43_v13 = vadd.f32 %v42_v11, %v5074_v10  ;;  %v4036_v24 = vcombine.high %v155_v20, %v159_v21  ;;  %v160_v26 = vld [vmem:[%s6822_s3 + $0x68] sm:$0xff]  ;;  %v163_v27 = vld [vmem:[%s6822_s3 + $0x80] sm:$0xff]  ;;  %1729 = vmatprep.subr.bf16.mxu0 %v4028_v17  ;;  %v4035_v32 = vcombine.low %v155_v20, %v159_v21 }
   0x8   :  { %39 = vadd.xlane.f32.xlu0 %v38_v12  ;;  %v4038_v28 = vcombine.high %v156_v25, %v160_v26  ;;  %v167_v29 = vld [vmem:[%s6822_s3 + $0xa0] sm:$0xff]  ;;  %v164_v30 = vld [vmem:[%s6822_s3 + $0x88] sm:$0xff]  ;;  %1815 = vmatprep.subr.bf16.mxu1 %v4030_v22  ;;  %v4037_v33 = vcombine.low %v156_v25, %v160_v26 }
   0x9   :  { %v168_v31 = vld [vmem:[%s6822_s3 + $0xa8] sm:$0xff]  ;;  %1730 = vmatpush1.bf16.msra.mxu0 %v4027_v19  ;;  %1816 = vmatpush1.bf16.msra.mxu1 %v4029_v23  ;;  %v4044_v34 = vcombine.high %v163_v27, %v167_v29  ;;  %v171_v36 = vld [vmem:[%s6822_s3 + $0xc0] sm:$0xff]  ;;  %v4043_v40 = vcombine.low %v163_v27, %v167_v29 }
   0xa   :  { %1731 = vmatprep.subr.bf16.mxu0 %v4036_v24  ;;  %1817 = vmatprep.subr.bf16.mxu1 %v4038_v28  ;;  %v4046_v35 = vcombine.high %v164_v30, %v168_v31  ;;  %v175_v37 = vld [vmem:[%s6822_s3 + $0xe0] sm:$0xff]  ;;  %v172_v38 = vld [vmem:[%s6822_s3 + $0xc8] sm:$0xff]  ;;  %v4045_v41 = vcombine.low %v164_v30, %v168_v31 }
   0xb   :  { %v176_v39 = vld [vmem:[%s6822_s3 + $0xe8] sm:$0xff]  ;;  %v4052_v42 = vcombine.high %v171_v36, %v175_v37  ;;  %v179_v44 = vld [vmem:[%s6822_s3 + $0x100] sm:$0xff]  ;;  %v4051_v48 = vcombine.low %v171_v36, %v175_v37 }
   0xc   :  { %44 = vadd.xlane.f32.xlu0 %v43_v13  ;;  %v4054_v43 = vcombine.high %v172_v38, %v176_v39  ;;  %v183_v45 = vld [vmem:[%s6822_s3 + $0x120] sm:$0xff]  ;;  %v180_v46 = vld [vmem:[%s6822_s3 + $0x108] sm:$0xff]  ;;  %v4053_v49 = vcombine.low %v172_v38, %v176_v39 }
   0xd   :  { %1732 = vmatpush1.bf16.msra.mxu0 %v4035_v32  ;;  %1818 = vmatpush1.bf16.msra.mxu1 %v4037_v33  ;;  %v184_v47 = vld [vmem:[%s6822_s3 + $0x128] sm:$0xff]  ;;  %v4060_v50 = vcombine.high %v179_v44, %v183_v45  ;;  %v187_v52 = vld [vmem:[%s6822_s3 + $0x140] sm:$0xff]  ;;  %v4059_v56 = vcombine.low %v179_v44, %v183_v45 }
   0xe   :  { %1733 = vmatprep.subr.bf16.mxu0 %v4044_v34  ;;  %1819 = vmatprep.subr.bf16.mxu1 %v4046_v35  ;;  %v4062_v51 = vcombine.high %v180_v46, %v184_v47  ;;  %v191_v53 = vld [vmem:[%s6822_s3 + $0x160] sm:$0xff]  ;;  %v188_v54 = vld [vmem:[%s6822_s3 + $0x148] sm:$0xff]  ;;  %v4061_v57 = vcombine.low %v180_v46, %v184_v47 }
   0xf   :  { %v192_v55 = vld [vmem:[%s6822_s3 + $0x168] sm:$0xff]  ;;  %v4068_v58 = vcombine.high %v187_v52, %v191_v53  ;;  %v195_v60 = vld [vmem:[%s6822_s3 + $0x180] sm:$0xff]  ;;  %v4067_v3 = vcombine.low %v187_v52, %v191_v53 }
  0x10   :  { %v4070_v59 = vcombine.high %v188_v54, %v192_v55  ;;  %v199_v61 = vld [vmem:[%s6822_s3 + $0x1a0] sm:$0xff]  ;;  %v196_v62 = vld [vmem:[%s6822_s3 + $0x188] sm:$0xff]  ;;  %v4069_v8 = vcombine.low %v188_v54, %v192_v55 }
  0x11   :  { %1734 = vmatpush1.bf16.msra.mxu0 %v4043_v40  ;;  %1820 = vmatpush1.bf16.msra.mxu1 %v4045_v41  ;;  %v200_v63 = vld [vmem:[%s6822_s3 + $0x1a8] sm:$0xff]  ;;  %v4076_v9 = vcombine.high %v195_v60, %v199_v61  ;;  %v203_v12 = vld [vmem:[%s6822_s3 + $0x1c0] sm:$0xff]  ;;  %v4075_v16 = vcombine.low %v195_v60, %v199_v61 }
  0x12   :  { %1735 = vmatprep.subr.bf16.mxu0 %v4052_v42  ;;  %1821 = vmatprep.subr.bf16.mxu1 %v4054_v43  ;;  %v4078_v11 = vcombine.high %v196_v62, %v200_v63  ;;  %v207_v13 = vld [vmem:[%s6822_s3 + $0x1e0] sm:$0xff]  ;;  %v204_v14 = vld [vmem:[%s6822_s3 + $0x1c8] sm:$0xff]  ;;  %v4077_v17 = vcombine.low %v196_v62, %v200_v63 }
  0x13   :  { %v208_v15 = vld [vmem:[%s6822_s3 + $0x1e8] sm:$0xff]  ;;  %v4084_v18 = vcombine.high %v203_v12, %v207_v13  ;;  %v211_v20 = vld [vmem:[%s6822_s3 + $0x200] sm:$0xff]  ;;  %v4083_v24 = vcombine.low %v203_v12, %v207_v13 }
  0x14   :  { %v4086_v19 = vcombine.high %v204_v14, %v208_v15  ;;  %v215_v21 = vld [vmem:[%s6822_s3 + $0x220] sm:$0xff]  ;;  %v212_v22 = vld [vmem:[%s6822_s3 + $0x208] sm:$0xff]  ;;  %v4085_v25 = vcombine.low %v204_v14, %v208_v15 }
  0x15   :  { %1736 = vmatpush1.bf16.msra.mxu0 %v4051_v48  ;;  %1822 = vmatpush1.bf16.msra.mxu1 %v4053_v49  ;;  %v216_v23 = vld [vmem:[%s6822_s3 + $0x228] sm:$0xff]  ;;  %v4092_v26 = vcombine.high %v211_v20, %v215_v21  ;;  %v219_v28 = vld [vmem:[%s6822_s3 + $0x240] sm:$0xff]  ;;  %v4091_v32 = vcombine.low %v211_v20, %v215_v21 }
  0x16   :  { %1737 = vmatprep.subr.bf16.mxu0 %v4060_v50  ;;  %1823 = vmatprep.subr.bf16.mxu1 %v4062_v51  ;;  %v4094_v27 = vcombine.high %v212_v22, %v216_v23  ;;  %v223_v29 = vld [vmem:[%s6822_s3 + $0x260] sm:$0xff]  ;;  %v220_v30 = vld [vmem:[%s6822_s3 + $0x248] sm:$0xff]  ;;  %v4093_v33 = vcombine.low %v212_v22, %v216_v23 }
  0x17   :  { %v224_v31 = vld [vmem:[%s6822_s3 + $0x268] sm:$0xff]  ;;  %v4100_v34 = vcombine.high %v219_v28, %v223_v29  ;;  %v251_v22 = vld [vmem:[%s6822_s3 + $0x340] sm:$0xff] }
  0x18   :  { %v4102_v35 = vcombine.high %v220_v30, %v224_v31  ;;  %v4101_v55 = vcombine.low %v220_v30, %v224_v31  ;;  %v232_v60 = vld [vmem:[%s6822_s3 + $0x2a8] sm:$0xff]  ;;  %v255_v23 = vld [vmem:[%s6822_s3 + $0x360] sm:$0xff] }
  0x19   :  { %1738 = vmatpush1.bf16.msra.mxu0 %v4059_v56  ;;  %1824 = vmatpush1.bf16.msra.mxu1 %v4061_v57  ;;  %v227_v56 = vld [vmem:[%s6822_s3 + $0x280] sm:$0xff]  ;;  %v240_v12 = vld [vmem:[%s6822_s3 + $0x2e8] sm:$0xff] }
  0x1a   :  { %1739 = vmatprep.subr.bf16.mxu0 %v4068_v58  ;;  %1825 = vmatprep.subr.bf16.mxu1 %v4070_v59  ;;  %v231_v57 = vld [vmem:[%s6822_s3 + $0x2a0] sm:$0xff]  ;;  %v228_v58 = vld [vmem:[%s6822_s3 + $0x288] sm:$0xff] }
  0x1b   :  { %v4108_v59 = vcombine.high %v227_v56, %v231_v57  ;;  %v4110_v61 = vcombine.high %v228_v58, %v232_v60  ;;  %v4107_v62 = vcombine.low %v227_v56, %v231_v57  ;;  %v4109_v63 = vcombine.low %v228_v58, %v232_v60  ;;  %v248_v20 = vld [vmem:[%s6822_s3 + $0x328] sm:$0xff]  ;;  %v259_v30 = vld [vmem:[%s6822_s3 + $0x380] sm:$0xff] }
  0x1c   :  { %v263_v31 = vld [vmem:[%s6822_s3 + $0x3a0] sm:$0xff]  ;;  %v90_v58 = vlaneseq }
  0x1d   :  { %1740 = vmatpush1.bf16.msra.mxu0 %v4067_v3  ;;  %1826 = vmatpush1.bf16.msra.mxu1 %v4069_v8  ;;  %v235_v3 = vld [vmem:[%s6822_s3 + $0x2c0] sm:$0xff] }
  0x1e   :  { %1741 = vmatprep.subr.bf16.mxu0 %v4076_v9  ;;  %1827 = vmatprep.subr.bf16.mxu1 %v4078_v11  ;;  %v239_v8 = vld [vmem:[%s6822_s3 + $0x2e0] sm:$0xff]  ;;  %v236_v9 = vld [vmem:[%s6822_s3 + $0x2c8] sm:$0xff] }
  0x1f   :  { %v4116_v11 = vcombine.high %v235_v3, %v239_v8  ;;  %v4118_v13 = vcombine.high %v236_v9, %v240_v12  ;;  %v4115_v14 = vcombine.low %v235_v3, %v239_v8  ;;  %v4117_v15 = vcombine.low %v236_v9, %v240_v12  ;;  %v34_v8 = vld [vmem:[%s6823_s1] sm:$0xf] }
  0x20   :  { %v35_v12 = vld [vmem:[%s6824_s2] sm:$0xf] }
  0x21   :  { %1742 = vmatpush1.bf16.msra.mxu0 %v4075_v16  ;;  %1828 = vmatpush1.bf16.msra.mxu1 %v4077_v17  ;;  %v243_v16 = vld [vmem:[%s6822_s3 + $0x300] sm:$0xff] }
  0x22   :  { %1743 = vmatprep.subr.bf16.mxu0 %v4084_v18  ;;  %1829 = vmatprep.subr.bf16.mxu1 %v4086_v19  ;;  %v247_v17 = vld [vmem:[%s6822_s3 + $0x320] sm:$0xff]  ;;  %v244_v18 = vld [vmem:[%s6822_s3 + $0x308] sm:$0xff] }
  0x23   :  { %v4124_v19 = vcombine.high %v243_v16, %v247_v17  ;;  %v4123_v21 = vcombine.low %v243_v16, %v247_v17 }
  0x25   :  { %1744 = vmatpush1.bf16.msra.mxu0 %v4083_v24  ;;  %1830 = vmatpush1.bf16.msra.mxu1 %v4085_v25  ;;  %v4126_v24 = vcombine.high %v244_v18, %v248_v20  ;;  %v4125_v25 = vcombine.low %v244_v18, %v248_v20 }
  0x26   :  { %1745 = vmatprep.subr.bf16.mxu0 %v4092_v26  ;;  %1831 = vmatprep.subr.bf16.mxu1 %v4094_v27  ;;  %v4132_v26 = vcombine.high %v251_v22, %v255_v23  ;;  %v252_v27 = vld [vmem:[%s6822_s3 + $0x348] sm:$0xff] }
  0x29   :  { %1746 = vmatpush1.bf16.msra.mxu0 %v4091_v32  ;;  %1832 = vmatpush1.bf16.msra.mxu1 %v4093_v33  ;;  %v260_v32 = vld [vmem:[%s6822_s3 + $0x388] sm:$0xff] }
  0x2a   :  { %1747 = vmatprep.subr.bf16.mxu0 %v4100_v34  ;;  %1833 = vmatprep.subr.bf16.mxu1 %v4102_v35  ;;  %v264_v33 = vld [vmem:[%s6822_s3 + $0x3a8] sm:$0xff]  ;;  %v4131_v34 = vcombine.low %v251_v22, %v255_v23 }
  0x2d   :  { %1834 = vmatpush1.bf16.msra.mxu1 %v4101_v55 }
  0x2e   :  { %1835 = vmatprep.subr.bf16.mxu1 %v4110_v61 }
  0x31   :  { %1836 = vmatpush1.bf16.msra.mxu1 %v4109_v63 }
  0x32   :  { %1837 = vmatprep.subr.bf16.mxu1 %v4118_v13 }
  0x35   :  { %1838 = vmatpush1.bf16.msra.mxu1 %v4117_v15 }
  0x36   :  { %1839 = vmatprep.subr.bf16.mxu1 %v4126_v24 }
  0x39   :  { %1840 = vmatpush1.bf16.msra.mxu1 %v4125_v25 }
  0x95   :  { %v40_v36 = vpop.xlane.xlu0 %39 }
  0x96   :  { %v47_v37 = vmul.f32 0.001953125, %v40_v36  ;;  %v4140_v36 = vcombine.high %v259_v30, %v263_v31 }
  0x98   :  { %v5200_v38 = vsub.f32 %v5034_v0, %v47_v37  ;;  %v5203_v39 = vsub.f32 %v5039_v1, %v47_v37  ;;  %v5206_v40 = vsub.f32 %v5044_v2, %v47_v37  ;;  %v5209_v42 = vsub.f32 %v5061_v6, %v47_v37 }
  0x99   :  { %v45_v41 = vpop.xlane.xlu0 %44  ;;  %v4142_v37 = vcombine.high %v260_v32, %v264_v33 }
  0x9a   :  { %v48_v43 = vmul.f32 0.001953125, %v45_v41  ;;  %v57_v44 = vmul.f32 %v5200_v38, %v5200_v38  ;;  %v58_v45 = vmul.f32 %v5203_v39, %v5203_v39  ;;  %v59_v0 = vmul.f32 %v5206_v40, %v5206_v40  ;;  %v267_v41 = vld [vmem:[%s6822_s3 + $0x3c0] sm:$0xff] }
  0x9b   :  { %v60_v47 = vmul.f32 %v5209_v42, %v5209_v42 }
  0x9c   :  { %v5218_v1 = vsub.f32 %v5051_v4, %v48_v43  ;;  %v5221_v2 = vsub.f32 %v5056_v5, %v48_v43  ;;  %v65_v46 = vadd.f32 %v58_v45, %v57_v44  ;;  %v5224_v6 = vsub.f32 %v5066_v7, %v48_v43  ;;  %v268_v44 = vld [vmem:[%s6822_s3 + $0x3c8] sm:$0xff] }
  0x9d   :  { %v5229_v49 = vsub.f32 %v5074_v10, %v48_v43  ;;  %v4099_v10 = vcombine.low %v219_v28, %v223_v29  ;;  %v256_v28 = vld [vmem:[%s6822_s3 + $0x368] sm:$0xff]  ;;  %v271_v43 = vld [vmem:[%s6822_s3 + $0x3e0] sm:$0xff] }
  0x9e   :  { %v66_v48 = vadd.f32 %v65_v46, %v59_v0  ;;  %v61_v50 = vmul.f32 %v5218_v1, %v5218_v1  ;;  %v62_v4 = vmul.f32 %v5221_v2, %v5221_v2  ;;  %v63_v5 = vmul.f32 %v5224_v6, %v5224_v6  ;;  %v272_v45 = vld [vmem:[%s6822_s3 + $0x3e8] sm:$0xff] }
  0x9f   :  { %v64_v7 = vmul.f32 %v5229_v49, %v5229_v49  ;;  %1748 = vmatpush1.bf16.msra.mxu0 %v4099_v10  ;;  %v4134_v29 = vcombine.high %v252_v27, %v256_v28  ;;  %v4133_v35 = vcombine.low %v252_v27, %v256_v28  ;;  %v4139_v0 = vcombine.low %v259_v30, %v263_v31 }
  0xa0   :  { %v67_v51 = vadd.f32 %v66_v48, %v60_v47  ;;  %v70_v52 = vadd.f32 %v62_v4, %v61_v50  ;;  %1749 = vmatprep.subr.bf16.mxu0 %v4108_v59  ;;  %v4141_v46 = vcombine.low %v260_v32, %v264_v33  ;;  %v4148_v47 = vcombine.high %v267_v41, %v271_v43 }
  0xa1   :  { %1841 = vmatprep.subr.bf16.mxu1 %v4134_v29  ;;  %v4150_v48 = vcombine.high %v268_v44, %v272_v45  ;;  %v4147_v50 = vcombine.low %v267_v41, %v271_v43  ;;  %v4149_v4 = vcombine.low %v268_v44, %v272_v45  ;;  %v288_v45 = vld [vmem:[%s6822_s3 + $0x468] sm:$0xff] }
  0xa2   :  { %68 = vadd.xlane.f32.xlu1 %v67_v51  ;;  %v71_v53 = vadd.f32 %v70_v52, %v63_v5  ;;  %1842 = vmatpush1.bf16.msra.mxu1 %v4133_v35  ;;  %v5314_v51 = vld [vmem:[%s6822_s3 + $0x400] sm:$0xff]  ;;  %v5324_v52 = vld [vmem:[%s6822_s3 + $0x408] sm:$0xff] }
  0xa3   :  { %1750 = vmatpush1.bf16.msra.mxu0 %v4107_v62  ;;  %1843 = vmatprep.subr.bf16.mxu1 %v4142_v37  ;;  %v5319_v5 = vld [vmem:[%s6822_s3 + $0x420] sm:$0xff]  ;;  %v5339_v62 = vshrl.u32 %v90_v58, 7  ;;  %v296_v58 = vld [vmem:[%s6822_s3 + $0x4a8] sm:$0xff] }
  0xa4   :  { %v72_v54 = vadd.f32 %v71_v53, %v64_v7  ;;  %1751 = vmatprep.subr.bf16.mxu0 %v4116_v11  ;;  %v4156_v7 = vcombine.high %v5314_v51, %v5319_v5  ;;  %v5331_v53 = vld [vmem:[%s6822_s3 + $0x428] sm:$0xff] }
  0xa5   :  { %v4157_v10 = vcombine.low %v5324_v52, %v5331_v53  ;;  %v4158_v55 = vcombine.high %v5324_v52, %v5331_v53  ;;  %v5342_v3 = vsub.s32 2, %v5339_v62  ;;  %v5348_v9 = vsub.s32 1, %v5339_v62  ;;  %v304_v52 = vld [vmem:[%s6822_s3 + $0x4e8] sm:$0xff] }
  0xa6   :  { %73 = vadd.xlane.f32.xlu1 %v72_v54  ;;  %1844 = vmatpush1.bf16.msra.mxu1 %v4141_v46  ;;  %v4155_v54 = vcombine.low %v5314_v51, %v5319_v5  ;;  %v5351_v11 = vsub.s32 0, %v5339_v62  ;;  %v5359_v16 = vsub.s32 3, %v5339_v62  ;;  %v303_v51 = vld [vmem:[%s6822_s3 + $0x4e0] sm:$0xff]  ;;  %v300_v5 = vld [vmem:[%s6822_s3 + $0x4c8] sm:$0xff] }
  0xa7   :  { %1752 = vmatpush1.bf16.msra.mxu0 %v4115_v14  ;;  %1845 = vmatprep.subr.bf16.mxu1 %v4150_v48  ;;  %v101_v13 = vrot.slane %v34_v8, %v5342_v3  ;;  %v97_v15 = vrot.slane %v34_v8, %v5348_v9  ;;  %v126_v24 = vrot.slane %v35_v12, %v5348_v9 }
  0xa8   :  { %1753 = vmatprep.subr.bf16.mxu0 %v4124_v19  ;;  %v93_v19 = vrot.slane %v34_v8, %v5351_v11  ;;  %v122_v25 = vrot.slane %v35_v12, %v5351_v11  ;;  %v105_v27 = vrot.slane %v34_v8, %v5359_v16 }
  0xaa   :  { %1846 = vmatpush1.bf16.msra.mxu1 %v4149_v4 }
  0xab   :  { %1754 = vmatpush1.bf16.msra.mxu0 %v4123_v21  ;;  %1858 = vmatprep.subr.bf16.mxu1 %v4158_v55  ;;  %v130_v21 = vrot.slane %v35_v12, %v5342_v3 }
  0xac   :  { %1755 = vmatprep.subr.bf16.mxu0 %v4132_v26 }
  0xaf   :  { %1756 = vmatpush1.bf16.msra.mxu0 %v4131_v34 }
  0xb0   :  { %1757 = vmatprep.subr.bf16.mxu0 %v4140_v36  ;;  %v134_v36 = vrot.slane %v35_v12, %v5359_v16  ;;  %v299_v12 = vld [vmem:[%s6822_s3 + $0x4c0] sm:$0xff] }
  0xb3   :  { %1758 = vmatpush1.bf16.msra.mxu0 %v4139_v0 }
  0xb4   :  { %1759 = vmatprep.subr.bf16.mxu0 %v4148_v47 }
  0xb7   :  { %1760 = vmatpush1.bf16.msra.mxu0 %v4147_v50  ;;  %v291_v50 = vld [vmem:[%s6822_s3 + $0x480] sm:$0xff] }
  0xb8   :  { %1772 = vmatprep.subr.bf16.mxu0 %v4156_v7 }
 0x12f   :  { %v69_v56 = vpop.xlane.xlu1 %68 }
 0x130   :  { %v75_v57 = vmul.f32 0.001953125, %v69_v56  ;;  %v295_v56 = vld [vmem:[%s6822_s3 + $0x4a0] sm:$0xff] }
 0x131   :  { %v4171_v53 = vcombine.low %v291_v50, %v295_v56 }
 0x132   :  { %v77_v59 = vadd.f32 1e-05, %v75_v57  ;;  %v292_v57 = vld [vmem:[%s6822_s3 + $0x488] sm:$0xff] }
 0x133   :  { %v74_v60 = vpop.xlane.xlu1 %73  ;;  %v4174_v8 = vcombine.high %v292_v57, %v296_v58 }
 0x134   :  { %4979 = vrsqrt.f32 %v77_v59  ;;  %v76_v61 = vmul.f32 0.001953125, %v74_v60 }
 0x136   :  { %v78_v63 = vadd.f32 1e-05, %v76_v61 }
 0x138   :  { %4981 = vrsqrt.f32 %v78_v63  ;;  %v4172_v63 = vcombine.high %v291_v50, %v295_v56  ;;  %v347_v56 = vld [vmem:[%s6822_s3 + $0x640] sm:$0xff] }
 0x13e   :  { %v4980_v14 = vpop.eup %4979 }
 0x13f   :  { %v82_v17 = vmul.f32 %v4980_v14, %v5203_v39  ;;  %v81_v18 = vmul.f32 %v4980_v14, %v5200_v38  ;;  %v83_v20 = vmul.f32 %v4980_v14, %v5206_v40  ;;  %v84_v26 = vmul.f32 %v4980_v14, %v5209_v42  ;;  %v307_v14 = vld [vmem:[%s6822_s3 + $0x500] sm:$0xff] }
 0x141   :  { %v112_v22 = vmul.f32 %v101_v13, %v83_v20  ;;  %v111_v28 = vmul.f32 %v97_v15, %v82_v17  ;;  %v110_v29 = vmul.f32 %v93_v19, %v81_v18  ;;  %v113_v34 = vmul.f32 %v105_v27, %v84_v26  ;;  %v308_v17 = vld [vmem:[%s6822_s3 + $0x508] sm:$0xff] }
 0x142   :  { %v4982_v23 = vpop.eup %4981  ;;  %v312_v18 = vld [vmem:[%s6822_s3 + $0x528] sm:$0xff]  ;;  %v4181_v20 = vcombine.low %v300_v5, %v304_v52 }
 0x143   :  { %v86_v39 = vmul.f32 %v4982_v23, %v5221_v2  ;;  %v85_v38 = vmul.f32 %v4982_v23, %v5218_v1  ;;  %v88_v40 = vmul.f32 %v4982_v23, %v5229_v49  ;;  %v87_v30 = vmul.f32 %v4982_v23, %v5224_v6  ;;  %v283_v1 = vld [vmem:[%s6822_s3 + $0x440] sm:$0xff]  ;;  %v284_v49 = vld [vmem:[%s6822_s3 + $0x448] sm:$0xff] }
 0x144   :  { %v141_v31 = vadd.f32 %v130_v21, %v112_v22  ;;  %v140_v37 = vadd.f32 %v126_v24, %v111_v28  ;;  %v139_v43 = vadd.f32 %v122_v25, %v110_v29  ;;  %v287_v6 = vld [vmem:[%s6822_s3 + $0x460] sm:$0xff]  ;;  %v142_v48 = vadd.f32 %v134_v36, %v113_v34  ;;  %v320_v26 = vld [vmem:[%s6822_s3 + $0x568] sm:$0xff] }
 0x145   :  { %v115_v32 = vmul.f32 %v97_v15, %v86_v39  ;;  %v114_v33 = vmul.f32 %v93_v19, %v85_v38  ;;  %v117_v35 = vmul.f32 %v105_v27, %v88_v40  ;;  %v116_v42 = vmul.f32 %v101_v13, %v87_v30  ;;  %v311_v15 = vld [vmem:[%s6822_s3 + $0x520] sm:$0xff]  ;;  %v324_v30 = vld [vmem:[%s6822_s3 + $0x588] sm:$0xff] }
 0x146   :  { %v4164_v7 = vcombine.high %v283_v1, %v287_v6  ;;  %v4166_v55 = vcombine.high %v284_v49, %v288_v45  ;;  %v4163_v60 = vcombine.low %v283_v1, %v287_v6  ;;  %v4165_v61 = vcombine.low %v284_v49, %v288_v45  ;;  %v315_v23 = vld [vmem:[%s6822_s3 + $0x540] sm:$0xff]  ;;  %v340_v45 = vld [vmem:[%s6822_s3 + $0x608] sm:$0xff] }
 0x147   :  { %v144_v41 = vadd.f32 %v126_v24, %v115_v32  ;;  %v143_v2 = vadd.f32 %v122_v25, %v114_v33  ;;  %v146_v44 = vadd.f32 %v134_v36, %v117_v35  ;;  %v145_v0 = vadd.f32 %v130_v21, %v116_v42  ;;  %v319_v24 = vld [vmem:[%s6822_s3 + $0x560] sm:$0xff]  ;;  %v316_v25 = vld [vmem:[%s6822_s3 + $0x548] sm:$0xff] }
 0x148   :  { %v4182_v13 = vcombine.high %v300_v5, %v304_v52  ;;  %v4179_v19 = vcombine.low %v299_v12, %v303_v51  ;;  %v4188_v21 = vcombine.high %v307_v14, %v311_v15  ;;  %v4190_v22 = vcombine.high %v308_v17, %v312_v18  ;;  %v323_v29 = vld [vmem:[%s6822_s3 + $0x580] sm:$0xff]  ;;  %v356_v52 = vld [vmem:[%s6822_s3 + $0x688] sm:$0xff] }
 0x149   :  { %v5387_v46 = vpack.c.bf16 %v144_v41, %v140_v37  ;;  %v5389_v47 = vpack.c.bf16 %v143_v2, %v139_v43  ;;  %v5394_v4 = vpack.c.bf16 %v145_v0, %v141_v31  ;;  %v5409_v59 = vpack.c.bf16 %v146_v44, %v142_v48  ;;  %v327_v40 = vld [vmem:[%s6822_s3 + $0x5a0] sm:$0xff]  ;;  %v328_v31 = vld [vmem:[%s6822_s3 + $0x5a8] sm:$0xff] }
 0x14a   :  { %v4187_v27 = vcombine.low %v307_v14, %v311_v15  ;;  %v4189_v39 = vcombine.low %v308_v17, %v312_v18  ;;  %v4196_v28 = vcombine.high %v315_v23, %v319_v24  ;;  %v4198_v38 = vcombine.high %v316_v25, %v320_v26  ;;  %v331_v36 = vld [vmem:[%s6822_s3 + $0x5c0] sm:$0xff]  ;;  %v332_v37 = vld [vmem:[%s6822_s3 + $0x5c8] sm:$0xff] }
 0x14b   :  { %1761 = vmatprep.mubr.bf16.mxu0 %v5387_v46  ;;  %1847 = vmatprep.mubr.bf16.mxu1 %v5387_v46  ;;  %v4195_v32 = vcombine.low %v315_v23, %v319_v24  ;;  %v4197_v33 = vcombine.low %v316_v25, %v320_v26  ;;  %v4204_v34 = vcombine.high %v323_v29, %v327_v40  ;;  %v335_v42 = vld [vmem:[%s6822_s3 + $0x5e0] sm:$0xff]  ;;  %v336_v41 = vld [vmem:[%s6822_s3 + $0x5e8] sm:$0xff] }
 0x14c   :  { %1762 = vmatmul.mubr.bf16.vlgmr.msra.gmra.mrb[0].mxu0 %v5389_v47  ;;  %1848 = vmatmul.mubr.bf16.vlgmr.msra.gmra.mrb[0].mxu1 %v5389_v47  ;;  %v4206_v35 = vcombine.high %v324_v30, %v328_v31  ;;  %v4203_v43 = vcombine.low %v323_v29, %v327_v40  ;;  %v4205_v2 = vcombine.low %v324_v30, %v328_v31  ;;  %v339_v6 = vld [vmem:[%s6822_s3 + $0x600] sm:$0xff]  ;;  %v344_v0 = vld [vmem:[%s6822_s3 + $0x628] sm:$0xff] }
 0x14d   :  { %1773 = vmatpush1.bf16.msra.mxu0 %v4155_v54  ;;  %1859 = vmatpush1.bf16.msra.mxu1 %v4157_v10  ;;  %v4173_v54 = vcombine.low %v292_v57, %v296_v58  ;;  %v4180_v10 = vcombine.high %v299_v12, %v303_v51  ;;  %v4212_v1 = vcombine.high %v331_v36, %v335_v42  ;;  %v343_v49 = vld [vmem:[%s6822_s3 + $0x620] sm:$0xff]  ;;  %v348_v58 = vld [vmem:[%s6822_s3 + $0x648] sm:$0xff] }
 0x14e   :  { %1804 = vmatprep.mubr.bf16.mxu0 %v5409_v59  ;;  %1890 = vmatprep.mubr.bf16.mxu1 %v5409_v59  ;;  %v4214_v44 = vcombine.high %v332_v37, %v336_v41  ;;  %v4211_v48 = vcombine.low %v331_v36, %v335_v42  ;;  %v4213_v50 = vcombine.low %v332_v37, %v336_v41  ;;  %v351_v57 = vld [vmem:[%s6822_s3 + $0x660] sm:$0xff]  ;;  %v364_v18 = vld [vmem:[%s6822_s3 + $0x6c8] sm:$0xff] }
 0x14f   :  { %1774 = vmatprep.subr.bf16.mxu0 %v4164_v7  ;;  %1860 = vmatprep.subr.bf16.mxu1 %v4166_v55  ;;  %v4220_v7 = vcombine.high %v339_v6, %v343_v49  ;;  %v4222_v55 = vcombine.high %v340_v45, %v344_v0  ;;  %v355_v51 = vld [vmem:[%s6822_s3 + $0x680] sm:$0xff]  ;;  %v372_v26 = vld [vmem:[%s6822_s3 + $0x708] sm:$0xff] }
 0x150   :  { %v359_v5 = vld [vmem:[%s6822_s3 + $0x6a0] sm:$0xff]  ;;  %v380_v31 = vld [vmem:[%s6822_s3 + $0x748] sm:$0xff] }
 0x151   :  { %1775 = vmatpush1.bf16.msra.mxu0 %v4163_v60  ;;  %1861 = vmatpush1.bf16.msra.mxu1 %v4165_v61  ;;  %v352_v60 = vld [vmem:[%s6822_s3 + $0x668] sm:$0xff]  ;;  %v4219_v61 = vcombine.low %v339_v6, %v343_v49  ;;  %v363_v15 = vld [vmem:[%s6822_s3 + $0x6c0] sm:$0xff] }
 0x152   :  { %1776 = vmatprep.subr.bf16.mxu0 %v4172_v63  ;;  %1862 = vmatprep.subr.bf16.mxu1 %v4174_v8  ;;  %v4221_v63 = vcombine.low %v340_v45, %v344_v0  ;;  %v4228_v8 = vcombine.high %v347_v56, %v351_v57  ;;  %v4230_v12 = vcombine.high %v348_v58, %v352_v60  ;;  %v367_v17 = vld [vmem:[%s6822_s3 + $0x6e0] sm:$0xff]  ;;  %v388_v41 = vld [vmem:[%s6822_s3 + $0x788] sm:$0xff] }
 0x153   :  { %v371_v24 = vld [vmem:[%s6822_s3 + $0x700] sm:$0xff]  ;;  %v396_v0 = vld [vmem:[%s6822_s3 + $0x7c8] sm:$0xff] }
 0x154   :  { %v375_v25 = vld [vmem:[%s6822_s3 + $0x720] sm:$0xff] }
 0x155   :  { %1777 = vmatpush1.bf16.msra.mxu0 %v4171_v53  ;;  %1863 = vmatpush1.bf16.msra.mxu1 %v4173_v54  ;;  %v360_v53 = vld [vmem:[%s6822_s3 + $0x6a8] sm:$0xff]  ;;  %v4227_v54 = vcombine.low %v347_v56, %v351_v57  ;;  %v379_v40 = vld [vmem:[%s6822_s3 + $0x740] sm:$0xff]  ;;  %v149_v57 = vld [vmem:[%s6822_s3 + $0x10] sm:$0xff] }
 0x156   :  { %1778 = vmatprep.subr.bf16.mxu0 %v4180_v10  ;;  %1864 = vmatprep.subr.bf16.mxu1 %v4182_v13  ;;  %v4229_v10 = vcombine.low %v348_v58, %v352_v60  ;;  %v4236_v13 = vcombine.high %v355_v51, %v359_v5  ;;  %v4238_v14 = vcombine.high %v356_v52, %v360_v53  ;;  %v383_v30 = vld [vmem:[%s6822_s3 + $0x760] sm:$0xff]  ;;  %v153_v58 = vld [vmem:[%s6822_s3 + $0x30] sm:$0xff]  ;;  %v150_v60 = vld [vmem:[%s6822_s3 + $0x18] sm:$0xff] }
 0x157   :  { %v387_v42 = vld [vmem:[%s6822_s3 + $0x780] sm:$0xff] }
 0x158   :  { %v391_v37 = vld [vmem:[%s6822_s3 + $0x7a0] sm:$0xff] }
 0x159   :  { %1779 = vmatpush1.bf16.msra.mxu0 %v4179_v19  ;;  %1865 = vmatpush1.bf16.msra.mxu1 %v4181_v20  ;;  %v368_v19 = vld [vmem:[%s6822_s3 + $0x6e8] sm:$0xff]  ;;  %v4235_v20 = vcombine.low %v355_v51, %v359_v5  ;;  %v395_v49 = vld [vmem:[%s6822_s3 + $0x7c0] sm:$0xff]  ;;  %v157_v5 = vld [vmem:[%s6822_s3 + $0x50] sm:$0xff] }
 0x15a   :  { %1780 = vmatprep.subr.bf16.mxu0 %v4188_v21  ;;  %1866 = vmatprep.subr.bf16.mxu1 %v4190_v22  ;;  %v4237_v21 = vcombine.low %v356_v52, %v360_v53  ;;  %v4244_v22 = vcombine.high %v363_v15, %v367_v17  ;;  %v4246_v23 = vcombine.high %v364_v18, %v368_v19  ;;  %v399_v45 = vld [vmem:[%s6822_s3 + $0x7e0] sm:$0xff]  ;;  %v161_v52 = vld [vmem:[%s6822_s3 + $0x70] sm:$0xff]  ;;  %v158_v53 = vld [vmem:[%s6822_s3 + $0x58] sm:$0xff] }
 0x15d   :  { %1781 = vmatpush1.bf16.msra.mxu0 %v4187_v27  ;;  %1867 = vmatpush1.bf16.msra.mxu1 %v4189_v39  ;;  %v376_v27 = vld [vmem:[%s6822_s3 + $0x728] sm:$0xff]  ;;  %v4243_v39 = vcombine.low %v363_v15, %v367_v17  ;;  %v165_v17 = vld [vmem:[%s6822_s3 + $0x90] sm:$0xff] }
 0x15e   :  { %1782 = vmatprep.subr.bf16.mxu0 %v4196_v28  ;;  %1868 = vmatprep.subr.bf16.mxu1 %v4198_v38  ;;  %v4245_v28 = vcombine.low %v364_v18, %v368_v19  ;;  %v4252_v38 = vcombine.high %v371_v24, %v375_v25  ;;  %v4254_v29 = vcombine.high %v372_v26, %v376_v27  ;;  %v169_v18 = vld [vmem:[%s6822_s3 + $0xb0] sm:$0xff]  ;;  %v166_v19 = vld [vmem:[%s6822_s3 + $0x98] sm:$0xff] }
 0x161   :  { %1783 = vmatpush1.bf16.msra.mxu0 %v4195_v32  ;;  %1869 = vmatpush1.bf16.msra.mxu1 %v4197_v33  ;;  %v384_v32 = vld [vmem:[%s6822_s3 + $0x768] sm:$0xff]  ;;  %v4251_v33 = vcombine.low %v371_v24, %v375_v25  ;;  %v173_v24 = vld [vmem:[%s6822_s3 + $0xd0] sm:$0xff] }
 0x162   :  { %1784 = vmatprep.subr.bf16.mxu0 %v4204_v34  ;;  %1870 = vmatprep.subr.bf16.mxu1 %v4206_v35  ;;  %v4253_v34 = vcombine.low %v372_v26, %v376_v27  ;;  %v4260_v35 = vcombine.high %v379_v40, %v383_v30  ;;  %v4262_v36 = vcombine.high %v380_v31, %v384_v32  ;;  %v177_v26 = vld [vmem:[%s6822_s3 + $0xf0] sm:$0xff]  ;;  %v174_v27 = vld [vmem:[%s6822_s3 + $0xd8] sm:$0xff] }
 0x165   :  { %1785 = vmatpush1.bf16.msra.mxu0 %v4203_v43  ;;  %1871 = vmatpush1.bf16.msra.mxu1 %v4205_v2  ;;  %v392_v43 = vld [vmem:[%s6822_s3 + $0x7a8] sm:$0xff]  ;;  %v4259_v2 = vcombine.low %v379_v40, %v383_v30  ;;  %v185_v30 = vld [vmem:[%s6822_s3 + $0x130] sm:$0xff] }
 0x166   :  { %1786 = vmatprep.subr.bf16.mxu0 %v4212_v1  ;;  %1872 = vmatprep.subr.bf16.mxu1 %v4214_v44  ;;  %v4261_v1 = vcombine.low %v380_v31, %v384_v32  ;;  %v4268_v44 = vcombine.high %v387_v42, %v391_v37  ;;  %v4270_v6 = vcombine.high %v388_v41, %v392_v43  ;;  %v182_v31 = vld [vmem:[%s6822_s3 + $0x118] sm:$0xff] }
 0x167   :  { %v186_v32 = vld [vmem:[%s6822_s3 + $0x138] sm:$0xff] }
 0x169   :  { %1787 = vmatpush1.bf16.msra.mxu0 %v4211_v48  ;;  %1873 = vmatpush1.bf16.msra.mxu1 %v4213_v50  ;;  %v400_v48 = vld [vmem:[%s6822_s3 + $0x7e8] sm:$0xff]  ;;  %v4267_v50 = vcombine.low %v387_v42, %v391_v37  ;;  %v4066_v42 = vcombine.high %v182_v31, %v186_v32  ;;  %v193_v37 = vld [vmem:[%s6822_s3 + $0x170] sm:$0xff] }
 0x16a   :  { %1788 = vmatprep.subr.bf16.mxu0 %v4220_v7  ;;  %1874 = vmatprep.subr.bf16.mxu1 %v4222_v55  ;;  %v4269_v7 = vcombine.low %v388_v41, %v392_v43  ;;  %v4276_v55 = vcombine.high %v395_v49, %v399_v45  ;;  %v4278_v56 = vcombine.high %v396_v0, %v400_v48  ;;  %v190_v41 = vld [vmem:[%s6822_s3 + $0x158] sm:$0xff] }
 0x16b   :  { %v194_v43 = vld [vmem:[%s6822_s3 + $0x178] sm:$0xff] }
 0x16d   :  { %1789 = vmatpush1.bf16.msra.mxu0 %v4219_v61  ;;  %1875 = vmatpush1.bf16.msra.mxu1 %v4221_v63  ;;  %v154_v61 = vld [vmem:[%s6822_s3 + $0x38] sm:$0xff]  ;;  %v4275_v63 = vcombine.low %v395_v49, %v399_v45  ;;  %v201_v49 = vld [vmem:[%s6822_s3 + $0x1b0] sm:$0xff] }
 0x16e   :  { %1790 = vmatprep.subr.bf16.mxu0 %v4228_v8  ;;  %1876 = vmatprep.subr.bf16.mxu1 %v4230_v12  ;;  %v4277_v8 = vcombine.low %v396_v0, %v400_v48  ;;  %v4032_v12 = vcombine.high %v149_v57, %v153_v58  ;;  %v4034_v51 = vcombine.high %v150_v60, %v154_v61  ;;  %v198_v45 = vld [vmem:[%s6822_s3 + $0x198] sm:$0xff] }
 0x16f   :  { %v4074_v0 = vcombine.high %v190_v41, %v194_v43  ;;  %v202_v48 = vld [vmem:[%s6822_s3 + $0x1b8] sm:$0xff] }
 0x171   :  { %1791 = vmatpush1.bf16.msra.mxu0 %v4227_v54  ;;  %1877 = vmatpush1.bf16.msra.mxu1 %v4229_v10  ;;  %v162_v54 = vld [vmem:[%s6822_s3 + $0x78] sm:$0xff]  ;;  %v4031_v10 = vcombine.low %v149_v57, %v153_v58  ;;  %v209_v57 = vld [vmem:[%s6822_s3 + $0x1f0] sm:$0xff] }
 0x172   :  { %1792 = vmatprep.subr.bf16.mxu0 %v4236_v13  ;;  %1878 = vmatprep.subr.bf16.mxu1 %v4238_v14  ;;  %v4033_v13 = vcombine.low %v150_v60, %v154_v61  ;;  %v4040_v14 = vcombine.high %v157_v5, %v161_v52  ;;  %v4042_v15 = vcombine.high %v158_v53, %v162_v54  ;;  %v206_v58 = vld [vmem:[%s6822_s3 + $0x1d8] sm:$0xff] }
 0x173   :  { %v4082_v60 = vcombine.high %v198_v45, %v202_v48  ;;  %v210_v61 = vld [vmem:[%s6822_s3 + $0x1f8] sm:$0xff] }
 0x175   :  { %1793 = vmatpush1.bf16.msra.mxu0 %v4235_v20  ;;  %1879 = vmatpush1.bf16.msra.mxu1 %v4237_v21  ;;  %v170_v20 = vld [vmem:[%s6822_s3 + $0xb8] sm:$0xff]  ;;  %v4039_v21 = vcombine.low %v157_v5, %v161_v52  ;;  %v217_v5 = vld [vmem:[%s6822_s3 + $0x230] sm:$0xff] }
 0x176   :  { %1794 = vmatprep.subr.bf16.mxu0 %v4244_v22  ;;  %1880 = vmatprep.subr.bf16.mxu1 %v4246_v23  ;;  %v4041_v22 = vcombine.low %v158_v53, %v162_v54  ;;  %v4048_v23 = vcombine.high %v165_v17, %v169_v18  ;;  %v4050_v25 = vcombine.high %v166_v19, %v170_v20  ;;  %v214_v52 = vld [vmem:[%s6822_s3 + $0x218] sm:$0xff] }
 0x177   :  { %v4090_v53 = vcombine.high %v206_v58, %v210_v61  ;;  %v218_v54 = vld [vmem:[%s6822_s3 + $0x238] sm:$0xff] }
 0x179   :  { %1795 = vmatpush1.bf16.msra.mxu0 %v4243_v39  ;;  %1881 = vmatpush1.bf16.msra.mxu1 %v4245_v28  ;;  %v4047_v39 = vcombine.low %v165_v17, %v169_v18  ;;  %v4049_v28 = vcombine.low %v166_v19, %v170_v20  ;;  %v225_v17 = vld [vmem:[%s6822_s3 + $0x270] sm:$0xff]  ;;  %v222_v18 = vld [vmem:[%s6822_s3 + $0x258] sm:$0xff]  ;;  %v4098_v19 = vcombine.high %v214_v52, %v218_v54 }
 0x17a   :  { %1796 = vmatprep.subr.bf16.mxu0 %v4252_v38  ;;  %1882 = vmatprep.subr.bf16.mxu1 %v4254_v29  ;;  %v4056_v38 = vcombine.high %v173_v24, %v177_v26  ;;  %v181_v29 = vld [vmem:[%s6822_s3 + $0x110] sm:$0xff]  ;;  %v226_v20 = vld [vmem:[%s6822_s3 + $0x278] sm:$0xff] }
 0x17d   :  { %1797 = vmatpush1.bf16.msra.mxu0 %v4251_v33  ;;  %1883 = vmatpush1.bf16.msra.mxu1 %v4253_v34  ;;  %v4055_v33 = vcombine.low %v173_v24, %v177_v26  ;;  %v229_v24 = vld [vmem:[%s6822_s3 + $0x290] sm:$0xff]  ;;  %v230_v26 = vld [vmem:[%s6822_s3 + $0x298] sm:$0xff] }
 0x17e   :  { %1798 = vmatprep.subr.bf16.mxu0 %v4260_v35  ;;  %1884 = vmatprep.subr.bf16.mxu1 %v4262_v36  ;;  %v4064_v35 = vcombine.high %v181_v29, %v185_v30  ;;  %v189_v36 = vld [vmem:[%s6822_s3 + $0x150] sm:$0xff] }
 0x181   :  { %1799 = vmatpush1.bf16.msra.mxu0 %v4259_v2  ;;  %1885 = vmatpush1.bf16.msra.mxu1 %v4261_v1  ;;  %v4063_v2 = vcombine.low %v181_v29, %v185_v30  ;;  %v4065_v1 = vcombine.low %v182_v31, %v186_v32  ;;  %v237_v29 = vld [vmem:[%s6822_s3 + $0x2d0] sm:$0xff]  ;;  %v238_v30 = vld [vmem:[%s6822_s3 + $0x2d8] sm:$0xff] }
 0x182   :  { %1800 = vmatprep.subr.bf16.mxu0 %v4268_v44  ;;  %1886 = vmatprep.subr.bf16.mxu1 %v4270_v6  ;;  %v4072_v44 = vcombine.high %v189_v36, %v193_v37  ;;  %v197_v6 = vld [vmem:[%s6822_s3 + $0x190] sm:$0xff]  ;;  %v242_v32 = vld [vmem:[%s6822_s3 + $0x2f8] sm:$0xff] }
 0x185   :  { %1801 = vmatpush1.bf16.msra.mxu0 %v4267_v50  ;;  %1887 = vmatpush1.bf16.msra.mxu1 %v4269_v7  ;;  %v4071_v50 = vcombine.low %v189_v36, %v193_v37  ;;  %v4073_v7 = vcombine.low %v190_v41, %v194_v43  ;;  %v245_v36 = vld [vmem:[%s6822_s3 + $0x310] sm:$0xff]  ;;  %v246_v37 = vld [vmem:[%s6822_s3 + $0x318] sm:$0xff]  ;;  %v4122_v41 = vcombine.high %v238_v30, %v242_v32 }
 0x186   :  { %1802 = vmatprep.subr.bf16.mxu0 %v4276_v55  ;;  %1888 = vmatprep.subr.bf16.mxu1 %v4278_v56  ;;  %v4080_v55 = vcombine.high %v197_v6, %v201_v49  ;;  %v205_v56 = vld [vmem:[%s6822_s3 + $0x1d0] sm:$0xff]  ;;  %v250_v43 = vld [vmem:[%s6822_s3 + $0x338] sm:$0xff] }
 0x189   :  { %1803 = vmatpush1.bf16.msra.mxu0 %v4275_v63  ;;  %1889 = vmatpush1.bf16.msra.mxu1 %v4277_v8  ;;  %v4079_v63 = vcombine.low %v197_v6, %v201_v49  ;;  %v4081_v8 = vcombine.low %v198_v45, %v202_v48  ;;  %v253_v6 = vld [vmem:[%s6822_s3 + $0x350] sm:$0xff]  ;;  %v254_v45 = vld [vmem:[%s6822_s3 + $0x358] sm:$0xff] }
 0x18a   :  { %1901 = vmatprep.subr.bf16.mxu0 %v4032_v12  ;;  %1987 = vmatprep.subr.bf16.mxu1 %v4034_v51  ;;  %v4088_v12 = vcombine.high %v205_v56, %v209_v57  ;;  %v213_v51 = vld [vmem:[%s6822_s3 + $0x210] sm:$0xff]  ;;  %v258_v48 = vld [vmem:[%s6822_s3 + $0x378] sm:$0xff] }
 0x18b   :  { %v257_v49 = vld [vmem:[%s6822_s3 + $0x370] sm:$0xff] }
 0x18c   :  { %1805 = vmatmul.mubr.bf16.vlgmr.msra.gmra.mrb[0].mxu0 %v5394_v4  ;;  %1891 = vmatmul.mubr.bf16.vlgmr.msra.gmra.mrb[0].mxu1 %v5394_v4 }
 0x18d   :  { %1902 = vmatpush1.bf16.msra.mxu0 %v4031_v10  ;;  %1933 = vmatprep.mubr.bf16.mxu0 %v5387_v46  ;;  %v4087_v10 = vcombine.low %v205_v56, %v209_v57  ;;  %v261_v56 = vld [vmem:[%s6822_s3 + $0x390] sm:$0xff] }
 0x18e   :  { %1988 = vmatpush1.bf16.msra.mxu1 %v4033_v13  ;;  %2019 = vmatprep.mubr.bf16.mxu1 %v5387_v46  ;;  %v178_v46 = vld [vmem:[%s6822_s3 + $0xf8] sm:$0xff]  ;;  %v4089_v13 = vcombine.low %v206_v58, %v210_v61  ;;  %v265_v57 = vld [vmem:[%s6822_s3 + $0x3b0] sm:$0xff] }
 0x18f   :  { %1903 = vmatprep.subr.bf16.mxu0 %v4040_v14  ;;  %1989 = vmatprep.subr.bf16.mxu1 %v4042_v15  ;;  %v4058_v40 = vcombine.high %v174_v27, %v178_v46  ;;  %v4057_v34 = vcombine.low %v174_v27, %v178_v46  ;;  %v4096_v14 = vcombine.high %v213_v51, %v217_v5  ;;  %v221_v15 = vld [vmem:[%s6822_s3 + $0x250] sm:$0xff]  ;;  %v234_v46 = vld [vmem:[%s6822_s3 + $0x2b8] sm:$0xff] }
 0x190   :  { %v4106_v27 = vcombine.high %v222_v18, %v226_v20  ;;  %v4114_v31 = vcombine.high %v230_v26, %v234_v46  ;;  %v262_v58 = vld [vmem:[%s6822_s3 + $0x398] sm:$0xff] }
 0x191   :  { %1904 = vmatpush1.bf16.msra.mxu0 %v4039_v21  ;;  %v4095_v21 = vcombine.low %v213_v51, %v217_v5  ;;  %v266_v61 = vld [vmem:[%s6822_s3 + $0x3b8] sm:$0xff]  ;;  %v269_v51 = vld [vmem:[%s6822_s3 + $0x3d0] sm:$0xff] }
 0x192   :  { %1990 = vmatpush1.bf16.msra.mxu1 %v4041_v22  ;;  %1905 = vmatprep.subr.bf16.mxu0 %v4048_v23  ;;  %v4097_v22 = vcombine.low %v214_v52, %v218_v54  ;;  %v4104_v23 = vcombine.high %v221_v15, %v225_v17  ;;  %v273_v5 = vld [vmem:[%s6822_s3 + $0x3f0] sm:$0xff]  ;;  %v270_v52 = vld [vmem:[%s6822_s3 + $0x3d8] sm:$0xff] }
 0x193   :  { %1991 = vmatprep.subr.bf16.mxu1 %v4050_v25  ;;  %v233_v25 = vld [vmem:[%s6822_s3 + $0x2b0] sm:$0xff]  ;;  %v274_v54 = vld [vmem:[%s6822_s3 + $0x3f8] sm:$0xff] }
 0x195   :  { %1906 = vmatpush1.bf16.msra.mxu0 %v4047_v39  ;;  %v4103_v39 = vcombine.low %v221_v15, %v225_v17  ;;  %v4145_v15 = vcombine.low %v262_v58, %v266_v61  ;;  %v4152_v17 = vcombine.high %v269_v51, %v273_v5 }
 0x196   :  { %1992 = vmatpush1.bf16.msra.mxu1 %v4049_v28  ;;  %1907 = vmatprep.subr.bf16.mxu0 %v4056_v38  ;;  %v4105_v28 = vcombine.low %v222_v18, %v226_v20  ;;  %v4112_v38 = vcombine.high %v229_v24, %v233_v25  ;;  %v278_v18 = vld [vmem:[%s6822_s3 + $0x418] sm:$0xff] }
 0x197   :  { %1993 = vmatprep.subr.bf16.mxu1 %v4058_v40  ;;  %v241_v40 = vld [vmem:[%s6822_s3 + $0x2f0] sm:$0xff]  ;;  %v282_v20 = vld [vmem:[%s6822_s3 + $0x438] sm:$0xff] }
 0x199   :  { %1908 = vmatpush1.bf16.msra.mxu0 %v4055_v33  ;;  %v4111_v33 = vcombine.low %v229_v24, %v233_v25  ;;  %v285_v24 = vld [vmem:[%s6822_s3 + $0x450] sm:$0xff] }
 0x19a   :  { %1994 = vmatpush1.bf16.msra.mxu1 %v4057_v34  ;;  %1909 = vmatprep.subr.bf16.mxu0 %v4064_v35  ;;  %v4113_v34 = vcombine.low %v230_v26, %v234_v46  ;;  %v4120_v35 = vcombine.high %v237_v29, %v241_v40  ;;  %v289_v25 = vld [vmem:[%s6822_s3 + $0x470] sm:$0xff]  ;;  %v4162_v26 = vcombine.high %v278_v18, %v282_v20  ;;  %v290_v46 = vld [vmem:[%s6822_s3 + $0x478] sm:$0xff] }
 0x19b   :  { %1995 = vmatprep.subr.bf16.mxu1 %v4066_v42  ;;  %v249_v42 = vld [vmem:[%s6822_s3 + $0x330] sm:$0xff] }
 0x19d   :  { %1910 = vmatpush1.bf16.msra.mxu0 %v4063_v2  ;;  %v4119_v2 = vcombine.low %v237_v29, %v241_v40  ;;  %v4161_v29 = vcombine.low %v278_v18, %v282_v20  ;;  %v294_v40 = vld [vmem:[%s6822_s3 + $0x498] sm:$0xff]  ;;  %v341_v20 = vld [vmem:[%s6822_s3 + $0x610] sm:$0xff] }
 0x19e   :  { %1996 = vmatpush1.bf16.msra.mxu1 %v4065_v1  ;;  %1911 = vmatprep.subr.bf16.mxu0 %v4072_v44  ;;  %v4121_v1 = vcombine.low %v238_v30, %v242_v32  ;;  %v4128_v44 = vcombine.high %v245_v36, %v249_v42  ;;  %v298_v30 = vld [vmem:[%s6822_s3 + $0x4b8] sm:$0xff] }
 0x19f   :  { %1997 = vmatprep.subr.bf16.mxu1 %v4074_v0  ;;  %v4130_v0 = vcombine.high %v246_v37, %v250_v43 }
 0x1a1   :  { %1912 = vmatpush1.bf16.msra.mxu0 %v4071_v50  ;;  %v4127_v50 = vcombine.low %v245_v36, %v249_v42 }
 0x1a2   :  { %1998 = vmatpush1.bf16.msra.mxu1 %v4073_v7  ;;  %1913 = vmatprep.subr.bf16.mxu0 %v4080_v55  ;;  %v4129_v7 = vcombine.low %v246_v37, %v250_v43  ;;  %v4136_v55 = vcombine.high %v253_v6, %v257_v49  ;;  %v302_v37 = vld [vmem:[%s6822_s3 + $0x4d8] sm:$0xff] }
 0x1a3   :  { %1999 = vmatprep.subr.bf16.mxu1 %v4082_v60  ;;  %v4138_v60 = vcombine.high %v254_v45, %v258_v48 }
 0x1a5   :  { %1914 = vmatpush1.bf16.msra.mxu0 %v4079_v63  ;;  %v4135_v63 = vcombine.low %v253_v6, %v257_v49  ;;  %v314_v49 = vld [vmem:[%s6822_s3 + $0x538] sm:$0xff] }
 0x1a6   :  { %2000 = vmatpush1.bf16.msra.mxu1 %v4081_v8  ;;  %1915 = vmatprep.subr.bf16.mxu0 %v4088_v12  ;;  %v4137_v8 = vcombine.low %v254_v45, %v258_v48  ;;  %v4144_v12 = vcombine.high %v261_v56, %v265_v57  ;;  %v317_v48 = vld [vmem:[%s6822_s3 + $0x550] sm:$0xff] }
 0x1a7   :  { %2001 = vmatprep.subr.bf16.mxu1 %v4090_v53  ;;  %v4146_v53 = vcombine.high %v262_v58, %v266_v61  ;;  %v325_v61 = vld [vmem:[%s6822_s3 + $0x590] sm:$0xff] }
 0x1a9   :  { %1916 = vmatpush1.bf16.msra.mxu0 %v4087_v10  ;;  %v4143_v10 = vcombine.low %v261_v56, %v265_v57  ;;  %v318_v56 = vld [vmem:[%s6822_s3 + $0x558] sm:$0xff] }
 0x1aa   :  { %2002 = vmatpush1.bf16.msra.mxu1 %v4089_v13  ;;  %1917 = vmatprep.subr.bf16.mxu0 %v4096_v14  ;;  %v277_v13 = vld [vmem:[%s6822_s3 + $0x410] sm:$0xff]  ;;  %v322_v57 = vld [vmem:[%s6822_s3 + $0x578] sm:$0xff] }
 0x1ab   :  { %2003 = vmatprep.subr.bf16.mxu1 %v4098_v19  ;;  %v281_v14 = vld [vmem:[%s6822_s3 + $0x430] sm:$0xff]  ;;  %v4154_v19 = vcombine.high %v270_v52, %v274_v54 }
 0x1ad   :  { %1918 = vmatpush1.bf16.msra.mxu0 %v4095_v21  ;;  %v4151_v21 = vcombine.low %v269_v51, %v273_v5  ;;  %v326_v51 = vld [vmem:[%s6822_s3 + $0x598] sm:$0xff] }
 0x1ae   :  { %2004 = vmatpush1.bf16.msra.mxu1 %v4097_v22  ;;  %1919 = vmatprep.subr.bf16.mxu0 %v4104_v23  ;;  %v4153_v22 = vcombine.low %v270_v52, %v274_v54  ;;  %v4160_v23 = vcombine.high %v277_v13, %v281_v14  ;;  %v330_v5 = vld [vmem:[%s6822_s3 + $0x5b8] sm:$0xff]  ;;  %v4202_v52 = vcombine.high %v318_v56, %v322_v57  ;;  %v333_v54 = vld [vmem:[%s6822_s3 + $0x5d0] sm:$0xff] }
 0x1af   :  { %2005 = vmatprep.subr.bf16.mxu1 %v4106_v27  ;;  %v286_v27 = vld [vmem:[%s6822_s3 + $0x458] sm:$0xff]  ;;  %v4210_v18 = vcombine.high %v326_v51, %v330_v5 }
 0x1b0   :  { %v4170_v32 = vcombine.high %v286_v27, %v290_v46  ;;  %v4169_v36 = vcombine.low %v286_v27, %v290_v46  ;;  %v349_v46 = vld [vmem:[%s6822_s3 + $0x650] sm:$0xff] }
 0x1b1   :  { %1920 = vmatpush1.bf16.msra.mxu0 %v4103_v39  ;;  %v4159_v39 = vcombine.low %v277_v13, %v281_v14  ;;  %v4201_v13 = vcombine.low %v318_v56, %v322_v57  ;;  %v378_v56 = vld [vmem:[%s6822_s3 + $0x738] sm:$0xff] }
 0x1b2   :  { %2006 = vmatpush1.bf16.msra.mxu1 %v4105_v28  ;;  %1921 = vmatprep.subr.bf16.mxu0 %v4112_v38  ;;  %v293_v28 = vld [vmem:[%s6822_s3 + $0x490] sm:$0xff] }
 0x1b3   :  { %2007 = vmatprep.subr.bf16.mxu1 %v4114_v31  ;;  %v297_v38 = vld [vmem:[%s6822_s3 + $0x4b0] sm:$0xff]  ;;  %v4168_v31 = vcombine.high %v285_v24, %v289_v25 }
 0x1b4   :  { %v4176_v42 = vcombine.high %v293_v28, %v297_v38  ;;  %v4175_v43 = vcombine.low %v293_v28, %v297_v38 }
 0x1b5   :  { %1922 = vmatpush1.bf16.msra.mxu0 %v4111_v33  ;;  %v4167_v33 = vcombine.low %v285_v24, %v289_v25  ;;  %v342_v24 = vld [vmem:[%s6822_s3 + $0x618] sm:$0xff] }
 0x1b6   :  { %2008 = vmatpush1.bf16.msra.mxu1 %v4113_v34  ;;  %1923 = vmatprep.subr.bf16.mxu0 %v4120_v35  ;;  %v301_v34 = vld [vmem:[%s6822_s3 + $0x4d0] sm:$0xff]  ;;  %v346_v25 = vld [vmem:[%s6822_s3 + $0x638] sm:$0xff] }
 0x1b7   :  { %2009 = vmatprep.subr.bf16.mxu1 %v4122_v41  ;;  %v305_v35 = vld [vmem:[%s6822_s3 + $0x4f0] sm:$0xff]  ;;  %v4178_v41 = vcombine.high %v294_v40, %v298_v30 }
 0x1b8   :  { %v4184_v6 = vcombine.high %v301_v34, %v305_v35 }
 0x1b9   :  { %1924 = vmatpush1.bf16.msra.mxu0 %v4119_v2  ;;  %v309_v2 = vld [vmem:[%s6822_s3 + $0x510] sm:$0xff] }
 0x1ba   :  { %2010 = vmatpush1.bf16.msra.mxu1 %v4121_v1  ;;  %1925 = vmatprep.subr.bf16.mxu0 %v4128_v44  ;;  %v313_v1 = vld [vmem:[%s6822_s3 + $0x530] sm:$0xff]  ;;  %v4177_v44 = vcombine.low %v294_v40, %v298_v30  ;;  %v354_v40 = vld [vmem:[%s6822_s3 + $0x678] sm:$0xff]  ;;  %v4226_v30 = vcombine.high %v342_v24, %v346_v25 }
 0x1bb   :  { %2011 = vmatprep.subr.bf16.mxu1 %v4130_v0  ;;  %v4183_v0 = vcombine.low %v301_v34, %v305_v35  ;;  %v361_v35 = vld [vmem:[%s6822_s3 + $0x6b0] sm:$0xff] }
 0x1bd   :  { %1926 = vmatpush1.bf16.msra.mxu0 %v4127_v50  ;;  %v321_v50 = vld [vmem:[%s6822_s3 + $0x570] sm:$0xff] }
 0x1be   :  { %2012 = vmatpush1.bf16.msra.mxu1 %v4129_v7  ;;  %1927 = vmatprep.subr.bf16.mxu0 %v4136_v55  ;;  %v4192_v55 = vcombine.high %v309_v2, %v313_v1 }
 0x1bf   :  { %2013 = vmatprep.subr.bf16.mxu1 %v4138_v60  ;;  %v4191_v60 = vcombine.low %v309_v2, %v313_v1  ;;  %v365_v1 = vld [vmem:[%s6822_s3 + $0x6d0] sm:$0xff] }
 0x1c1   :  { %1928 = vmatpush1.bf16.msra.mxu0 %v4135_v63  ;;  %v329_v63 = vld [vmem:[%s6822_s3 + $0x5b0] sm:$0xff] }
 0x1c2   :  { %2014 = vmatpush1.bf16.msra.mxu1 %v4137_v8  ;;  %1929 = vmatprep.subr.bf16.mxu0 %v4144_v12  ;;  %v4200_v12 = vcombine.high %v317_v48, %v321_v50  ;;  %v4208_v14 = vcombine.high %v325_v61, %v329_v63 }
 0x1c3   :  { %2015 = vmatprep.subr.bf16.mxu1 %v4146_v53  ;;  %v4199_v53 = vcombine.low %v317_v48, %v321_v50  ;;  %v373_v50 = vld [vmem:[%s6822_s3 + $0x710] sm:$0xff] }
 0x1c5   :  { %1930 = vmatpush1.bf16.msra.mxu0 %v4143_v10  ;;  %v337_v10 = vld [vmem:[%s6822_s3 + $0x5f0] sm:$0xff] }
 0x1c6   :  { %2016 = vmatpush1.bf16.msra.mxu1 %v4145_v15  ;;  %1931 = vmatprep.subr.bf16.mxu0 %v4152_v17  ;;  %v334_v15 = vld [vmem:[%s6822_s3 + $0x5d8] sm:$0xff]  ;;  %v4215_v27 = vcombine.low %v333_v54, %v337_v10 }
 0x1c7   :  { %2017 = vmatprep.subr.bf16.mxu1 %v4154_v19  ;;  %v338_v17 = vld [vmem:[%s6822_s3 + $0x5f8] sm:$0xff]  ;;  %v4207_v19 = vcombine.low %v325_v61, %v329_v63  ;;  %v381_v63 = vld [vmem:[%s6822_s3 + $0x750] sm:$0xff] }
 0x1c8   :  { %v4217_v28 = vcombine.low %v334_v15, %v338_v17 }
 0x1c9   :  { %1932 = vmatpush1.bf16.msra.mxu0 %v4151_v21  ;;  %v345_v21 = vld [vmem:[%s6822_s3 + $0x630] sm:$0xff] }
 0x1ca   :  { %2018 = vmatpush1.bf16.msra.mxu1 %v4153_v22  ;;  %1944 = vmatprep.subr.bf16.mxu0 %v4160_v23  ;;  %v4209_v22 = vcombine.low %v326_v51, %v330_v5  ;;  %v4216_v23 = vcombine.high %v333_v54, %v337_v10  ;;  %v4224_v38 = vcombine.high %v341_v20, %v345_v21  ;;  %v386_v51 = vld [vmem:[%s6822_s3 + $0x778] sm:$0xff]  ;;  %v389_v10 = vld [vmem:[%s6822_s3 + $0x790] sm:$0xff] }
 0x1cb   :  { %2030 = vmatprep.subr.bf16.mxu1 %v4162_v26  ;;  %v4218_v26 = vcombine.high %v334_v15, %v338_v17  ;;  %v394_v15 = vld [vmem:[%s6822_s3 + $0x7b8] sm:$0xff] }
 0x1cc   :  { %1934 = vmatmul.mubr.bf16.vlgmr.msra.gmra.mrb[4].mxu0 %v5389_v47 }
 0x1cd   :  { %2020 = vmatmul.mubr.bf16.vlgmr.msra.gmra.mrb[4].mxu1 %v5389_v47  ;;  %1945 = vmatpush1.bf16.msra.mxu0 %v4159_v39  ;;  %v306_v47 = vld [vmem:[%s6822_s3 + $0x4f8] sm:$0xff]  ;;  %v353_v39 = vld [vmem:[%s6822_s3 + $0x670] sm:$0xff] }
 0x1ce   :  { %1976 = vmatprep.mubr.bf16.mxu0 %v5409_v59  ;;  %2031 = vmatpush1.bf16.msra.mxu1 %v4161_v29  ;;  %v4186_v45 = vcombine.high %v302_v37, %v306_v47  ;;  %v4185_v7 = vcombine.low %v302_v37, %v306_v47  ;;  %v350_v29 = vld [vmem:[%s6822_s3 + $0x658] sm:$0xff]  ;;  %v4232_v34 = vcombine.high %v349_v46, %v353_v39 }
 0x1cf   :  { %2062 = vmatprep.mubr.bf16.mxu1 %v5409_v59  ;;  %1946 = vmatprep.subr.bf16.mxu0 %v4168_v31  ;;  %v310_v59 = vld [vmem:[%s6822_s3 + $0x518] sm:$0xff]  ;;  %v4223_v31 = vcombine.low %v341_v20, %v345_v21  ;;  %v4231_v47 = vcombine.low %v349_v46, %v353_v39  ;;  %v397_v21 = vld [vmem:[%s6822_s3 + $0x7d0] sm:$0xff] }
 0x1d0   :  { %2032 = vmatprep.subr.bf16.mxu1 %v4170_v32  ;;  %v4194_v58 = vcombine.high %v310_v59, %v314_v49  ;;  %v4193_v8 = vcombine.low %v310_v59, %v314_v49  ;;  %v357_v32 = vld [vmem:[%s6822_s3 + $0x690] sm:$0xff]  ;;  %v362_v37 = vld [vmem:[%s6822_s3 + $0x6b8] sm:$0xff] }
 0x1d1   :  { %1947 = vmatpush1.bf16.msra.mxu0 %v4167_v33  ;;  %v4225_v33 = vcombine.low %v342_v24, %v346_v25  ;;  %v370_v59 = vld [vmem:[%s6822_s3 + $0x6f8] sm:$0xff]  ;;  %v4239_v49 = vcombine.low %v357_v32, %v361_v35 }
 0x1d2   :  { %2033 = vmatpush1.bf16.msra.mxu1 %v4169_v36  ;;  %1948 = vmatprep.subr.bf16.mxu0 %v4176_v42  ;;  %v4234_v36 = vcombine.high %v350_v29, %v354_v40  ;;  %v358_v42 = vld [vmem:[%s6822_s3 + $0x698] sm:$0xff] }
 0x1d3   :  { %2034 = vmatprep.subr.bf16.mxu1 %v4178_v41  ;;  %v4233_v41 = vcombine.low %v350_v29, %v354_v40  ;;  %v4242_v2 = vcombine.high %v358_v42, %v362_v37  ;;  %v402_v24 = vld [vmem:[%s6822_s3 + $0x7f8] sm:$0xff]  ;;  %v4595_v40 = vld [vmem:[%s6825_s5] ss:$16 sps:$4 sm:$0xff]  }
 0x1d4   :  { %v4600_v29 = vld [vmem:[%s6825_s5 + $0xc] ss:$16 sps:$4 sm:$0xff]  }
 0x1d5   :  { %1949 = vmatpush1.bf16.msra.mxu0 %v4175_v43  ;;  %v4240_v43 = vcombine.high %v357_v32, %v361_v35  ;;  %v4606_v32 = vld [vmem:[%s6825_s5 + $0x2c] ss:$16 sps:$4 sm:$0xff]   ;;  %v4609_v35 = vld [vmem:[%s6825_s5 + $0x44] ss:$16 sps:$4 sm:$0xff]  }
 0x1d6   :  { %2035 = vmatpush1.bf16.msra.mxu1 %v4177_v44  ;;  %1950 = vmatprep.subr.bf16.mxu0 %v4184_v6  ;;  %v369_v44 = vld [vmem:[%s6822_s3 + $0x6f0] sm:$0xff]  ;;  %v366_v6 = vld [vmem:[%s6822_s3 + $0x6d8] sm:$0xff] }
 0x1d7   :  { %2036 = vmatprep.subr.bf16.mxu1 %v4186_v45  ;;  %v4241_v45 = vcombine.low %v358_v42, %v362_v37  ;;  %v4250_v48 = vcombine.high %v366_v6, %v370_v59  ;;  %v4247_v57 = vcombine.low %v365_v1, %v369_v44  ;;  %v4610_v42 = vld [vmem:[%s6825_s5 + $0x48] ss:$16 sps:$4 sm:$0xff]   ;;  %v4615_v37 = vld [vmem:[%s6825_s5 + $0x64] ss:$16 sps:$4 sm:$0xff]  }
 0x1d9   :  { %1951 = vmatpush1.bf16.msra.mxu0 %v4183_v0  ;;  %v4248_v0 = vcombine.high %v365_v1, %v369_v44  ;;  %v4624_v1 = vld [vmem:[%s6825_s5 + $0x8c] ss:$16 sps:$4 sm:$0xff]   ;;  %v4619_v44 = vld [vmem:[%s6825_s5 + $0x80] ss:$16 sps:$4 sm:$0xff]  }
 0x1da   :  { %2037 = vmatpush1.bf16.msra.mxu1 %v4185_v7  ;;  %1952 = vmatprep.subr.bf16.mxu0 %v4192_v55  ;;  %v377_v7 = vld [vmem:[%s6822_s3 + $0x730] sm:$0xff]  ;;  %v374_v55 = vld [vmem:[%s6822_s3 + $0x718] sm:$0xff] }
 0x1db   :  { %2038 = vmatprep.subr.bf16.mxu1 %v4194_v58  ;;  %v4249_v58 = vcombine.low %v366_v6, %v370_v59  ;;  %v4258_v61 = vcombine.high %v374_v55, %v378_v56  ;;  %v4255_v5 = vcombine.low %v373_v50, %v377_v7  ;;  %v4622_v6 = vld [vmem:[%s6825_s5 + $0x88] ss:$16 sps:$4 sm:$0xff]   ;;  %v4627_v59 = vld [vmem:[%s6825_s5 + $0xa4] ss:$16 sps:$4 sm:$0xff]  }
 0x1dd   :  { %1953 = vmatpush1.bf16.msra.mxu0 %v4191_v60  ;;  %v4256_v60 = vcombine.high %v373_v50, %v377_v7  ;;  %v4636_v50 = vld [vmem:[%s6825_s5 + $0xcc] ss:$16 sps:$4 sm:$0xff]   ;;  %v4631_v7 = vld [vmem:[%s6825_s5 + $0xc0] ss:$16 sps:$4 sm:$0xff]  }
 0x1de   :  { %2039 = vmatpush1.bf16.msra.mxu1 %v4193_v8  ;;  %1954 = vmatprep.subr.bf16.mxu0 %v4200_v12  ;;  %v385_v8 = vld [vmem:[%s6822_s3 + $0x770] sm:$0xff]  ;;  %v382_v12 = vld [vmem:[%s6822_s3 + $0x758] sm:$0xff] }
 0x1df   :  { %2040 = vmatprep.subr.bf16.mxu1 %v4202_v52  ;;  %v4257_v52 = vcombine.low %v374_v55, %v378_v56  ;;  %v4266_v54 = vcombine.high %v382_v12, %v386_v51  ;;  %v4263_v17 = vcombine.low %v381_v63, %v385_v8  ;;  %v4634_v55 = vld [vmem:[%s6825_s5 + $0xc8] ss:$16 sps:$4 sm:$0xff]   ;;  %v4639_v56 = vld [vmem:[%s6825_s5 + $0xe4] ss:$16 sps:$4 sm:$0xff]  }
 0x1e1   :  { %1955 = vmatpush1.bf16.msra.mxu0 %v4199_v53  ;;  %v4264_v53 = vcombine.high %v381_v63, %v385_v8  ;;  %v4648_v63 = vld [vmem:[%s6825_s5 + $0x10c] ss:$16 sps:$4 sm:$0xff]   ;;  %v4643_v8 = vld [vmem:[%s6825_s5 + $0x100] ss:$16 sps:$4 sm:$0xff]  }
 0x1e2   :  { %2041 = vmatpush1.bf16.msra.mxu1 %v4201_v13  ;;  %1956 = vmatprep.subr.bf16.mxu0 %v4208_v14  ;;  %v393_v13 = vld [vmem:[%s6822_s3 + $0x7b0] sm:$0xff]  ;;  %v390_v14 = vld [vmem:[%s6822_s3 + $0x798] sm:$0xff] }
 0x1e3   :  { %2042 = vmatprep.subr.bf16.mxu1 %v4210_v18  ;;  %v4265_v18 = vcombine.low %v382_v12, %v386_v51  ;;  %v4274_v20 = vcombine.high %v390_v14, %v394_v15  ;;  %v4271_v25 = vcombine.low %v389_v10, %v393_v13  ;;  %v4646_v12 = vld [vmem:[%s6825_s5 + $0x108] ss:$16 sps:$4 sm:$0xff]   ;;  %v4651_v51 = vld [vmem:[%s6825_s5 + $0x124] ss:$16 sps:$4 sm:$0xff]  }
 0x1e5   :  { %1957 = vmatpush1.bf16.msra.mxu0 %v4207_v19  ;;  %v4272_v19 = vcombine.high %v389_v10, %v393_v13  ;;  %v4660_v10 = vld [vmem:[%s6825_s5 + $0x14c] ss:$16 sps:$4 sm:$0xff]   ;;  %v4655_v13 = vld [vmem:[%s6825_s5 + $0x140] ss:$16 sps:$4 sm:$0xff]  }
 0x1e6   :  { %2043 = vmatpush1.bf16.msra.mxu1 %v4209_v22  ;;  %1958 = vmatprep.subr.bf16.mxu0 %v4216_v23  ;;  %v401_v22 = vld [vmem:[%s6822_s3 + $0x7f0] sm:$0xff]  ;;  %v398_v23 = vld [vmem:[%s6822_s3 + $0x7d8] sm:$0xff] }
 0x1e7   :  { %2044 = vmatprep.subr.bf16.mxu1 %v4218_v26  ;;  %v4273_v26 = vcombine.low %v390_v14, %v394_v15  ;;  %v4282_v46 = vcombine.high %v398_v23, %v402_v24  ;;  %v4279_v39 = vcombine.low %v397_v21, %v401_v22  ;;  %v4658_v14 = vld [vmem:[%s6825_s5 + $0x148] ss:$16 sps:$4 sm:$0xff]   ;;  %v4663_v15 = vld [vmem:[%s6825_s5 + $0x164] ss:$16 sps:$4 sm:$0xff]  }
 0x1e9   :  { %1959 = vmatpush1.bf16.msra.mxu0 %v4215_v27  ;;  %v4280_v27 = vcombine.high %v397_v21, %v401_v22  ;;  %v4672_v21 = vld [vmem:[%s6825_s5 + $0x18c] ss:$16 sps:$4 sm:$0xff]   ;;  %v4667_v22 = vld [vmem:[%s6825_s5 + $0x180] ss:$16 sps:$4 sm:$0xff]  }
 0x1ea   :  { %2045 = vmatpush1.bf16.msra.mxu1 %v4217_v28  ;;  %1960 = vmatprep.subr.bf16.mxu0 %v4224_v38  ;;  %v4281_v28 = vcombine.low %v398_v23, %v402_v24  ;;  %v4597_v38 = vld [vmem:[%s6825_s5 + $0x4] ss:$16 sps:$4 sm:$0xff]   ;;  %v4670_v23 = vld [vmem:[%s6825_s5 + $0x188] ss:$16 sps:$4 sm:$0xff]  }
 0x1eb   :  { %2046 = vmatprep.subr.bf16.mxu1 %v4226_v30  ;;  %v4598_v30 = vld [vmem:[%s6825_s5 + $0x8] ss:$16 sps:$4 sm:$0xff]   ;;  %v4675_v24 = vld [vmem:[%s6825_s5 + $0x1a4] ss:$16 sps:$4 sm:$0xff]  }
 0x1ed   :  { %1961 = vmatpush1.bf16.msra.mxu0 %v4223_v31  ;;  %v4603_v31 = vld [vmem:[%s6825_s5 + $0x24] ss:$16 sps:$4 sm:$0xff]  }
 0x1ee   :  { %2047 = vmatpush1.bf16.msra.mxu1 %v4225_v33  ;;  %1962 = vmatprep.subr.bf16.mxu0 %v4232_v34  ;;  %v4601_v33 = vld [vmem:[%s6825_s5 + $0x20] ss:$16 sps:$4 sm:$0xff]   ;;  %v4604_v34 = vld [vmem:[%s6825_s5 + $0x28] ss:$16 sps:$4 sm:$0xff]  }
 0x1ef   :  { %2048 = vmatprep.subr.bf16.mxu1 %v4234_v36  ;;  %v4607_v36 = vld [vmem:[%s6825_s5 + $0x40] ss:$16 sps:$4 sm:$0xff]  }
 0x1f1   :  { %1963 = vmatpush1.bf16.msra.mxu0 %v4231_v47  ;;  %v4618_v47 = vld [vmem:[%s6825_s5 + $0x6c] ss:$16 sps:$4 sm:$0xff]  }
 0x1f2   :  { %2049 = vmatpush1.bf16.msra.mxu1 %v4233_v41  ;;  %1964 = vmatprep.subr.bf16.mxu0 %v4240_v43  ;;  %v4613_v41 = vld [vmem:[%s6825_s5 + $0x60] ss:$16 sps:$4 sm:$0xff]   ;;  %v4616_v43 = vld [vmem:[%s6825_s5 + $0x68] ss:$16 sps:$4 sm:$0xff]  }
 0x1f3   :  { %2050 = vmatprep.subr.bf16.mxu1 %v4242_v2  ;;  %v4621_v2 = vld [vmem:[%s6825_s5 + $0x84] ss:$16 sps:$4 sm:$0xff]  }
 0x1f5   :  { %1965 = vmatpush1.bf16.msra.mxu0 %v4239_v49  ;;  %v4630_v49 = vld [vmem:[%s6825_s5 + $0xac] ss:$16 sps:$4 sm:$0xff]  }
 0x1f6   :  { %2051 = vmatpush1.bf16.msra.mxu1 %v4241_v45  ;;  %1966 = vmatprep.subr.bf16.mxu0 %v4248_v0  ;;  %v4625_v45 = vld [vmem:[%s6825_s5 + $0xa0] ss:$16 sps:$4 sm:$0xff]   ;;  %v4628_v0 = vld [vmem:[%s6825_s5 + $0xa8] ss:$16 sps:$4 sm:$0xff]  }
 0x1f7   :  { %2052 = vmatprep.subr.bf16.mxu1 %v4250_v48  ;;  %v4633_v48 = vld [vmem:[%s6825_s5 + $0xc4] ss:$16 sps:$4 sm:$0xff]  }
 0x1f9   :  { %1967 = vmatpush1.bf16.msra.mxu0 %v4247_v57  ;;  %v4642_v57 = vld [vmem:[%s6825_s5 + $0xec] ss:$16 sps:$4 sm:$0xff]  }
 0x1fa   :  { %2053 = vmatpush1.bf16.msra.mxu1 %v4249_v58  ;;  %1968 = vmatprep.subr.bf16.mxu0 %v4256_v60  ;;  %v4637_v58 = vld [vmem:[%s6825_s5 + $0xe0] ss:$16 sps:$4 sm:$0xff]   ;;  %v4640_v60 = vld [vmem:[%s6825_s5 + $0xe8] ss:$16 sps:$4 sm:$0xff]  }
 0x1fb   :  { %2054 = vmatprep.subr.bf16.mxu1 %v4258_v61  ;;  %v4645_v61 = vld [vmem:[%s6825_s5 + $0x104] ss:$16 sps:$4 sm:$0xff]  }
 0x1fd   :  { %1969 = vmatpush1.bf16.msra.mxu0 %v4255_v5  ;;  %v4654_v5 = vld [vmem:[%s6825_s5 + $0x12c] ss:$16 sps:$4 sm:$0xff]  }
 0x1fe   :  { %2055 = vmatpush1.bf16.msra.mxu1 %v4257_v52  ;;  %1970 = vmatprep.subr.bf16.mxu0 %v4264_v53  ;;  %v4649_v52 = vld [vmem:[%s6825_s5 + $0x120] ss:$16 sps:$4 sm:$0xff]   ;;  %v4652_v53 = vld [vmem:[%s6825_s5 + $0x128] ss:$16 sps:$4 sm:$0xff]  }
 0x1ff   :  { %2056 = vmatprep.subr.bf16.mxu1 %v4266_v54  ;;  %v4657_v54 = vld [vmem:[%s6825_s5 + $0x144] ss:$16 sps:$4 sm:$0xff]  }
 0x201   :  { %1971 = vmatpush1.bf16.msra.mxu0 %v4263_v17  ;;  %v4666_v17 = vld [vmem:[%s6825_s5 + $0x16c] ss:$16 sps:$4 sm:$0xff]  }
 0x202   :  { %2057 = vmatpush1.bf16.msra.mxu1 %v4265_v18  ;;  %1972 = vmatprep.subr.bf16.mxu0 %v4272_v19  ;;  %v4661_v18 = vld [vmem:[%s6825_s5 + $0x160] ss:$16 sps:$4 sm:$0xff]   ;;  %v4664_v19 = vld [vmem:[%s6825_s5 + $0x168] ss:$16 sps:$4 sm:$0xff]  }
 0x203   :  { %2058 = vmatprep.subr.bf16.mxu1 %v4274_v20  ;;  %v4669_v20 = vld [vmem:[%s6825_s5 + $0x184] ss:$16 sps:$4 sm:$0xff]  }
 0x205   :  { %1973 = vmatpush1.bf16.msra.mxu0 %v4271_v25  ;;  %v4678_v25 = vld [vmem:[%s6825_s5 + $0x1ac] ss:$16 sps:$4 sm:$0xff]  }
 0x206   :  { %2059 = vmatpush1.bf16.msra.mxu1 %v4273_v26  ;;  %1974 = vmatprep.subr.bf16.mxu0 %v4280_v27  ;;  %v4673_v26 = vld [vmem:[%s6825_s5 + $0x1a0] ss:$16 sps:$4 sm:$0xff]   ;;  %v4676_v27 = vld [vmem:[%s6825_s5 + $0x1a8] ss:$16 sps:$4 sm:$0xff]  }
 0x207   :  { %2060 = vmatprep.subr.bf16.mxu1 %v4282_v46  ;;  %v4681_v46 = vld [vmem:[%s6825_s5 + $0x1c4] ss:$16 sps:$4 sm:$0xff]  }
 0x209   :  { %1975 = vmatpush1.bf16.msra.mxu0 %v4279_v39  ;;  %v4684_v39 = vld [vmem:[%s6825_s5 + $0x1cc] ss:$16 sps:$4 sm:$0xff]  }
 0x20a   :  { %2061 = vmatpush1.bf16.msra.mxu1 %v4281_v28  ;;  %3633 = vmatprep.subr.bf16.mxu0 %v4597_v38  ;;  %v4679_v28 = vld [vmem:[%s6825_s5 + $0x1c0] ss:$16 sps:$4 sm:$0xff]   ;;  %v4682_v38 = vld [vmem:[%s6825_s5 + $0x1c8] ss:$16 sps:$4 sm:$0xff]  }
 0x20b   :  { %3805 = vmatprep.subr.bf16.mxu1 %v4600_v29  ;;  %v4687_v29 = vld [vmem:[%s6825_s5 + $0x1e4] ss:$16 sps:$4 sm:$0xff]  }
 0x20c   :  { %1977 = vmatmul.mubr.bf16.vlgmr.msra.gmra.mrb[4].mxu0 %v5394_v4 }
 0x20d   :  { %2063 = vmatmul.mubr.bf16.vlgmr.msra.gmra.mrb[4].mxu1 %v5394_v4  ;;  %3634 = vmatpush1.bf16.msra.mxu0 %v4595_v40  ;;  %v4612_v4 = vld [vmem:[%s6825_s5 + $0x4c] ss:$16 sps:$4 sm:$0xff]  }
 0x20e   :  { %3806 = vmatpush1.bf16.msra.mxu1 %v4598_v30  ;;  %3635 = vmatprep.subr.bf16.mxu0 %v4603_v31  ;;  %v4690_v40 = vld [vmem:[%s6825_s5 + $0x1ec] ss:$16 sps:$4 sm:$0xff]   ;;  %v4685_v30 = vld [vmem:[%s6825_s5 + $0x1e0] ss:$16 sps:$4 sm:$0xff]   ;;  %v4688_v31 = vld [vmem:[%s6825_s5 + $0x1e8] ss:$16 sps:$4 sm:$0xff]  }
 0x20f   :  { %3807 = vmatprep.subr.bf16.mxu1 %v4606_v32  ;;  %v4693_v32 = vld [vmem:[%s6825_s5 + $0x204] ss:$16 sps:$4 sm:$0xff]  }
 0x211   :  { %3636 = vmatpush1.bf16.msra.mxu0 %v4601_v33  ;;  %v4696_v33 = vld [vmem:[%s6825_s5 + $0x20c] ss:$16 sps:$4 sm:$0xff]  }
 0x212   :  { %3808 = vmatpush1.bf16.msra.mxu1 %v4604_v34  ;;  %3637 = vmatprep.subr.bf16.mxu0 %v4609_v35  ;;  %v6170_v34 = vld [vmem:[%s6826_s4] sm:$0xff] }
 0x213   :  { %3809 = vmatprep.subr.bf16.mxu1 %v4612_v4  ;;  %v412_v35 = vrot.slane %v6170_v34, %v5351_v11  ;;  %v420_v4 = vrot.slane %v6170_v34, %v5342_v3 }
 0x215   :  { %3638 = vmatpush1.bf16.msra.mxu0 %v4607_v36  ;;  %v416_v36 = vrot.slane %v6170_v34, %v5348_v9 }
 0x216   :  { %3810 = vmatpush1.bf16.msra.mxu1 %v4610_v42  ;;  %3639 = vmatprep.subr.bf16.mxu0 %v4615_v37  ;;  %v424_v42 = vrot.slane %v6170_v34, %v5359_v16 }
 0x217   :  { %3811 = vmatprep.subr.bf16.mxu1 %v4618_v47 }
 0x219   :  { %3640 = vmatpush1.bf16.msra.mxu0 %v4613_v41 }
 0x21a   :  { %3812 = vmatpush1.bf16.msra.mxu1 %v4616_v43  ;;  %3641 = vmatprep.subr.bf16.mxu0 %v4621_v2 }
 0x21b   :  { %3813 = vmatprep.subr.bf16.mxu1 %v4624_v1 }
 0x21d   :  { %3642 = vmatpush1.bf16.msra.mxu0 %v4619_v44 }
 0x21e   :  { %3814 = vmatpush1.bf16.msra.mxu1 %v4622_v6  ;;  %3643 = vmatprep.subr.bf16.mxu0 %v4627_v59 }
 0x21f   :  { %3815 = vmatprep.subr.bf16.mxu1 %v4630_v49 }
 0x221   :  { %3644 = vmatpush1.bf16.msra.mxu0 %v4625_v45 }
 0x222   :  { %3816 = vmatpush1.bf16.msra.mxu1 %v4628_v0  ;;  %3645 = vmatprep.subr.bf16.mxu0 %v4633_v48 }
 0x223   :  { %3817 = vmatprep.subr.bf16.mxu1 %v4636_v50 }
 0x225   :  { %3646 = vmatpush1.bf16.msra.mxu0 %v4631_v7 }
 0x226   :  { %3818 = vmatpush1.bf16.msra.mxu1 %v4634_v55  ;;  %3647 = vmatprep.subr.bf16.mxu0 %v4639_v56 }
 0x227   :  { %3819 = vmatprep.subr.bf16.mxu1 %v4642_v57 }
 0x229   :  { %3648 = vmatpush1.bf16.msra.mxu0 %v4637_v58 }
 0x22a   :  { %3820 = vmatpush1.bf16.msra.mxu1 %v4640_v60  ;;  %3649 = vmatprep.subr.bf16.mxu0 %v4645_v61 }
 0x22b   :  { %3821 = vmatprep.subr.bf16.mxu1 %v4648_v63 }
 0x22d   :  { %3650 = vmatpush1.bf16.msra.mxu0 %v4643_v8 }
 0x22e   :  { %3822 = vmatpush1.bf16.msra.mxu1 %v4646_v12  ;;  %3651 = vmatprep.subr.bf16.mxu0 %v4651_v51 }
 0x22f   :  { %3823 = vmatprep.subr.bf16.mxu1 %v4654_v5 }
 0x231   :  { %3652 = vmatpush1.bf16.msra.mxu0 %v4649_v52 }
 0x232   :  { %3824 = vmatpush1.bf16.msra.mxu1 %v4652_v53  ;;  %3653 = vmatprep.subr.bf16.mxu0 %v4657_v54  ;;  %v4691_v54 = vld [vmem:[%s6825_s5 + $0x200] ss:$16 sps:$4 sm:$0xff]  }
 0x233   :  { %3825 = vmatprep.subr.bf16.mxu1 %v4660_v10  ;;  %v4694_v10 = vld [vmem:[%s6825_s5 + $0x208] ss:$16 sps:$4 sm:$0xff]  }
 0x235   :  { %3654 = vmatpush1.bf16.msra.mxu0 %v4655_v13  ;;  %v4699_v13 = vld [vmem:[%s6825_s5 + $0x224] ss:$16 sps:$4 sm:$0xff]  }
 0x236   :  { %3826 = vmatpush1.bf16.msra.mxu1 %v4658_v14  ;;  %3655 = vmatprep.subr.bf16.mxu0 %v4663_v15  ;;  %v4702_v14 = vld [vmem:[%s6825_s5 + $0x22c] ss:$16 sps:$4 sm:$0xff]   ;;  %v4697_v15 = vld [vmem:[%s6825_s5 + $0x220] ss:$16 sps:$4 sm:$0xff]  }
 0x237   :  { %3827 = vmatprep.subr.bf16.mxu1 %v4666_v17  ;;  %v4700_v17 = vld [vmem:[%s6825_s5 + $0x228] ss:$16 sps:$4 sm:$0xff]  }
 0x239   :  { %3656 = vmatpush1.bf16.msra.mxu0 %v4661_v18  ;;  %v4705_v18 = vld [vmem:[%s6825_s5 + $0x244] ss:$16 sps:$4 sm:$0xff]  }
 0x23a   :  { %3828 = vmatpush1.bf16.msra.mxu1 %v4664_v19  ;;  %3657 = vmatprep.subr.bf16.mxu0 %v4669_v20  ;;  %v4708_v19 = vld [vmem:[%s6825_s5 + $0x24c] ss:$16 sps:$4 sm:$0xff]   ;;  %v4703_v20 = vld [vmem:[%s6825_s5 + $0x240] ss:$16 sps:$4 sm:$0xff]  }
 0x23b   :  { %3829 = vmatprep.subr.bf16.mxu1 %v4672_v21  ;;  %v4706_v21 = vld [vmem:[%s6825_s5 + $0x248] ss:$16 sps:$4 sm:$0xff]  }
 0x23d   :  { %3658 = vmatpush1.bf16.msra.mxu0 %v4667_v22  ;;  %v4711_v22 = vld [vmem:[%s6825_s5 + $0x264] ss:$16 sps:$4 sm:$0xff]  }
 0x23e   :  { %3830 = vmatpush1.bf16.msra.mxu1 %v4670_v23  ;;  %3659 = vmatprep.subr.bf16.mxu0 %v4675_v24  ;;  %v4714_v23 = vld [vmem:[%s6825_s5 + $0x26c] ss:$16 sps:$4 sm:$0xff]   ;;  %v4709_v24 = vld [vmem:[%s6825_s5 + $0x260] ss:$16 sps:$4 sm:$0xff]  }
 0x23f   :  { %3831 = vmatprep.subr.bf16.mxu1 %v4678_v25  ;;  %v4712_v25 = vld [vmem:[%s6825_s5 + $0x268] ss:$16 sps:$4 sm:$0xff]  }
 0x241   :  { %3660 = vmatpush1.bf16.msra.mxu0 %v4673_v26  ;;  %v4717_v26 = vld [vmem:[%s6825_s5 + $0x284] ss:$16 sps:$4 sm:$0xff]  }
 0x242   :  { %3832 = vmatpush1.bf16.msra.mxu1 %v4676_v27  ;;  %3661 = vmatprep.subr.bf16.mxu0 %v4681_v46  ;;  %v4720_v27 = vld [vmem:[%s6825_s5 + $0x28c] ss:$16 sps:$4 sm:$0xff]   ;;  %v4715_v46 = vld [vmem:[%s6825_s5 + $0x280] ss:$16 sps:$4 sm:$0xff]  }
 0x243   :  { %3833 = vmatprep.subr.bf16.mxu1 %v4684_v39  ;;  %v4718_v39 = vld [vmem:[%s6825_s5 + $0x288] ss:$16 sps:$4 sm:$0xff]  }
 0x245   :  { %3662 = vmatpush1.bf16.msra.mxu0 %v4679_v28  ;;  %v4723_v28 = vld [vmem:[%s6825_s5 + $0x2a4] ss:$16 sps:$4 sm:$0xff]  }
 0x246   :  { %3834 = vmatpush1.bf16.msra.mxu1 %v4682_v38  ;;  %3663 = vmatprep.subr.bf16.mxu0 %v4687_v29  ;;  %v4726_v38 = vld [vmem:[%s6825_s5 + $0x2ac] ss:$16 sps:$4 sm:$0xff]   ;;  %v4721_v29 = vld [vmem:[%s6825_s5 + $0x2a0] ss:$16 sps:$4 sm:$0xff]  }
 0x247   :  { %3835 = vmatprep.subr.bf16.mxu1 %v4690_v40  ;;  %v4724_v40 = vld [vmem:[%s6825_s5 + $0x2a8] ss:$16 sps:$4 sm:$0xff]  }
 0x249   :  { %3664 = vmatpush1.bf16.msra.mxu0 %v4685_v30  ;;  %v4729_v30 = vld [vmem:[%s6825_s5 + $0x2c4] ss:$16 sps:$4 sm:$0xff]  }
 0x24a   :  { %3836 = vmatpush1.bf16.msra.mxu1 %v4688_v31  ;;  %3676 = vmatprep.subr.bf16.mxu0 %v4693_v32  ;;  %v4732_v31 = vld [vmem:[%s6825_s5 + $0x2cc] ss:$16 sps:$4 sm:$0xff]   ;;  %v4727_v32 = vld [vmem:[%s6825_s5 + $0x2c0] ss:$16 sps:$4 sm:$0xff]  }
 0x24b   :  { %3848 = vmatprep.subr.bf16.mxu1 %v4696_v33  ;;  %v4730_v33 = vld [vmem:[%s6825_s5 + $0x2c8] ss:$16 sps:$4 sm:$0xff]  }
 0x25f   :  { %v1806_v37 = vpop.f32.mrb[0].mxu0  ;;  %v1892_v47 = vpop.f32.mrb[0].mxu1 }
 0x260   :  { %v4539_v41 = vadd.f32 %v1806_v37, %v412_v35  ;;  %v4543_v43 = vadd.f32 %v1892_v47, %v420_v4  ;;  %v1808_v2 = vpop.f32.mrb[1].mxu0  ;;  %v1894_v1 = vpop.f32.mrb[1].mxu1  ;;  %v4741_v37 = vld [vmem:[%s6825_s5 + $0x304] ss:$16 sps:$4 sm:$0xff]   ;;  %v4744_v47 = vld [vmem:[%s6825_s5 + $0x30c] ss:$16 sps:$4 sm:$0xff]  }
 0x261   :  { %v4540_v44 = vadd.f32 %v1808_v2, %v416_v36  ;;  %v4544_v6 = vadd.f32 %v1894_v1, %v424_v42  ;;  %v1810_v59 = vpop.f32.mrb[2].mxu0  ;;  %v1896_v49 = vpop.f32.mrb[2].mxu1  ;;  %v4747_v2 = vld [vmem:[%s6825_s5 + $0x324] ss:$16 sps:$4 sm:$0xff]   ;;  %v4750_v1 = vld [vmem:[%s6825_s5 + $0x32c] ss:$16 sps:$4 sm:$0xff]  }
 0x262   :  { %v4541_v45 = vadd.f32 %v1810_v59, %v412_v35  ;;  %v4545_v0 = vadd.f32 %v1896_v49, %v420_v4  ;;  %v1812_v48 = vpop.f32.mrb[3].mxu0  ;;  %v1898_v50 = vpop.f32.mrb[3].mxu1  ;;  %v2073_v56 = vmax.f32 %v4539_v41, 0.0  ;;  %v2075_v57 = vmax.f32 %v4543_v43, 0.0  ;;  %v4735_v35 = vld [vmem:[%s6825_s5 + $0x2e4] ss:$16 sps:$4 sm:$0xff]  }
 0x263   :  { %v4542_v7 = vadd.f32 %v1812_v48, %v416_v36  ;;  %v4546_v55 = vadd.f32 %v1898_v50, %v424_v42  ;;  %v2074_v61 = vmax.f32 %v4540_v44, 0.0  ;;  %v2076_v63 = vmax.f32 %v4544_v6, 0.0  ;;  %v4738_v4 = vld [vmem:[%s6825_s5 + $0x2ec] ss:$16 sps:$4 sm:$0xff]   ;;  %v4733_v36 = vld [vmem:[%s6825_s5 + $0x2e0] ss:$16 sps:$4 sm:$0xff]  }
 0x264   :  { %v2081_v58 = vmax.f32 %v4541_v45, 0.0  ;;  %v2083_v60 = vmax.f32 %v4545_v0, 0.0  ;;  %v4736_v42 = vld [vmem:[%s6825_s5 + $0x2e8] ss:$16 sps:$4 sm:$0xff]   ;;  %v4739_v41 = vld [vmem:[%s6825_s5 + $0x300] ss:$16 sps:$4 sm:$0xff]  }
 0x265   :  { %v2082_v8 = vmax.f32 %v4542_v7, 0.0  ;;  %v2084_v12 = vmax.f32 %v4546_v55, 0.0  ;;  %v4742_v43 = vld [vmem:[%s6825_s5 + $0x308] ss:$16 sps:$4 sm:$0xff]   ;;  %v4745_v44 = vld [vmem:[%s6825_s5 + $0x320] ss:$16 sps:$4 sm:$0xff]  }
 0x266   :  { %v2345_v51 = vpack.c.bf16 %v2081_v58, %v2073_v56  ;;  %v6180_v5 = vpack.c.bf16 %v2083_v60, %v2075_v57  ;;  %v4748_v6 = vld [vmem:[%s6825_s5 + $0x328] ss:$16 sps:$4 sm:$0xff]   ;;  %v4753_v59 = vld [vmem:[%s6825_s5 + $0x344] ss:$16 sps:$4 sm:$0xff]   ;;  %v4756_v49 = vld [vmem:[%s6825_s5 + $0x34c] ss:$16 sps:$4 sm:$0xff]  }
 0x267   :  { %v2346_v52 = vpack.c.bf16 %v2082_v8, %v2074_v61  ;;  %v2348_v53 = vpack.c.bf16 %v2084_v12, %v2076_v63  ;;  %v4751_v45 = vld [vmem:[%s6825_s5 + $0x340] ss:$16 sps:$4 sm:$0xff]   ;;  %v4754_v0 = vld [vmem:[%s6825_s5 + $0x348] ss:$16 sps:$4 sm:$0xff]   ;;  %v4759_v48 = vld [vmem:[%s6825_s5 + $0x364] ss:$16 sps:$4 sm:$0xff]  }
 0x268   :  { %v4762_v50 = vld [vmem:[%s6825_s5 + $0x36c] ss:$16 sps:$4 sm:$0xff]   ;;  %v4757_v7 = vld [vmem:[%s6825_s5 + $0x360] ss:$16 sps:$4 sm:$0xff]   ;;  %v4760_v55 = vld [vmem:[%s6825_s5 + $0x368] ss:$16 sps:$4 sm:$0xff]  }
 0x269   :  { %3665 = vmatprep.mubr.bf16.mxu0 %v2346_v52  ;;  %3837 = vmatprep.mubr.bf16.mxu1 %v2346_v52  ;;  %v4765_v56 = vld [vmem:[%s6825_s5 + $0x384] ss:$16 sps:$4 sm:$0xff]   ;;  %v4768_v57 = vld [vmem:[%s6825_s5 + $0x38c] ss:$16 sps:$4 sm:$0xff]   ;;  %v4763_v58 = vld [vmem:[%s6825_s5 + $0x380] ss:$16 sps:$4 sm:$0xff]  }
 0x26a   :  { %3666 = vmatmul.mubr.bf16.vlgmr.msra.gmra.mrb[8].mxu0 %v2345_v51  ;;  %3838 = vmatmul.mubr.bf16.vlgmr.msra.gmra.mrb[8].mxu1 %v2345_v51  ;;  %v4766_v60 = vld [vmem:[%s6825_s5 + $0x388] ss:$16 sps:$4 sm:$0xff]   ;;  %v4771_v61 = vld [vmem:[%s6825_s5 + $0x3a4] ss:$16 sps:$4 sm:$0xff]   ;;  %v4774_v63 = vld [vmem:[%s6825_s5 + $0x3ac] ss:$16 sps:$4 sm:$0xff]  }
 0x26b   :  { %3677 = vmatpush1.bf16.msra.mxu0 %v4691_v54  ;;  %3849 = vmatpush1.bf16.msra.mxu1 %v4694_v10  ;;  %v4769_v8 = vld [vmem:[%s6825_s5 + $0x3a0] ss:$16 sps:$4 sm:$0xff]   ;;  %v4772_v12 = vld [vmem:[%s6825_s5 + $0x3a8] ss:$16 sps:$4 sm:$0xff]   ;;  %v4777_v51 = vld [vmem:[%s6825_s5 + $0x3c4] ss:$16 sps:$4 sm:$0xff]  }
 0x26c   :  { %3708 = vmatprep.mubr.bf16.mxu0 %v2348_v53  ;;  %3880 = vmatprep.mubr.bf16.mxu1 %v2348_v53  ;;  %v4780_v52 = vld [vmem:[%s6825_s5 + $0x3cc] ss:$16 sps:$4 sm:$0xff]   ;;  %v4775_v53 = vld [vmem:[%s6825_s5 + $0x3c0] ss:$16 sps:$4 sm:$0xff]   ;;  %v4778_v54 = vld [vmem:[%s6825_s5 + $0x3c8] ss:$16 sps:$4 sm:$0xff]  }
 0x26d   :  { %3678 = vmatprep.subr.bf16.mxu0 %v4699_v13  ;;  %3850 = vmatprep.subr.bf16.mxu1 %v4702_v14  ;;  %v4783_v10 = vld [vmem:[%s6825_s5 + $0x3e4] ss:$16 sps:$4 sm:$0xff]   ;;  %v4786_v13 = vld [vmem:[%s6825_s5 + $0x3ec] ss:$16 sps:$4 sm:$0xff]   ;;  %v4781_v14 = vld [vmem:[%s6825_s5 + $0x3e0] ss:$16 sps:$4 sm:$0xff]  }
 0x26f   :  { %3679 = vmatpush1.bf16.msra.mxu0 %v4697_v15  ;;  %3851 = vmatpush1.bf16.msra.mxu1 %v4700_v17  ;;  %v4784_v15 = vld [vmem:[%s6825_s5 + $0x3e8] ss:$16 sps:$4 sm:$0xff]   ;;  %v4789_v17 = vld [vmem:[%s6825_s5 + $0x404] ss:$16 sps:$4 sm:$0xff]  }
 0x270   :  { %3680 = vmatprep.subr.bf16.mxu0 %v4705_v18  ;;  %3852 = vmatprep.subr.bf16.mxu1 %v4708_v19  ;;  %v4792_v18 = vld [vmem:[%s6825_s5 + $0x40c] ss:$16 sps:$4 sm:$0xff]   ;;  %v4787_v19 = vld [vmem:[%s6825_s5 + $0x400] ss:$16 sps:$4 sm:$0xff]  }
 0x273   :  { %3681 = vmatpush1.bf16.msra.mxu0 %v4703_v20  ;;  %3853 = vmatpush1.bf16.msra.mxu1 %v4706_v21  ;;  %v4790_v20 = vld [vmem:[%s6825_s5 + $0x408] ss:$16 sps:$4 sm:$0xff]   ;;  %v4795_v21 = vld [vmem:[%s6825_s5 + $0x424] ss:$16 sps:$4 sm:$0xff]  }
 0x274   :  { %3682 = vmatprep.subr.bf16.mxu0 %v4711_v22  ;;  %3854 = vmatprep.subr.bf16.mxu1 %v4714_v23  ;;  %v4798_v22 = vld [vmem:[%s6825_s5 + $0x42c] ss:$16 sps:$4 sm:$0xff]   ;;  %v4793_v23 = vld [vmem:[%s6825_s5 + $0x420] ss:$16 sps:$4 sm:$0xff]  }
 0x277   :  { %3683 = vmatpush1.bf16.msra.mxu0 %v4709_v24  ;;  %3855 = vmatpush1.bf16.msra.mxu1 %v4712_v25  ;;  %v4796_v24 = vld [vmem:[%s6825_s5 + $0x428] ss:$16 sps:$4 sm:$0xff]   ;;  %v4801_v25 = vld [vmem:[%s6825_s5 + $0x444] ss:$16 sps:$4 sm:$0xff]  }
 0x278   :  { %3684 = vmatprep.subr.bf16.mxu0 %v4717_v26  ;;  %3856 = vmatprep.subr.bf16.mxu1 %v4720_v27  ;;  %v4799_v26 = vld [vmem:[%s6825_s5 + $0x440] ss:$16 sps:$4 sm:$0xff]   ;;  %v4802_v27 = vld [vmem:[%s6825_s5 + $0x448] ss:$16 sps:$4 sm:$0xff]  }
 0x27b   :  { %3685 = vmatpush1.bf16.msra.mxu0 %v4715_v46  ;;  %3857 = vmatpush1.bf16.msra.mxu1 %v4718_v39  ;;  %v4807_v46 = vld [vmem:[%s6825_s5 + $0x464] ss:$16 sps:$4 sm:$0xff]   ;;  %v4810_v39 = vld [vmem:[%s6825_s5 + $0x46c] ss:$16 sps:$4 sm:$0xff]  }
 0x27c   :  { %3686 = vmatprep.subr.bf16.mxu0 %v4723_v28  ;;  %3858 = vmatprep.subr.bf16.mxu1 %v4726_v38  ;;  %v4805_v28 = vld [vmem:[%s6825_s5 + $0x460] ss:$16 sps:$4 sm:$0xff]   ;;  %v4808_v38 = vld [vmem:[%s6825_s5 + $0x468] ss:$16 sps:$4 sm:$0xff]  }
 0x27f   :  { %3687 = vmatpush1.bf16.msra.mxu0 %v4721_v29  ;;  %3859 = vmatpush1.bf16.msra.mxu1 %v4724_v40  ;;  %v4813_v29 = vld [vmem:[%s6825_s5 + $0x484] ss:$16 sps:$4 sm:$0xff]   ;;  %v4816_v40 = vld [vmem:[%s6825_s5 + $0x48c] ss:$16 sps:$4 sm:$0xff]  }
 0x280   :  { %3688 = vmatprep.subr.bf16.mxu0 %v4729_v30  ;;  %3860 = vmatprep.subr.bf16.mxu1 %v4732_v31  ;;  %v4811_v30 = vld [vmem:[%s6825_s5 + $0x480] ss:$16 sps:$4 sm:$0xff]   ;;  %v4814_v31 = vld [vmem:[%s6825_s5 + $0x488] ss:$16 sps:$4 sm:$0xff]  }
 0x283   :  { %3689 = vmatpush1.bf16.msra.mxu0 %v4727_v32  ;;  %3861 = vmatpush1.bf16.msra.mxu1 %v4730_v33  ;;  %v4819_v32 = vld [vmem:[%s6825_s5 + $0x4a4] ss:$16 sps:$4 sm:$0xff]   ;;  %v4822_v33 = vld [vmem:[%s6825_s5 + $0x4ac] ss:$16 sps:$4 sm:$0xff]  }
 0x284   :  { %3690 = vmatprep.subr.bf16.mxu0 %v4735_v35  ;;  %3862 = vmatprep.subr.bf16.mxu1 %v4738_v4  ;;  %v4817_v35 = vld [vmem:[%s6825_s5 + $0x4a0] ss:$16 sps:$4 sm:$0xff]   ;;  %v4820_v4 = vld [vmem:[%s6825_s5 + $0x4a8] ss:$16 sps:$4 sm:$0xff]  }
 0x287   :  { %3691 = vmatpush1.bf16.msra.mxu0 %v4733_v36  ;;  %3863 = vmatpush1.bf16.msra.mxu1 %v4736_v42  ;;  %v4825_v36 = vld [vmem:[%s6825_s5 + $0x4c4] ss:$16 sps:$4 sm:$0xff]   ;;  %v4828_v42 = vld [vmem:[%s6825_s5 + $0x4cc] ss:$16 sps:$4 sm:$0xff]  }
 0x288   :  { %3692 = vmatprep.subr.bf16.mxu0 %v4741_v37  ;;  %3864 = vmatprep.subr.bf16.mxu1 %v4744_v47  ;;  %v4823_v37 = vld [vmem:[%s6825_s5 + $0x4c0] ss:$16 sps:$4 sm:$0xff]   ;;  %v4826_v47 = vld [vmem:[%s6825_s5 + $0x4c8] ss:$16 sps:$4 sm:$0xff]  }
 0x28b   :  { %3693 = vmatpush1.bf16.msra.mxu0 %v4739_v41  ;;  %3865 = vmatpush1.bf16.msra.mxu1 %v4742_v43  ;;  %v4831_v41 = vld [vmem:[%s6825_s5 + $0x4e4] ss:$16 sps:$4 sm:$0xff]   ;;  %v4834_v43 = vld [vmem:[%s6825_s5 + $0x4ec] ss:$16 sps:$4 sm:$0xff]  }
 0x28c   :  { %3694 = vmatprep.subr.bf16.mxu0 %v4747_v2  ;;  %3866 = vmatprep.subr.bf16.mxu1 %v4750_v1  ;;  %v4829_v2 = vld [vmem:[%s6825_s5 + $0x4e0] ss:$16 sps:$4 sm:$0xff]   ;;  %v4832_v1 = vld [vmem:[%s6825_s5 + $0x4e8] ss:$16 sps:$4 sm:$0xff]  }
 0x28f   :  { %3695 = vmatpush1.bf16.msra.mxu0 %v4745_v44  ;;  %3867 = vmatpush1.bf16.msra.mxu1 %v4748_v6  ;;  %v4837_v44 = vld [vmem:[%s6825_s5 + $0x504] ss:$16 sps:$4 sm:$0xff]   ;;  %v4840_v6 = vld [vmem:[%s6825_s5 + $0x50c] ss:$16 sps:$4 sm:$0xff]  }
 0x290   :  { %3696 = vmatprep.subr.bf16.mxu0 %v4753_v59  ;;  %3868 = vmatprep.subr.bf16.mxu1 %v4756_v49  ;;  %v4835_v59 = vld [vmem:[%s6825_s5 + $0x500] ss:$16 sps:$4 sm:$0xff]   ;;  %v4838_v49 = vld [vmem:[%s6825_s5 + $0x508] ss:$16 sps:$4 sm:$0xff]  }
 0x293   :  { %3697 = vmatpush1.bf16.msra.mxu0 %v4751_v45  ;;  %3869 = vmatpush1.bf16.msra.mxu1 %v4754_v0  ;;  %v4843_v45 = vld [vmem:[%s6825_s5 + $0x524] ss:$16 sps:$4 sm:$0xff]   ;;  %v4846_v0 = vld [vmem:[%s6825_s5 + $0x52c] ss:$16 sps:$4 sm:$0xff]  }
 0x294   :  { %3698 = vmatprep.subr.bf16.mxu0 %v4759_v48  ;;  %3870 = vmatprep.subr.bf16.mxu1 %v4762_v50  ;;  %v4841_v48 = vld [vmem:[%s6825_s5 + $0x520] ss:$16 sps:$4 sm:$0xff]   ;;  %v4844_v50 = vld [vmem:[%s6825_s5 + $0x528] ss:$16 sps:$4 sm:$0xff]  }
 0x297   :  { %3699 = vmatpush1.bf16.msra.mxu0 %v4757_v7  ;;  %3871 = vmatpush1.bf16.msra.mxu1 %v4760_v55  ;;  %v4849_v7 = vld [vmem:[%s6825_s5 + $0x544] ss:$16 sps:$4 sm:$0xff]   ;;  %v4852_v55 = vld [vmem:[%s6825_s5 + $0x54c] ss:$16 sps:$4 sm:$0xff]  }
 0x298   :  { %3700 = vmatprep.subr.bf16.mxu0 %v4765_v56  ;;  %3872 = vmatprep.subr.bf16.mxu1 %v4768_v57  ;;  %v4847_v56 = vld [vmem:[%s6825_s5 + $0x540] ss:$16 sps:$4 sm:$0xff]   ;;  %v4850_v57 = vld [vmem:[%s6825_s5 + $0x548] ss:$16 sps:$4 sm:$0xff]  }
 0x29b   :  { %3701 = vmatpush1.bf16.msra.mxu0 %v4763_v58  ;;  %3873 = vmatpush1.bf16.msra.mxu1 %v4766_v60  ;;  %v4855_v58 = vld [vmem:[%s6825_s5 + $0x564] ss:$16 sps:$4 sm:$0xff]   ;;  %v4858_v60 = vld [vmem:[%s6825_s5 + $0x56c] ss:$16 sps:$4 sm:$0xff]  }
 0x29c   :  { %3702 = vmatprep.subr.bf16.mxu0 %v4771_v61  ;;  %3874 = vmatprep.subr.bf16.mxu1 %v4774_v63  ;;  %v4853_v61 = vld [vmem:[%s6825_s5 + $0x560] ss:$16 sps:$4 sm:$0xff]   ;;  %v4856_v63 = vld [vmem:[%s6825_s5 + $0x568] ss:$16 sps:$4 sm:$0xff]  }
 0x29f   :  { %3703 = vmatpush1.bf16.msra.mxu0 %v4769_v8  ;;  %3875 = vmatpush1.bf16.msra.mxu1 %v4772_v12  ;;  %v4861_v8 = vld [vmem:[%s6825_s5 + $0x584] ss:$16 sps:$4 sm:$0xff]   ;;  %v4864_v12 = vld [vmem:[%s6825_s5 + $0x58c] ss:$16 sps:$4 sm:$0xff]  }
 0x2a0   :  { %3704 = vmatprep.subr.bf16.mxu0 %v4777_v51  ;;  %3876 = vmatprep.subr.bf16.mxu1 %v4780_v52  ;;  %v4859_v51 = vld [vmem:[%s6825_s5 + $0x580] ss:$16 sps:$4 sm:$0xff]   ;;  %v4862_v52 = vld [vmem:[%s6825_s5 + $0x588] ss:$16 sps:$4 sm:$0xff]  }
 0x2a3   :  { %3705 = vmatpush1.bf16.msra.mxu0 %v4775_v53  ;;  %3877 = vmatpush1.bf16.msra.mxu1 %v4778_v54  ;;  %v4867_v53 = vld [vmem:[%s6825_s5 + $0x5a4] ss:$16 sps:$4 sm:$0xff]   ;;  %v4870_v54 = vld [vmem:[%s6825_s5 + $0x5ac] ss:$16 sps:$4 sm:$0xff]  }
 0x2a4   :  { %3706 = vmatprep.subr.bf16.mxu0 %v4783_v10  ;;  %3878 = vmatprep.subr.bf16.mxu1 %v4786_v13  ;;  %v427_v10 = vsub.s32 4, %v5339_v62  ;;  %v435_v13 = vsub.s32 6, %v5339_v62 }
 0x2a7   :  { %3707 = vmatpush1.bf16.msra.mxu0 %v4781_v14  ;;  %3879 = vmatpush1.bf16.msra.mxu1 %v4784_v15  ;;  %v431_v14 = vsub.s32 5, %v5339_v62  ;;  %v439_v15 = vsub.s32 7, %v5339_v62  ;;  %v4876_v62 = vld [vmem:[%s6825_s5 + $0x5cc] ss:$16 sps:$4 sm:$0xff]  }
 0x2a8   :  { %3719 = vmatprep.subr.bf16.mxu0 %v4789_v17  ;;  %3891 = vmatprep.subr.bf16.mxu1 %v4792_v18  ;;  %v4865_v17 = vld [vmem:[%s6825_s5 + $0x5a0] ss:$16 sps:$4 sm:$0xff]   ;;  %v4868_v18 = vld [vmem:[%s6825_s5 + $0x5a8] ss:$16 sps:$4 sm:$0xff]  }
 0x2aa   :  { %3709 = vmatmul.mubr.bf16.vlgmr.msra.gmra.mrb[8].mxu0 %v6180_v5  ;;  %3881 = vmatmul.mubr.bf16.vlgmr.msra.gmra.mrb[8].mxu1 %v6180_v5  ;;  %v4804_v5 = vld [vmem:[%s6825_s5 + $0x44c] ss:$16 sps:$4 sm:$0xff]  }
 0x2ab   :  { %3720 = vmatpush1.bf16.msra.mxu0 %v4787_v19  ;;  %3892 = vmatpush1.bf16.msra.mxu1 %v4790_v20  ;;  %v428_v19 = vrot.slane %v6170_v34, %v427_v10  ;;  %v4873_v20 = vld [vmem:[%s6825_s5 + $0x5c4] ss:$16 sps:$4 sm:$0xff]   ;;  %v4901_v10 = vld [vmem:[%s6825_s5 + $0x660] ss:$16 sps:$4 sm:$0xff]  }
 0x2ac   :  { %3721 = vmatprep.subr.bf16.mxu0 %v4795_v21  ;;  %3893 = vmatprep.subr.bf16.mxu1 %v4798_v22  ;;  %v436_v21 = vrot.slane %v6170_v34, %v435_v13  ;;  %v432_v22 = vrot.slane %v6170_v34, %v431_v14  ;;  %v4904_v13 = vld [vmem:[%s6825_s5 + $0x668] ss:$16 sps:$4 sm:$0xff]   ;;  %v4909_v14 = vld [vmem:[%s6825_s5 + $0x684] ss:$16 sps:$4 sm:$0xff]  }
 0x2af   :  { %3722 = vmatpush1.bf16.msra.mxu0 %v4793_v23  ;;  %3894 = vmatpush1.bf16.msra.mxu1 %v4796_v24  ;;  %v440_v23 = vrot.slane %v6170_v34, %v439_v15  ;;  %v4879_v34 = vld [vmem:[%s6825_s5 + $0x5e4] ss:$16 sps:$4 sm:$0xff]   ;;  %v4912_v15 = vld [vmem:[%s6825_s5 + $0x68c] ss:$16 sps:$4 sm:$0xff]  }
 0x2b0   :  { %3723 = vmatprep.subr.bf16.mxu0 %v4801_v25  ;;  %3895 = vmatprep.subr.bf16.mxu1 %v4804_v5  ;;  %v4871_v25 = vld [vmem:[%s6825_s5 + $0x5c0] ss:$16 sps:$4 sm:$0xff]   ;;  %v4874_v5 = vld [vmem:[%s6825_s5 + $0x5c8] ss:$16 sps:$4 sm:$0xff]  }
 0x2b3   :  { %3724 = vmatpush1.bf16.msra.mxu0 %v4799_v26  ;;  %3896 = vmatpush1.bf16.msra.mxu1 %v4802_v27 }
 0x2b4   :  { %3725 = vmatprep.subr.bf16.mxu0 %v4807_v46  ;;  %3897 = vmatprep.subr.bf16.mxu1 %v4810_v39  ;;  %v4882_v39 = vld [vmem:[%s6825_s5 + $0x5ec] ss:$16 sps:$4 sm:$0xff]  }
 0x2b7   :  { %3726 = vmatpush1.bf16.msra.mxu0 %v4805_v28  ;;  %3898 = vmatpush1.bf16.msra.mxu1 %v4808_v38 }
 0x2b8   :  { %3727 = vmatprep.subr.bf16.mxu0 %v4813_v29  ;;  %3899 = vmatprep.subr.bf16.mxu1 %v4816_v40 }
 0x2bb   :  { %3728 = vmatpush1.bf16.msra.mxu0 %v4811_v30  ;;  %3900 = vmatpush1.bf16.msra.mxu1 %v4814_v31 }
 0x2bc   :  { %3729 = vmatprep.subr.bf16.mxu0 %v4819_v32  ;;  %3901 = vmatprep.subr.bf16.mxu1 %v4822_v33 }
 0x2bf   :  { %3730 = vmatpush1.bf16.msra.mxu0 %v4817_v35  ;;  %3902 = vmatpush1.bf16.msra.mxu1 %v4820_v4 }
 0x2c0   :  { %3731 = vmatprep.subr.bf16.mxu0 %v4825_v36  ;;  %3903 = vmatprep.subr.bf16.mxu1 %v4828_v42  ;;  %v4877_v42 = vld [vmem:[%s6825_s5 + $0x5e0] ss:$16 sps:$4 sm:$0xff]  }
 0x2c3   :  { %3732 = vmatpush1.bf16.msra.mxu0 %v4823_v37  ;;  %3904 = vmatpush1.bf16.msra.mxu1 %v4826_v47  ;;  %v4880_v37 = vld [vmem:[%s6825_s5 + $0x5e8] ss:$16 sps:$4 sm:$0xff]  }
 0x2c4   :  { %3733 = vmatprep.subr.bf16.mxu0 %v4831_v41  ;;  %3905 = vmatprep.subr.bf16.mxu1 %v4834_v43 }
 0x2c7   :  { %3734 = vmatpush1.bf16.msra.mxu0 %v4829_v2  ;;  %3906 = vmatpush1.bf16.msra.mxu1 %v4832_v1  ;;  %v4885_v2 = vld [vmem:[%s6825_s5 + $0x604] ss:$16 sps:$4 sm:$0xff]   ;;  %v4888_v1 = vld [vmem:[%s6825_s5 + $0x60c] ss:$16 sps:$4 sm:$0xff]  }
 0x2c8   :  { %3735 = vmatprep.subr.bf16.mxu0 %v4837_v44  ;;  %3907 = vmatprep.subr.bf16.mxu1 %v4840_v6 }
 0x2cb   :  { %3736 = vmatpush1.bf16.msra.mxu0 %v4835_v59  ;;  %3908 = vmatpush1.bf16.msra.mxu1 %v4838_v49 }
 0x2cc   :  { %3737 = vmatprep.subr.bf16.mxu0 %v4843_v45  ;;  %3909 = vmatprep.subr.bf16.mxu1 %v4846_v0 }
 0x2cf   :  { %3738 = vmatpush1.bf16.msra.mxu0 %v4841_v48  ;;  %3910 = vmatpush1.bf16.msra.mxu1 %v4844_v50 }
 0x2d0   :  { %3739 = vmatprep.subr.bf16.mxu0 %v4849_v7  ;;  %3911 = vmatprep.subr.bf16.mxu1 %v4852_v55  ;;  %v4883_v55 = vld [vmem:[%s6825_s5 + $0x600] ss:$16 sps:$4 sm:$0xff]  }
 0x2d3   :  { %3740 = vmatpush1.bf16.msra.mxu0 %v4847_v56  ;;  %3912 = vmatpush1.bf16.msra.mxu1 %v4850_v57  ;;  %v4886_v56 = vld [vmem:[%s6825_s5 + $0x608] ss:$16 sps:$4 sm:$0xff]  }
 0x2d4   :  { %3741 = vmatprep.subr.bf16.mxu0 %v4855_v58  ;;  %3913 = vmatprep.subr.bf16.mxu1 %v4858_v60  ;;  %v4891_v58 = vld [vmem:[%s6825_s5 + $0x624] ss:$16 sps:$4 sm:$0xff]   ;;  %v4894_v60 = vld [vmem:[%s6825_s5 + $0x62c] ss:$16 sps:$4 sm:$0xff]  }
 0x2d7   :  { %3742 = vmatpush1.bf16.msra.mxu0 %v4853_v61  ;;  %3914 = vmatpush1.bf16.msra.mxu1 %v4856_v63  ;;  %v4889_v61 = vld [vmem:[%s6825_s5 + $0x620] ss:$16 sps:$4 sm:$0xff]   ;;  %v4892_v63 = vld [vmem:[%s6825_s5 + $0x628] ss:$16 sps:$4 sm:$0xff]  }
 0x2d8   :  { %3743 = vmatprep.subr.bf16.mxu0 %v4861_v8  ;;  %3915 = vmatprep.subr.bf16.mxu1 %v4864_v12  ;;  %v4897_v8 = vld [vmem:[%s6825_s5 + $0x644] ss:$16 sps:$4 sm:$0xff]   ;;  %v4900_v12 = vld [vmem:[%s6825_s5 + $0x64c] ss:$16 sps:$4 sm:$0xff]  }
 0x2db   :  { %3744 = vmatpush1.bf16.msra.mxu0 %v4859_v51  ;;  %3916 = vmatpush1.bf16.msra.mxu1 %v4862_v52  ;;  %v4895_v51 = vld [vmem:[%s6825_s5 + $0x640] ss:$16 sps:$4 sm:$0xff]   ;;  %v4898_v52 = vld [vmem:[%s6825_s5 + $0x648] ss:$16 sps:$4 sm:$0xff]  }
 0x2dc   :  { %3745 = vmatprep.subr.bf16.mxu0 %v4867_v53  ;;  %3917 = vmatprep.subr.bf16.mxu1 %v4870_v54  ;;  %v4903_v53 = vld [vmem:[%s6825_s5 + $0x664] ss:$16 sps:$4 sm:$0xff]   ;;  %v4906_v54 = vld [vmem:[%s6825_s5 + $0x66c] ss:$16 sps:$4 sm:$0xff]  }
 0x2df   :  { %3746 = vmatpush1.bf16.msra.mxu0 %v4865_v17  ;;  %3918 = vmatpush1.bf16.msra.mxu1 %v4868_v18  ;;  %v1978_v24 = vpop.f32.mrb[4].mxu0  ;;  %v4907_v17 = vld [vmem:[%s6825_s5 + $0x680] ss:$16 sps:$4 sm:$0xff]   ;;  %v4910_v18 = vld [vmem:[%s6825_s5 + $0x688] ss:$16 sps:$4 sm:$0xff]  }
 0x2e0   :  { %v4547_v26 = vadd.f32 %v1978_v24, %v428_v19  ;;  %v2064_v27 = vpop.f32.mrb[4].mxu1  ;;  %v1980_v46 = vpop.f32.mrb[5].mxu0  ;;  %3747 = vmatprep.subr.bf16.mxu0 %v4873_v20  ;;  %3919 = vmatprep.subr.bf16.mxu1 %v4876_v62  ;;  %v4918_v20 = vld [vmem:[%s6825_s5 + $0x6ac] ss:$16 sps:$4 sm:$0xff]   ;;  %v4913_v62 = vld [vmem:[%s6825_s5 + $0x6a0] ss:$16 sps:$4 sm:$0xff]  }
 0x2e1   :  { %v4551_v28 = vadd.f32 %v2064_v27, %v436_v21  ;;  %v4548_v38 = vadd.f32 %v1980_v46, %v432_v22  ;;  %v2066_v29 = vpop.f32.mrb[5].mxu1  ;;  %v1982_v40 = vpop.f32.mrb[6].mxu0  ;;  %v4919_v24 = vld [vmem:[%s6825_s5 + $0x6c0] ss:$16 sps:$4 sm:$0xff]   ;;  %v4928_v46 = vld [vmem:[%s6825_s5 + $0x6e8] ss:$16 sps:$4 sm:$0xff]  }
 0x2e2   :  { %v4552_v30 = vadd.f32 %v2066_v29, %v440_v23  ;;  %v4549_v31 = vadd.f32 %v1982_v40, %v428_v19  ;;  %v2068_v32 = vpop.f32.mrb[6].mxu1  ;;  %v1984_v33 = vpop.f32.mrb[7].mxu0  ;;  %v2077_v47 = vmax.f32 %v4547_v26, 0.0  ;;  %v4915_v19 = vld [vmem:[%s6825_s5 + $0x6a4] ss:$16 sps:$4 sm:$0xff]  }
 0x2e3   :  { %v4553_v35 = vadd.f32 %v2068_v32, %v436_v21  ;;  %v4550_v4 = vadd.f32 %v1984_v33, %v432_v22  ;;  %v2070_v36 = vpop.f32.mrb[7].mxu1  ;;  %3748 = vmatpush1.bf16.msra.mxu0 %v4871_v25  ;;  %3920 = vmatpush1.bf16.msra.mxu1 %v4874_v5  ;;  %v2079_v44 = vmax.f32 %v4551_v28, 0.0  ;;  %v2078_v6 = vmax.f32 %v4548_v38, 0.0  ;;  %v4916_v21 = vld [vmem:[%s6825_s5 + $0x6a8] ss:$16 sps:$4 sm:$0xff]  }
 0x2e4   :  { %v2085_v41 = vmax.f32 %v4549_v31, 0.0  ;;  %v4554_v43 = vadd.f32 %v2070_v36, %v440_v23  ;;  %3749 = vmatprep.subr.bf16.mxu0 %v4879_v34  ;;  %3921 = vmatprep.subr.bf16.mxu1 %v4882_v39  ;;  %v2080_v45 = vmax.f32 %v4552_v30, 0.0  ;;  %v4921_v22 = vld [vmem:[%s6825_s5 + $0x6c4] ss:$16 sps:$4 sm:$0xff]   ;;  %v4924_v23 = vld [vmem:[%s6825_s5 + $0x6cc] ss:$16 sps:$4 sm:$0xff]  }
 0x2e5   :  { %v2087_v59 = vmax.f32 %v4553_v35, 0.0  ;;  %v2086_v49 = vmax.f32 %v4550_v4, 0.0  ;;  %v4922_v25 = vld [vmem:[%s6825_s5 + $0x6c8] ss:$16 sps:$4 sm:$0xff]   ;;  %v4927_v5 = vld [vmem:[%s6825_s5 + $0x6e4] ss:$16 sps:$4 sm:$0xff]  }
 0x2e6   :  { %v2349_v0 = vpack.c.bf16 %v2085_v41, %v2077_v47  ;;  %v2088_v48 = vmax.f32 %v4554_v43, 0.0  ;;  %v4930_v26 = vld [vmem:[%s6825_s5 + $0x6ec] ss:$16 sps:$4 sm:$0xff]   ;;  %v4925_v27 = vld [vmem:[%s6825_s5 + $0x6e0] ss:$16 sps:$4 sm:$0xff]  }
 0x2e7   :  { %v6576_v50 = vpack.c.bf16 %v2087_v59, %v2079_v44  ;;  %v2350_v7 = vpack.c.bf16 %v2086_v49, %v2078_v6  ;;  %3750 = vmatpush1.bf16.msra.mxu0 %v4877_v42  ;;  %3922 = vmatpush1.bf16.msra.mxu1 %v4880_v37  ;;  %v4933_v34 = vld [vmem:[%s6825_s5 + $0x704] ss:$16 sps:$4 sm:$0xff]   ;;  %v4936_v39 = vld [vmem:[%s6825_s5 + $0x70c] ss:$16 sps:$4 sm:$0xff]   ;;  %v4931_v28 = vld [vmem:[%s6825_s5 + $0x700] ss:$16 sps:$4 sm:$0xff]  }
 0x2e8   :  { %v2352_v57 = vpack.c.bf16 %v2088_v48, %v2080_v45  ;;  %3762 = vmatprep.subr.bf16.mxu0 %v4885_v2  ;;  %3934 = vmatprep.subr.bf16.mxu1 %v4888_v1  ;;  %v4934_v38 = vld [vmem:[%s6825_s5 + $0x708] ss:$16 sps:$4 sm:$0xff]   ;;  %v4939_v29 = vld [vmem:[%s6825_s5 + $0x724] ss:$16 sps:$4 sm:$0xff]   ;;  %v4942_v40 = vld [vmem:[%s6825_s5 + $0x72c] ss:$16 sps:$4 sm:$0xff]  }
 0x2e9   :  { %3751 = vmatprep.mubr.bf16.mxu0 %v2350_v7  ;;  %3923 = vmatprep.mubr.bf16.mxu1 %v2350_v7  ;;  %v4937_v30 = vld [vmem:[%s6825_s5 + $0x720] ss:$16 sps:$4 sm:$0xff]   ;;  %v4940_v31 = vld [vmem:[%s6825_s5 + $0x728] ss:$16 sps:$4 sm:$0xff]   ;;  %v4945_v32 = vld [vmem:[%s6825_s5 + $0x744] ss:$16 sps:$4 sm:$0xff]  }
 0x2ea   :  { %3752 = vmatmul.mubr.bf16.vlgmr.msra.gmra.mrb[8].mxu0 %v2349_v0  ;;  %3924 = vmatmul.mubr.bf16.vlgmr.msra.gmra.mrb[8].mxu1 %v2349_v0  ;;  %v4948_v33 = vld [vmem:[%s6825_s5 + $0x74c] ss:$16 sps:$4 sm:$0xff]   ;;  %v4943_v35 = vld [vmem:[%s6825_s5 + $0x740] ss:$16 sps:$4 sm:$0xff]   ;;  %v4946_v4 = vld [vmem:[%s6825_s5 + $0x748] ss:$16 sps:$4 sm:$0xff]  }
 0x2eb   :  { %3763 = vmatpush1.bf16.msra.mxu0 %v4883_v55  ;;  %3935 = vmatpush1.bf16.msra.mxu1 %v4886_v56  ;;  %v4951_v36 = vld [vmem:[%s6825_s5 + $0x764] ss:$16 sps:$4 sm:$0xff]   ;;  %v4954_v42 = vld [vmem:[%s6825_s5 + $0x76c] ss:$16 sps:$4 sm:$0xff]   ;;  %v4949_v37 = vld [vmem:[%s6825_s5 + $0x760] ss:$16 sps:$4 sm:$0xff]  }
 0x2ec   :  { %3794 = vmatprep.mubr.bf16.mxu0 %v2352_v57  ;;  %3966 = vmatprep.mubr.bf16.mxu1 %v2352_v57  ;;  %v4952_v47 = vld [vmem:[%s6825_s5 + $0x768] ss:$16 sps:$4 sm:$0xff]   ;;  %v4957_v41 = vld [vmem:[%s6825_s5 + $0x784] ss:$16 sps:$4 sm:$0xff]   ;;  %v4960_v43 = vld [vmem:[%s6825_s5 + $0x78c] ss:$16 sps:$4 sm:$0xff]  }
 0x2ed   :  { %3764 = vmatprep.subr.bf16.mxu0 %v4891_v58  ;;  %3936 = vmatprep.subr.bf16.mxu1 %v4894_v60  ;;  %v4955_v2 = vld [vmem:[%s6825_s5 + $0x780] ss:$16 sps:$4 sm:$0xff]   ;;  %v4958_v1 = vld [vmem:[%s6825_s5 + $0x788] ss:$16 sps:$4 sm:$0xff]   ;;  %v4963_v44 = vld [vmem:[%s6825_s5 + $0x7a4] ss:$16 sps:$4 sm:$0xff]  }
 0x2ee   :  { %v4966_v6 = vld [vmem:[%s6825_s5 + $0x7ac] ss:$16 sps:$4 sm:$0xff]   ;;  %v4961_v59 = vld [vmem:[%s6825_s5 + $0x7a0] ss:$16 sps:$4 sm:$0xff]   ;;  %v4964_v49 = vld [vmem:[%s6825_s5 + $0x7a8] ss:$16 sps:$4 sm:$0xff]  }
 0x2ef   :  { %3765 = vmatpush1.bf16.msra.mxu0 %v4889_v61  ;;  %3937 = vmatpush1.bf16.msra.mxu1 %v4892_v63  ;;  %v4969_v45 = vld [vmem:[%s6825_s5 + $0x7c4] ss:$16 sps:$4 sm:$0xff]   ;;  %v4972_v0 = vld [vmem:[%s6825_s5 + $0x7cc] ss:$16 sps:$4 sm:$0xff]   ;;  %v4967_v48 = vld [vmem:[%s6825_s5 + $0x7c0] ss:$16 sps:$4 sm:$0xff]  }
 0x2f0   :  { %3766 = vmatprep.subr.bf16.mxu0 %v4897_v8  ;;  %3938 = vmatprep.subr.bf16.mxu1 %v4900_v12  ;;  %v4970_v7 = vld [vmem:[%s6825_s5 + $0x7c8] ss:$16 sps:$4 sm:$0xff]   ;;  %v4975_v55 = vld [vmem:[%s6825_s5 + $0x7e4] ss:$16 sps:$4 sm:$0xff]   ;;  %v4978_v56 = vld [vmem:[%s6825_s5 + $0x7ec] ss:$16 sps:$4 sm:$0xff]  }
 0x2f1   :  { %v4973_v57 = vld [vmem:[%s6825_s5 + $0x7e0] ss:$16 sps:$4 sm:$0xff]   ;;  %v4976_v58 = vld [vmem:[%s6825_s5 + $0x7e8] ss:$16 sps:$4 sm:$0xff]  }
 0x2f2   :  { %v3985_v60 = vld [vmem:[%s6827_s6] sm:$0xf] }
 0x2f3   :  { %3767 = vmatpush1.bf16.msra.mxu0 %v4895_v51  ;;  %3939 = vmatpush1.bf16.msra.mxu1 %v4898_v52  ;;  %v3990_v61 = vrot.slane %v3985_v60, %v5351_v11  ;;  %v3998_v63 = vrot.slane %v3985_v60, %v5342_v3  ;;  %v3994_v51 = vrot.slane %v3985_v60, %v5348_v9  ;;  %v4985_v3 = vld [vmem:[%s6821_s0 + $0x8] sm:$0xff]  ;;  %v4986_v9 = vld [vmem:[%s6821_s0 + $0x18] sm:$0xff] }
 0x2f4   :  { %3768 = vmatprep.subr.bf16.mxu0 %v4903_v53  ;;  %3940 = vmatprep.subr.bf16.mxu1 %v4906_v54  ;;  %v4002_v52 = vrot.slane %v3985_v60, %v5359_v16  ;;  %v4983_v53 = vld [vmem:[%s6821_s0] sm:$0xff] }
 0x2f7   :  { %3769 = vmatpush1.bf16.msra.mxu0 %v4901_v10  ;;  %3941 = vmatpush1.bf16.msra.mxu1 %v4904_v13 }
 0x2f8   :  { %3770 = vmatprep.subr.bf16.mxu0 %v4909_v14  ;;  %3942 = vmatprep.subr.bf16.mxu1 %v4912_v15 }
 0x2fb   :  { %3771 = vmatpush1.bf16.msra.mxu0 %v4907_v17  ;;  %3943 = vmatpush1.bf16.msra.mxu1 %v4910_v18 }
 0x2fc   :  { %3772 = vmatprep.subr.bf16.mxu0 %v4915_v19  ;;  %3944 = vmatprep.subr.bf16.mxu1 %v4918_v20  ;;  %v4987_v20 = vld [vmem:[%s6821_s0 + $0x20] sm:$0xff] }
 0x2ff   :  { %3773 = vmatpush1.bf16.msra.mxu0 %v4913_v62  ;;  %3945 = vmatpush1.bf16.msra.mxu1 %v4916_v21  ;;  %v4988_v21 = vld [vmem:[%s6821_s0 + $0x30] sm:$0xff] }
 0x300   :  { %3774 = vmatprep.subr.bf16.mxu0 %v4921_v22  ;;  %3946 = vmatprep.subr.bf16.mxu1 %v4924_v23 }
 0x303   :  { %3775 = vmatpush1.bf16.msra.mxu0 %v4919_v24  ;;  %3947 = vmatpush1.bf16.msra.mxu1 %v4922_v25 }
 0x304   :  { %3776 = vmatprep.subr.bf16.mxu0 %v4927_v5  ;;  %3948 = vmatprep.subr.bf16.mxu1 %v4930_v26  ;;  %v4989_v26 = vld [vmem:[%s6821_s0 + $0x28] sm:$0xff] }
 0x307   :  { %3777 = vmatpush1.bf16.msra.mxu0 %v4925_v27  ;;  %3949 = vmatpush1.bf16.msra.mxu1 %v4928_v46  ;;  %v4990_v46 = vld [vmem:[%s6821_s0 + $0x38] sm:$0xff] }
 0x308   :  { %3778 = vmatprep.subr.bf16.mxu0 %v4933_v34  ;;  %3950 = vmatprep.subr.bf16.mxu1 %v4936_v39 }
 0x30b   :  { %3779 = vmatpush1.bf16.msra.mxu0 %v4931_v28  ;;  %3951 = vmatpush1.bf16.msra.mxu1 %v4934_v38 }
 0x30c   :  { %3780 = vmatprep.subr.bf16.mxu0 %v4939_v29  ;;  %3952 = vmatprep.subr.bf16.mxu1 %v4942_v40 }
 0x30f   :  { %3781 = vmatpush1.bf16.msra.mxu0 %v4937_v30  ;;  %3953 = vmatpush1.bf16.msra.mxu1 %v4940_v31 }
 0x310   :  { %3782 = vmatprep.subr.bf16.mxu0 %v4945_v32  ;;  %3954 = vmatprep.subr.bf16.mxu1 %v4948_v33 }
 0x313   :  { %3783 = vmatpush1.bf16.msra.mxu0 %v4943_v35  ;;  %3955 = vmatpush1.bf16.msra.mxu1 %v4946_v4 }
 0x314   :  { %3784 = vmatprep.subr.bf16.mxu0 %v4951_v36  ;;  %3956 = vmatprep.subr.bf16.mxu1 %v4954_v42 }
 0x317   :  { %3785 = vmatpush1.bf16.msra.mxu0 %v4949_v37  ;;  %3957 = vmatpush1.bf16.msra.mxu1 %v4952_v47 }
 0x318   :  { %3786 = vmatprep.subr.bf16.mxu0 %v4957_v41  ;;  %3958 = vmatprep.subr.bf16.mxu1 %v4960_v43 }
 0x31b   :  { %3787 = vmatpush1.bf16.msra.mxu0 %v4955_v2  ;;  %3959 = vmatpush1.bf16.msra.mxu1 %v4958_v1 }
 0x31c   :  { %3788 = vmatprep.subr.bf16.mxu0 %v4963_v44  ;;  %3960 = vmatprep.subr.bf16.mxu1 %v4966_v6 }
 0x31f   :  { %3789 = vmatpush1.bf16.msra.mxu0 %v4961_v59  ;;  %3961 = vmatpush1.bf16.msra.mxu1 %v4964_v49 }
 0x320   :  { %3790 = vmatprep.subr.bf16.mxu0 %v4969_v45  ;;  %3962 = vmatprep.subr.bf16.mxu1 %v4972_v0 }
 0x323   :  { %3791 = vmatpush1.bf16.msra.mxu0 %v4967_v48  ;;  %3963 = vmatpush1.bf16.msra.mxu1 %v4970_v7 }
 0x324   :  { %3792 = vmatprep.subr.bf16.mxu0 %v4975_v55  ;;  %3964 = vmatprep.subr.bf16.mxu1 %v4978_v56 }
 0x327   :  { %3793 = vmatpush1.bf16.msra.mxu0 %v4973_v57  ;;  %3965 = vmatpush1.bf16.msra.mxu1 %v4976_v58 }
 0x32a   :  { %3795 = vmatmul.mubr.bf16.vlgmr.msra.gmra.mrb[8].mxu0 %v6576_v50  ;;  %3967 = vmatmul.mubr.bf16.vlgmr.msra.gmra.mrb[8].mxu1 %v6576_v50  ;;  %v4984_v50 = vld [vmem:[%s6821_s0 + $0x10] sm:$0xff] }
 0x3fd   :  { %v3796_v8 = vpop.f32.mrb[8].mxu0  ;;  %v3968_v12 = vpop.f32.mrb[8].mxu1 }
 0x3fe   :  { %v3977_v54 = vadd.f32 %v4983_v53, %v3796_v8  ;;  %v3979_v10 = vadd.f32 %v4984_v50, %v3968_v12  ;;  %v3798_v13 = vpop.f32.mrb[9].mxu0  ;;  %v3970_v11 = vpop.f32.mrb[9].mxu1 }
 0x3ff   :  { %v3978_v14 = vadd.f32 %v4985_v3, %v3798_v13  ;;  %v3980_v16 = vadd.f32 %v4986_v9, %v3970_v11  ;;  %v3800_v15 = vpop.f32.mrb[10].mxu0  ;;  %v3972_v17 = vpop.f32.mrb[10].mxu1 }
 0x400   :  { %v4007_v18 = vadd.f32 %v3990_v61, %v3977_v54  ;;  %v4009_v19 = vadd.f32 %v3998_v63, %v3979_v10  ;;  %v3981_v62 = vadd.f32 %v4987_v20, %v3800_v15  ;;  %v3983_v22 = vadd.f32 %v4988_v21, %v3972_v17  ;;  %v3802_v23 = vpop.f32.mrb[11].mxu0  ;;  %v3974_v24 = vpop.f32.mrb[11].mxu1 }
 0x401   :  { %v4008_v25 = vadd.f32 %v3994_v51, %v3978_v14  ;;  %v4010_v5 = vadd.f32 %v4002_v52, %v3980_v16  ;;  %v3982_v27 = vadd.f32 %v4989_v26, %v3802_v23  ;;  %v3984_v34 = vadd.f32 %v4990_v46, %v3974_v24 }
 0x402   :  { %4015 = vst [vmem:[%s6828_s7] sm:$0xff] %v4007_v18  ;;  %4017 = vst [vmem:[%s6828_s7 + $0x10] sm:$0xff] %v4009_v19  ;;  %v4011_v39 = vadd.f32 %v3990_v61, %v3981_v62  ;;  %v4013_v28 = vadd.f32 %v3998_v63, %v3983_v22 }
 0x403   :  { %4016 = vst [vmem:[%s6828_s7 + $0x8] sm:$0xff] %v4008_v25  ;;  %4018 = vst [vmem:[%s6828_s7 + $0x18] sm:$0xff] %v4010_v5  ;;  %v4012_v38 = vadd.f32 %v3994_v51, %v3982_v27  ;;  %v4014_v29 = vadd.f32 %v4002_v52, %v3984_v34 }
 0x404   :  { %4019 = vst [vmem:[%s6828_s7 + $0x20] sm:$0xff] %v4011_v39  ;;  %4021 = vst [vmem:[%s6828_s7 + $0x30] sm:$0xff] %v4013_v28 }
 0x405   :  { %4020 = vst [vmem:[%s6828_s7 + $0x28] sm:$0xff] %v4012_v38  ;;  %4022 = vst [vmem:[%s6828_s7 + $0x38] sm:$0xff] %v4014_v29 }

// kernel: transformer_forward.36
= control target key start
LH: loop header
LB: loop body
LE: loop exit
PB: predicated region body
PF: predicated region fallthrough
CT: control target
= control target key end

     0   :  { %s2026_s0 = inlined_call_operand.vmem [shape: f32[16,512], index: 0, kind: input, shape index: {}]   ;;  %s2027_s3 = inlined_call_operand.vmem [shape: bf16[512,512], index: 3, kind: input, shape index: {}]   ;;  %s2028_s1 = inlined_call_operand.vmem [shape: f32[1,512], index: 1, kind: input, shape index: {}]   ;;  %s2029_s2 = inlined_call_operand.vmem [shape: f32[1,512], index: 2, kind: input, shape index: {}]   ;;  %s2030_s4 = inlined_call_operand.vmem [shape: f32[1,512], index: 4, kind: input, shape index: {}]   ;;  %s2031_s5 = inlined_call_operand.vmem [shape: f32[16,512], index: 5, kind: output, shape index: {}]  }
   0x1   :  { %v1492_v0 = vld [vmem:[%s2026_s0] sm:$0xff]  ;;  %v1497_v1 = vld [vmem:[%s2026_s0 + $0x8] sm:$0xff]  ;;  %v1502_v2 = vld [vmem:[%s2026_s0 + $0x10] sm:$0xff] }
   0x2   :  { %v30_v3 = vadd.f32 %v1497_v1, %v1492_v0  ;;  %v1509_v4 = vld [vmem:[%s2026_s0 + $0x20] sm:$0xff]  ;;  %v1514_v5 = vld [vmem:[%s2026_s0 + $0x28] sm:$0xff]  ;;  %v1519_v6 = vld [vmem:[%s2026_s0 + $0x18] sm:$0xff] }
   0x3   :  { %v1524_v7 = vld [vmem:[%s2026_s0 + $0x30] sm:$0xff]  ;;  %v35_v8 = vadd.f32 %v1514_v5, %v1509_v4  ;;  %v1532_v10 = vld [vmem:[%s2026_s0 + $0x38] sm:$0xff] }
   0x4   :  { %v31_v9 = vadd.f32 %v30_v3, %v1502_v2  ;;  %v1263_v14 = vld [vmem:[%s2027_s3 + $0x4] ss:$16 sps:$4 sm:$0xff]   ;;  %v1265_v15 = vld [vmem:[%s2027_s3 + $0xc] ss:$16 sps:$4 sm:$0xff]   ;;  %v1267_v16 = vld [vmem:[%s2027_s3] ss:$16 sps:$4 sm:$0xff]  }
   0x5   :  { %v36_v11 = vadd.f32 %v35_v8, %v1524_v7  ;;  %935 = vmatprep.subr.bf16.mxu0 %v1263_v14  ;;  %v1268_v17 = vld [vmem:[%s2027_s3 + $0x8] ss:$16 sps:$4 sm:$0xff]   ;;  %1021 = vmatprep.subr.bf16.mxu1 %v1265_v15  ;;  %v1269_v18 = vld [vmem:[%s2027_s3 + $0x24] ss:$16 sps:$4 sm:$0xff]   ;;  %v1271_v19 = vld [vmem:[%s2027_s3 + $0x2c] ss:$16 sps:$4 sm:$0xff]  }
   0x6   :  { %v32_v12 = vadd.f32 %v31_v9, %v1519_v6  ;;  %936 = vmatpush1.bf16.msra.mxu0 %v1267_v16  ;;  %1022 = vmatpush1.bf16.msra.mxu1 %v1268_v17  ;;  %v1273_v20 = vld [vmem:[%s2027_s3 + $0x20] ss:$16 sps:$4 sm:$0xff]   ;;  %v1274_v21 = vld [vmem:[%s2027_s3 + $0x28] ss:$16 sps:$4 sm:$0xff]   ;;  %v1275_v22 = vld [vmem:[%s2027_s3 + $0x44] ss:$16 sps:$4 sm:$0xff]  }
   0x7   :  { %v37_v13 = vadd.f32 %v36_v11, %v1532_v10  ;;  %937 = vmatprep.subr.bf16.mxu0 %v1269_v18  ;;  %1023 = vmatprep.subr.bf16.mxu1 %v1271_v19  ;;  %v1277_v23 = vld [vmem:[%s2027_s3 + $0x4c] ss:$16 sps:$4 sm:$0xff]   ;;  %v1279_v24 = vld [vmem:[%s2027_s3 + $0x40] ss:$16 sps:$4 sm:$0xff]   ;;  %v1280_v25 = vld [vmem:[%s2027_s3 + $0x48] ss:$16 sps:$4 sm:$0xff]  }
   0x8   :  { %33 = vadd.xlane.f32.xlu0 %v32_v12  ;;  %v1281_v26 = vld [vmem:[%s2027_s3 + $0x64] ss:$16 sps:$4 sm:$0xff]   ;;  %v1283_v27 = vld [vmem:[%s2027_s3 + $0x6c] ss:$16 sps:$4 sm:$0xff]   ;;  %v1285_v28 = vld [vmem:[%s2027_s3 + $0x60] ss:$16 sps:$4 sm:$0xff]  }
   0x9   :  { %v1286_v29 = vld [vmem:[%s2027_s3 + $0x68] ss:$16 sps:$4 sm:$0xff]   ;;  %v1287_v30 = vld [vmem:[%s2027_s3 + $0x84] ss:$16 sps:$4 sm:$0xff]   ;;  %v1289_v31 = vld [vmem:[%s2027_s3 + $0x8c] ss:$16 sps:$4 sm:$0xff]  }
   0xa   :  { %938 = vmatpush1.bf16.msra.mxu0 %v1273_v20  ;;  %1024 = vmatpush1.bf16.msra.mxu1 %v1274_v21  ;;  %v1291_v32 = vld [vmem:[%s2027_s3 + $0x80] ss:$16 sps:$4 sm:$0xff]   ;;  %v1292_v33 = vld [vmem:[%s2027_s3 + $0x88] ss:$16 sps:$4 sm:$0xff]   ;;  %v1293_v34 = vld [vmem:[%s2027_s3 + $0xa4] ss:$16 sps:$4 sm:$0xff]  }
   0xb   :  { %939 = vmatprep.subr.bf16.mxu0 %v1275_v22  ;;  %1025 = vmatprep.subr.bf16.mxu1 %v1277_v23  ;;  %v1295_v35 = vld [vmem:[%s2027_s3 + $0xac] ss:$16 sps:$4 sm:$0xff]   ;;  %v1297_v36 = vld [vmem:[%s2027_s3 + $0xa0] ss:$16 sps:$4 sm:$0xff]   ;;  %v1298_v37 = vld [vmem:[%s2027_s3 + $0xa8] ss:$16 sps:$4 sm:$0xff]  }
   0xc   :  { %38 = vadd.xlane.f32.xlu0 %v37_v13  ;;  %v1299_v38 = vld [vmem:[%s2027_s3 + $0xc4] ss:$16 sps:$4 sm:$0xff]   ;;  %v1301_v39 = vld [vmem:[%s2027_s3 + $0xcc] ss:$16 sps:$4 sm:$0xff]   ;;  %v1303_v40 = vld [vmem:[%s2027_s3 + $0xc0] ss:$16 sps:$4 sm:$0xff]  }
   0xd   :  { %v1304_v41 = vld [vmem:[%s2027_s3 + $0xc8] ss:$16 sps:$4 sm:$0xff]   ;;  %v1305_v42 = vld [vmem:[%s2027_s3 + $0xe4] ss:$16 sps:$4 sm:$0xff]   ;;  %v1307_v43 = vld [vmem:[%s2027_s3 + $0xec] ss:$16 sps:$4 sm:$0xff]  }
   0xe   :  { %940 = vmatpush1.bf16.msra.mxu0 %v1279_v24  ;;  %1026 = vmatpush1.bf16.msra.mxu1 %v1280_v25  ;;  %v1309_v44 = vld [vmem:[%s2027_s3 + $0xe0] ss:$16 sps:$4 sm:$0xff]   ;;  %v1310_v45 = vld [vmem:[%s2027_s3 + $0xe8] ss:$16 sps:$4 sm:$0xff]   ;;  %v1311_v46 = vld [vmem:[%s2027_s3 + $0x104] ss:$16 sps:$4 sm:$0xff]  }
   0xf   :  { %941 = vmatprep.subr.bf16.mxu0 %v1281_v26  ;;  %1027 = vmatprep.subr.bf16.mxu1 %v1283_v27  ;;  %v1313_v47 = vld [vmem:[%s2027_s3 + $0x10c] ss:$16 sps:$4 sm:$0xff]   ;;  %v1315_v48 = vld [vmem:[%s2027_s3 + $0x100] ss:$16 sps:$4 sm:$0xff]   ;;  %v1316_v49 = vld [vmem:[%s2027_s3 + $0x108] ss:$16 sps:$4 sm:$0xff]  }
  0x10   :  { %v1317_v50 = vld [vmem:[%s2027_s3 + $0x124] ss:$16 sps:$4 sm:$0xff]   ;;  %v1319_v51 = vld [vmem:[%s2027_s3 + $0x12c] ss:$16 sps:$4 sm:$0xff]   ;;  %v1322_v15 = vld [vmem:[%s2027_s3 + $0x128] ss:$16 sps:$4 sm:$0xff]  }
  0x11   :  { %v1323_v16 = vld [vmem:[%s2027_s3 + $0x144] ss:$16 sps:$4 sm:$0xff]   ;;  %v1325_v17 = vld [vmem:[%s2027_s3 + $0x14c] ss:$16 sps:$4 sm:$0xff]   ;;  %v1327_v18 = vld [vmem:[%s2027_s3 + $0x140] ss:$16 sps:$4 sm:$0xff]  }
  0x12   :  { %942 = vmatpush1.bf16.msra.mxu0 %v1285_v28  ;;  %1028 = vmatpush1.bf16.msra.mxu1 %v1286_v29  ;;  %v1328_v19 = vld [vmem:[%s2027_s3 + $0x148] ss:$16 sps:$4 sm:$0xff]   ;;  %v1329_v20 = vld [vmem:[%s2027_s3 + $0x164] ss:$16 sps:$4 sm:$0xff]   ;;  %v1331_v21 = vld [vmem:[%s2027_s3 + $0x16c] ss:$16 sps:$4 sm:$0xff]  }
  0x13   :  { %943 = vmatprep.subr.bf16.mxu0 %v1287_v30  ;;  %1029 = vmatprep.subr.bf16.mxu1 %v1289_v31  ;;  %v1333_v22 = vld [vmem:[%s2027_s3 + $0x160] ss:$16 sps:$4 sm:$0xff]   ;;  %v1334_v23 = vld [vmem:[%s2027_s3 + $0x168] ss:$16 sps:$4 sm:$0xff]   ;;  %v1335_v24 = vld [vmem:[%s2027_s3 + $0x184] ss:$16 sps:$4 sm:$0xff]  }
  0x14   :  { %v1337_v25 = vld [vmem:[%s2027_s3 + $0x18c] ss:$16 sps:$4 sm:$0xff]   ;;  %v1339_v26 = vld [vmem:[%s2027_s3 + $0x180] ss:$16 sps:$4 sm:$0xff]   ;;  %v1340_v27 = vld [vmem:[%s2027_s3 + $0x188] ss:$16 sps:$4 sm:$0xff]  }
  0x15   :  { %v1341_v28 = vld [vmem:[%s2027_s3 + $0x1a4] ss:$16 sps:$4 sm:$0xff]   ;;  %v1343_v29 = vld [vmem:[%s2027_s3 + $0x1ac] ss:$16 sps:$4 sm:$0xff]   ;;  %v1345_v30 = vld [vmem:[%s2027_s3 + $0x1a0] ss:$16 sps:$4 sm:$0xff]  }
  0x16   :  { %944 = vmatpush1.bf16.msra.mxu0 %v1291_v32  ;;  %1030 = vmatpush1.bf16.msra.mxu1 %v1292_v33  ;;  %v1346_v31 = vld [vmem:[%s2027_s3 + $0x1a8] ss:$16 sps:$4 sm:$0xff]   ;;  %v1347_v32 = vld [vmem:[%s2027_s3 + $0x1c4] ss:$16 sps:$4 sm:$0xff]   ;;  %v1349_v33 = vld [vmem:[%s2027_s3 + $0x1cc] ss:$16 sps:$4 sm:$0xff]  }
  0x17   :  { %945 = vmatprep.subr.bf16.mxu0 %v1293_v34  ;;  %1031 = vmatprep.subr.bf16.mxu1 %v1295_v35  ;;  %v1351_v34 = vld [vmem:[%s2027_s3 + $0x1c0] ss:$16 sps:$4 sm:$0xff]   ;;  %v1352_v35 = vld [vmem:[%s2027_s3 + $0x1c8] ss:$16 sps:$4 sm:$0xff]  }
  0x1a   :  { %946 = vmatpush1.bf16.msra.mxu0 %v1297_v36  ;;  %1032 = vmatpush1.bf16.msra.mxu1 %v1298_v37  ;;  %v1353_v36 = vld [vmem:[%s2027_s3 + $0x1e4] ss:$16 sps:$4 sm:$0xff]   ;;  %v1355_v37 = vld [vmem:[%s2027_s3 + $0x1ec] ss:$16 sps:$4 sm:$0xff]  }
  0x1b   :  { %947 = vmatprep.subr.bf16.mxu0 %v1299_v38  ;;  %1033 = vmatprep.subr.bf16.mxu1 %v1301_v39  ;;  %v1357_v38 = vld [vmem:[%s2027_s3 + $0x1e0] ss:$16 sps:$4 sm:$0xff]   ;;  %v1358_v39 = vld [vmem:[%s2027_s3 + $0x1e8] ss:$16 sps:$4 sm:$0xff]  }
  0x1e   :  { %948 = vmatpush1.bf16.msra.mxu0 %v1303_v40  ;;  %1034 = vmatpush1.bf16.msra.mxu1 %v1304_v41  ;;  %v1361_v40 = vld [vmem:[%s2027_s3 + $0x204] ss:$16 sps:$4 sm:$0xff]   ;;  %v1364_v41 = vld [vmem:[%s2027_s3 + $0x20c] ss:$16 sps:$4 sm:$0xff]  }
  0x1f   :  { %949 = vmatprep.subr.bf16.mxu0 %v1305_v42  ;;  %1035 = vmatprep.subr.bf16.mxu1 %v1307_v43 }
  0x22   :  { %950 = vmatpush1.bf16.msra.mxu0 %v1309_v44  ;;  %1036 = vmatpush1.bf16.msra.mxu1 %v1310_v45  ;;  %v84_v44 = vlaneseq }
  0x23   :  { %951 = vmatprep.subr.bf16.mxu0 %v1311_v46  ;;  %1037 = vmatprep.subr.bf16.mxu1 %v1313_v47 }
  0x26   :  { %952 = vmatpush1.bf16.msra.mxu0 %v1315_v48  ;;  %1038 = vmatpush1.bf16.msra.mxu1 %v1316_v49  ;;  %v85_v48 = vshrl.u32 %v84_v44, 7  ;;  %v1385_v44 = vld [vmem:[%s2027_s3 + $0x284] ss:$16 sps:$4 sm:$0xff]  }
  0x27   :  { %953 = vmatprep.subr.bf16.mxu0 %v1317_v50  ;;  %1039 = vmatprep.subr.bf16.mxu1 %v1319_v51  ;;  %v28_v51 = vld [vmem:[%s2028_s1] sm:$0xf] }
  0x28   :  { %v1775_v50 = vsub.s32 2, %v85_v48 }
  0x2a   :  { %1040 = vmatpush1.bf16.msra.mxu1 %v1322_v15 }
  0x2b   :  { %1041 = vmatprep.subr.bf16.mxu1 %v1325_v17 }
  0x2e   :  { %1042 = vmatpush1.bf16.msra.mxu1 %v1328_v19 }
  0x2f   :  { %1043 = vmatprep.subr.bf16.mxu1 %v1331_v21 }
  0x32   :  { %1044 = vmatpush1.bf16.msra.mxu1 %v1334_v23 }
  0x33   :  { %1045 = vmatprep.subr.bf16.mxu1 %v1337_v25 }
  0x36   :  { %1046 = vmatpush1.bf16.msra.mxu1 %v1340_v27 }
  0x37   :  { %1047 = vmatprep.subr.bf16.mxu1 %v1343_v29 }
  0x3a   :  { %1048 = vmatpush1.bf16.msra.mxu1 %v1346_v31  ;;  %v1367_v31 = vld [vmem:[%s2027_s3 + $0x224] ss:$16 sps:$4 sm:$0xff]  }
  0x3b   :  { %1049 = vmatprep.subr.bf16.mxu1 %v1349_v33 }
  0x3e   :  { %1050 = vmatpush1.bf16.msra.mxu1 %v1352_v35  ;;  %v1368_v35 = vld [vmem:[%s2027_s3 + $0x228] ss:$16 sps:$4 sm:$0xff]  }
  0x3f   :  { %1051 = vmatprep.subr.bf16.mxu1 %v1355_v37  ;;  %v1376_v37 = vld [vmem:[%s2027_s3 + $0x24c] ss:$16 sps:$4 sm:$0xff]  }
  0x42   :  { %1052 = vmatpush1.bf16.msra.mxu1 %v1358_v39  ;;  %v1374_v39 = vld [vmem:[%s2027_s3 + $0x248] ss:$16 sps:$4 sm:$0xff]  }
  0x43   :  { %1064 = vmatprep.subr.bf16.mxu1 %v1364_v41  ;;  %v1382_v41 = vld [vmem:[%s2027_s3 + $0x26c] ss:$16 sps:$4 sm:$0xff]  }
  0x95   :  { %v34_v52 = vpop.xlane.xlu0 %33 }
  0x96   :  { %v41_v53 = vmul.f32 0.001953125, %v34_v52  ;;  %v1780_v52 = vsub.s32 1, %v85_v48 }
  0x98   :  { %v1652_v54 = vsub.f32 %v1492_v0, %v41_v53  ;;  %v1655_v55 = vsub.f32 %v1497_v1, %v41_v53  ;;  %v1658_v56 = vsub.f32 %v1502_v2, %v41_v53  ;;  %v1661_v58 = vsub.f32 %v1519_v6, %v41_v53 }
  0x99   :  { %v39_v57 = vpop.xlane.xlu0 %38  ;;  %v1782_v53 = vsub.s32 0, %v85_v48 }
  0x9a   :  { %v42_v59 = vmul.f32 0.001953125, %v39_v57  ;;  %v51_v60 = vmul.f32 %v1652_v54, %v1652_v54  ;;  %v52_v61 = vmul.f32 %v1655_v55, %v1655_v55  ;;  %v53_v62 = vmul.f32 %v1658_v56, %v1658_v56  ;;  %v29_v57 = vld [vmem:[%s2029_s2] sm:$0xf] }
  0x9b   :  { %v54_v3 = vmul.f32 %v1661_v58, %v1661_v58 }
  0x9c   :  { %v1670_v63 = vsub.f32 %v1509_v4, %v42_v59  ;;  %v1673_v0 = vsub.f32 %v1514_v5, %v42_v59  ;;  %v59_v1 = vadd.f32 %v52_v61, %v51_v60  ;;  %v1676_v2 = vsub.f32 %v1524_v7, %v42_v59 }
  0x9d   :  { %v1681_v8 = vsub.f32 %v1532_v10, %v42_v59  ;;  %v1321_v10 = vld [vmem:[%s2027_s3 + $0x120] ss:$16 sps:$4 sm:$0xff]   ;;  %v95_v59 = vrot.slane %v28_v51, %v1775_v50  ;;  %v91_v61 = vrot.slane %v28_v51, %v1780_v52 }
  0x9e   :  { %v60_v6 = vadd.f32 %v59_v1, %v53_v62  ;;  %v55_v9 = vmul.f32 %v1670_v63, %v1670_v63  ;;  %v56_v4 = vmul.f32 %v1673_v0, %v1673_v0  ;;  %v57_v5 = vmul.f32 %v1676_v2, %v1676_v2  ;;  %954 = vmatpush1.bf16.msra.mxu0 %v1321_v10 }
  0x9f   :  { %v58_v7 = vmul.f32 %v1681_v8, %v1681_v8  ;;  %955 = vmatprep.subr.bf16.mxu0 %v1323_v16  ;;  %v1789_v62 = vsub.s32 3, %v85_v48  ;;  %v1391_v48 = vld [vmem:[%s2027_s3 + $0x2a4] ss:$16 sps:$4 sm:$0xff]  }
  0xa0   :  { %v61_v11 = vadd.f32 %v60_v6, %v54_v3  ;;  %v64_v12 = vadd.f32 %v56_v4, %v55_v9  ;;  %v87_v6 = vrot.slane %v28_v51, %v1782_v53  ;;  %v124_v4 = vrot.slane %v29_v57, %v1775_v50 }
  0xa2   :  { %62 = vadd.xlane.f32.xlu1 %v61_v11  ;;  %v65_v13 = vadd.f32 %v64_v12, %v57_v5  ;;  %956 = vmatpush1.bf16.msra.mxu0 %v1327_v18  ;;  %v120_v12 = vrot.slane %v29_v57, %v1780_v52 }
  0xa3   :  { %957 = vmatprep.subr.bf16.mxu0 %v1329_v20 }
  0xa4   :  { %v66_v14 = vadd.f32 %v65_v13, %v58_v7  ;;  %v116_v7 = vrot.slane %v29_v57, %v1782_v53 }
  0xa6   :  { %67 = vadd.xlane.f32.xlu1 %v66_v14  ;;  %958 = vmatpush1.bf16.msra.mxu0 %v1333_v22  ;;  %v99_v14 = vrot.slane %v28_v51, %v1789_v62  ;;  %v128_v22 = vrot.slane %v29_v57, %v1789_v62  ;;  %v1389_v51 = vld [vmem:[%s2027_s3 + $0x2a0] ss:$16 sps:$4 sm:$0xff]   ;;  %v1392_v57 = vld [vmem:[%s2027_s3 + $0x2a8] ss:$16 sps:$4 sm:$0xff]  }
  0xa7   :  { %959 = vmatprep.subr.bf16.mxu0 %v1335_v24 }
  0xaa   :  { %960 = vmatpush1.bf16.msra.mxu0 %v1339_v26 }
  0xab   :  { %961 = vmatprep.subr.bf16.mxu0 %v1341_v28 }
  0xae   :  { %962 = vmatpush1.bf16.msra.mxu0 %v1345_v30 }
  0xaf   :  { %963 = vmatprep.subr.bf16.mxu0 %v1347_v32  ;;  %v1370_v32 = vld [vmem:[%s2027_s3 + $0x22c] ss:$16 sps:$4 sm:$0xff]  }
  0xb2   :  { %964 = vmatpush1.bf16.msra.mxu0 %v1351_v34  ;;  %v1365_v34 = vld [vmem:[%s2027_s3 + $0x220] ss:$16 sps:$4 sm:$0xff]  }
  0xb3   :  { %965 = vmatprep.subr.bf16.mxu0 %v1353_v36  ;;  %v1373_v36 = vld [vmem:[%s2027_s3 + $0x244] ss:$16 sps:$4 sm:$0xff]  }
  0xb6   :  { %966 = vmatpush1.bf16.msra.mxu0 %v1357_v38  ;;  %v1371_v38 = vld [vmem:[%s2027_s3 + $0x240] ss:$16 sps:$4 sm:$0xff]  }
  0xb7   :  { %978 = vmatprep.subr.bf16.mxu0 %v1361_v40  ;;  %v1379_v40 = vld [vmem:[%s2027_s3 + $0x264] ss:$16 sps:$4 sm:$0xff]  }
 0x12f   :  { %v63_v42 = vpop.xlane.xlu1 %62 }
 0x130   :  { %v69_v43 = vmul.f32 0.001953125, %v63_v42  ;;  %v1377_v42 = vld [vmem:[%s2027_s3 + $0x260] ss:$16 sps:$4 sm:$0xff]  }
 0x132   :  { %v71_v45 = vadd.f32 1e-05, %v69_v43  ;;  %v1380_v43 = vld [vmem:[%s2027_s3 + $0x268] ss:$16 sps:$4 sm:$0xff]  }
 0x133   :  { %v68_v46 = vpop.xlane.xlu1 %67 }
 0x134   :  { %1455 = vrsqrt.f32 %v71_v45  ;;  %v70_v47 = vmul.f32 0.001953125, %v68_v46  ;;  %v1388_v45 = vld [vmem:[%s2027_s3 + $0x28c] ss:$16 sps:$4 sm:$0xff]   ;;  %v1383_v46 = vld [vmem:[%s2027_s3 + $0x280] ss:$16 sps:$4 sm:$0xff]  }
 0x136   :  { %v72_v49 = vadd.f32 1e-05, %v70_v47  ;;  %v1386_v47 = vld [vmem:[%s2027_s3 + $0x288] ss:$16 sps:$4 sm:$0xff]  }
 0x138   :  { %1457 = vrsqrt.f32 %v72_v49  ;;  %v1394_v49 = vld [vmem:[%s2027_s3 + $0x2ac] ss:$16 sps:$4 sm:$0xff]  }
 0x13e   :  { %v1456_v60 = vpop.eup %1455 }
 0x13f   :  { %v76_v1 = vmul.f32 %v1456_v60, %v1655_v55  ;;  %v75_v3 = vmul.f32 %v1456_v60, %v1652_v54  ;;  %v77_v9 = vmul.f32 %v1456_v60, %v1658_v56  ;;  %v78_v13 = vmul.f32 %v1456_v60, %v1661_v58  ;;  %v1400_v60 = vld [vmem:[%s2027_s3 + $0x2cc] ss:$16 sps:$4 sm:$0xff]  }
 0x141   :  { %v106_v11 = vmul.f32 %v95_v59, %v77_v9  ;;  %v105_v10 = vmul.f32 %v91_v61, %v76_v1  ;;  %v104_v15 = vmul.f32 %v87_v6, %v75_v3  ;;  %v107_v20 = vmul.f32 %v99_v14, %v78_v13  ;;  %v1398_v1 = vld [vmem:[%s2027_s3 + $0x2c8] ss:$16 sps:$4 sm:$0xff]   ;;  %v1403_v3 = vld [vmem:[%s2027_s3 + $0x2e4] ss:$16 sps:$4 sm:$0xff]   ;;  %v1401_v9 = vld [vmem:[%s2027_s3 + $0x2e0] ss:$16 sps:$4 sm:$0xff]  }
 0x142   :  { %v1458_v5 = vpop.eup %1457  ;;  %v1415_v13 = vld [vmem:[%s2027_s3 + $0x324] ss:$16 sps:$4 sm:$0xff]  }
 0x143   :  { %v80_v55 = vmul.f32 %v1458_v5, %v1673_v0  ;;  %v79_v54 = vmul.f32 %v1458_v5, %v1670_v63  ;;  %v82_v56 = vmul.f32 %v1458_v5, %v1681_v8  ;;  %v81_v16 = vmul.f32 %v1458_v5, %v1676_v2  ;;  %v1359_v8 = vld [vmem:[%s2027_s3 + $0x200] ss:$16 sps:$4 sm:$0xff]   ;;  %v1362_v2 = vld [vmem:[%s2027_s3 + $0x208] ss:$16 sps:$4 sm:$0xff]   ;;  %v1412_v5 = vld [vmem:[%s2027_s3 + $0x30c] ss:$16 sps:$4 sm:$0xff]  }
 0x144   :  { %v135_v17 = vadd.f32 %v124_v4, %v106_v11  ;;  %v134_v23 = vadd.f32 %v120_v12, %v105_v10  ;;  %v133_v25 = vadd.f32 %v116_v7, %v104_v15  ;;  %v136_v29 = vadd.f32 %v128_v22, %v107_v20  ;;  %v1409_v11 = vld [vmem:[%s2027_s3 + $0x304] ss:$16 sps:$4 sm:$0xff]   ;;  %v1416_v10 = vld [vmem:[%s2027_s3 + $0x328] ss:$16 sps:$4 sm:$0xff]   ;;  %v1424_v15 = vld [vmem:[%s2027_s3 + $0x34c] ss:$16 sps:$4 sm:$0xff]  }
 0x145   :  { %v109_v18 = vmul.f32 %v91_v61, %v80_v55  ;;  %v108_v19 = vmul.f32 %v87_v6, %v79_v54  ;;  %v111_v21 = vmul.f32 %v99_v14, %v82_v56  ;;  %v110_v58 = vmul.f32 %v95_v59, %v81_v16  ;;  %v1397_v59 = vld [vmem:[%s2027_s3 + $0x2c4] ss:$16 sps:$4 sm:$0xff]   ;;  %v1395_v61 = vld [vmem:[%s2027_s3 + $0x2c0] ss:$16 sps:$4 sm:$0xff]   ;;  %v1406_v6 = vld [vmem:[%s2027_s3 + $0x2ec] ss:$16 sps:$4 sm:$0xff]  }
 0x146   :  { %v1418_v14 = vld [vmem:[%s2027_s3 + $0x32c] ss:$16 sps:$4 sm:$0xff]   ;;  %v1413_v55 = vld [vmem:[%s2027_s3 + $0x320] ss:$16 sps:$4 sm:$0xff]   ;;  %v1421_v54 = vld [vmem:[%s2027_s3 + $0x344] ss:$16 sps:$4 sm:$0xff]  }
 0x147   :  { %v138_v24 = vadd.f32 %v120_v12, %v109_v18  ;;  %v137_v0 = vadd.f32 %v116_v7, %v108_v19  ;;  %v140_v26 = vadd.f32 %v128_v22, %v111_v21  ;;  %v139_v27 = vadd.f32 %v124_v4, %v110_v58  ;;  %v1404_v4 = vld [vmem:[%s2027_s3 + $0x2e8] ss:$16 sps:$4 sm:$0xff]   ;;  %v1407_v12 = vld [vmem:[%s2027_s3 + $0x300] ss:$16 sps:$4 sm:$0xff]   ;;  %v1430_v18 = vld [vmem:[%s2027_s3 + $0x36c] ss:$16 sps:$4 sm:$0xff]  }
 0x148   :  { %v1410_v7 = vld [vmem:[%s2027_s3 + $0x308] ss:$16 sps:$4 sm:$0xff]   ;;  %v1419_v56 = vld [vmem:[%s2027_s3 + $0x340] ss:$16 sps:$4 sm:$0xff]   ;;  %v1433_v21 = vld [vmem:[%s2027_s3 + $0x384] ss:$16 sps:$4 sm:$0xff]  }
 0x149   :  { %v270_v63 = vpack.c.bf16 %v138_v24, %v134_v23  ;;  %v269_v28 = vpack.c.bf16 %v137_v0, %v133_v25  ;;  %v1811_v30 = vpack.c.bf16 %v139_v27, %v135_v17  ;;  %v272_v33 = vpack.c.bf16 %v140_v26, %v136_v29  ;;  %v1422_v16 = vld [vmem:[%s2027_s3 + $0x348] ss:$16 sps:$4 sm:$0xff]   ;;  %v1427_v17 = vld [vmem:[%s2027_s3 + $0x364] ss:$16 sps:$4 sm:$0xff]   ;;  %v1425_v19 = vld [vmem:[%s2027_s3 + $0x360] ss:$16 sps:$4 sm:$0xff]  }
 0x14a   :  { %v1428_v20 = vld [vmem:[%s2027_s3 + $0x368] ss:$16 sps:$4 sm:$0xff]   ;;  %v1436_v22 = vld [vmem:[%s2027_s3 + $0x38c] ss:$16 sps:$4 sm:$0xff]   ;;  %v1431_v58 = vld [vmem:[%s2027_s3 + $0x380] ss:$16 sps:$4 sm:$0xff]  }
 0x14b   :  { %967 = vmatprep.mubr.bf16.mxu0 %v270_v63  ;;  %1053 = vmatprep.mubr.bf16.mxu1 %v270_v63  ;;  %v1434_v23 = vld [vmem:[%s2027_s3 + $0x388] ss:$16 sps:$4 sm:$0xff]   ;;  %v1439_v24 = vld [vmem:[%s2027_s3 + $0x3a4] ss:$16 sps:$4 sm:$0xff]   ;;  %v1442_v25 = vld [vmem:[%s2027_s3 + $0x3ac] ss:$16 sps:$4 sm:$0xff]  }
 0x14c   :  { %968 = vmatmul.mubr.bf16.vlgmr.msra.gmra.mrb[0].mxu0 %v269_v28  ;;  %1054 = vmatmul.mubr.bf16.vlgmr.msra.gmra.mrb[0].mxu1 %v269_v28  ;;  %v1437_v0 = vld [vmem:[%s2027_s3 + $0x3a0] ss:$16 sps:$4 sm:$0xff]   ;;  %v1440_v26 = vld [vmem:[%s2027_s3 + $0x3a8] ss:$16 sps:$4 sm:$0xff]   ;;  %v1445_v27 = vld [vmem:[%s2027_s3 + $0x3c4] ss:$16 sps:$4 sm:$0xff]  }
 0x14d   :  { %979 = vmatpush1.bf16.msra.mxu0 %v1359_v8  ;;  %1065 = vmatpush1.bf16.msra.mxu1 %v1362_v2  ;;  %v1448_v63 = vld [vmem:[%s2027_s3 + $0x3cc] ss:$16 sps:$4 sm:$0xff]   ;;  %v1443_v8 = vld [vmem:[%s2027_s3 + $0x3c0] ss:$16 sps:$4 sm:$0xff]   ;;  %v1446_v2 = vld [vmem:[%s2027_s3 + $0x3c8] ss:$16 sps:$4 sm:$0xff]  }
 0x14e   :  { %1010 = vmatprep.mubr.bf16.mxu0 %v272_v33  ;;  %1096 = vmatprep.mubr.bf16.mxu1 %v272_v33  ;;  %v1451_v28 = vld [vmem:[%s2027_s3 + $0x3e4] ss:$16 sps:$4 sm:$0xff]   ;;  %v1454_v29 = vld [vmem:[%s2027_s3 + $0x3ec] ss:$16 sps:$4 sm:$0xff]   ;;  %v273_v33 = vld [vmem:[%s2030_s4] sm:$0xf] }
 0x14f   :  { %980 = vmatprep.subr.bf16.mxu0 %v1367_v31  ;;  %1066 = vmatprep.subr.bf16.mxu1 %v1370_v32  ;;  %v1449_v31 = vld [vmem:[%s2027_s3 + $0x3e0] ss:$16 sps:$4 sm:$0xff]   ;;  %v1452_v32 = vld [vmem:[%s2027_s3 + $0x3e8] ss:$16 sps:$4 sm:$0xff]  }
 0x151   :  { %981 = vmatpush1.bf16.msra.mxu0 %v1365_v34  ;;  %1067 = vmatpush1.bf16.msra.mxu1 %v1368_v35  ;;  %v278_v34 = vrot.slane %v273_v33, %v1782_v53  ;;  %v286_v35 = vrot.slane %v273_v33, %v1775_v50 }
 0x152   :  { %982 = vmatprep.subr.bf16.mxu0 %v1373_v36  ;;  %1068 = vmatprep.subr.bf16.mxu1 %v1376_v37  ;;  %v282_v36 = vrot.slane %v273_v33, %v1780_v52  ;;  %v290_v37 = vrot.slane %v273_v33, %v1789_v62 }
 0x155   :  { %983 = vmatpush1.bf16.msra.mxu0 %v1371_v38  ;;  %1069 = vmatpush1.bf16.msra.mxu1 %v1374_v39 }
 0x156   :  { %984 = vmatprep.subr.bf16.mxu0 %v1379_v40  ;;  %1070 = vmatprep.subr.bf16.mxu1 %v1382_v41 }
 0x159   :  { %985 = vmatpush1.bf16.msra.mxu0 %v1377_v42  ;;  %1071 = vmatpush1.bf16.msra.mxu1 %v1380_v43 }
 0x15a   :  { %986 = vmatprep.subr.bf16.mxu0 %v1385_v44  ;;  %1072 = vmatprep.subr.bf16.mxu1 %v1388_v45 }
 0x15d   :  { %987 = vmatpush1.bf16.msra.mxu0 %v1383_v46  ;;  %1073 = vmatpush1.bf16.msra.mxu1 %v1386_v47 }
 0x15e   :  { %988 = vmatprep.subr.bf16.mxu0 %v1391_v48  ;;  %1074 = vmatprep.subr.bf16.mxu1 %v1394_v49 }
 0x161   :  { %989 = vmatpush1.bf16.msra.mxu0 %v1389_v51  ;;  %1075 = vmatpush1.bf16.msra.mxu1 %v1392_v57 }
 0x162   :  { %990 = vmatprep.subr.bf16.mxu0 %v1397_v59  ;;  %1076 = vmatprep.subr.bf16.mxu1 %v1400_v60 }
 0x165   :  { %991 = vmatpush1.bf16.msra.mxu0 %v1395_v61  ;;  %1077 = vmatpush1.bf16.msra.mxu1 %v1398_v1 }
 0x166   :  { %992 = vmatprep.subr.bf16.mxu0 %v1403_v3  ;;  %1078 = vmatprep.subr.bf16.mxu1 %v1406_v6 }
 0x169   :  { %993 = vmatpush1.bf16.msra.mxu0 %v1401_v9  ;;  %1079 = vmatpush1.bf16.msra.mxu1 %v1404_v4 }
 0x16a   :  { %994 = vmatprep.subr.bf16.mxu0 %v1409_v11  ;;  %1080 = vmatprep.subr.bf16.mxu1 %v1412_v5 }
 0x16d   :  { %995 = vmatpush1.bf16.msra.mxu0 %v1407_v12  ;;  %1081 = vmatpush1.bf16.msra.mxu1 %v1410_v7 }
 0x16e   :  { %996 = vmatprep.subr.bf16.mxu0 %v1415_v13  ;;  %1082 = vmatprep.subr.bf16.mxu1 %v1418_v14 }
 0x171   :  { %997 = vmatpush1.bf16.msra.mxu0 %v1413_v55  ;;  %1083 = vmatpush1.bf16.msra.mxu1 %v1416_v10 }
 0x172   :  { %998 = vmatprep.subr.bf16.mxu0 %v1421_v54  ;;  %1084 = vmatprep.subr.bf16.mxu1 %v1424_v15 }
 0x175   :  { %999 = vmatpush1.bf16.msra.mxu0 %v1419_v56  ;;  %1085 = vmatpush1.bf16.msra.mxu1 %v1422_v16 }
 0x176   :  { %1000 = vmatprep.subr.bf16.mxu0 %v1427_v17  ;;  %1086 = vmatprep.subr.bf16.mxu1 %v1430_v18 }
 0x179   :  { %1001 = vmatpush1.bf16.msra.mxu0 %v1425_v19  ;;  %1087 = vmatpush1.bf16.msra.mxu1 %v1428_v20 }
 0x17a   :  { %1002 = vmatprep.subr.bf16.mxu0 %v1433_v21  ;;  %1088 = vmatprep.subr.bf16.mxu1 %v1436_v22 }
 0x17d   :  { %1003 = vmatpush1.bf16.msra.mxu0 %v1431_v58  ;;  %1089 = vmatpush1.bf16.msra.mxu1 %v1434_v23 }
 0x17e   :  { %1004 = vmatprep.subr.bf16.mxu0 %v1439_v24  ;;  %1090 = vmatprep.subr.bf16.mxu1 %v1442_v25 }
 0x181   :  { %1005 = vmatpush1.bf16.msra.mxu0 %v1437_v0  ;;  %1091 = vmatpush1.bf16.msra.mxu1 %v1440_v26 }
 0x182   :  { %1006 = vmatprep.subr.bf16.mxu0 %v1445_v27  ;;  %1092 = vmatprep.subr.bf16.mxu1 %v1448_v63 }
 0x185   :  { %1007 = vmatpush1.bf16.msra.mxu0 %v1443_v8  ;;  %1093 = vmatpush1.bf16.msra.mxu1 %v1446_v2 }
 0x186   :  { %1008 = vmatprep.subr.bf16.mxu0 %v1451_v28  ;;  %1094 = vmatprep.subr.bf16.mxu1 %v1454_v29 }
 0x189   :  { %1009 = vmatpush1.bf16.msra.mxu0 %v1449_v31  ;;  %1095 = vmatpush1.bf16.msra.mxu1 %v1452_v32 }
 0x18c   :  { %1011 = vmatmul.mubr.bf16.vlgmr.msra.gmra.mrb[0].mxu0 %v1811_v30  ;;  %1097 = vmatmul.mubr.bf16.vlgmr.msra.gmra.mrb[0].mxu1 %v1811_v30 }
 0x25f   :  { %v1012_v38 = vpop.f32.mrb[0].mxu0  ;;  %v1098_v39 = vpop.f32.mrb[0].mxu1 }
 0x260   :  { %v1247_v40 = vadd.f32 %v1012_v38, %v278_v34  ;;  %v1251_v41 = vadd.f32 %v1098_v39, %v286_v35  ;;  %v1014_v42 = vpop.f32.mrb[1].mxu0  ;;  %v1100_v43 = vpop.f32.mrb[1].mxu1 }
 0x261   :  { %v1248_v44 = vadd.f32 %v1014_v42, %v282_v36  ;;  %v1252_v30 = vadd.f32 %v1100_v43, %v290_v37  ;;  %v1016_v45 = vpop.f32.mrb[2].mxu0  ;;  %v1102_v46 = vpop.f32.mrb[2].mxu1 }
 0x262   :  { %1107 = vst [vmem:[%s2031_s5] sm:$0xff] %v1247_v40  ;;  %1109 = vst [vmem:[%s2031_s5 + $0x10] sm:$0xff] %v1251_v41  ;;  %v1249_v50 = vadd.f32 %v1016_v45, %v278_v34  ;;  %v1253_v52 = vadd.f32 %v1102_v46, %v286_v35  ;;  %v1018_v53 = vpop.f32.mrb[3].mxu0  ;;  %v1104_v62 = vpop.f32.mrb[3].mxu1 }
 0x263   :  { %1108 = vst [vmem:[%s2031_s5 + $0x8] sm:$0xff] %v1248_v44  ;;  %1110 = vst [vmem:[%s2031_s5 + $0x18] sm:$0xff] %v1252_v30  ;;  %v1250_v47 = vadd.f32 %v1018_v53, %v282_v36  ;;  %v1254_v48 = vadd.f32 %v1104_v62, %v290_v37 }
 0x264   :  { %1111 = vst [vmem:[%s2031_s5 + $0x20] sm:$0xff] %v1249_v50  ;;  %1113 = vst [vmem:[%s2031_s5 + $0x30] sm:$0xff] %v1253_v52 }
 0x265   :  { %1112 = vst [vmem:[%s2031_s5 + $0x28] sm:$0xff] %v1250_v47  ;;  %1114 = vst [vmem:[%s2031_s5 + $0x38] sm:$0xff] %v1254_v48 }

// kernel: transformer_forward.38
= control target key start
LH: loop header
LB: loop body
LE: loop exit
PB: predicated region body
PF: predicated region fallthrough
CT: control target
= control target key end

     0   :  { %s706_s15 = smov 0   ;;  %s708_s16 = smov 0   ;;  %s788_s0 = inlined_call_operand.vmem [shape: f32[2,8,512], index: 0, kind: input, shape index: {}]   ;;  %s789_s1 = inlined_call_operand.vmem [shape: f32[2,8,1024], index: 1, kind: input, shape index: {}, may-alias: {1,2}]   ;;  %s790_s2 = inlined_call_operand.vmem [shape: f32[2,8,1024], index: 2, kind: input, shape index: {}, may-alias: {1,2}]   ;;  %s791_s3 = inlined_call_operand.vmem [shape: f32[2,8,8], index: 3, kind: input, shape index: {}]   ;;  %s792_s4 = inlined_call_operand.vmem [shape: f32[2,8,512], index: 4, kind: output, shape index: {}]  }
   0x1   :  { %s710_s17 = smov 0   ;;  %s712_s18 = smov 0  }
   0x2   :  { %s714_s19 = smov 0  }
   0x3 LB: > { %s23_s20 = sadd.s32 1, %s669_s17  ;;  %s26_s21 = sadd.s32 1, %s673_s18  ;;  %s677_s19 = sphi %s714_s19, %s14_s19   ;;  %s673_s18 = sphi %s712_s18, %s796_s18   ;;  %s669_s17 = sphi %s710_s17, %s795_s17   ;;  %s665_s16 = sphi %s708_s16, %s794_s16   ;;  %s661_s15 = sphi %s706_s15, %s793_s15  }
   0x4   : > { %p24_p0 = scmp.ge.s32.totalorder %s23_s20, 4  ;;  %p564_p1 = scmp.ge.s32.totalorder %s677_s19, 1 }
   0x5   : > { %p224_p2 = scmp.lt.s32.totalorder %s677_s19, 9 }
   0x6   : > { %s798_s20 = smov (%p24_p0, %s23_s20), 0  ;;  %s800_s21 = smov (!%p24_p0, %s26_s21), %s673_s18 }
   0x7   : > { %p225_p3 = pnand %p564_p1, %p224_p2  ;;  %p28_p4 = scmp.ge.s32.totalorder %s800_s21, 2 }
   0x8   : > { %p277_p5 = scmp.lt.s32.totalorder (!%p225_p3), %s665_s16, 1  ;;  %p287_p6 = scmp.lt.s32.totalorder (!%p225_p3), %s661_s15, 7  ;;  %v679_v0 = vmov (!%p225_p3), 0.0   ;;  %vm680_vm0 = vmmov (!%p225_p3), 0   ;;  %vm365_vm1 = vcmask (!%p225_p3), 64512   ;;  %vm381_vm2 = vcmask (!%p225_p3), 1043456  }
   0x9   : > { %s802_s21 = smov (%p28_p4, %s800_s21), 0  ;;  %228 = sbr.rel (%p225_p3) target bundleno = 779 (0x30b), region = 36 }
   0xa   : > { %581 = vmatprep.subr.bf16.mxu0 (!%p225_p3), %v679_v0  ;;  %583 = vmatprep.mubr.msk.bf16.mxu0 (!%p225_p3), %vm680_vm0, %v679_v0  ;;  %p279_p7 = scmp.lt.s32.totalorder (!%p225_p3), %s661_s15, 3  ;;  %s293_s13 = sadd.s32 (!%p225_p3), 4, %s661_s15 }
   0xb   : > { %587 = vmatprep.subr.bf16.mxu1 (!%p225_p3), %v679_v0  ;;  %589 = vmatprep.mubr.msk.bf16.mxu1 (!%p225_p3), %vm680_vm0, %v679_v0  ;;  %p296_p8 = scmp.lt.s32.totalorder (!%p225_p3), %s293_s13, 7 }
  0x10   : > { %s804_s16 = smov (!%p277_p5, %s665_s16), 1  ;;  %s806_s13 = smov (!%p296_p8, %s293_s13), 7 }
  0x11   : > { %s288_s22 = scalar_select %p287_p6, %s661_s15, 7 }
  0x12   : > { %s740_s23 = sshll.u32 %s804_s16, 3  ;;  %s565_s29 = sshll.u32 %s804_s16, 2 }
  0x13   : > { %s290_s24 = sadd.s32 %s740_s23, %s288_s22  ;;  %s306_s12 = scalar_lea.vmem %s791_s3, %s740_s23 }
  0x14   : > { %s568_s25 = sshll.u32 %s290_s24, 3  ;;  %v363_v6 = vld [vmem:[%s306_s12] sm:$0xff]  ;;  %s299_s14 = sadd.s32 %s740_s23, %s806_s13 }
  0x15   : > { %s292_s28 = scalar_lea.vmem %s789_s1, %s568_s25  ;;  %s570_s16 = sshll.u32 %s299_s14, 3 }
  0x16   : > { %v318_v1 = vld [vmem:[%s292_s28] sm:$0xff]  ;;  %s280_s30 = scalar_select %p279_p7, %s661_s15, 3 }
  0x17   : > { %v319_v2 = vpack.c.bf16 %v318_v1, %v318_v1  ;;  %s301_s25 = scalar_lea.vmem %s790_s2, %s570_s16 }
  0x18   : > { %s748_s5 = sadd.s32 %s565_s29, %s280_s30  ;;  %v320_v18 = vld [vmem:[%s301_s25] sm:$0xff] }
  0x19   : > { %582 = vmatpush3.bf16.xpose.msra.mxu0 %v319_v2  ;;  %s566_s6 = sshll.u32 %s748_s5, 3  ;;  %v321_v19 = vpack.c.bf16 %v320_v18, %v320_v18 }
  0x1a   : > { %s284_s9 = scalar_lea.vmem %s788_s0, %s566_s6  ;;  %s314_s26 = scalar_lea.vmem %s792_s4, %s566_s6 }
  0x1b   : > { %v316_v3 = vld [vmem:[%s284_s9] sm:$0xff]  ;;  %v383_v20 = vsel %vm381_vm2, %v321_v19, 0 }
  0x1c   : > { %v317_v4 = vpack.c.bf16 %v316_v3, %v316_v3  ;;  %588 = vmatpush3.bf16.msra.mxu1 %v383_v20 }
  0x20   : > { %584 = vmatmul.mubr.bf16.vlgmr.msra.gmra.mrb[0].mxu0 %v317_v4 }
  0xf3   : > { %v356_v5 = vpop.f32.mrb[0].mxu0 }
  0xf4   : > { %v362_v7 = vmul.f32 0.088388346, %v356_v5  ;;  %v585_v8 = vpop.f32.mrb[1].mxu0 }
  0xf5   : > { %v359_v9 = vpop.f32.mrb[2].mxu0 }
  0xf6   : > { %v586_v10 = vpop.f32.mrb[3].mxu0  ;;  %v364_v11 = vadd.f32 %v363_v6, %v362_v7 }
  0xf8   : > { %v366_v12 = vsel %vm365_vm1, %v364_v11, -inf }
  0xf9   : > { %367 = vmax.xlane.f32.xlu0 %v366_v12 }
 0x186   : > { %v368_v13 = vpop.xlane.xlu0 %367 }
 0x187   : > { %v369_v14 = vsub.f32 %v364_v11, %v368_v13 }
 0x189   : > { %v370_v15 = vmul.f32 1.442695, %v369_v14 }
 0x18b   : > { %635 = vpow2.f32 %v370_v15 }
 0x195   : > { %v636_v16 = vpop.eup %635 }
 0x196   : > { %v372_v17 = vsel %vm365_vm1, %v636_v16, 0.0 }
 0x197   : > { %373 = vadd.xlane.f32.xlu0 %v372_v17 }
 0x224   : > { %v374_v21 = vpop.xlane.xlu0 %373 }
 0x225   : > { %637 = vrcp.f32 %v374_v21 }
 0x22f   : > { %v638_v22 = vpop.eup %637 }
 0x230   : > { %v376_v23 = vmul.f32 %v638_v22, %v636_v16 }
 0x232   : > { %v377_v24 = vpack.c.bf16 %v376_v23, %v376_v23 }
 0x234   : > { %590 = vmatmul.mubr.msk.bf16.vlgmr.msra.gmra.mrb[0].mxu1 %vm365_vm1, %v377_v24 }
 0x307   : > { %v419_v25 = vpop.f32.mrb[0].mxu1 }
 0x308   : > { %425 = vst [vmem:[%s314_s26] sm:$0xff] %v419_v25  ;;  %v591_v26 = vpop.f32.mrb[1].mxu1 }
 0x309   : > { %v422_v27 = vpop.f32.mrb[2].mxu1 }
 0x30a   : > { %v592_v28 = vpop.f32.mrb[3].mxu1 }
 0x30b PF: > { %s14_s19 = sadd.s32 1, %s677_s19   ;;  %s793_s15 = smov %s669_s17 }
 0x30c   : > { %p11_p9 = scmp.ge.s32.totalorder %s14_s19, 10   ;;  %s794_s16 = smov %s673_s18 }
 0x30d   : > { %s795_s17 = smov %s798_s20  ;;  %s796_s18 = smov %s802_s21 }
 0x30e   :  { %13 = sbr.rel (!%p11_p9) target bundleno = 3 (0x3), region = 75 }

// kernel: transformer_forward.49
= control target key start
LH: loop header
LB: loop body
LE: loop exit
PB: predicated region body
PF: predicated region fallthrough
CT: control target
= control target key end

     0   :  { %s2133_s0 = inlined_call_operand.vmem [shape: f32[16,512], index: 0, kind: input, shape index: {}]   ;;  %s2134_s1 = inlined_call_operand.vmem [shape: f32[1,512], index: 1, kind: input, shape index: {}]   ;;  %s2135_s2 = inlined_call_operand.vmem [shape: f32[1,512], index: 2, kind: input, shape index: {}]   ;;  %s2136_s3 = inlined_call_operand.vmem [shape: bf16[512,512], index: 3, kind: input, shape index: {}]   ;;  %s2137_s4 = inlined_call_operand.vmem [shape: f32[1,512], index: 4, kind: input, shape index: {}]   ;;  %s2138_s5 = inlined_call_operand.hbm [shape: f32[16,512], index: 5, kind: output, shape index: {}]  }
   0x1   :  { %v1611_v0 = vld [vmem:[%s2133_s0] sm:$0xff]  ;;  %v1616_v1 = vld [vmem:[%s2133_s0 + $0x8] sm:$0xff]  ;;  %v1621_v2 = vld [vmem:[%s2133_s0 + $0x10] sm:$0xff] }
   0x2   :  { %v1626_v3 = vld [vmem:[%s2133_s0 + $0x18] sm:$0xff]  ;;  %v31_v4 = vadd.f32 %v1616_v1, %v1611_v0  ;;  %v1633_v5 = vld [vmem:[%s2133_s0 + $0x20] sm:$0xff]  ;;  %v1638_v6 = vld [vmem:[%s2133_s0 + $0x28] sm:$0xff] }
   0x3   :  { %v1643_v7 = vld [vmem:[%s2133_s0 + $0x30] sm:$0xff]  ;;  %v1648_v8 = vld [vmem:[%s2133_s0 + $0x38] sm:$0xff]  ;;  %v36_v9 = vadd.f32 %v1638_v6, %v1633_v5 }
   0x4   :  { %v32_v10 = vadd.f32 %v31_v4, %v1621_v2  ;;  %v1335_v14 = vld [vmem:[%s2136_s3 + $0x4] ss:$16 sps:$4 sm:$0xff]   ;;  %v1337_v15 = vld [vmem:[%s2136_s3 + $0xc] ss:$16 sps:$4 sm:$0xff]   ;;  %v1339_v16 = vld [vmem:[%s2136_s3] ss:$16 sps:$4 sm:$0xff]  }
   0x5   :  { %v37_v11 = vadd.f32 %v36_v9, %v1643_v7  ;;  %v1340_v17 = vld [vmem:[%s2136_s3 + $0x8] ss:$16 sps:$4 sm:$0xff]   ;;  %v1341_v18 = vld [vmem:[%s2136_s3 + $0x24] ss:$16 sps:$4 sm:$0xff]   ;;  %v1343_v19 = vld [vmem:[%s2136_s3 + $0x2c] ss:$16 sps:$4 sm:$0xff]   ;;  %936 = vmatprep.subr.bf16.mxu0 %v1335_v14  ;;  %1022 = vmatprep.subr.bf16.mxu1 %v1337_v15 }
   0x6   :  { %v33_v12 = vadd.f32 %v32_v10, %v1626_v3  ;;  %937 = vmatpush1.bf16.msra.mxu0 %v1339_v16  ;;  %1023 = vmatpush1.bf16.msra.mxu1 %v1340_v17  ;;  %v1345_v20 = vld [vmem:[%s2136_s3 + $0x20] ss:$16 sps:$4 sm:$0xff]   ;;  %v1346_v21 = vld [vmem:[%s2136_s3 + $0x28] ss:$16 sps:$4 sm:$0xff]   ;;  %v1347_v22 = vld [vmem:[%s2136_s3 + $0x44] ss:$16 sps:$4 sm:$0xff]  }
   0x7   :  { %v38_v13 = vadd.f32 %v37_v11, %v1648_v8  ;;  %938 = vmatprep.subr.bf16.mxu0 %v1341_v18  ;;  %1024 = vmatprep.subr.bf16.mxu1 %v1343_v19  ;;  %v1349_v23 = vld [vmem:[%s2136_s3 + $0x4c] ss:$16 sps:$4 sm:$0xff]   ;;  %v1351_v24 = vld [vmem:[%s2136_s3 + $0x40] ss:$16 sps:$4 sm:$0xff]   ;;  %v1352_v25 = vld [vmem:[%s2136_s3 + $0x48] ss:$16 sps:$4 sm:$0xff]  }
   0x8   :  { %34 = vadd.xlane.f32.xlu0 %v33_v12  ;;  %v1353_v26 = vld [vmem:[%s2136_s3 + $0x64] ss:$16 sps:$4 sm:$0xff]   ;;  %v1355_v27 = vld [vmem:[%s2136_s3 + $0x6c] ss:$16 sps:$4 sm:$0xff]   ;;  %v1357_v28 = vld [vmem:[%s2136_s3 + $0x60] ss:$16 sps:$4 sm:$0xff]  }
   0x9   :  { %v1358_v29 = vld [vmem:[%s2136_s3 + $0x68] ss:$16 sps:$4 sm:$0xff]   ;;  %v1359_v30 = vld [vmem:[%s2136_s3 + $0x84] ss:$16 sps:$4 sm:$0xff]   ;;  %v1361_v31 = vld [vmem:[%s2136_s3 + $0x8c] ss:$16 sps:$4 sm:$0xff]  }
   0xa   :  { %939 = vmatpush1.bf16.msra.mxu0 %v1345_v20  ;;  %1025 = vmatpush1.bf16.msra.mxu1 %v1346_v21  ;;  %v1363_v32 = vld [vmem:[%s2136_s3 + $0x80] ss:$16 sps:$4 sm:$0xff]   ;;  %v1364_v33 = vld [vmem:[%s2136_s3 + $0x88] ss:$16 sps:$4 sm:$0xff]   ;;  %v1365_v34 = vld [vmem:[%s2136_s3 + $0xa4] ss:$16 sps:$4 sm:$0xff]  }
   0xb   :  { %940 = vmatprep.subr.bf16.mxu0 %v1347_v22  ;;  %1026 = vmatprep.subr.bf16.mxu1 %v1349_v23  ;;  %v1367_v35 = vld [vmem:[%s2136_s3 + $0xac] ss:$16 sps:$4 sm:$0xff]   ;;  %v1369_v36 = vld [vmem:[%s2136_s3 + $0xa0] ss:$16 sps:$4 sm:$0xff]   ;;  %v1370_v37 = vld [vmem:[%s2136_s3 + $0xa8] ss:$16 sps:$4 sm:$0xff]  }
   0xc   :  { %39 = vadd.xlane.f32.xlu0 %v38_v13  ;;  %v1371_v38 = vld [vmem:[%s2136_s3 + $0xc4] ss:$16 sps:$4 sm:$0xff]   ;;  %v1373_v39 = vld [vmem:[%s2136_s3 + $0xcc] ss:$16 sps:$4 sm:$0xff]  }
   0xe   :  { %941 = vmatpush1.bf16.msra.mxu0 %v1351_v24  ;;  %1027 = vmatpush1.bf16.msra.mxu1 %v1352_v25 }
   0xf   :  { %942 = vmatprep.subr.bf16.mxu0 %v1353_v26  ;;  %1028 = vmatprep.subr.bf16.mxu1 %v1355_v27 }
  0x12   :  { %943 = vmatpush1.bf16.msra.mxu0 %v1357_v28  ;;  %1029 = vmatpush1.bf16.msra.mxu1 %v1358_v29 }
  0x13   :  { %944 = vmatprep.subr.bf16.mxu0 %v1359_v30  ;;  %1030 = vmatprep.subr.bf16.mxu1 %v1361_v31 }
  0x16   :  { %945 = vmatpush1.bf16.msra.mxu0 %v1363_v32  ;;  %1031 = vmatpush1.bf16.msra.mxu1 %v1364_v33 }
  0x17   :  { %946 = vmatprep.subr.bf16.mxu0 %v1365_v34  ;;  %1032 = vmatprep.subr.bf16.mxu1 %v1367_v35 }
  0x18   :  { %10 = vsyncpa [#allocation3], 0  ;;  %v1375_v40 = vld [vmem:[%s2136_s3 + $0xc0] ss:$16 sps:$4 sm:$0xff]   ;;  %v1376_v41 = vld [vmem:[%s2136_s3 + $0xc8] ss:$16 sps:$4 sm:$0xff]  }
  0x19   :  { %v1377_v42 = vld [vmem:[%s2136_s3 + $0xe4] ss:$16 sps:$4 sm:$0xff]   ;;  %v1379_v43 = vld [vmem:[%s2136_s3 + $0xec] ss:$16 sps:$4 sm:$0xff]   ;;  %v1381_v44 = vld [vmem:[%s2136_s3 + $0xe0] ss:$16 sps:$4 sm:$0xff]  }
  0x1a   :  { %947 = vmatpush1.bf16.msra.mxu0 %v1369_v36  ;;  %1033 = vmatpush1.bf16.msra.mxu1 %v1370_v37  ;;  %v1382_v45 = vld [vmem:[%s2136_s3 + $0xe8] ss:$16 sps:$4 sm:$0xff]   ;;  %v1383_v46 = vld [vmem:[%s2136_s3 + $0x104] ss:$16 sps:$4 sm:$0xff]   ;;  %v1385_v47 = vld [vmem:[%s2136_s3 + $0x10c] ss:$16 sps:$4 sm:$0xff]  }
  0x1b   :  { %948 = vmatprep.subr.bf16.mxu0 %v1371_v38  ;;  %1034 = vmatprep.subr.bf16.mxu1 %v1373_v39  ;;  %v1387_v48 = vld [vmem:[%s2136_s3 + $0x100] ss:$16 sps:$4 sm:$0xff]   ;;  %v1388_v49 = vld [vmem:[%s2136_s3 + $0x108] ss:$16 sps:$4 sm:$0xff]   ;;  %v1389_v50 = vld [vmem:[%s2136_s3 + $0x124] ss:$16 sps:$4 sm:$0xff]  }
  0x1c   :  { %v1391_v51 = vld [vmem:[%s2136_s3 + $0x12c] ss:$16 sps:$4 sm:$0xff]   ;;  %v1394_v15 = vld [vmem:[%s2136_s3 + $0x128] ss:$16 sps:$4 sm:$0xff]   ;;  %v1395_v16 = vld [vmem:[%s2136_s3 + $0x144] ss:$16 sps:$4 sm:$0xff]  }
  0x1d   :  { %v1397_v17 = vld [vmem:[%s2136_s3 + $0x14c] ss:$16 sps:$4 sm:$0xff]   ;;  %v1399_v18 = vld [vmem:[%s2136_s3 + $0x140] ss:$16 sps:$4 sm:$0xff]   ;;  %v1400_v19 = vld [vmem:[%s2136_s3 + $0x148] ss:$16 sps:$4 sm:$0xff]  }
  0x1e   :  { %949 = vmatpush1.bf16.msra.mxu0 %v1375_v40  ;;  %1035 = vmatpush1.bf16.msra.mxu1 %v1376_v41  ;;  %v1401_v20 = vld [vmem:[%s2136_s3 + $0x164] ss:$16 sps:$4 sm:$0xff]   ;;  %v1403_v21 = vld [vmem:[%s2136_s3 + $0x16c] ss:$16 sps:$4 sm:$0xff]   ;;  %v1405_v22 = vld [vmem:[%s2136_s3 + $0x160] ss:$16 sps:$4 sm:$0xff]  }
  0x1f   :  { %950 = vmatprep.subr.bf16.mxu0 %v1377_v42  ;;  %1036 = vmatprep.subr.bf16.mxu1 %v1379_v43  ;;  %v1406_v23 = vld [vmem:[%s2136_s3 + $0x168] ss:$16 sps:$4 sm:$0xff]   ;;  %v1407_v24 = vld [vmem:[%s2136_s3 + $0x184] ss:$16 sps:$4 sm:$0xff]   ;;  %v1409_v25 = vld [vmem:[%s2136_s3 + $0x18c] ss:$16 sps:$4 sm:$0xff]  }
  0x20   :  { %v1411_v26 = vld [vmem:[%s2136_s3 + $0x180] ss:$16 sps:$4 sm:$0xff]   ;;  %v1412_v27 = vld [vmem:[%s2136_s3 + $0x188] ss:$16 sps:$4 sm:$0xff]   ;;  %v1413_v28 = vld [vmem:[%s2136_s3 + $0x1a4] ss:$16 sps:$4 sm:$0xff]  }
  0x21   :  { %v1415_v29 = vld [vmem:[%s2136_s3 + $0x1ac] ss:$16 sps:$4 sm:$0xff]   ;;  %v1417_v30 = vld [vmem:[%s2136_s3 + $0x1a0] ss:$16 sps:$4 sm:$0xff]   ;;  %v1418_v31 = vld [vmem:[%s2136_s3 + $0x1a8] ss:$16 sps:$4 sm:$0xff]  }
  0x22   :  { %951 = vmatpush1.bf16.msra.mxu0 %v1381_v44  ;;  %1037 = vmatpush1.bf16.msra.mxu1 %v1382_v45  ;;  %v1419_v32 = vld [vmem:[%s2136_s3 + $0x1c4] ss:$16 sps:$4 sm:$0xff]   ;;  %v1421_v33 = vld [vmem:[%s2136_s3 + $0x1cc] ss:$16 sps:$4 sm:$0xff]   ;;  %v1423_v34 = vld [vmem:[%s2136_s3 + $0x1c0] ss:$16 sps:$4 sm:$0xff]   ;;  %v85_v44 = vlaneseq }
  0x23   :  { %952 = vmatprep.subr.bf16.mxu0 %v1383_v46  ;;  %1038 = vmatprep.subr.bf16.mxu1 %v1385_v47  ;;  %v1424_v35 = vld [vmem:[%s2136_s3 + $0x1c8] ss:$16 sps:$4 sm:$0xff]   ;;  %v1425_v36 = vld [vmem:[%s2136_s3 + $0x1e4] ss:$16 sps:$4 sm:$0xff]   ;;  %v1427_v37 = vld [vmem:[%s2136_s3 + $0x1ec] ss:$16 sps:$4 sm:$0xff]  }
  0x24   :  { %v1429_v38 = vld [vmem:[%s2136_s3 + $0x1e0] ss:$16 sps:$4 sm:$0xff]   ;;  %v1430_v39 = vld [vmem:[%s2136_s3 + $0x1e8] ss:$16 sps:$4 sm:$0xff]   ;;  %v1433_v40 = vld [vmem:[%s2136_s3 + $0x204] ss:$16 sps:$4 sm:$0xff]  }
  0x25   :  { %v1436_v41 = vld [vmem:[%s2136_s3 + $0x20c] ss:$16 sps:$4 sm:$0xff]  }
  0x26   :  { %953 = vmatpush1.bf16.msra.mxu0 %v1387_v48  ;;  %1039 = vmatpush1.bf16.msra.mxu1 %v1388_v49  ;;  %v86_v48 = vshrl.u32 %v85_v44, 7  ;;  %v1457_v44 = vld [vmem:[%s2136_s3 + $0x284] ss:$16 sps:$4 sm:$0xff]  }
  0x27   :  { %954 = vmatprep.subr.bf16.mxu0 %v1389_v50  ;;  %1040 = vmatprep.subr.bf16.mxu1 %v1391_v51  ;;  %v29_v51 = vld [vmem:[%s2134_s1] sm:$0xf] }
  0x28   :  { %v1894_v50 = vsub.s32 2, %v86_v48 }
  0x2a   :  { %1041 = vmatpush1.bf16.msra.mxu1 %v1394_v15 }
  0x2b   :  { %1042 = vmatprep.subr.bf16.mxu1 %v1397_v17 }
  0x2e   :  { %1043 = vmatpush1.bf16.msra.mxu1 %v1400_v19 }
  0x2f   :  { %1044 = vmatprep.subr.bf16.mxu1 %v1403_v21 }
  0x32   :  { %1045 = vmatpush1.bf16.msra.mxu1 %v1406_v23 }
  0x33   :  { %1046 = vmatprep.subr.bf16.mxu1 %v1409_v25 }
  0x36   :  { %1047 = vmatpush1.bf16.msra.mxu1 %v1412_v27 }
  0x37   :  { %1048 = vmatprep.subr.bf16.mxu1 %v1415_v29 }
  0x3a   :  { %1049 = vmatpush1.bf16.msra.mxu1 %v1418_v31  ;;  %v1439_v31 = vld [vmem:[%s2136_s3 + $0x224] ss:$16 sps:$4 sm:$0xff]  }
  0x3b   :  { %1050 = vmatprep.subr.bf16.mxu1 %v1421_v33 }
  0x3e   :  { %1051 = vmatpush1.bf16.msra.mxu1 %v1424_v35  ;;  %v1440_v35 = vld [vmem:[%s2136_s3 + $0x228] ss:$16 sps:$4 sm:$0xff]  }
  0x3f   :  { %1052 = vmatprep.subr.bf16.mxu1 %v1427_v37  ;;  %v1448_v37 = vld [vmem:[%s2136_s3 + $0x24c] ss:$16 sps:$4 sm:$0xff]  }
  0x42   :  { %1053 = vmatpush1.bf16.msra.mxu1 %v1430_v39  ;;  %v1446_v39 = vld [vmem:[%s2136_s3 + $0x248] ss:$16 sps:$4 sm:$0xff]  }
  0x43   :  { %1065 = vmatprep.subr.bf16.mxu1 %v1436_v41  ;;  %v1454_v41 = vld [vmem:[%s2136_s3 + $0x26c] ss:$16 sps:$4 sm:$0xff]  }
  0x95   :  { %v35_v52 = vpop.xlane.xlu0 %34 }
  0x96   :  { %v42_v53 = vmul.f32 0.001953125, %v35_v52  ;;  %v1899_v52 = vsub.s32 1, %v86_v48 }
  0x98   :  { %v1771_v54 = vsub.f32 %v1611_v0, %v42_v53  ;;  %v1774_v55 = vsub.f32 %v1616_v1, %v42_v53  ;;  %v1777_v56 = vsub.f32 %v1621_v2, %v42_v53  ;;  %v1780_v58 = vsub.f32 %v1626_v3, %v42_v53 }
  0x99   :  { %v40_v57 = vpop.xlane.xlu0 %39  ;;  %v1901_v53 = vsub.s32 0, %v86_v48 }
  0x9a   :  { %v43_v59 = vmul.f32 0.001953125, %v40_v57  ;;  %v52_v60 = vmul.f32 %v1771_v54, %v1771_v54  ;;  %v53_v61 = vmul.f32 %v1774_v55, %v1774_v55  ;;  %v54_v62 = vmul.f32 %v1777_v56, %v1777_v56  ;;  %v30_v57 = vld [vmem:[%s2135_s2] sm:$0xf] }
  0x9b   :  { %v55_v3 = vmul.f32 %v1780_v58, %v1780_v58 }
  0x9c   :  { %v1789_v63 = vsub.f32 %v1633_v5, %v43_v59  ;;  %v1792_v0 = vsub.f32 %v1638_v6, %v43_v59  ;;  %v60_v1 = vadd.f32 %v53_v61, %v52_v60  ;;  %v1795_v2 = vsub.f32 %v1643_v7, %v43_v59 }
  0x9d   :  { %v1800_v9 = vsub.f32 %v1648_v8, %v43_v59  ;;  %v1393_v8 = vld [vmem:[%s2136_s3 + $0x120] ss:$16 sps:$4 sm:$0xff]   ;;  %v96_v59 = vrot.slane %v29_v51, %v1894_v50  ;;  %v92_v61 = vrot.slane %v29_v51, %v1899_v52 }
  0x9e   :  { %v61_v4 = vadd.f32 %v60_v1, %v54_v62  ;;  %v56_v10 = vmul.f32 %v1789_v63, %v1789_v63  ;;  %v57_v5 = vmul.f32 %v1792_v0, %v1792_v0  ;;  %v58_v6 = vmul.f32 %v1795_v2, %v1795_v2  ;;  %955 = vmatpush1.bf16.msra.mxu0 %v1393_v8 }
  0x9f   :  { %v59_v7 = vmul.f32 %v1800_v9, %v1800_v9  ;;  %956 = vmatprep.subr.bf16.mxu0 %v1395_v16  ;;  %v1908_v62 = vsub.s32 3, %v86_v48  ;;  %v1463_v48 = vld [vmem:[%s2136_s3 + $0x2a4] ss:$16 sps:$4 sm:$0xff]  }
  0xa0   :  { %v62_v11 = vadd.f32 %v61_v4, %v55_v3  ;;  %v65_v12 = vadd.f32 %v57_v5, %v56_v10  ;;  %v88_v4 = vrot.slane %v29_v51, %v1901_v53  ;;  %v125_v5 = vrot.slane %v30_v57, %v1894_v50 }
  0xa2   :  { %63 = vadd.xlane.f32.xlu1 %v62_v11  ;;  %v66_v13 = vadd.f32 %v65_v12, %v58_v6  ;;  %957 = vmatpush1.bf16.msra.mxu0 %v1399_v18  ;;  %v121_v12 = vrot.slane %v30_v57, %v1899_v52 }
  0xa3   :  { %958 = vmatprep.subr.bf16.mxu0 %v1401_v20 }
  0xa4   :  { %v67_v14 = vadd.f32 %v66_v13, %v59_v7  ;;  %v117_v7 = vrot.slane %v30_v57, %v1901_v53 }
  0xa6   :  { %68 = vadd.xlane.f32.xlu1 %v67_v14  ;;  %959 = vmatpush1.bf16.msra.mxu0 %v1405_v22  ;;  %v100_v14 = vrot.slane %v29_v51, %v1908_v62  ;;  %v129_v22 = vrot.slane %v30_v57, %v1908_v62  ;;  %v1461_v51 = vld [vmem:[%s2136_s3 + $0x2a0] ss:$16 sps:$4 sm:$0xff]   ;;  %v1464_v57 = vld [vmem:[%s2136_s3 + $0x2a8] ss:$16 sps:$4 sm:$0xff]  }
  0xa7   :  { %960 = vmatprep.subr.bf16.mxu0 %v1407_v24 }
  0xaa   :  { %961 = vmatpush1.bf16.msra.mxu0 %v1411_v26 }
  0xab   :  { %962 = vmatprep.subr.bf16.mxu0 %v1413_v28 }
  0xae   :  { %963 = vmatpush1.bf16.msra.mxu0 %v1417_v30 }
  0xaf   :  { %964 = vmatprep.subr.bf16.mxu0 %v1419_v32  ;;  %v1442_v32 = vld [vmem:[%s2136_s3 + $0x22c] ss:$16 sps:$4 sm:$0xff]  }
  0xb2   :  { %965 = vmatpush1.bf16.msra.mxu0 %v1423_v34  ;;  %v1437_v34 = vld [vmem:[%s2136_s3 + $0x220] ss:$16 sps:$4 sm:$0xff]  }
  0xb3   :  { %966 = vmatprep.subr.bf16.mxu0 %v1425_v36  ;;  %v1445_v36 = vld [vmem:[%s2136_s3 + $0x244] ss:$16 sps:$4 sm:$0xff]  }
  0xb6   :  { %967 = vmatpush1.bf16.msra.mxu0 %v1429_v38  ;;  %v1443_v38 = vld [vmem:[%s2136_s3 + $0x240] ss:$16 sps:$4 sm:$0xff]  }
  0xb7   :  { %979 = vmatprep.subr.bf16.mxu0 %v1433_v40  ;;  %v1451_v40 = vld [vmem:[%s2136_s3 + $0x264] ss:$16 sps:$4 sm:$0xff]  }
 0x12f   :  { %v64_v42 = vpop.xlane.xlu1 %63 }
 0x130   :  { %v70_v43 = vmul.f32 0.001953125, %v64_v42  ;;  %v1449_v42 = vld [vmem:[%s2136_s3 + $0x260] ss:$16 sps:$4 sm:$0xff]  }
 0x132   :  { %v72_v45 = vadd.f32 1e-05, %v70_v43  ;;  %v1452_v43 = vld [vmem:[%s2136_s3 + $0x268] ss:$16 sps:$4 sm:$0xff]  }
 0x133   :  { %v69_v46 = vpop.xlane.xlu1 %68 }
 0x134   :  { %1527 = vrsqrt.f32 %v72_v45  ;;  %v71_v47 = vmul.f32 0.001953125, %v69_v46  ;;  %v1460_v45 = vld [vmem:[%s2136_s3 + $0x28c] ss:$16 sps:$4 sm:$0xff]   ;;  %v1455_v46 = vld [vmem:[%s2136_s3 + $0x280] ss:$16 sps:$4 sm:$0xff]  }
 0x136   :  { %v73_v49 = vadd.f32 1e-05, %v71_v47  ;;  %v1458_v47 = vld [vmem:[%s2136_s3 + $0x288] ss:$16 sps:$4 sm:$0xff]  }
 0x138   :  { %1529 = vrsqrt.f32 %v73_v49  ;;  %v1466_v49 = vld [vmem:[%s2136_s3 + $0x2ac] ss:$16 sps:$4 sm:$0xff]  }
 0x13e   :  { %v1528_v60 = vpop.eup %1527 }
 0x13f   :  { %v77_v1 = vmul.f32 %v1528_v60, %v1774_v55  ;;  %v76_v3 = vmul.f32 %v1528_v60, %v1771_v54  ;;  %v78_v10 = vmul.f32 %v1528_v60, %v1777_v56  ;;  %v79_v13 = vmul.f32 %v1528_v60, %v1780_v58  ;;  %v1472_v60 = vld [vmem:[%s2136_s3 + $0x2cc] ss:$16 sps:$4 sm:$0xff]  }
 0x141   :  { %v107_v11 = vmul.f32 %v96_v59, %v78_v10  ;;  %v106_v8 = vmul.f32 %v92_v61, %v77_v1  ;;  %v105_v15 = vmul.f32 %v88_v4, %v76_v3  ;;  %v108_v20 = vmul.f32 %v100_v14, %v79_v13  ;;  %v1470_v1 = vld [vmem:[%s2136_s3 + $0x2c8] ss:$16 sps:$4 sm:$0xff]   ;;  %v1475_v3 = vld [vmem:[%s2136_s3 + $0x2e4] ss:$16 sps:$4 sm:$0xff]   ;;  %v1473_v10 = vld [vmem:[%s2136_s3 + $0x2e0] ss:$16 sps:$4 sm:$0xff]  }
 0x142   :  { %v1530_v6 = vpop.eup %1529  ;;  %v1487_v13 = vld [vmem:[%s2136_s3 + $0x324] ss:$16 sps:$4 sm:$0xff]  }
 0x143   :  { %v81_v55 = vmul.f32 %v1530_v6, %v1792_v0  ;;  %v80_v54 = vmul.f32 %v1530_v6, %v1789_v63  ;;  %v83_v56 = vmul.f32 %v1530_v6, %v1800_v9  ;;  %v82_v16 = vmul.f32 %v1530_v6, %v1795_v2  ;;  %v1431_v9 = vld [vmem:[%s2136_s3 + $0x200] ss:$16 sps:$4 sm:$0xff]   ;;  %v1434_v2 = vld [vmem:[%s2136_s3 + $0x208] ss:$16 sps:$4 sm:$0xff]   ;;  %v1484_v6 = vld [vmem:[%s2136_s3 + $0x30c] ss:$16 sps:$4 sm:$0xff]  }
 0x144   :  { %v136_v17 = vadd.f32 %v125_v5, %v107_v11  ;;  %v135_v23 = vadd.f32 %v121_v12, %v106_v8  ;;  %v134_v25 = vadd.f32 %v117_v7, %v105_v15  ;;  %v137_v29 = vadd.f32 %v129_v22, %v108_v20  ;;  %v1481_v11 = vld [vmem:[%s2136_s3 + $0x304] ss:$16 sps:$4 sm:$0xff]   ;;  %v1488_v8 = vld [vmem:[%s2136_s3 + $0x328] ss:$16 sps:$4 sm:$0xff]   ;;  %v1496_v15 = vld [vmem:[%s2136_s3 + $0x34c] ss:$16 sps:$4 sm:$0xff]  }
 0x145   :  { %v110_v18 = vmul.f32 %v92_v61, %v81_v55  ;;  %v109_v19 = vmul.f32 %v88_v4, %v80_v54  ;;  %v112_v21 = vmul.f32 %v100_v14, %v83_v56  ;;  %v111_v58 = vmul.f32 %v96_v59, %v82_v16  ;;  %v1469_v59 = vld [vmem:[%s2136_s3 + $0x2c4] ss:$16 sps:$4 sm:$0xff]   ;;  %v1467_v61 = vld [vmem:[%s2136_s3 + $0x2c0] ss:$16 sps:$4 sm:$0xff]   ;;  %v1478_v4 = vld [vmem:[%s2136_s3 + $0x2ec] ss:$16 sps:$4 sm:$0xff]  }
 0x146   :  { %v1490_v14 = vld [vmem:[%s2136_s3 + $0x32c] ss:$16 sps:$4 sm:$0xff]   ;;  %v1485_v55 = vld [vmem:[%s2136_s3 + $0x320] ss:$16 sps:$4 sm:$0xff]   ;;  %v1493_v54 = vld [vmem:[%s2136_s3 + $0x344] ss:$16 sps:$4 sm:$0xff]  }
 0x147   :  { %v139_v24 = vadd.f32 %v121_v12, %v110_v18  ;;  %v138_v0 = vadd.f32 %v117_v7, %v109_v19  ;;  %v141_v26 = vadd.f32 %v129_v22, %v112_v21  ;;  %v140_v27 = vadd.f32 %v125_v5, %v111_v58  ;;  %v1476_v5 = vld [vmem:[%s2136_s3 + $0x2e8] ss:$16 sps:$4 sm:$0xff]   ;;  %v1479_v12 = vld [vmem:[%s2136_s3 + $0x300] ss:$16 sps:$4 sm:$0xff]   ;;  %v1502_v18 = vld [vmem:[%s2136_s3 + $0x36c] ss:$16 sps:$4 sm:$0xff]  }
 0x148   :  { %v1482_v7 = vld [vmem:[%s2136_s3 + $0x308] ss:$16 sps:$4 sm:$0xff]   ;;  %v1491_v56 = vld [vmem:[%s2136_s3 + $0x340] ss:$16 sps:$4 sm:$0xff]   ;;  %v1505_v21 = vld [vmem:[%s2136_s3 + $0x384] ss:$16 sps:$4 sm:$0xff]  }
 0x149   :  { %v271_v63 = vpack.c.bf16 %v139_v24, %v135_v23  ;;  %v270_v28 = vpack.c.bf16 %v138_v0, %v134_v25  ;;  %v1930_v30 = vpack.c.bf16 %v140_v27, %v136_v17  ;;  %v273_v33 = vpack.c.bf16 %v141_v26, %v137_v29  ;;  %v1494_v16 = vld [vmem:[%s2136_s3 + $0x348] ss:$16 sps:$4 sm:$0xff]   ;;  %v1499_v17 = vld [vmem:[%s2136_s3 + $0x364] ss:$16 sps:$4 sm:$0xff]   ;;  %v1497_v19 = vld [vmem:[%s2136_s3 + $0x360] ss:$16 sps:$4 sm:$0xff]  }
 0x14a   :  { %v1500_v20 = vld [vmem:[%s2136_s3 + $0x368] ss:$16 sps:$4 sm:$0xff]   ;;  %v1508_v22 = vld [vmem:[%s2136_s3 + $0x38c] ss:$16 sps:$4 sm:$0xff]   ;;  %v1503_v58 = vld [vmem:[%s2136_s3 + $0x380] ss:$16 sps:$4 sm:$0xff]  }
 0x14b   :  { %968 = vmatprep.mubr.bf16.mxu0 %v271_v63  ;;  %1054 = vmatprep.mubr.bf16.mxu1 %v271_v63  ;;  %v1506_v23 = vld [vmem:[%s2136_s3 + $0x388] ss:$16 sps:$4 sm:$0xff]   ;;  %v1511_v24 = vld [vmem:[%s2136_s3 + $0x3a4] ss:$16 sps:$4 sm:$0xff]   ;;  %v1514_v25 = vld [vmem:[%s2136_s3 + $0x3ac] ss:$16 sps:$4 sm:$0xff]  }
 0x14c   :  { %969 = vmatmul.mubr.bf16.vlgmr.msra.gmra.mrb[0].mxu0 %v270_v28  ;;  %1055 = vmatmul.mubr.bf16.vlgmr.msra.gmra.mrb[0].mxu1 %v270_v28  ;;  %v1509_v0 = vld [vmem:[%s2136_s3 + $0x3a0] ss:$16 sps:$4 sm:$0xff]   ;;  %v1512_v26 = vld [vmem:[%s2136_s3 + $0x3a8] ss:$16 sps:$4 sm:$0xff]   ;;  %v1517_v27 = vld [vmem:[%s2136_s3 + $0x3c4] ss:$16 sps:$4 sm:$0xff]  }
 0x14d   :  { %980 = vmatpush1.bf16.msra.mxu0 %v1431_v9  ;;  %1066 = vmatpush1.bf16.msra.mxu1 %v1434_v2  ;;  %v1520_v63 = vld [vmem:[%s2136_s3 + $0x3cc] ss:$16 sps:$4 sm:$0xff]   ;;  %v1515_v9 = vld [vmem:[%s2136_s3 + $0x3c0] ss:$16 sps:$4 sm:$0xff]   ;;  %v1518_v2 = vld [vmem:[%s2136_s3 + $0x3c8] ss:$16 sps:$4 sm:$0xff]  }
 0x14e   :  { %1011 = vmatprep.mubr.bf16.mxu0 %v273_v33  ;;  %1097 = vmatprep.mubr.bf16.mxu1 %v273_v33  ;;  %v1523_v28 = vld [vmem:[%s2136_s3 + $0x3e4] ss:$16 sps:$4 sm:$0xff]   ;;  %v1526_v29 = vld [vmem:[%s2136_s3 + $0x3ec] ss:$16 sps:$4 sm:$0xff]   ;;  %v274_v33 = vld [vmem:[%s2137_s4] sm:$0xf] }
 0x14f   :  { %981 = vmatprep.subr.bf16.mxu0 %v1439_v31  ;;  %1067 = vmatprep.subr.bf16.mxu1 %v1442_v32  ;;  %v1521_v31 = vld [vmem:[%s2136_s3 + $0x3e0] ss:$16 sps:$4 sm:$0xff]   ;;  %v1524_v32 = vld [vmem:[%s2136_s3 + $0x3e8] ss:$16 sps:$4 sm:$0xff]   ;;  %s1575_s3 = smov [#allocation2]  }
 0x150   :  { %s1177_s4 = sshll.u32 %s1575_s3, 4  ;;  %s1178_s4 = int_to_ptr.vmem [resolvable:$true] %s1177_s4 }
 0x151   :  { %982 = vmatpush1.bf16.msra.mxu0 %v1437_v34  ;;  %1068 = vmatpush1.bf16.msra.mxu1 %v1440_v35  ;;  %v279_v34 = vrot.slane %v274_v33, %v1901_v53  ;;  %v287_v35 = vrot.slane %v274_v33, %v1894_v50  ;;  %s1551_s26 = scalar_lea.vmem %s1178_s4, 1024  ;;  %p1556_p1 = scmp.lt.s32.totalorder %s1178_s4, %s1178_s4 }
 0x152   :  { %983 = vmatprep.subr.bf16.mxu0 %v1445_v36  ;;  %1069 = vmatprep.subr.bf16.mxu1 %v1448_v37  ;;  %v283_v36 = vrot.slane %v274_v33, %v1899_v52  ;;  %v291_v37 = vrot.slane %v274_v33, %v1908_v62  ;;  %p1552_p0 = scmp.ne.s32.totalorder %s1178_s4, %s1551_s26  ;;  %p1557_p2 = scmp.lt.s32.totalorder %s1551_s26, %s1551_s26 }
 0x154   :  { %p1558_p3 = por %p1557_p2, %p1556_p1 }
 0x155   :  { %984 = vmatpush1.bf16.msra.mxu0 %v1443_v38  ;;  %1070 = vmatpush1.bf16.msra.mxu1 %v1446_v39 }
 0x156   :  { %985 = vmatprep.subr.bf16.mxu0 %v1451_v40  ;;  %1071 = vmatprep.subr.bf16.mxu1 %v1454_v41  ;;  %p1559_p4 = pnand %p1558_p3, %p1552_p0 }
 0x159   :  { %986 = vmatpush1.bf16.msra.mxu0 %v1449_v42  ;;  %1072 = vmatpush1.bf16.msra.mxu1 %v1452_v43 }
 0x15a   :  { %987 = vmatprep.subr.bf16.mxu0 %v1457_v44  ;;  %1073 = vmatprep.subr.bf16.mxu1 %v1460_v45 }
 0x15d   :  { %988 = vmatpush1.bf16.msra.mxu0 %v1455_v46  ;;  %1074 = vmatpush1.bf16.msra.mxu1 %v1458_v47 }
 0x15e   :  { %989 = vmatprep.subr.bf16.mxu0 %v1463_v48  ;;  %1075 = vmatprep.subr.bf16.mxu1 %v1466_v49 }
 0x161   :  { %990 = vmatpush1.bf16.msra.mxu0 %v1461_v51  ;;  %1076 = vmatpush1.bf16.msra.mxu1 %v1464_v57 }
 0x162   :  { %991 = vmatprep.subr.bf16.mxu0 %v1469_v59  ;;  %1077 = vmatprep.subr.bf16.mxu1 %v1472_v60 }
 0x165   :  { %992 = vmatpush1.bf16.msra.mxu0 %v1467_v61  ;;  %1078 = vmatpush1.bf16.msra.mxu1 %v1470_v1 }
 0x166   :  { %993 = vmatprep.subr.bf16.mxu0 %v1475_v3  ;;  %1079 = vmatprep.subr.bf16.mxu1 %v1478_v4 }
 0x169   :  { %994 = vmatpush1.bf16.msra.mxu0 %v1473_v10  ;;  %1080 = vmatpush1.bf16.msra.mxu1 %v1476_v5 }
 0x16a   :  { %995 = vmatprep.subr.bf16.mxu0 %v1481_v11  ;;  %1081 = vmatprep.subr.bf16.mxu1 %v1484_v6 }
 0x16d   :  { %996 = vmatpush1.bf16.msra.mxu0 %v1479_v12  ;;  %1082 = vmatpush1.bf16.msra.mxu1 %v1482_v7 }
 0x16e   :  { %997 = vmatprep.subr.bf16.mxu0 %v1487_v13  ;;  %1083 = vmatprep.subr.bf16.mxu1 %v1490_v14 }
 0x171   :  { %998 = vmatpush1.bf16.msra.mxu0 %v1485_v55  ;;  %1084 = vmatpush1.bf16.msra.mxu1 %v1488_v8 }
 0x172   :  { %999 = vmatprep.subr.bf16.mxu0 %v1493_v54  ;;  %1085 = vmatprep.subr.bf16.mxu1 %v1496_v15 }
 0x175   :  { %1000 = vmatpush1.bf16.msra.mxu0 %v1491_v56  ;;  %1086 = vmatpush1.bf16.msra.mxu1 %v1494_v16 }
 0x176   :  { %1001 = vmatprep.subr.bf16.mxu0 %v1499_v17  ;;  %1087 = vmatprep.subr.bf16.mxu1 %v1502_v18 }
 0x179   :  { %1002 = vmatpush1.bf16.msra.mxu0 %v1497_v19  ;;  %1088 = vmatpush1.bf16.msra.mxu1 %v1500_v20 }
 0x17a   :  { %1003 = vmatprep.subr.bf16.mxu0 %v1505_v21  ;;  %1089 = vmatprep.subr.bf16.mxu1 %v1508_v22 }
 0x17d   :  { %1004 = vmatpush1.bf16.msra.mxu0 %v1503_v58  ;;  %1090 = vmatpush1.bf16.msra.mxu1 %v1506_v23 }
 0x17e   :  { %1005 = vmatprep.subr.bf16.mxu0 %v1511_v24  ;;  %1091 = vmatprep.subr.bf16.mxu1 %v1514_v25 }
 0x181   :  { %1006 = vmatpush1.bf16.msra.mxu0 %v1509_v0  ;;  %1092 = vmatpush1.bf16.msra.mxu1 %v1512_v26 }
 0x182   :  { %1007 = vmatprep.subr.bf16.mxu0 %v1517_v27  ;;  %1093 = vmatprep.subr.bf16.mxu1 %v1520_v63 }
 0x185   :  { %1008 = vmatpush1.bf16.msra.mxu0 %v1515_v9  ;;  %1094 = vmatpush1.bf16.msra.mxu1 %v1518_v2 }
 0x186   :  { %1009 = vmatprep.subr.bf16.mxu0 %v1523_v28  ;;  %1095 = vmatprep.subr.bf16.mxu1 %v1526_v29 }
 0x189   :  { %1010 = vmatpush1.bf16.msra.mxu0 %v1521_v31  ;;  %1096 = vmatpush1.bf16.msra.mxu1 %v1524_v32 }
 0x18c   :  { %1012 = vmatmul.mubr.bf16.vlgmr.msra.gmra.mrb[0].mxu0 %v1930_v30  ;;  %1098 = vmatmul.mubr.bf16.vlgmr.msra.gmra.mrb[0].mxu1 %v1930_v30 }
 0x25f   :  { %v1013_v38 = vpop.f32.mrb[0].mxu0  ;;  %v1099_v39 = vpop.f32.mrb[0].mxu1 }
 0x260   :  { %v1316_v40 = vadd.f32 %v1013_v38, %v279_v34  ;;  %v1320_v41 = vadd.f32 %v1099_v39, %v287_v35  ;;  %v1015_v42 = vpop.f32.mrb[1].mxu0  ;;  %v1101_v43 = vpop.f32.mrb[1].mxu1 }
 0x261   :  { %v1317_v44 = vadd.f32 %v1015_v42, %v283_v36  ;;  %v1321_v30 = vadd.f32 %v1101_v43, %v291_v37  ;;  %v1017_v45 = vpop.f32.mrb[2].mxu0  ;;  %v1103_v46 = vpop.f32.mrb[2].mxu1 }
 0x262   :  { %v1108_v47 = vmax.f32 %v1316_v40, %v1320_v41  ;;  %v1318_v48 = vadd.f32 %v1017_v45, %v279_v34  ;;  %v1322_v49 = vadd.f32 %v1103_v46, %v287_v35  ;;  %v1019_v53 = vpop.f32.mrb[3].mxu0  ;;  %v1105_v51 = vpop.f32.mrb[3].mxu1 }
 0x263   :  { %v1109_v50 = vmax.f32 %v1317_v44, %v1321_v30  ;;  %v1319_v57 = vadd.f32 %v1019_v53, %v283_v36  ;;  %v1323_v52 = vadd.f32 %v1105_v51, %v291_v37 }
 0x264   :  { %v1113_v59 = vmax.f32 %v1318_v48, %v1322_v49 }
 0x265   :  { %v1114_v62 = vmax.f32 %v1319_v57, %v1323_v52  ;;  %v1110_v60 = vmax.f32 %v1108_v47, %v1109_v50 }
 0x267   :  { %1111 = vmax.xlane.f32.xlu0 %v1110_v60  ;;  %v1115_v61 = vmax.f32 %v1113_v59, %v1114_v62 }
 0x269   :  { %1116 = vmax.xlane.f32.xlu1 %v1115_v61 }
 0x2f4   :  { %v1112_v1 = vpop.xlane.xlu0 %1111 }
 0x2f5   :  { %v1118_v3 = vsub.f32 %v1316_v40, %v1112_v1  ;;  %v1119_v4 = vsub.f32 %v1317_v44, %v1112_v1  ;;  %v1120_v10 = vsub.f32 %v1320_v41, %v1112_v1  ;;  %v1121_v5 = vsub.f32 %v1321_v30, %v1112_v1 }
 0x2f6   :  { %v1117_v11 = vpop.xlane.xlu1 %1116 }
 0x2f7   :  { %v1126_v6 = vmul.f32 1.442695, %v1118_v3  ;;  %v1128_v12 = vmul.f32 1.442695, %v1119_v4  ;;  %v1130_v7 = vmul.f32 1.442695, %v1120_v10  ;;  %v1122_v13 = vsub.f32 %v1318_v48, %v1117_v11 }
 0x2f8   :  { %v1132_v14 = vmul.f32 1.442695, %v1121_v5  ;;  %v1123_v55 = vsub.f32 %v1319_v57, %v1117_v11  ;;  %v1124_v8 = vsub.f32 %v1322_v49, %v1117_v11  ;;  %v1125_v15 = vsub.f32 %v1323_v52, %v1117_v11 }
 0x2f9   :  { %1531 = vpow2.f32 %v1126_v6  ;;  %v1134_v54 = vmul.f32 1.442695, %v1122_v13 }
 0x2fa   :  { %1533 = vpow2.f32 %v1128_v12  ;;  %v1136_v56 = vmul.f32 1.442695, %v1123_v55  ;;  %v1138_v16 = vmul.f32 1.442695, %v1124_v8  ;;  %v1140_v17 = vmul.f32 1.442695, %v1125_v15 }
 0x2fb   :  { %1535 = vpow2.f32 %v1130_v7 }
 0x2fc   :  { %1537 = vpow2.f32 %v1132_v14 }
 0x2fd   :  { %1539 = vpow2.f32 %v1134_v54 }
 0x2fe   :  { %1541 = vpow2.f32 %v1136_v56 }
 0x2ff   :  { %1543 = vpow2.f32 %v1138_v16 }
 0x300   :  { %1545 = vpow2.f32 %v1140_v17 }
 0x303   :  { %v1532_v18 = vpop.eup %1531 }
 0x304   :  { %v1534_v19 = vpop.eup %1533 }
 0x305   :  { %v1536_v20 = vpop.eup %1535  ;;  %v1142_v21 = vadd.f32 %v1534_v19, %v1532_v18 }
 0x306   :  { %v1538_v22 = vpop.eup %1537 }
 0x307   :  { %v1540_v58 = vpop.eup %1539  ;;  %v1143_v23 = vadd.f32 %v1536_v20, %v1142_v21 }
 0x308   :  { %v1542_v24 = vpop.eup %1541 }
 0x309   :  { %v1144_v25 = vadd.f32 %v1538_v22, %v1143_v23  ;;  %v1147_v0 = vadd.f32 %v1542_v24, %v1540_v58  ;;  %v1544_v26 = vpop.eup %1543 }
 0x30a   :  { %v1546_v63 = vpop.eup %1545 }
 0x30b   :  { %1145 = vadd.xlane.f32.xlu0 %v1144_v25  ;;  %v1148_v27 = vadd.f32 %v1544_v26, %v1147_v0 }
 0x30d   :  { %v1149_v9 = vadd.f32 %v1546_v63, %v1148_v27 }
 0x30f   :  { %1150 = vadd.xlane.f32.xlu1 %v1149_v9 }
 0x398   :  { %v1146_v2 = vpop.xlane.xlu0 %1145 }
 0x399   :  { %1547 = vlog2.f32 %v1146_v2 }
 0x39c   :  { %v1151_v28 = vpop.xlane.xlu1 %1150 }
 0x39d   :  { %1549 = vlog2.f32 %v1151_v28 }
 0x3a3   :  { %v1548_v29 = vpop.eup %1547 }
 0x3a4   :  { %v1153_v31 = vmul.f32 0.6931472, %v1548_v29 }
 0x3a6   :  { %v1156_v32 = vsub.f32 %v1118_v3, %v1153_v31  ;;  %v1157_v33 = vsub.f32 %v1119_v4, %v1153_v31  ;;  %v1158_v34 = vsub.f32 %v1120_v10, %v1153_v31  ;;  %v1159_v35 = vsub.f32 %v1121_v5, %v1153_v31 }
 0x3a7   :  { %v1550_v36 = vpop.eup %1549 }
 0x3a8   :  { %1164 = vst [vmem:[#allocation2] sm:$0xff] %v1156_v32  ;;  %1165 = vst [vmem:[#allocation2 + $0x8] sm:$0xff] %v1157_v33  ;;  %v1155_v37 = vmul.f32 0.6931472, %v1550_v36 }
 0x3a9   :  { %1166 = vst [vmem:[#allocation2 + $0x10] sm:$0xff] %v1158_v34  ;;  %1167 = vst [vmem:[#allocation2 + $0x18] sm:$0xff] %v1159_v35 }
 0x3aa   :  { %v1160_v38 = vsub.f32 %v1122_v13, %v1155_v37  ;;  %v1161_v39 = vsub.f32 %v1123_v55, %v1155_v37  ;;  %v1162_v40 = vsub.f32 %v1124_v8, %v1155_v37  ;;  %v1163_v41 = vsub.f32 %v1125_v15, %v1155_v37 }
 0x3ac   :  { %1168 = vst [vmem:[#allocation2 + $0x20] sm:$0xff] %v1160_v38  ;;  %1169 = vst [vmem:[#allocation2 + $0x28] sm:$0xff] %v1161_v39 }
 0x3ad   :  { %1170 = vst [vmem:[#allocation2 + $0x30] sm:$0xff] %v1162_v40  ;;  %1171 = vst [vmem:[#allocation2 + $0x38] sm:$0xff] %v1163_v41 }
 0x3ae   :  { %1562 = shalt.err (!%p1559_p4)
}
 0x3af   :  { %s1563_s29 = scalar_lea.hbm %s2138_s5, 1024 }
 0x3b0   :  { %p1564_p5 = scmp.ne.s32.totalorder %s2138_s5, %s1563_s29  ;;  %p1567_p6 = scmp.lt.u32.totalorder %s1563_s29, %s2138_s5 }
 0x3b2   :  { %p1569_p7 = pnand %p1567_p6, %p1564_p5 }
 0x3b4   :  { %1572 = shalt.err (!%p1569_p7)
}
 0x3b5   :  { %s1576_s9 = smov 512   ;;  %s1577_s10 = smov 32  }
 0x3b6   :  { %1183 = dma.vmem_to_hbm [thread:$0]  %s1178_s4, 1024, %s2138_s5, [#allocation3], %s1576_s9, %s1576_s9, %s1577_s10  }
 0x3b7   :  { %1573 = dma.done.wait [#allocation3], 1024  }
 0x3b8   :  { %1574 = vsyncadd [#allocation3], 4294966272 }
 0x3b9   :  { %1187 = vsyncpa [#allocation3], 1 }

</bundles_post_ra>
